<compile_context>
chip_gen: v7x
topology: tpu7x:2x2x1
jax: 0.10.0
libtpu: 0.0.40
codegen_flags: <defaults>
</compile_context>

<pallas_src>
import functools

import jax
import jax.numpy as jnp
from jax.experimental import pallas as pl
from jax.experimental.pallas import tpu as pltpu

_VMEM_LIMIT = 32 * 1024 * 1024   # safe across v5e/v6e/v7x scoped-VMEM budgets
_LN_EPS = 1e-5
_BN_EPS = 1e-5


# ----------------------------------------------------------------------------
# small helpers (used inside kernels)
# ----------------------------------------------------------------------------
def _bf16(x):
    return x.astype(jnp.bfloat16)


def _gelu_tanh(y):
    # TODO(synk): nn.GELU() default is exact erf-GELU; tanh approximation used
    # (erf lowering on Mosaic not guaranteed) -> ~1e-3-level divergence.
    c = 0.7978845608028654  # sqrt(2/pi)
    return 0.5 * y * (1.0 + jnp.tanh(c * (y + 0.044715 * y * y * y)))


def _ln(x, g, b, eps=_LN_EPS):
    mu = jnp.mean(x, axis=-1, keepdims=True)
    var = jnp.mean(jnp.square(x - mu), axis=-1, keepdims=True)
    return (x - mu) * jax.lax.rsqrt(var + eps) * g + b


def _pick_tile(m, target, align):
    """Largest divisor of m that is <= target and a multiple of `align`.
    Falls back to m (single block, always legal since block == full dims)."""
    if m <= target:
        return m
    t = (target // align) * align
    while t >= align:
        if m % t == 0:
            return t
        t -= align
    return m


def _sym_pad(sz, p):
    r = sz % p
    if r == 0:
        return (0, 0)
    t = p - r
    return (t // 2, t - t // 2)


# ----------------------------------------------------------------------------
# Pallas kernels
# ----------------------------------------------------------------------------
def _conv_stats_kernel(cols_ref, w_ref, y_ref, st_ref):
    """im2col'ed conv as matmul (bf16 operands, f32 acc) + per-tile BN partial
    statistics (sum / sum-of-squares per channel)."""
    y = jnp.dot(_bf16(cols_ref[...]), _bf16(w_ref[...]),
                preferred_element_type=jnp.float32)
    y_ref[...] = y
    s = jnp.sum(y, axis=0, keepdims=True)
    sq = jnp.sum(y * y, axis=0, keepdims=True)
    st_ref[0] = jnp.concatenate([s, sq], axis=0)          # (2, C)


def _patch_embed_kernel(t_ref, bns_ref, bnb_ref, g1_ref, b1_ref, w_ref, b_ref,
                        g2_ref, b2_ref, pos_ref, o_ref):
    """Fused: BatchNorm affine (folded) -> LN(patch_dim) -> Linear -> LN(dim)
    -> + positional embedding."""
    t = t_ref[...] * bns_ref[...] + bnb_ref[...]
    t = _ln(t, g1_ref[...], b1_ref[...])
    y = jnp.dot(_bf16(t), _bf16(w_ref[...]),
                preferred_element_type=jnp.float32) + b_ref[...]
    y = _ln(y, g2_ref[...], b2_ref[...])
    o_ref[...] = y + pos_ref[...]


def _layer_kernel(x_ref, ln1g_ref, ln1b_ref, qkvw_ref, outw_ref, outb_ref,
                  ln2g_ref, ln2b_ref, f1w_ref, f1b_ref, f2w_ref, f2b_ref,
                  o_ref, attn_ref, *, batch, n_tok, heads, dim_head, scale):
    """One full pre-norm transformer layer, fully VMEM resident."""
    dim = x_ref.shape[-1]
    inner = heads * dim_head
    x = x_ref[...]

    # ---- attention branch ----
    xn = _ln(x, ln1g_ref[...], ln1b_ref[...])
    qkv = jnp.dot(_bf16(xn), _bf16(qkvw_ref[...]),
                  preferred_element_type=jnp.float32)      # (M, 3*inner), no bias

    for bi in range(batch):                                # static loops (small)
        r0 = bi * n_tok
        acc = jnp.zeros((n_tok, dim), jnp.float32)
        for h in range(heads):
            c0 = h * dim_head
            q = qkv[r0:r0 + n_tok, c0:c0 + dim_head] * scale
            k = qkv[r0:r0 + n_tok, inner + c0:inner + c0 + dim_head]
            v = qkv[r0:r0 + n_tok, 2 * inner + c0:2 * inner + c0 + dim_head]
            s = jax.lax.dot_general(_bf16(q), _bf16(k),
                                    (((1,), (1,)), ((), ())),
                                    preferred_element_type=jnp.float32)
            s = s - jnp.max(s, axis=-1, keepdims=True)
            p = jnp.exp(s)
            rinv = pl.reciprocal(jnp.sum(p, axis=-1, keepdims=True), approx=True)
            o = jnp.dot(_bf16(p), _bf16(v),
                        preferred_element_type=jnp.float32) * rinv
            # per-head slice of the output projection (block-matmul == concat)
            acc = acc + jnp.dot(_bf16(o),
                                _bf16(outw_ref[c0:c0 + dim_head, :]),
                                preferred_element_type=jnp.float32)
        attn_ref[r0:r0 + n_tok, :] = acc

    x = x + attn_ref[...] + outb_ref[...]                  # residual + out bias

    # ---- feed-forward branch ----
    xn2 = _ln(x, ln2g_ref[...], ln2b_ref[...])
    h1 = _gelu_tanh(jnp.dot(_bf16(xn2), _bf16(f1w_ref[...]),
                            preferred_element_type=jnp.float32) + f1b_ref[...])
    h2 = jnp.dot(_bf16(h1), _bf16(f2w_ref[...]),
                 preferred_element_type=jnp.float32) + f2b_ref[...]
    o_ref[...] = x + h2                                    # residual


def _unpatch_kernel(x_ref, g1_ref, b1_ref, w_ref, b_ref, g2_ref, b2_ref, o_ref):
    """Fused from_patch_embedding: LN(dim) -> Linear -> LN(patch_dim)."""
    x = _ln(x_ref[...], g1_ref[...], b1_ref[...])
    y = jnp.dot(_bf16(x), _bf16(w_ref[...]),
                preferred_element_type=jnp.float32) + b_ref[...]
    o_ref[...] = _ln(y, g2_ref[...], b2_ref[...])


def _conv2_tanh_kernel(w_ref, cols_ref, b_ref, o_ref):
    """Final 1-output-channel conv as (1,K)@(K,TM) -> lane-dense (1,TM) + tanh."""
    y = jnp.dot(_bf16(w_ref[...]), _bf16(cols_ref[...]),
                preferred_element_type=jnp.float32)
    o_ref[...] = jnp.tanh(y + b_ref[...])


# ----------------------------------------------------------------------------
# Pallas wrappers
# ----------------------------------------------------------------------------
def conv3d_bn_stats(cols, w):
    m, k = cols.shape
    c = w.shape[1]
    tm = _pick_tile(m, 512, 8)      # exact divisor -> no padded rows in BN stats
    nt = m // tm
    y, stats = pl.pallas_call(
        _conv_stats_kernel,
        grid=(nt,),
        in_specs=[pl.BlockSpec((tm, k), lambda i: (i, 0)),
                  pl.BlockSpec((k, c), lambda i: (0, 0))],
        out_specs=[pl.BlockSpec((tm, c), lambda i: (i, 0)),
                   pl.BlockSpec((1, 2, c), lambda i: (i, 0, 0))],
        out_shape=[jax.ShapeDtypeStruct((m, c), jnp.float32),
                   jax.ShapeDtypeStruct((nt, 2, c), jnp.float32)],
        compiler_params=pltpu.CompilerParams(
            dimension_semantics=("parallel",),
            vmem_limit_bytes=_VMEM_LIMIT),
    )(cols, w)
    return y, stats


def patch_embed(t2, bn_scale, bn_shift, g1, b1, w, bias, g2, b2, pos2d):
    m, pd = t2.shape
    dim = w.shape[1]
    return pl.pallas_call(
        _patch_embed_kernel,
        out_shape=jax.ShapeDtypeStruct((m, dim), jnp.float32),
        compiler_params=pltpu.CompilerParams(vmem_limit_bytes=_VMEM_LIMIT),
    )(t2, bn_scale.reshape(1, pd), bn_shift.reshape(1, pd),
      g1.reshape(1, pd), b1.reshape(1, pd), w, bias.reshape(1, dim),
      g2.reshape(1, dim), b2.reshape(1, dim), pos2d)


def transformer_layer(x2, lp, batch, n_tok, heads, dim_head):
    m, dim = x2.shape
    mlp = lp["ff1_w"].shape[1]
    kern = functools.partial(_layer_kernel, batch=batch, n_tok=n_tok,
                             heads=heads, dim_head=dim_head,
                             scale=float(dim_head) ** -0.5)
    return pl.pallas_call(
        kern,
        out_shape=jax.ShapeDtypeStruct((m, dim), jnp.float32),
        scratch_shapes=[pltpu.VMEM((m, dim), jnp.float32)],
        compiler_params=pltpu.CompilerParams(vmem_limit_bytes=_VMEM_LIMIT),
    )(x2, lp["ln1_g"].reshape(1, dim), lp["ln1_b"].reshape(1, dim),
      lp["qkv_w"], lp["out_w"], lp["out_b"].reshape(1, dim),
      lp["ln2_g"].reshape(1, dim), lp["ln2_b"].reshape(1, dim),
      lp["ff1_w"], lp["ff1_b"].reshape(1, mlp),
      lp["ff2_w"], lp["ff2_b"].reshape(1, dim))


def from_patch_embed(x2, g1, b1, w, bias, g2, b2):
    m, dim = x2.shape
    pd = w.shape[1]
    return pl.pallas_call(
        _unpatch_kernel,
        out_shape=jax.ShapeDtypeStruct((m, pd), jnp.float32),
        compiler_params=pltpu.CompilerParams(vmem_limit_bytes=_VMEM_LIMIT),
    )(x2, g1.reshape(1, dim), b1.reshape(1, dim), w, bias.reshape(1, pd),
      g2.reshape(1, pd), b2.reshape(1, pd))


def conv3d_out_tanh(cols_t, w_row, bias):
    k, m = cols_t.shape
    tm = _pick_tile(m, 512, 128)    # lane-dense output tiles (multiple of 128)
    nt = m // tm
    return pl.pallas_call(
        _conv2_tanh_kernel,
        grid=(nt,),
        in_specs=[pl.BlockSpec((1, k), lambda i: (0, 0)),
                  pl.BlockSpec((k, tm), lambda i: (0, i)),
                  pl.BlockSpec((1, 1), lambda i: (0, 0))],
        out_specs=pl.BlockSpec((1, tm), lambda i: (0, i)),
        out_shape=jax.ShapeDtypeStruct((1, m), jnp.float32),
        compiler_params=pltpu.CompilerParams(
            dimension_semantics=("parallel",),
            vmem_limit_bytes=_VMEM_LIMIT),
    )(w_row, cols_t, bias.reshape(1, 1))


# ----------------------------------------------------------------------------
# JAX glue (padding, im2col, rearranges)
# ----------------------------------------------------------------------------
def _im2col3d(xp, d, h, w):
    """xp: (b, c, d+2, h+2, w+2) padded. Returns (b*d*h*w, c*27); column order
    (c, kd, kh, kw) matches PyTorch Conv3d weight.reshape(cout, cin*27)."""
    b, c = xp.shape[0], xp.shape[1]
    cols = []
    for kd in range(3):
        for kh in range(3):
            for kw in range(3):
                cols.append(xp[:, :, kd:kd + d, kh:kh + h, kw:kw + w])
    p = jnp.stack(cols, axis=-1)                  # (b, c, d, h, w, 27)
    p = p.transpose(0, 2, 3, 4, 1, 5)             # (b, d, h, w, c, 27)
    return p.reshape(b * d * h * w, c * 27)


def _im2col3d_t(xp, d, h, w):
    """Transposed im2col: (c*27, b*d*h*w) so the 1-channel output conv can be
    computed with a lane-dense (1, M) result."""
    b, c = xp.shape[0], xp.shape[1]
    cols = []
    for kd in range(3):
        for kh in range(3):
            for kw in range(3):
                cols.append(xp[:, :, kd:kd + d, kh:kh + h, kw:kw + w])
    p = jnp.stack(cols, axis=2)                   # (b, c, 27, d, h, w)
    p = p.transpose(1, 2, 0, 3, 4, 5)             # (c, 27, b, d, h, w)
    return p.reshape(c * 27, b * d * h * w)


def vit_forward(x, params, cfg):
    # x: (b, 1, F, H, W) float32 (NCDHW)
    b = x.shape[0]
    p1 = p2 = cfg["image_patch_size"]
    pf = cfg["frame_patch_size"]
    C = cfg["channels"]
    dim = cfg["dim"]

    # ---- zero-pad spatial dims to patch multiples (as in the reference) ----
    F0, H0, W0 = x.shape[2], x.shape[3], x.shape[4]
    pad_w = _sym_pad(W0, p2)
    pad_h = _sym_pad(H0, p1)
    pad_f = _sym_pad(F0, pf)
    if any(v != 0 for v in pad_w + pad_h + pad_f):
        x = jnp.pad(x, ((0, 0), (0, 0), pad_f, pad_h, pad_w))
    F, H, W = x.shape[2], x.shape[3], x.shape[4]

    f, h, w = F // pf, H // p1, W // p2
    n = f * h * w
    patch_dim = C * p1 * p2 * pf
    ppp = p1 * p2 * pf

    # ---- conv1 (circular padding, no bias); BN folded into patch embed ----
    xp = jnp.pad(x, ((0, 0), (0, 0), (1, 1), (1, 1), (1, 1)), mode="wrap")
    cols1 = _im2col3d(xp, F, H, W)                       # (b*F*H*W, 27)
    w1 = params["conv1_w"].reshape(C, 27).T              # (27, C)
    y, stats = conv3d_bn_stats(cols1, w1)                # rows ordered (b,F,H,W)

    # global BatchNorm3d batch statistics (training-mode, biased variance)
    m_rows = y.shape[0]
    tot = jnp.sum(stats[:, 0, :], axis=0)
    tot_sq = jnp.sum(stats[:, 1, :], axis=0)
    mu = tot / m_rows
    var = tot_sq / m_rows - mu * mu
    bn_scale = params["bn1_g"] * jax.lax.rsqrt(var + _BN_EPS)
    bn_shift = params["bn1_b"] - mu * bn_scale
    # patch columns are ordered (p1, p2, pf, c) with c fastest -> tile per-c
    bn_scale_pd = jnp.tile(bn_scale, ppp)
    bn_shift_pd = jnp.tile(bn_shift, ppp)

    # ---- rearrange conv output (channel-last) directly into patches ----
    t = y.reshape(b, f, pf, h, p1, w, p2, C)
    t = t.transpose(0, 1, 3, 5, 4, 6, 2, 7)              # b f h w p1 p2 pf c
    t2 = t.reshape(b * n, patch_dim)

    pos2d = jnp.tile(params["pos_emb"][0, :n], (b, 1))   # (b*n, dim)
    x2 = patch_embed(t2, bn_scale_pd, bn_shift_pd,
                     params["pe_ln1_g"], params["pe_ln1_b"],
                     params["pe_w"], params["pe_b"],
                     params["pe_ln2_g"], params["pe_ln2_b"], pos2d)

    # ---- transformer: one fused pallas_call per layer (dropout = identity) --
    for lp in params["layers"]:
        x2 = transformer_layer(x2, lp, b, n, cfg["heads"], cfg["dim_head"])

    # ---- from_patch_embedding ----
    x2 = from_patch_embed(x2, params["fp_ln1_g"], params["fp_ln1_b"],
                          params["fp_w"], params["fp_b"],
                          params["fp_ln2_g"], params["fp_ln2_b"])
    t = x2.reshape(b, f, h, w, p1, p2, pf, C)
    t = t.transpose(0, 7, 1, 6, 2, 4, 3, 5)              # b c f pf h p1 w p2
    t = t.reshape(b, C, F, H, W)

    # ---- conv2 (zero padding, bias) + tanh, lane-dense output ----
    tp = jnp.pad(t, ((0, 0), (0, 0), (1, 1), (1, 1), (1, 1)))
    cols2_t = _im2col3d_t(tp, F, H, W)                   # (C*27, b*F*H*W)
    w2 = params["conv2_w"].reshape(1, C * 27)            # (1, C*27)
    out = conv3d_out_tanh(cols2_t, w2, params["conv2_b"])  # (1, M) lane-dense
    out = out.reshape(b, F, H, W)[:, None]               # (b, 1, F, H, W)

    # crop the zero padding back off
    out = out[:, :,
              pad_f[0]:F - pad_f[1],
              pad_h[0]:H - pad_h[1],
              pad_w[0]:W - pad_w[1]]
    return out


# ----------------------------------------------------------------------------
# Deterministic parameter init (shapes as in the PyTorch __init__)
# ----------------------------------------------------------------------------
def init_params(key, cfg):
    C = cfg["channels"]
    dim, depth = cfg["dim"], cfg["depth"]
    heads, dim_head, mlp_dim = cfg["heads"], cfg["dim_head"], cfg["mlp_dim"]
    F, S = cfg["frames"], cfg["image_size"]
    p1 = cfg["image_patch_size"]
    pf = cfg["frame_patch_size"]
    num_patches = -(-S // p1) * -(-S // p1) * -(-F // pf)   # ceil-div
    patch_dim = C * p1 * p1 * pf
    inner = heads * dim_head

    keys = iter(jax.random.split(key, 8 + 8 * depth))

    def nrm(shape, scale=0.02):
        return (scale * jax.random.normal(next(keys), shape)).astype(jnp.float32)

    p = {
        "conv1_w": nrm((C, 1, 3, 3, 3), 0.2),
        "bn1_g": jnp.ones((C,), jnp.float32),
        "bn1_b": jnp.zeros((C,), jnp.float32),
        "pe_ln1_g": jnp.ones((patch_dim,), jnp.float32),
        "pe_ln1_b": jnp.zeros((patch_dim,), jnp.float32),
        "pe_w": nrm((patch_dim, dim)),
        "pe_b": jnp.zeros((dim,), jnp.float32),
        "pe_ln2_g": jnp.ones((dim,), jnp.float32),
        "pe_ln2_b": jnp.zeros((dim,), jnp.float32),
        "pos_emb": nrm((1, num_patches, dim), 1.0),
        "fp_ln1_g": jnp.ones((dim,), jnp.float32),
        "fp_ln1_b": jnp.zeros((dim,), jnp.float32),
        "fp_w": nrm((dim, patch_dim)),
        "fp_b": jnp.zeros((patch_dim,), jnp.float32),
        "fp_ln2_g": jnp.ones((patch_dim,), jnp.float32),
        "fp_ln2_b": jnp.zeros((patch_dim,), jnp.float32),
        "conv2_w": nrm((1, C, 3, 3, 3), 0.2),
        "conv2_b": jnp.zeros((1,), jnp.float32),
        "layers": [],
    }
    for _ in range(depth):
        p["layers"].append({
            "ln1_g": jnp.ones((dim,), jnp.float32),
            "ln1_b": jnp.zeros((dim,), jnp.float32),
            "qkv_w": nrm((dim, 3 * inner)),
            "out_w": nrm((inner, dim)),
            "out_b": jnp.zeros((dim,), jnp.float32),
            "ln2_g": jnp.ones((dim,), jnp.float32),
            "ln2_b": jnp.zeros((dim,), jnp.float32),
            "ff1_w": nrm((dim, mlp_dim)),
            "ff1_b": jnp.zeros((mlp_dim,), jnp.float32),
            "ff2_w": nrm((mlp_dim, dim)),
            "ff2_b": jnp.zeros((dim,), jnp.float32),
        })
    return p


# ----------------------------------------------------------------------------
if __name__ == "__main__":
    cfg = dict(
        image_size=16,
        image_patch_size=4,
        frames=4,
        frame_patch_size=2,
        dim=32,
        depth=2,
        heads=4,
        dim_head=8,
        mlp_dim=64,
        channels=10,   # fixed to 10 by the module (conv1 out channels)
    )

    key = jax.random.PRNGKey(0)
    k_x, k_p = jax.random.split(key)
    x = jax.random.normal(
        k_x, (2, 1, cfg["frames"], cfg["image_size"], cfg["image_size"]),
        dtype=jnp.float32)
    params = init_params(k_p, cfg)

    fwd = jax.jit(functools.partial(vit_forward, cfg=cfg))
    out = fwd(x, params)
    out = jax.block_until_ready(out)
    assert out.shape == (2, 1, cfg["frames"], cfg["image_size"], cfg["image_size"])
    assert bool(jnp.all(jnp.isfinite(out)))
    print("KERNEL_OK")
</pallas_src>

<mosaic_0001>
module attributes {stable_mosaic.version = 11 : i64} {
  func.func @_conv_stats_kernel(%arg0: i32, %arg1: memref<512x27xf32, #tpu.memory_space<vmem>>, %arg2: memref<27x10xf32, #tpu.memory_space<vmem>>, %arg3: memref<512x10xf32, #tpu.memory_space<vmem>>, %arg4: memref<1x2x10xf32, #tpu.memory_space<vmem>>) attributes {dimension_semantics = [#tpu.dimension_semantics<parallel>], iteration_bounds = array<i64: 4>, scalar_prefetch = 0 : i64, scratch_operands = 0 : i64, tpu.core_type = #tpu.core_type<tc>, window_params = [{transform_indices = @transform_0, window_bounds = array<i64: 512, 27>}, {pipeline_mode = #tpu.pipeline_mode<synchronous>, transform_indices = @transform_1, window_bounds = array<i64: 27, 10>}, {transform_indices = @transform_2, window_bounds = array<i64: 512, 10>}, {transform_indices = @transform_3, window_bounds = array<i64: 1, 2, 10>}]} {
    %c0 = arith.constant 0 : index
    %c0_0 = arith.constant 0 : index
    %0 = vector.load %arg1[%c0, %c0_0] : memref<512x27xf32, #tpu.memory_space<vmem>>, vector<512x27xf32>
    %1 = arith.truncf %0 : vector<512x27xf32> to vector<512x27xbf16>
    %c0_1 = arith.constant 0 : index
    %c0_2 = arith.constant 0 : index
    %2 = vector.load %arg2[%c0_1, %c0_2] : memref<27x10xf32, #tpu.memory_space<vmem>>, vector<27x10xf32>
    %3 = arith.truncf %2 : vector<27x10xf32> to vector<27x10xbf16>
    %cst = arith.constant dense<0.000000e+00> : vector<512x10xf32>
    %4 = tpu.matmul %1, %3, %cst {dimension_numbers = #tpu.dot_dimension_numbers<[1], [0], [0], [1], [0, 0, 1, 1], [], []>} : vector<512x27xbf16>, vector<27x10xbf16>, vector<512x10xf32> -> vector<512x10xf32>
    %c0_3 = arith.constant 0 : index
    %c0_4 = arith.constant 0 : index
    %5 = vector.load %arg3[%c0_3, %c0_4] : memref<512x10xf32, #tpu.memory_space<vmem>>, vector<512x10xf32>
    tpu.vector_store %arg3[%c0_3, %c0_4], %4 {strides = array<i32>} : memref<512x10xf32, #tpu.memory_space<vmem>>, vector<512x10xf32>,
    %cst_5 = arith.constant dense<0.000000e+00> : vector<10xf32>
    %6 = vector.multi_reduction <add>, %4, %cst_5 [0] : vector<512x10xf32> to vector<10xf32>
    %7 = vector.shape_cast %6 : vector<10xf32> to vector<1x10xf32>
    %8 = arith.mulf %4, %4 : vector<512x10xf32>
    %cst_6 = arith.constant dense<0.000000e+00> : vector<10xf32>
    %9 = vector.multi_reduction <add>, %8, %cst_6 [0] : vector<512x10xf32> to vector<10xf32>
    %10 = vector.shape_cast %9 : vector<10xf32> to vector<1x10xf32>
    %11 = tpu.concatenate %7, %10 in 0 : vector<1x10xf32>, vector<1x10xf32> -> vector<2x10xf32>
    %c0_7 = arith.constant 0 : index
    %c0_8 = arith.constant 0 : index
    %c0_9 = arith.constant 0 : index
    %12 = vector.load %arg4[%c0_7, %c0_8, %c0_9] : memref<1x2x10xf32, #tpu.memory_space<vmem>>, vector<1x2x10xf32>
    %13 = vector.shape_cast %12 : vector<1x2x10xf32> to vector<2x10xf32>
    %14 = vector.shape_cast %11 : vector<2x10xf32> to vector<1x2x10xf32>
    tpu.vector_store %arg4[%c0_7, %c0_8, %c0_9], %14 {strides = array<i32>} : memref<1x2x10xf32, #tpu.memory_space<vmem>>, vector<1x2x10xf32>,
    return
  }
  func.func @transform_0(%arg0: i32) -> (i32, i32) {
    %c0_i32 = arith.constant 0 : i32
    %c0_i32_0 = arith.constant 0 : i32
    return %arg0, %c0_i32 : i32, i32
  }
  func.func @transform_1(%arg0: i32) -> (i32, i32) {
    %c0_i32 = arith.constant 0 : i32
    %c0_i32_0 = arith.constant 0 : i32
    %c0_i32_1 = arith.constant 0 : i32
    return %c0_i32, %c0_i32_0 : i32, i32
  }
  func.func @transform_2(%arg0: i32) -> (i32, i32) {
    %c0_i32 = arith.constant 0 : i32
    %c0_i32_0 = arith.constant 0 : i32
    return %arg0, %c0_i32 : i32, i32
  }
  func.func @transform_3(%arg0: i32) -> (i32, i32, i32) {
    %c0_i32 = arith.constant 0 : i32
    %c0_i32_0 = arith.constant 0 : i32
    %c0_i32_1 = arith.constant 0 : i32
    return %arg0, %c0_i32, %c0_i32_0 : i32, i32, i32
  }
}

module attributes {stable_mosaic.version = 11 : i64} {
  func.func @_patch_embed_kernel(%arg0: memref<64x320xf32, #tpu.memory_space<vmem>>, %arg1: memref<1x320xf32, #tpu.memory_space<vmem>>, %arg2: memref<1x320xf32, #tpu.memory_space<vmem>>, %arg3: memref<1x320xf32, #tpu.memory_space<vmem>>, %arg4: memref<1x320xf32, #tpu.memory_space<vmem>>, %arg5: memref<320x32xf32, #tpu.memory_space<vmem>>, %arg6: memref<1x32xf32, #tpu.memory_space<vmem>>, %arg7: memref<1x32xf32, #tpu.memory_space<vmem>>, %arg8: memref<1x32xf32, #tpu.memory_space<vmem>>, %arg9: memref<64x32xf32, #tpu.memory_space<vmem>>, %arg10: memref<64x32xf32, #tpu.memory_space<vmem>>) attributes {dimension_semantics = [], scalar_prefetch = 0 : i64, scratch_operands = 0 : i64, tpu.core_type = #tpu.core_type<tc>} {
    %c0 = arith.constant 0 : index
    %c0_0 = arith.constant 0 : index
    %0 = vector.load %arg0[%c0, %c0_0] : memref<64x320xf32, #tpu.memory_space<vmem>>, vector<64x320xf32>
    %c0_1 = arith.constant 0 : index
    %c0_2 = arith.constant 0 : index
    %1 = vector.load %arg1[%c0_1, %c0_2] : memref<1x320xf32, #tpu.memory_space<vmem>>, vector<1x320xf32>
    %2 = vector.broadcast %1 : vector<1x320xf32> to vector<64x320xf32>
    %3 = arith.mulf %0, %2 : vector<64x320xf32>
    %c0_3 = arith.constant 0 : index
    %c0_4 = arith.constant 0 : index
    %4 = vector.load %arg2[%c0_3, %c0_4] : memref<1x320xf32, #tpu.memory_space<vmem>>, vector<1x320xf32>
    %5 = vector.broadcast %4 : vector<1x320xf32> to vector<64x320xf32>
    %6 = arith.addf %3, %5 : vector<64x320xf32>
    %c0_5 = arith.constant 0 : index
    %c0_6 = arith.constant 0 : index
    %7 = vector.load %arg3[%c0_5, %c0_6] : memref<1x320xf32, #tpu.memory_space<vmem>>, vector<1x320xf32>
    %c0_7 = arith.constant 0 : index
    %c0_8 = arith.constant 0 : index
    %8 = vector.load %arg4[%c0_7, %c0_8] : memref<1x320xf32, #tpu.memory_space<vmem>>, vector<1x320xf32>
    %cst = arith.constant dense<0.000000e+00> : vector<64xf32>
    %9 = vector.multi_reduction <add>, %6, %cst [1] : vector<64x320xf32> to vector<64xf32>
    %10 = vector.shape_cast %9 : vector<64xf32> to vector<64x1xf32>
    %cst_9 = arith.constant 3.200000e+02 : f32
    %11 = vector.broadcast %cst_9 : f32 to vector<64x1xf32>
    %12 = arith.divf %10, %11 : vector<64x1xf32>
    %13 = vector.broadcast %12 : vector<64x1xf32> to vector<64x320xf32>
    %14 = arith.subf %6, %13 : vector<64x320xf32>
    %15 = arith.mulf %14, %14 : vector<64x320xf32>
    %cst_10 = arith.constant dense<0.000000e+00> : vector<64xf32>
    %16 = vector.multi_reduction <add>, %15, %cst_10 [1] : vector<64x320xf32> to vector<64xf32>
    %17 = vector.shape_cast %16 : vector<64xf32> to vector<64x1xf32>
    %cst_11 = arith.constant 3.200000e+02 : f32
    %18 = vector.broadcast %cst_11 : f32 to vector<64x1xf32>
    %19 = arith.divf %17, %18 : vector<64x1xf32>
    %20 = vector.broadcast %12 : vector<64x1xf32> to vector<64x320xf32>
    %21 = arith.subf %6, %20 : vector<64x320xf32>
    %cst_12 = arith.constant 9.99999974E-6 : f32
    %22 = vector.broadcast %cst_12 : f32 to vector<64x1xf32>
    %23 = arith.addf %19, %22 : vector<64x1xf32>
    %24 = math.rsqrt %23 : vector<64x1xf32>
    %25 = vector.broadcast %24 : vector<64x1xf32> to vector<64x320xf32>
    %26 = arith.mulf %21, %25 : vector<64x320xf32>
    %27 = vector.broadcast %7 : vector<1x320xf32> to vector<64x320xf32>
    %28 = arith.mulf %26, %27 : vector<64x320xf32>
    %29 = vector.broadcast %8 : vector<1x320xf32> to vector<64x320xf32>
    %30 = arith.addf %28, %29 : vector<64x320xf32>
    %31 = arith.truncf %30 : vector<64x320xf32> to vector<64x320xbf16>
    %c0_13 = arith.constant 0 : index
    %c0_14 = arith.constant 0 : index
    %32 = vector.load %arg5[%c0_13, %c0_14] : memref<320x32xf32, #tpu.memory_space<vmem>>, vector<320x32xf32>
    %33 = arith.truncf %32 : vector<320x32xf32> to vector<320x32xbf16>
    %cst_15 = arith.constant dense<0.000000e+00> : vector<64x32xf32>
    %34 = tpu.matmul %31, %33, %cst_15 {dimension_numbers = #tpu.dot_dimension_numbers<[1], [0], [0], [1], [0, 0, 1, 1], [], []>} : vector<64x320xbf16>, vector<320x32xbf16>, vector<64x32xf32> -> vector<64x32xf32>
    %c0_16 = arith.constant 0 : index
    %c0_17 = arith.constant 0 : index
    %35 = vector.load %arg6[%c0_16, %c0_17] : memref<1x32xf32, #tpu.memory_space<vmem>>, vector<1x32xf32>
    %36 = vector.broadcast %35 : vector<1x32xf32> to vector<64x32xf32>
    %37 = arith.addf %34, %36 : vector<64x32xf32>
    %c0_18 = arith.constant 0 : index
    %c0_19 = arith.constant 0 : index
    %38 = vector.load %arg7[%c0_18, %c0_19] : memref<1x32xf32, #tpu.memory_space<vmem>>, vector<1x32xf32>
    %c0_20 = arith.constant 0 : index
    %c0_21 = arith.constant 0 : index
    %39 = vector.load %arg8[%c0_20, %c0_21] : memref<1x32xf32, #tpu.memory_space<vmem>>, vector<1x32xf32>
    %cst_22 = arith.constant dense<0.000000e+00> : vector<64xf32>
    %40 = vector.multi_reduction <add>, %37, %cst_22 [1] : vector<64x32xf32> to vector<64xf32>
    %41 = vector.shape_cast %40 : vector<64xf32> to vector<64x1xf32>
    %cst_23 = arith.constant 3.200000e+01 : f32
    %42 = vector.broadcast %cst_23 : f32 to vector<64x1xf32>
    %43 = arith.divf %41, %42 : vector<64x1xf32>
    %44 = vector.broadcast %43 : vector<64x1xf32> to vector<64x32xf32>
    %45 = arith.subf %37, %44 : vector<64x32xf32>
    %46 = arith.mulf %45, %45 : vector<64x32xf32>
    %cst_24 = arith.constant dense<0.000000e+00> : vector<64xf32>
    %47 = vector.multi_reduction <add>, %46, %cst_24 [1] : vector<64x32xf32> to vector<64xf32>
    %48 = vector.shape_cast %47 : vector<64xf32> to vector<64x1xf32>
    %cst_25 = arith.constant 3.200000e+01 : f32
    %49 = vector.broadcast %cst_25 : f32 to vector<64x1xf32>
    %50 = arith.divf %48, %49 : vector<64x1xf32>
    %51 = vector.broadcast %43 : vector<64x1xf32> to vector<64x32xf32>
    %52 = arith.subf %37, %51 : vector<64x32xf32>
    %cst_26 = arith.constant 9.99999974E-6 : f32
    %53 = vector.broadcast %cst_26 : f32 to vector<64x1xf32>
    %54 = arith.addf %50, %53 : vector<64x1xf32>
    %55 = math.rsqrt %54 : vector<64x1xf32>
    %56 = vector.broadcast %55 : vector<64x1xf32> to vector<64x32xf32>
    %57 = arith.mulf %52, %56 : vector<64x32xf32>
    %58 = vector.broadcast %38 : vector<1x32xf32> to vector<64x32xf32>
    %59 = arith.mulf %57, %58 : vector<64x32xf32>
    %60 = vector.broadcast %39 : vector<1x32xf32> to vector<64x32xf32>
    %61 = arith.addf %59, %60 : vector<64x32xf32>
    %c0_27 = arith.constant 0 : index
    %c0_28 = arith.constant 0 : index
    %62 = vector.load %arg9[%c0_27, %c0_28] : memref<64x32xf32, #tpu.memory_space<vmem>>, vector<64x32xf32>
    %63 = arith.addf %61, %62 : vector<64x32xf32>
    %c0_29 = arith.constant 0 : index
    %c0_30 = arith.constant 0 : index
    %64 = vector.load %arg10[%c0_29, %c0_30] : memref<64x32xf32, #tpu.memory_space<vmem>>, vector<64x32xf32>
    tpu.vector_store %arg10[%c0_29, %c0_30], %63 {strides = array<i32>} : memref<64x32xf32, #tpu.memory_space<vmem>>, vector<64x32xf32>,
    return
  }
}

module attributes {stable_mosaic.version = 11 : i64} {
  func.func @_layer_kernel(%arg0: memref<64x32xf32, #tpu.memory_space<vmem>>, %arg1: memref<1x32xf32, #tpu.memory_space<vmem>>, %arg2: memref<1x32xf32, #tpu.memory_space<vmem>>, %arg3: memref<32x96xf32, #tpu.memory_space<vmem>>, %arg4: memref<32x32xf32, #tpu.memory_space<vmem>>, %arg5: memref<1x32xf32, #tpu.memory_space<vmem>>, %arg6: memref<1x32xf32, #tpu.memory_space<vmem>>, %arg7: memref<1x32xf32, #tpu.memory_space<vmem>>, %arg8: memref<32x64xf32, #tpu.memory_space<vmem>>, %arg9: memref<1x64xf32, #tpu.memory_space<vmem>>, %arg10: memref<64x32xf32, #tpu.memory_space<vmem>>, %arg11: memref<1x32xf32, #tpu.memory_space<vmem>>, %arg12: memref<64x32xf32, #tpu.memory_space<vmem>>, %arg13: memref<64x32xf32, #tpu.memory_space<vmem>>) attributes {dimension_semantics = [], scalar_prefetch = 0 : i64, scratch_operands = 1 : i64, tpu.core_type = #tpu.core_type<tc>} {
    %c0 = arith.constant 0 : index
    %c0_0 = arith.constant 0 : index
    %0 = vector.load %arg0[%c0, %c0_0] : memref<64x32xf32, #tpu.memory_space<vmem>>, vector<64x32xf32>
    %c0_1 = arith.constant 0 : index
    %c0_2 = arith.constant 0 : index
    %1 = vector.load %arg1[%c0_1, %c0_2] : memref<1x32xf32, #tpu.memory_space<vmem>>, vector<1x32xf32>
    %c0_3 = arith.constant 0 : index
    %c0_4 = arith.constant 0 : index
    %2 = vector.load %arg2[%c0_3, %c0_4] : memref<1x32xf32, #tpu.memory_space<vmem>>, vector<1x32xf32>
    %cst = arith.constant dense<0.000000e+00> : vector<64xf32>
    %3 = vector.multi_reduction <add>, %0, %cst [1] : vector<64x32xf32> to vector<64xf32>
    %4 = vector.shape_cast %3 : vector<64xf32> to vector<64x1xf32>
    %cst_5 = arith.constant 3.200000e+01 : f32
    %5 = vector.broadcast %cst_5 : f32 to vector<64x1xf32>
    %6 = arith.divf %4, %5 : vector<64x1xf32>
    %7 = vector.broadcast %6 : vector<64x1xf32> to vector<64x32xf32>
    %8 = arith.subf %0, %7 : vector<64x32xf32>
    %9 = arith.mulf %8, %8 : vector<64x32xf32>
    %cst_6 = arith.constant dense<0.000000e+00> : vector<64xf32>
    %10 = vector.multi_reduction <add>, %9, %cst_6 [1] : vector<64x32xf32> to vector<64xf32>
    %11 = vector.shape_cast %10 : vector<64xf32> to vector<64x1xf32>
    %cst_7 = arith.constant 3.200000e+01 : f32
    %12 = vector.broadcast %cst_7 : f32 to vector<64x1xf32>
    %13 = arith.divf %11, %12 : vector<64x1xf32>
    %14 = vector.broadcast %6 : vector<64x1xf32> to vector<64x32xf32>
    %15 = arith.subf %0, %14 : vector<64x32xf32>
    %cst_8 = arith.constant 9.99999974E-6 : f32
    %16 = vector.broadcast %cst_8 : f32 to vector<64x1xf32>
    %17 = arith.addf %13, %16 : vector<64x1xf32>
    %18 = math.rsqrt %17 : vector<64x1xf32>
    %19 = vector.broadcast %18 : vector<64x1xf32> to vector<64x32xf32>
    %20 = arith.mulf %15, %19 : vector<64x32xf32>
    %21 = vector.broadcast %1 : vector<1x32xf32> to vector<64x32xf32>
    %22 = arith.mulf %20, %21 : vector<64x32xf32>
    %23 = vector.broadcast %2 : vector<1x32xf32> to vector<64x32xf32>
    %24 = arith.addf %22, %23 : vector<64x32xf32>
    %25 = arith.truncf %24 : vector<64x32xf32> to vector<64x32xbf16>
    %c0_9 = arith.constant 0 : index
    %c0_10 = arith.constant 0 : index
    %26 = vector.load %arg3[%c0_9, %c0_10] : memref<32x96xf32, #tpu.memory_space<vmem>>, vector<32x96xf32>
    %27 = arith.truncf %26 : vector<32x96xf32> to vector<32x96xbf16>
    %cst_11 = arith.constant dense<0.000000e+00> : vector<64x96xf32>
    %28 = tpu.matmul %25, %27, %cst_11 {dimension_numbers = #tpu.dot_dimension_numbers<[1], [0], [0], [1], [0, 0, 1, 1], [], []>} : vector<64x32xbf16>, vector<32x96xbf16>, vector<64x96xf32> -> vector<64x96xf32>
    %cst_12 = arith.constant 0.000000e+00 : f32
    %29 = vector.broadcast %cst_12 : f32 to vector<32x32xf32>
    %30 = vector.extract_strided_slice %28 {offsets = [0, 0], sizes = [32, 8], strides = [1, 1]} : vector<64x96xf32> to vector<32x8xf32>
    %cst_13 = arith.constant 0.353553385 : f32
    %31 = vector.broadcast %cst_13 : f32 to vector<32x8xf32>
    %32 = arith.mulf %30, %31 : vector<32x8xf32>
    %33 = vector.extract_strided_slice %28 {offsets = [0, 32], sizes = [32, 8], strides = [1, 1]} : vector<64x96xf32> to vector<32x8xf32>
    %34 = vector.extract_strided_slice %28 {offsets = [0, 64], sizes = [32, 8], strides = [1, 1]} : vector<64x96xf32> to vector<32x8xf32>
    %35 = arith.truncf %32 : vector<32x8xf32> to vector<32x8xbf16>
    %36 = arith.truncf %33 : vector<32x8xf32> to vector<32x8xbf16>
    %cst_14 = arith.constant dense<0.000000e+00> : vector<32x32xf32>
    %37 = tpu.matmul %35, %36, %cst_14 {dimension_numbers = #tpu.dot_dimension_numbers<[1], [1], [0], [0], [0, 0, 1, 0], [], []>} : vector<32x8xbf16>, vector<32x8xbf16>, vector<32x32xf32> -> vector<32x32xf32>
    %cst_15 = arith.constant dense<0xFF800000> : vector<32xf32>
    %38 = vector.multi_reduction <maximumf>, %37, %cst_15 [1] : vector<32x32xf32> to vector<32xf32>
    %39 = vector.shape_cast %38 : vector<32xf32> to vector<32x1xf32>
    %40 = vector.broadcast %39 : vector<32x1xf32> to vector<32x32xf32>
    %41 = arith.subf %37, %40 : vector<32x32xf32>
    %42 = math.exp %41 : vector<32x32xf32>
    %cst_16 = arith.constant dense<0.000000e+00> : vector<32xf32>
    %43 = vector.multi_reduction <add>, %42, %cst_16 [1] : vector<32x32xf32> to vector<32xf32>
    %44 = vector.shape_cast %43 : vector<32xf32> to vector<32x1xf32>
    %45 = tpu.reciprocal %44 {approx = true} : vector<32x1xf32> -> vector<32x1xf32>
    %46 = arith.truncf %42 : vector<32x32xf32> to vector<32x32xbf16>
    %47 = arith.truncf %34 : vector<32x8xf32> to vector<32x8xbf16>
    %cst_17 = arith.constant dense<0.000000e+00> : vector<32x8xf32>
    %48 = tpu.matmul %46, %47, %cst_17 {dimension_numbers = #tpu.dot_dimension_numbers<[1], [0], [0], [1], [0, 0, 1, 1], [], []>} : vector<32x32xbf16>, vector<32x8xbf16>, vector<32x8xf32> -> vector<32x8xf32>
    %49 = vector.broadcast %45 : vector<32x1xf32> to vector<32x8xf32>
    %50 = arith.mulf %48, %49 : vector<32x8xf32>
    %51 = arith.truncf %50 : vector<32x8xf32> to vector<32x8xbf16>
    %c0_18 = arith.constant 0 : index
    %c0_19 = arith.constant 0 : index
    %52 = vector.load %arg4[%c0_18, %c0_19] : memref<32x32xf32, #tpu.memory_space<vmem>>, vector<8x32xf32>
    %53 = arith.truncf %52 : vector<8x32xf32> to vector<8x32xbf16>
    %cst_20 = arith.constant dense<0.000000e+00> : vector<32x32xf32>
    %54 = tpu.matmul %51, %53, %cst_20 {dimension_numbers = #tpu.dot_dimension_numbers<[1], [0], [0], [1], [0, 0, 1, 1], [], []>} : vector<32x8xbf16>, vector<8x32xbf16>, vector<32x32xf32> -> vector<32x32xf32>
    %55 = arith.addf %29, %54 : vector<32x32xf32>
    %56 = vector.extract_strided_slice %28 {offsets = [0, 8], sizes = [32, 8], strides = [1, 1]} : vector<64x96xf32> to vector<32x8xf32>
    %cst_21 = arith.constant 0.353553385 : f32
    %57 = vector.broadcast %cst_21 : f32 to vector<32x8xf32>
    %58 = arith.mulf %56, %57 : vector<32x8xf32>
    %59 = vector.extract_strided_slice %28 {offsets = [0, 40], sizes = [32, 8], strides = [1, 1]} : vector<64x96xf32> to vector<32x8xf32>
    %60 = vector.extract_strided_slice %28 {offsets = [0, 72], sizes = [32, 8], strides = [1, 1]} : vector<64x96xf32> to vector<32x8xf32>
    %61 = arith.truncf %58 : vector<32x8xf32> to vector<32x8xbf16>
    %62 = arith.truncf %59 : vector<32x8xf32> to vector<32x8xbf16>
    %cst_22 = arith.constant dense<0.000000e+00> : vector<32x32xf32>
    %63 = tpu.matmul %61, %62, %cst_22 {dimension_numbers = #tpu.dot_dimension_numbers<[1], [1], [0], [0], [0, 0, 1, 0], [], []>} : vector<32x8xbf16>, vector<32x8xbf16>, vector<32x32xf32> -> vector<32x32xf32>
    %cst_23 = arith.constant dense<0xFF800000> : vector<32xf32>
    %64 = vector.multi_reduction <maximumf>, %63, %cst_23 [1] : vector<32x32xf32> to vector<32xf32>
    %65 = vector.shape_cast %64 : vector<32xf32> to vector<32x1xf32>
    %66 = vector.broadcast %65 : vector<32x1xf32> to vector<32x32xf32>
    %67 = arith.subf %63, %66 : vector<32x32xf32>
    %68 = math.exp %67 : vector<32x32xf32>
    %cst_24 = arith.constant dense<0.000000e+00> : vector<32xf32>
    %69 = vector.multi_reduction <add>, %68, %cst_24 [1] : vector<32x32xf32> to vector<32xf32>
    %70 = vector.shape_cast %69 : vector<32xf32> to vector<32x1xf32>
    %71 = tpu.reciprocal %70 {approx = true} : vector<32x1xf32> -> vector<32x1xf32>
    %72 = arith.truncf %68 : vector<32x32xf32> to vector<32x32xbf16>
    %73 = arith.truncf %60 : vector<32x8xf32> to vector<32x8xbf16>
    %cst_25 = arith.constant dense<0.000000e+00> : vector<32x8xf32>
    %74 = tpu.matmul %72, %73, %cst_25 {dimension_numbers = #tpu.dot_dimension_numbers<[1], [0], [0], [1], [0, 0, 1, 1], [], []>} : vector<32x32xbf16>, vector<32x8xbf16>, vector<32x8xf32> -> vector<32x8xf32>
    %75 = vector.broadcast %71 : vector<32x1xf32> to vector<32x8xf32>
    %76 = arith.mulf %74, %75 : vector<32x8xf32>
    %77 = arith.truncf %76 : vector<32x8xf32> to vector<32x8xbf16>
    %c8 = arith.constant 8 : index
    %c0_26 = arith.constant 0 : index
    %78 = vector.load %arg4[%c8, %c0_26] : memref<32x32xf32, #tpu.memory_space<vmem>>, vector<8x32xf32>
    %79 = arith.truncf %78 : vector<8x32xf32> to vector<8x32xbf16>
    %cst_27 = arith.constant dense<0.000000e+00> : vector<32x32xf32>
    %80 = tpu.matmul %77, %79, %cst_27 {dimension_numbers = #tpu.dot_dimension_numbers<[1], [0], [0], [1], [0, 0, 1, 1], [], []>} : vector<32x8xbf16>, vector<8x32xbf16>, vector<32x32xf32> -> vector<32x32xf32>
    %81 = arith.addf %55, %80 : vector<32x32xf32>
    %82 = vector.extract_strided_slice %28 {offsets = [0, 16], sizes = [32, 8], strides = [1, 1]} : vector<64x96xf32> to vector<32x8xf32>
    %cst_28 = arith.constant 0.353553385 : f32
    %83 = vector.broadcast %cst_28 : f32 to vector<32x8xf32>
    %84 = arith.mulf %82, %83 : vector<32x8xf32>
    %85 = vector.extract_strided_slice %28 {offsets = [0, 48], sizes = [32, 8], strides = [1, 1]} : vector<64x96xf32> to vector<32x8xf32>
    %86 = vector.extract_strided_slice %28 {offsets = [0, 80], sizes = [32, 8], strides = [1, 1]} : vector<64x96xf32> to vector<32x8xf32>
    %87 = arith.truncf %84 : vector<32x8xf32> to vector<32x8xbf16>
    %88 = arith.truncf %85 : vector<32x8xf32> to vector<32x8xbf16>
    %cst_29 = arith.constant dense<0.000000e+00> : vector<32x32xf32>
    %89 = tpu.matmul %87, %88, %cst_29 {dimension_numbers = #tpu.dot_dimension_numbers<[1], [1], [0], [0], [0, 0, 1, 0], [], []>} : vector<32x8xbf16>, vector<32x8xbf16>, vector<32x32xf32> -> vector<32x32xf32>
    %cst_30 = arith.constant dense<0xFF800000> : vector<32xf32>
    %90 = vector.multi_reduction <maximumf>, %89, %cst_30 [1] : vector<32x32xf32> to vector<32xf32>
    %91 = vector.shape_cast %90 : vector<32xf32> to vector<32x1xf32>
    %92 = vector.broadcast %91 : vector<32x1xf32> to vector<32x32xf32>
    %93 = arith.subf %89, %92 : vector<32x32xf32>
    %94 = math.exp %93 : vector<32x32xf32>
    %cst_31 = arith.constant dense<0.000000e+00> : vector<32xf32>
    %95 = vector.multi_reduction <add>, %94, %cst_31 [1] : vector<32x32xf32> to vector<32xf32>
    %96 = vector.shape_cast %95 : vector<32xf32> to vector<32x1xf32>
    %97 = tpu.reciprocal %96 {approx = true} : vector<32x1xf32> -> vector<32x1xf32>
    %98 = arith.truncf %94 : vector<32x32xf32> to vector<32x32xbf16>
    %99 = arith.truncf %86 : vector<32x8xf32> to vector<32x8xbf16>
    %cst_32 = arith.constant dense<0.000000e+00> : vector<32x8xf32>
    %100 = tpu.matmul %98, %99, %cst_32 {dimension_numbers = #tpu.dot_dimension_numbers<[1], [0], [0], [1], [0, 0, 1, 1], [], []>} : vector<32x32xbf16>, vector<32x8xbf16>, vector<32x8xf32> -> vector<32x8xf32>
    %101 = vector.broadcast %97 : vector<32x1xf32> to vector<32x8xf32>
    %102 = arith.mulf %100, %101 : vector<32x8xf32>
    %103 = arith.truncf %102 : vector<32x8xf32> to vector<32x8xbf16>
    %c16 = arith.constant 16 : index
    %c0_33 = arith.constant 0 : index
    %104 = vector.load %arg4[%c16, %c0_33] : memref<32x32xf32, #tpu.memory_space<vmem>>, vector<8x32xf32>
    %105 = arith.truncf %104 : vector<8x32xf32> to vector<8x32xbf16>
    %cst_34 = arith.constant dense<0.000000e+00> : vector<32x32xf32>
    %106 = tpu.matmul %103, %105, %cst_34 {dimension_numbers = #tpu.dot_dimension_numbers<[1], [0], [0], [1], [0, 0, 1, 1], [], []>} : vector<32x8xbf16>, vector<8x32xbf16>, vector<32x32xf32> -> vector<32x32xf32>
    %107 = arith.addf %81, %106 : vector<32x32xf32>
    %108 = vector.extract_strided_slice %28 {offsets = [0, 24], sizes = [32, 8], strides = [1, 1]} : vector<64x96xf32> to vector<32x8xf32>
    %cst_35 = arith.constant 0.353553385 : f32
    %109 = vector.broadcast %cst_35 : f32 to vector<32x8xf32>
    %110 = arith.mulf %108, %109 : vector<32x8xf32>
    %111 = vector.extract_strided_slice %28 {offsets = [0, 56], sizes = [32, 8], strides = [1, 1]} : vector<64x96xf32> to vector<32x8xf32>
    %112 = vector.extract_strided_slice %28 {offsets = [0, 88], sizes = [32, 8], strides = [1, 1]} : vector<64x96xf32> to vector<32x8xf32>
    %113 = arith.truncf %110 : vector<32x8xf32> to vector<32x8xbf16>
    %114 = arith.truncf %111 : vector<32x8xf32> to vector<32x8xbf16>
    %cst_36 = arith.constant dense<0.000000e+00> : vector<32x32xf32>
    %115 = tpu.matmul %113, %114, %cst_36 {dimension_numbers = #tpu.dot_dimension_numbers<[1], [1], [0], [0], [0, 0, 1, 0], [], []>} : vector<32x8xbf16>, vector<32x8xbf16>, vector<32x32xf32> -> vector<32x32xf32>
    %cst_37 = arith.constant dense<0xFF800000> : vector<32xf32>
    %116 = vector.multi_reduction <maximumf>, %115, %cst_37 [1] : vector<32x32xf32> to vector<32xf32>
    %117 = vector.shape_cast %116 : vector<32xf32> to vector<32x1xf32>
    %118 = vector.broadcast %117 : vector<32x1xf32> to vector<32x32xf32>
    %119 = arith.subf %115, %118 : vector<32x32xf32>
    %120 = math.exp %119 : vector<32x32xf32>
    %cst_38 = arith.constant dense<0.000000e+00> : vector<32xf32>
    %121 = vector.multi_reduction <add>, %120, %cst_38 [1] : vector<32x32xf32> to vector<32xf32>
    %122 = vector.shape_cast %121 : vector<32xf32> to vector<32x1xf32>
    %123 = tpu.reciprocal %122 {approx = true} : vector<32x1xf32> -> vector<32x1xf32>
    %124 = arith.truncf %120 : vector<32x32xf32> to vector<32x32xbf16>
    %125 = arith.truncf %112 : vector<32x8xf32> to vector<32x8xbf16>
    %cst_39 = arith.constant dense<0.000000e+00> : vector<32x8xf32>
    %126 = tpu.matmul %124, %125, %cst_39 {dimension_numbers = #tpu.dot_dimension_numbers<[1], [0], [0], [1], [0, 0, 1, 1], [], []>} : vector<32x32xbf16>, vector<32x8xbf16>, vector<32x8xf32> -> vector<32x8xf32>
    %127 = vector.broadcast %123 : vector<32x1xf32> to vector<32x8xf32>
    %128 = arith.mulf %126, %127 : vector<32x8xf32>
    %129 = arith.truncf %128 : vector<32x8xf32> to vector<32x8xbf16>
    %c24 = arith.constant 24 : index
    %c0_40 = arith.constant 0 : index
    %130 = vector.load %arg4[%c24, %c0_40] : memref<32x32xf32, #tpu.memory_space<vmem>>, vector<8x32xf32>
    %131 = arith.truncf %130 : vector<8x32xf32> to vector<8x32xbf16>
    %cst_41 = arith.constant dense<0.000000e+00> : vector<32x32xf32>
    %132 = tpu.matmul %129, %131, %cst_41 {dimension_numbers = #tpu.dot_dimension_numbers<[1], [0], [0], [1], [0, 0, 1, 1], [], []>} : vector<32x8xbf16>, vector<8x32xbf16>, vector<32x32xf32> -> vector<32x32xf32>
    %133 = arith.addf %107, %132 : vector<32x32xf32>
    %c0_42 = arith.constant 0 : index
    %c0_43 = arith.constant 0 : index
    %134 = vector.load %arg13[%c0_42, %c0_43] : memref<64x32xf32, #tpu.memory_space<vmem>>, vector<32x32xf32>
    tpu.vector_store %arg13[%c0_42, %c0_43], %133 {strides = array<i32>} : memref<64x32xf32, #tpu.memory_space<vmem>>, vector<32x32xf32>,
    %cst_44 = arith.constant 0.000000e+00 : f32
    %135 = vector.broadcast %cst_44 : f32 to vector<32x32xf32>
    %136 = vector.extract_strided_slice %28 {offsets = [32, 0], sizes = [32, 8], strides = [1, 1]} : vector<64x96xf32> to vector<32x8xf32>
    %cst_45 = arith.constant 0.353553385 : f32
    %137 = vector.broadcast %cst_45 : f32 to vector<32x8xf32>
    %138 = arith.mulf %136, %137 : vector<32x8xf32>
    %139 = vector.extract_strided_slice %28 {offsets = [32, 32], sizes = [32, 8], strides = [1, 1]} : vector<64x96xf32> to vector<32x8xf32>
    %140 = vector.extract_strided_slice %28 {offsets = [32, 64], sizes = [32, 8], strides = [1, 1]} : vector<64x96xf32> to vector<32x8xf32>
    %141 = arith.truncf %138 : vector<32x8xf32> to vector<32x8xbf16>
    %142 = arith.truncf %139 : vector<32x8xf32> to vector<32x8xbf16>
    %cst_46 = arith.constant dense<0.000000e+00> : vector<32x32xf32>
    %143 = tpu.matmul %141, %142, %cst_46 {dimension_numbers = #tpu.dot_dimension_numbers<[1], [1], [0], [0], [0, 0, 1, 0], [], []>} : vector<32x8xbf16>, vector<32x8xbf16>, vector<32x32xf32> -> vector<32x32xf32>
    %cst_47 = arith.constant dense<0xFF800000> : vector<32xf32>
    %144 = vector.multi_reduction <maximumf>, %143, %cst_47 [1] : vector<32x32xf32> to vector<32xf32>
    %145 = vector.shape_cast %144 : vector<32xf32> to vector<32x1xf32>
    %146 = vector.broadcast %145 : vector<32x1xf32> to vector<32x32xf32>
    %147 = arith.subf %143, %146 : vector<32x32xf32>
    %148 = math.exp %147 : vector<32x32xf32>
    %cst_48 = arith.constant dense<0.000000e+00> : vector<32xf32>
    %149 = vector.multi_reduction <add>, %148, %cst_48 [1] : vector<32x32xf32> to vector<32xf32>
    %150 = vector.shape_cast %149 : vector<32xf32> to vector<32x1xf32>
    %151 = tpu.reciprocal %150 {approx = true} : vector<32x1xf32> -> vector<32x1xf32>
    %152 = arith.truncf %148 : vector<32x32xf32> to vector<32x32xbf16>
    %153 = arith.truncf %140 : vector<32x8xf32> to vector<32x8xbf16>
    %cst_49 = arith.constant dense<0.000000e+00> : vector<32x8xf32>
    %154 = tpu.matmul %152, %153, %cst_49 {dimension_numbers = #tpu.dot_dimension_numbers<[1], [0], [0], [1], [0, 0, 1, 1], [], []>} : vector<32x32xbf16>, vector<32x8xbf16>, vector<32x8xf32> -> vector<32x8xf32>
    %155 = vector.broadcast %151 : vector<32x1xf32> to vector<32x8xf32>
    %156 = arith.mulf %154, %155 : vector<32x8xf32>
    %157 = arith.truncf %156 : vector<32x8xf32> to vector<32x8xbf16>
    %c0_50 = arith.constant 0 : index
    %c0_51 = arith.constant 0 : index
    %158 = vector.load %arg4[%c0_50, %c0_51] : memref<32x32xf32, #tpu.memory_space<vmem>>, vector<8x32xf32>
    %159 = arith.truncf %158 : vector<8x32xf32> to vector<8x32xbf16>
    %cst_52 = arith.constant dense<0.000000e+00> : vector<32x32xf32>
    %160 = tpu.matmul %157, %159, %cst_52 {dimension_numbers = #tpu.dot_dimension_numbers<[1], [0], [0], [1], [0, 0, 1, 1], [], []>} : vector<32x8xbf16>, vector<8x32xbf16>, vector<32x32xf32> -> vector<32x32xf32>
    %161 = arith.addf %135, %160 : vector<32x32xf32>
    %162 = vector.extract_strided_slice %28 {offsets = [32, 8], sizes = [32, 8], strides = [1, 1]} : vector<64x96xf32> to vector<32x8xf32>
    %cst_53 = arith.constant 0.353553385 : f32
    %163 = vector.broadcast %cst_53 : f32 to vector<32x8xf32>
    %164 = arith.mulf %162, %163 : vector<32x8xf32>
    %165 = vector.extract_strided_slice %28 {offsets = [32, 40], sizes = [32, 8], strides = [1, 1]} : vector<64x96xf32> to vector<32x8xf32>
    %166 = vector.extract_strided_slice %28 {offsets = [32, 72], sizes = [32, 8], strides = [1, 1]} : vector<64x96xf32> to vector<32x8xf32>
    %167 = arith.truncf %164 : vector<32x8xf32> to vector<32x8xbf16>
    %168 = arith.truncf %165 : vector<32x8xf32> to vector<32x8xbf16>
    %cst_54 = arith.constant dense<0.000000e+00> : vector<32x32xf32>
    %169 = tpu.matmul %167, %168, %cst_54 {dimension_numbers = #tpu.dot_dimension_numbers<[1], [1], [0], [0], [0, 0, 1, 0], [], []>} : vector<32x8xbf16>, vector<32x8xbf16>, vector<32x32xf32> -> vector<32x32xf32>
    %cst_55 = arith.constant dense<0xFF800000> : vector<32xf32>
    %170 = vector.multi_reduction <maximumf>, %169, %cst_55 [1] : vector<32x32xf32> to vector<32xf32>
    %171 = vector.shape_cast %170 : vector<32xf32> to vector<32x1xf32>
    %172 = vector.broadcast %171 : vector<32x1xf32> to vector<32x32xf32>
    %173 = arith.subf %169, %172 : vector<32x32xf32>
    %174 = math.exp %173 : vector<32x32xf32>
    %cst_56 = arith.constant dense<0.000000e+00> : vector<32xf32>
    %175 = vector.multi_reduction <add>, %174, %cst_56 [1] : vector<32x32xf32> to vector<32xf32>
    %176 = vector.shape_cast %175 : vector<32xf32> to vector<32x1xf32>
    %177 = tpu.reciprocal %176 {approx = true} : vector<32x1xf32> -> vector<32x1xf32>
    %178 = arith.truncf %174 : vector<32x32xf32> to vector<32x32xbf16>
    %179 = arith.truncf %166 : vector<32x8xf32> to vector<32x8xbf16>
    %cst_57 = arith.constant dense<0.000000e+00> : vector<32x8xf32>
    %180 = tpu.matmul %178, %179, %cst_57 {dimension_numbers = #tpu.dot_dimension_numbers<[1], [0], [0], [1], [0, 0, 1, 1], [], []>} : vector<32x32xbf16>, vector<32x8xbf16>, vector<32x8xf32> -> vector<32x8xf32>
    %181 = vector.broadcast %177 : vector<32x1xf32> to vector<32x8xf32>
    %182 = arith.mulf %180, %181 : vector<32x8xf32>
    %183 = arith.truncf %182 : vector<32x8xf32> to vector<32x8xbf16>
    %c8_58 = arith.constant 8 : index
    %c0_59 = arith.constant 0 : index
    %184 = vector.load %arg4[%c8_58, %c0_59] : memref<32x32xf32, #tpu.memory_space<vmem>>, vector<8x32xf32>
    %185 = arith.truncf %184 : vector<8x32xf32> to vector<8x32xbf16>
    %cst_60 = arith.constant dense<0.000000e+00> : vector<32x32xf32>
    %186 = tpu.matmul %183, %185, %cst_60 {dimension_numbers = #tpu.dot_dimension_numbers<[1], [0], [0], [1], [0, 0, 1, 1], [], []>} : vector<32x8xbf16>, vector<8x32xbf16>, vector<32x32xf32> -> vector<32x32xf32>
    %187 = arith.addf %161, %186 : vector<32x32xf32>
    %188 = vector.extract_strided_slice %28 {offsets = [32, 16], sizes = [32, 8], strides = [1, 1]} : vector<64x96xf32> to vector<32x8xf32>
    %cst_61 = arith.constant 0.353553385 : f32
    %189 = vector.broadcast %cst_61 : f32 to vector<32x8xf32>
    %190 = arith.mulf %188, %189 : vector<32x8xf32>
    %191 = vector.extract_strided_slice %28 {offsets = [32, 48], sizes = [32, 8], strides = [1, 1]} : vector<64x96xf32> to vector<32x8xf32>
    %192 = vector.extract_strided_slice %28 {offsets = [32, 80], sizes = [32, 8], strides = [1, 1]} : vector<64x96xf32> to vector<32x8xf32>
    %193 = arith.truncf %190 : vector<32x8xf32> to vector<32x8xbf16>
    %194 = arith.truncf %191 : vector<32x8xf32> to vector<32x8xbf16>
    %cst_62 = arith.constant dense<0.000000e+00> : vector<32x32xf32>
    %195 = tpu.matmul %193, %194, %cst_62 {dimension_numbers = #tpu.dot_dimension_numbers<[1], [1], [0], [0], [0, 0, 1, 0], [], []>} : vector<32x8xbf16>, vector<32x8xbf16>, vector<32x32xf32> -> vector<32x32xf32>
    %cst_63 = arith.constant dense<0xFF800000> : vector<32xf32>
    %196 = vector.multi_reduction <maximumf>, %195, %cst_63 [1] : vector<32x32xf32> to vector<32xf32>
    %197 = vector.shape_cast %196 : vector<32xf32> to vector<32x1xf32>
    %198 = vector.broadcast %197 : vector<32x1xf32> to vector<32x32xf32>
    %199 = arith.subf %195, %198 : vector<32x32xf32>
    %200 = math.exp %199 : vector<32x32xf32>
    %cst_64 = arith.constant dense<0.000000e+00> : vector<32xf32>
    %201 = vector.multi_reduction <add>, %200, %cst_64 [1] : vector<32x32xf32> to vector<32xf32>
    %202 = vector.shape_cast %201 : vector<32xf32> to vector<32x1xf32>
    %203 = tpu.reciprocal %202 {approx = true} : vector<32x1xf32> -> vector<32x1xf32>
    %204 = arith.truncf %200 : vector<32x32xf32> to vector<32x32xbf16>
    %205 = arith.truncf %192 : vector<32x8xf32> to vector<32x8xbf16>
    %cst_65 = arith.constant dense<0.000000e+00> : vector<32x8xf32>
    %206 = tpu.matmul %204, %205, %cst_65 {dimension_numbers = #tpu.dot_dimension_numbers<[1], [0], [0], [1], [0, 0, 1, 1], [], []>} : vector<32x32xbf16>, vector<32x8xbf16>, vector<32x8xf32> -> vector<32x8xf32>
    %207 = vector.broadcast %203 : vector<32x1xf32> to vector<32x8xf32>
    %208 = arith.mulf %206, %207 : vector<32x8xf32>
    %209 = arith.truncf %208 : vector<32x8xf32> to vector<32x8xbf16>
    %c16_66 = arith.constant 16 : index
    %c0_67 = arith.constant 0 : index
    %210 = vector.load %arg4[%c16_66, %c0_67] : memref<32x32xf32, #tpu.memory_space<vmem>>, vector<8x32xf32>
    %211 = arith.truncf %210 : vector<8x32xf32> to vector<8x32xbf16>
    %cst_68 = arith.constant dense<0.000000e+00> : vector<32x32xf32>
    %212 = tpu.matmul %209, %211, %cst_68 {dimension_numbers = #tpu.dot_dimension_numbers<[1], [0], [0], [1], [0, 0, 1, 1], [], []>} : vector<32x8xbf16>, vector<8x32xbf16>, vector<32x32xf32> -> vector<32x32xf32>
    %213 = arith.addf %187, %212 : vector<32x32xf32>
    %214 = vector.extract_strided_slice %28 {offsets = [32, 24], sizes = [32, 8], strides = [1, 1]} : vector<64x96xf32> to vector<32x8xf32>
    %cst_69 = arith.constant 0.353553385 : f32
    %215 = vector.broadcast %cst_69 : f32 to vector<32x8xf32>
    %216 = arith.mulf %214, %215 : vector<32x8xf32>
    %217 = vector.extract_strided_slice %28 {offsets = [32, 56], sizes = [32, 8], strides = [1, 1]} : vector<64x96xf32> to vector<32x8xf32>
    %218 = vector.extract_strided_slice %28 {offsets = [32, 88], sizes = [32, 8], strides = [1, 1]} : vector<64x96xf32> to vector<32x8xf32>
    %219 = arith.truncf %216 : vector<32x8xf32> to vector<32x8xbf16>
    %220 = arith.truncf %217 : vector<32x8xf32> to vector<32x8xbf16>
    %cst_70 = arith.constant dense<0.000000e+00> : vector<32x32xf32>
    %221 = tpu.matmul %219, %220, %cst_70 {dimension_numbers = #tpu.dot_dimension_numbers<[1], [1], [0], [0], [0, 0, 1, 0], [], []>} : vector<32x8xbf16>, vector<32x8xbf16>, vector<32x32xf32> -> vector<32x32xf32>
    %cst_71 = arith.constant dense<0xFF800000> : vector<32xf32>
    %222 = vector.multi_reduction <maximumf>, %221, %cst_71 [1] : vector<32x32xf32> to vector<32xf32>
    %223 = vector.shape_cast %222 : vector<32xf32> to vector<32x1xf32>
    %224 = vector.broadcast %223 : vector<32x1xf32> to vector<32x32xf32>
    %225 = arith.subf %221, %224 : vector<32x32xf32>
    %226 = math.exp %225 : vector<32x32xf32>
    %cst_72 = arith.constant dense<0.000000e+00> : vector<32xf32>
    %227 = vector.multi_reduction <add>, %226, %cst_72 [1] : vector<32x32xf32> to vector<32xf32>
    %228 = vector.shape_cast %227 : vector<32xf32> to vector<32x1xf32>
    %229 = tpu.reciprocal %228 {approx = true} : vector<32x1xf32> -> vector<32x1xf32>
    %230 = arith.truncf %226 : vector<32x32xf32> to vector<32x32xbf16>
    %231 = arith.truncf %218 : vector<32x8xf32> to vector<32x8xbf16>
    %cst_73 = arith.constant dense<0.000000e+00> : vector<32x8xf32>
    %232 = tpu.matmul %230, %231, %cst_73 {dimension_numbers = #tpu.dot_dimension_numbers<[1], [0], [0], [1], [0, 0, 1, 1], [], []>} : vector<32x32xbf16>, vector<32x8xbf16>, vector<32x8xf32> -> vector<32x8xf32>
    %233 = vector.broadcast %229 : vector<32x1xf32> to vector<32x8xf32>
    %234 = arith.mulf %232, %233 : vector<32x8xf32>
    %235 = arith.truncf %234 : vector<32x8xf32> to vector<32x8xbf16>
    %c24_74 = arith.constant 24 : index
    %c0_75 = arith.constant 0 : index
    %236 = vector.load %arg4[%c24_74, %c0_75] : memref<32x32xf32, #tpu.memory_space<vmem>>, vector<8x32xf32>
    %237 = arith.truncf %236 : vector<8x32xf32> to vector<8x32xbf16>
    %cst_76 = arith.constant dense<0.000000e+00> : vector<32x32xf32>
    %238 = tpu.matmul %235, %237, %cst_76 {dimension_numbers = #tpu.dot_dimension_numbers<[1], [0], [0], [1], [0, 0, 1, 1], [], []>} : vector<32x8xbf16>, vector<8x32xbf16>, vector<32x32xf32> -> vector<32x32xf32>
    %239 = arith.addf %213, %238 : vector<32x32xf32>
    %c32 = arith.constant 32 : index
    %c0_77 = arith.constant 0 : index
    %240 = vector.load %arg13[%c32, %c0_77] : memref<64x32xf32, #tpu.memory_space<vmem>>, vector<32x32xf32>
    tpu.vector_store %arg13[%c32, %c0_77], %239 {strides = array<i32>} : memref<64x32xf32, #tpu.memory_space<vmem>>, vector<32x32xf32>,
    %c0_78 = arith.constant 0 : index
    %c0_79 = arith.constant 0 : index
    %241 = vector.load %arg13[%c0_78, %c0_79] : memref<64x32xf32, #tpu.memory_space<vmem>>, vector<64x32xf32>
    %242 = arith.addf %0, %241 : vector<64x32xf32>
    %c0_80 = arith.constant 0 : index
    %c0_81 = arith.constant 0 : index
    %243 = vector.load %arg5[%c0_80, %c0_81] : memref<1x32xf32, #tpu.memory_space<vmem>>, vector<1x32xf32>
    %244 = vector.broadcast %243 : vector<1x32xf32> to vector<64x32xf32>
    %245 = arith.addf %242, %244 : vector<64x32xf32>
    %c0_82 = arith.constant 0 : index
    %c0_83 = arith.constant 0 : index
    %246 = vector.load %arg6[%c0_82, %c0_83] : memref<1x32xf32, #tpu.memory_space<vmem>>, vector<1x32xf32>
    %c0_84 = arith.constant 0 : index
    %c0_85 = arith.constant 0 : index
    %247 = vector.load %arg7[%c0_84, %c0_85] : memref<1x32xf32, #tpu.memory_space<vmem>>, vector<1x32xf32>
    %cst_86 = arith.constant dense<0.000000e+00> : vector<64xf32>
    %248 = vector.multi_reduction <add>, %245, %cst_86 [1] : vector<64x32xf32> to vector<64xf32>
    %249 = vector.shape_cast %248 : vector<64xf32> to vector<64x1xf32>
    %cst_87 = arith.constant 3.200000e+01 : f32
    %250 = vector.broadcast %cst_87 : f32 to vector<64x1xf32>
    %251 = arith.divf %249, %250 : vector<64x1xf32>
    %252 = vector.broadcast %251 : vector<64x1xf32> to vector<64x32xf32>
    %253 = arith.subf %245, %252 : vector<64x32xf32>
    %254 = arith.mulf %253, %253 : vector<64x32xf32>
    %cst_88 = arith.constant dense<0.000000e+00> : vector<64xf32>
    %255 = vector.multi_reduction <add>, %254, %cst_88 [1] : vector<64x32xf32> to vector<64xf32>
    %256 = vector.shape_cast %255 : vector<64xf32> to vector<64x1xf32>
    %cst_89 = arith.constant 3.200000e+01 : f32
    %257 = vector.broadcast %cst_89 : f32 to vector<64x1xf32>
    %258 = arith.divf %256, %257 : vector<64x1xf32>
    %259 = vector.broadcast %251 : vector<64x1xf32> to vector<64x32xf32>
    %260 = arith.subf %245, %259 : vector<64x32xf32>
    %cst_90 = arith.constant 9.99999974E-6 : f32
    %261 = vector.broadcast %cst_90 : f32 to vector<64x1xf32>
    %262 = arith.addf %258, %261 : vector<64x1xf32>
    %263 = math.rsqrt %262 : vector<64x1xf32>
    %264 = vector.broadcast %263 : vector<64x1xf32> to vector<64x32xf32>
    %265 = arith.mulf %260, %264 : vector<64x32xf32>
    %266 = vector.broadcast %246 : vector<1x32xf32> to vector<64x32xf32>
    %267 = arith.mulf %265, %266 : vector<64x32xf32>
    %268 = vector.broadcast %247 : vector<1x32xf32> to vector<64x32xf32>
    %269 = arith.addf %267, %268 : vector<64x32xf32>
    %270 = arith.truncf %269 : vector<64x32xf32> to vector<64x32xbf16>
    %c0_91 = arith.constant 0 : index
    %c0_92 = arith.constant 0 : index
    %271 = vector.load %arg8[%c0_91, %c0_92] : memref<32x64xf32, #tpu.memory_space<vmem>>, vector<32x64xf32>
    %272 = arith.truncf %271 : vector<32x64xf32> to vector<32x64xbf16>
    %cst_93 = arith.constant dense<0.000000e+00> : vector<64x64xf32>
    %273 = tpu.matmul %270, %272, %cst_93 {dimension_numbers = #tpu.dot_dimension_numbers<[1], [0], [0], [1], [0, 0, 1, 1], [], []>} : vector<64x32xbf16>, vector<32x64xbf16>, vector<64x64xf32> -> vector<64x64xf32>
    %c0_94 = arith.constant 0 : index
    %c0_95 = arith.constant 0 : index
    %274 = vector.load %arg9[%c0_94, %c0_95] : memref<1x64xf32, #tpu.memory_space<vmem>>, vector<1x64xf32>
    %275 = vector.broadcast %274 : vector<1x64xf32> to vector<64x64xf32>
    %276 = arith.addf %273, %275 : vector<64x64xf32>
    %cst_96 = arith.constant 5.000000e-01 : f32
    %277 = vector.broadcast %cst_96 : f32 to vector<64x64xf32>
    %278 = arith.mulf %277, %276 : vector<64x64xf32>
    %cst_97 = arith.constant 4.471500e-02 : f32
    %279 = vector.broadcast %cst_97 : f32 to vector<64x64xf32>
    %280 = arith.mulf %279, %276 : vector<64x64xf32>
    %281 = arith.mulf %280, %276 : vector<64x64xf32>
    %282 = arith.mulf %281, %276 : vector<64x64xf32>
    %283 = arith.addf %276, %282 : vector<64x64xf32>
    %cst_98 = arith.constant 0.797884583 : f32
    %284 = vector.broadcast %cst_98 : f32 to vector<64x64xf32>
    %285 = arith.mulf %284, %283 : vector<64x64xf32>
    %286 = math.tanh %285 : vector<64x64xf32>
    %cst_99 = arith.constant 1.000000e+00 : f32
    %287 = vector.broadcast %cst_99 : f32 to vector<64x64xf32>
    %288 = arith.addf %287, %286 : vector<64x64xf32>
    %289 = arith.mulf %278, %288 : vector<64x64xf32>
    %290 = arith.truncf %289 : vector<64x64xf32> to vector<64x64xbf16>
    %c0_100 = arith.constant 0 : index
    %c0_101 = arith.constant 0 : index
    %291 = vector.load %arg10[%c0_100, %c0_101] : memref<64x32xf32, #tpu.memory_space<vmem>>, vector<64x32xf32>
    %292 = arith.truncf %291 : vector<64x32xf32> to vector<64x32xbf16>
    %cst_102 = arith.constant dense<0.000000e+00> : vector<64x32xf32>
    %293 = tpu.matmul %290, %292, %cst_102 {dimension_numbers = #tpu.dot_dimension_numbers<[1], [0], [0], [1], [0, 0, 1, 1], [], []>} : vector<64x64xbf16>, vector<64x32xbf16>, vector<64x32xf32> -> vector<64x32xf32>
    %c0_103 = arith.constant 0 : index
    %c0_104 = arith.constant 0 : index
    %294 = vector.load %arg11[%c0_103, %c0_104] : memref<1x32xf32, #tpu.memory_space<vmem>>, vector<1x32xf32>
    %295 = vector.broadcast %294 : vector<1x32xf32> to vector<64x32xf32>
    %296 = arith.addf %293, %295 : vector<64x32xf32>
    %297 = arith.addf %245, %296 : vector<64x32xf32>
    %c0_105 = arith.constant 0 : index
    %c0_106 = arith.constant 0 : index
    %298 = vector.load %arg12[%c0_105, %c0_106] : memref<64x32xf32, #tpu.memory_space<vmem>>, vector<64x32xf32>
    tpu.vector_store %arg12[%c0_105, %c0_106], %297 {strides = array<i32>} : memref<64x32xf32, #tpu.memory_space<vmem>>, vector<64x32xf32>,
    return
  }
}

module attributes {stable_mosaic.version = 11 : i64} {
  func.func @_unpatch_kernel(%arg0: memref<64x32xf32, #tpu.memory_space<vmem>>, %arg1: memref<1x32xf32, #tpu.memory_space<vmem>>, %arg2: memref<1x32xf32, #tpu.memory_space<vmem>>, %arg3: memref<32x320xf32, #tpu.memory_space<vmem>>, %arg4: memref<1x320xf32, #tpu.memory_space<vmem>>, %arg5: memref<1x320xf32, #tpu.memory_space<vmem>>, %arg6: memref<1x320xf32, #tpu.memory_space<vmem>>, %arg7: memref<64x320xf32, #tpu.memory_space<vmem>>) attributes {dimension_semantics = [], scalar_prefetch = 0 : i64, scratch_operands = 0 : i64, tpu.core_type = #tpu.core_type<tc>} {
    %c0 = arith.constant 0 : index
    %c0_0 = arith.constant 0 : index
    %0 = vector.load %arg0[%c0, %c0_0] : memref<64x32xf32, #tpu.memory_space<vmem>>, vector<64x32xf32>
    %c0_1 = arith.constant 0 : index
    %c0_2 = arith.constant 0 : index
    %1 = vector.load %arg1[%c0_1, %c0_2] : memref<1x32xf32, #tpu.memory_space<vmem>>, vector<1x32xf32>
    %c0_3 = arith.constant 0 : index
    %c0_4 = arith.constant 0 : index
    %2 = vector.load %arg2[%c0_3, %c0_4] : memref<1x32xf32, #tpu.memory_space<vmem>>, vector<1x32xf32>
    %cst = arith.constant dense<0.000000e+00> : vector<64xf32>
    %3 = vector.multi_reduction <add>, %0, %cst [1] : vector<64x32xf32> to vector<64xf32>
    %4 = vector.shape_cast %3 : vector<64xf32> to vector<64x1xf32>
    %cst_5 = arith.constant 3.200000e+01 : f32
    %5 = vector.broadcast %cst_5 : f32 to vector<64x1xf32>
    %6 = arith.divf %4, %5 : vector<64x1xf32>
    %7 = vector.broadcast %6 : vector<64x1xf32> to vector<64x32xf32>
    %8 = arith.subf %0, %7 : vector<64x32xf32>
    %9 = arith.mulf %8, %8 : vector<64x32xf32>
    %cst_6 = arith.constant dense<0.000000e+00> : vector<64xf32>
    %10 = vector.multi_reduction <add>, %9, %cst_6 [1] : vector<64x32xf32> to vector<64xf32>
    %11 = vector.shape_cast %10 : vector<64xf32> to vector<64x1xf32>
    %cst_7 = arith.constant 3.200000e+01 : f32
    %12 = vector.broadcast %cst_7 : f32 to vector<64x1xf32>
    %13 = arith.divf %11, %12 : vector<64x1xf32>
    %14 = vector.broadcast %6 : vector<64x1xf32> to vector<64x32xf32>
    %15 = arith.subf %0, %14 : vector<64x32xf32>
    %cst_8 = arith.constant 9.99999974E-6 : f32
    %16 = vector.broadcast %cst_8 : f32 to vector<64x1xf32>
    %17 = arith.addf %13, %16 : vector<64x1xf32>
    %18 = math.rsqrt %17 : vector<64x1xf32>
    %19 = vector.broadcast %18 : vector<64x1xf32> to vector<64x32xf32>
    %20 = arith.mulf %15, %19 : vector<64x32xf32>
    %21 = vector.broadcast %1 : vector<1x32xf32> to vector<64x32xf32>
    %22 = arith.mulf %20, %21 : vector<64x32xf32>
    %23 = vector.broadcast %2 : vector<1x32xf32> to vector<64x32xf32>
    %24 = arith.addf %22, %23 : vector<64x32xf32>
    %25 = arith.truncf %24 : vector<64x32xf32> to vector<64x32xbf16>
    %c0_9 = arith.constant 0 : index
    %c0_10 = arith.constant 0 : index
    %26 = vector.load %arg3[%c0_9, %c0_10] : memref<32x320xf32, #tpu.memory_space<vmem>>, vector<32x320xf32>
    %27 = arith.truncf %26 : vector<32x320xf32> to vector<32x320xbf16>
    %cst_11 = arith.constant dense<0.000000e+00> : vector<64x320xf32>
    %28 = tpu.matmul %25, %27, %cst_11 {dimension_numbers = #tpu.dot_dimension_numbers<[1], [0], [0], [1], [0, 0, 1, 1], [], []>} : vector<64x32xbf16>, vector<32x320xbf16>, vector<64x320xf32> -> vector<64x320xf32>
    %c0_12 = arith.constant 0 : index
    %c0_13 = arith.constant 0 : index
    %29 = vector.load %arg4[%c0_12, %c0_13] : memref<1x320xf32, #tpu.memory_space<vmem>>, vector<1x320xf32>
    %30 = vector.broadcast %29 : vector<1x320xf32> to vector<64x320xf32>
    %31 = arith.addf %28, %30 : vector<64x320xf32>
    %c0_14 = arith.constant 0 : index
    %c0_15 = arith.constant 0 : index
    %32 = vector.load %arg5[%c0_14, %c0_15] : memref<1x320xf32, #tpu.memory_space<vmem>>, vector<1x320xf32>
    %c0_16 = arith.constant 0 : index
    %c0_17 = arith.constant 0 : index
    %33 = vector.load %arg6[%c0_16, %c0_17] : memref<1x320xf32, #tpu.memory_space<vmem>>, vector<1x320xf32>
    %cst_18 = arith.constant dense<0.000000e+00> : vector<64xf32>
    %34 = vector.multi_reduction <add>, %31, %cst_18 [1] : vector<64x320xf32> to vector<64xf32>
    %35 = vector.shape_cast %34 : vector<64xf32> to vector<64x1xf32>
    %cst_19 = arith.constant 3.200000e+02 : f32
    %36 = vector.broadcast %cst_19 : f32 to vector<64x1xf32>
    %37 = arith.divf %35, %36 : vector<64x1xf32>
    %38 = vector.broadcast %37 : vector<64x1xf32> to vector<64x320xf32>
    %39 = arith.subf %31, %38 : vector<64x320xf32>
    %40 = arith.mulf %39, %39 : vector<64x320xf32>
    %cst_20 = arith.constant dense<0.000000e+00> : vector<64xf32>
    %41 = vector.multi_reduction <add>, %40, %cst_20 [1] : vector<64x320xf32> to vector<64xf32>
    %42 = vector.shape_cast %41 : vector<64xf32> to vector<64x1xf32>
    %cst_21 = arith.constant 3.200000e+02 : f32
    %43 = vector.broadcast %cst_21 : f32 to vector<64x1xf32>
    %44 = arith.divf %42, %43 : vector<64x1xf32>
    %45 = vector.broadcast %37 : vector<64x1xf32> to vector<64x320xf32>
    %46 = arith.subf %31, %45 : vector<64x320xf32>
    %cst_22 = arith.constant 9.99999974E-6 : f32
    %47 = vector.broadcast %cst_22 : f32 to vector<64x1xf32>
    %48 = arith.addf %44, %47 : vector<64x1xf32>
    %49 = math.rsqrt %48 : vector<64x1xf32>
    %50 = vector.broadcast %49 : vector<64x1xf32> to vector<64x320xf32>
    %51 = arith.mulf %46, %50 : vector<64x320xf32>
    %52 = vector.broadcast %32 : vector<1x320xf32> to vector<64x320xf32>
    %53 = arith.mulf %51, %52 : vector<64x320xf32>
    %54 = vector.broadcast %33 : vector<1x320xf32> to vector<64x320xf32>
    %55 = arith.addf %53, %54 : vector<64x320xf32>
    %c0_23 = arith.constant 0 : index
    %c0_24 = arith.constant 0 : index
    %56 = vector.load %arg7[%c0_23, %c0_24] : memref<64x320xf32, #tpu.memory_space<vmem>>, vector<64x320xf32>
    tpu.vector_store %arg7[%c0_23, %c0_24], %55 {strides = array<i32>} : memref<64x320xf32, #tpu.memory_space<vmem>>, vector<64x320xf32>,
    return
  }
}

module attributes {stable_mosaic.version = 11 : i64} {
  func.func @_conv2_tanh_kernel(%arg0: i32, %arg1: memref<1x270xf32, #tpu.memory_space<vmem>>, %arg2: memref<270x512xf32, #tpu.memory_space<vmem>>, %arg3: memref<1x1xf32, #tpu.memory_space<vmem>>, %arg4: memref<1x512xf32, #tpu.memory_space<vmem>>) attributes {dimension_semantics = [#tpu.dimension_semantics<parallel>], iteration_bounds = array<i64: 4>, scalar_prefetch = 0 : i64, scratch_operands = 0 : i64, tpu.core_type = #tpu.core_type<tc>, window_params = [{pipeline_mode = #tpu.pipeline_mode<synchronous>, transform_indices = @transform_0, window_bounds = array<i64: 1, 270>}, {transform_indices = @transform_1, window_bounds = array<i64: 270, 512>}, {pipeline_mode = #tpu.pipeline_mode<synchronous>, transform_indices = @transform_2, window_bounds = array<i64: 1, 1>}, {transform_indices = @transform_3, window_bounds = array<i64: 1, 512>}]} {
    %c0 = arith.constant 0 : index
    %c0_0 = arith.constant 0 : index
    %0 = vector.load %arg1[%c0, %c0_0] : memref<1x270xf32, #tpu.memory_space<vmem>>, vector<1x270xf32>
    %1 = arith.truncf %0 : vector<1x270xf32> to vector<1x270xbf16>
    %c0_1 = arith.constant 0 : index
    %c0_2 = arith.constant 0 : index
    %2 = vector.load %arg2[%c0_1, %c0_2] : memref<270x512xf32, #tpu.memory_space<vmem>>, vector<270x512xf32>
    %3 = arith.truncf %2 : vector<270x512xf32> to vector<270x512xbf16>
    %cst = arith.constant dense<0.000000e+00> : vector<1x512xf32>
    %4 = tpu.matmul %1, %3, %cst {dimension_numbers = #tpu.dot_dimension_numbers<[1], [0], [0], [1], [0, 0, 1, 1], [], []>} : vector<1x270xbf16>, vector<270x512xbf16>, vector<1x512xf32> -> vector<1x512xf32>
    %c0_3 = arith.constant 0 : index
    %c0_4 = arith.constant 0 : index
    %5 = vector.load %arg3[%c0_3, %c0_4] : memref<1x1xf32, #tpu.memory_space<vmem>>, vector<1x1xf32>
    %6 = vector.broadcast %5 : vector<1x1xf32> to vector<1x512xf32>
    %7 = arith.addf %4, %6 : vector<1x512xf32>
    %8 = math.tanh %7 : vector<1x512xf32>
    %c0_5 = arith.constant 0 : index
    %c0_6 = arith.constant 0 : index
    %9 = vector.load %arg4[%c0_5, %c0_6] : memref<1x512xf32, #tpu.memory_space<vmem>>, vector<1x512xf32>
    tpu.vector_store %arg4[%c0_5, %c0_6], %8 {strides = array<i32>} : memref<1x512xf32, #tpu.memory_space<vmem>>, vector<1x512xf32>,
    return
  }
  func.func @transform_0(%arg0: i32) -> (i32, i32) {
    %c0_i32 = arith.constant 0 : i32
    %c0_i32_0 = arith.constant 0 : i32
    %c0_i32_1 = arith.constant 0 : i32
    return %c0_i32, %c0_i32_0 : i32, i32
  }
  func.func @transform_1(%arg0: i32) -> (i32, i32) {
    %c0_i32 = arith.constant 0 : i32
    %c0_i32_0 = arith.constant 0 : i32
    return %c0_i32, %arg0 : i32, i32
  }
  func.func @transform_2(%arg0: i32) -> (i32, i32) {
    %c0_i32 = arith.constant 0 : i32
    %c0_i32_0 = arith.constant 0 : i32
    %c0_i32_1 = arith.constant 0 : i32
    return %c0_i32, %c0_i32_0 : i32, i32
  }
  func.func @transform_3(%arg0: i32) -> (i32, i32) {
    %c0_i32 = arith.constant 0 : i32
    %c0_i32_0 = arith.constant 0 : i32
    return %c0_i32, %arg0 : i32, i32
  }
}

</mosaic_0001>

<bundles_post_ra>
// kernel: tile.17
= control target key start
LH: loop header
LB: loop body
LE: loop exit
PB: predicated region body
PF: predicated region fallthrough
CT: control target
= control target key end

     0   :  { %s40_s0 = inlined_call_operand.vmem [shape: f32[10], index: 0, kind: input, shape index: {}]   ;;  %s41_s1 = inlined_call_operand.vmem [shape: f32[32,10], index: 1, kind: output, shape index: {}]  }
   0x1   :  { %v4_v0 = vld [vmem:[%s40_s0] ss:$0 sm:$0xff] }
   0x2   :  { %5 = vst [vmem:[%s41_s1] sm:$0xff] %v4_v0  ;;  %12 = vst [vmem:[%s41_s1 + $0x8] sm:$0xff] %v4_v0 }
   0x3   :  { %13 = vst [vmem:[%s41_s1 + $0x10] sm:$0xff] %v4_v0  ;;  %14 = vst [vmem:[%s41_s1 + $0x18] sm:$0xff] %v4_v0 }

// kernel: tile.26
= control target key start
LH: loop header
LB: loop body
LE: loop exit
PB: predicated region body
PF: predicated region fallthrough
CT: control target
= control target key end

     0   :  { %vm9_vm0 = vcmask 48128   ;;  %vm23_vm1 = vcmask 64512   ;;  %s308_s14 = smov 122   ;;  %s309_s15 = smov 112   ;;  %vm3_vm2 = vcmask 80896   ;;  %vm13_vm3 = vcmask 31744   ;;  %s460_s0 = inlined_call_operand.vmem [shape: f32[32,10], index: 0, kind: input, shape index: {}]   ;;  %s461_s1 = inlined_call_operand.vmem [shape: f32[1,320], index: 1, kind: output, shape index: {}]  }
   0x1   :  { %v242_v0 = vld [vmem:[%s460_s0 + $0x19] sm:$0x1]   ;;  %v246_v3 = vld [vmem:[%s460_s0 + $0x18] sm:$0x1]   ;;  %v244_v4 = vld [vmem:[%s460_s0 + $0xc] sm:$0x1]  }
   0x2   :  { %v243_v1 = vld [vmem:[%s460_s0 + $0x19] sm:$0x1]   ;;  %34 = vrot.lane.b32.xlu1 %v246_v3, %s309_s15  ;;  %v245_v5 = vld [vmem:[%s460_s0 + $0xc] sm:$0x1]   ;;  %v247_v7 = vld [vmem:[%s460_s0 + $0xb] sm:$0x1]  }
   0x3   :  { %v10_v2 = vsel %vm9_vm0, %v243_v1, %v242_v0  ;;  %v24_v6 = vsel %vm23_vm1, %v245_v5, %v244_v4  ;;  %s310_s20 = smov 120   ;;  %s311_s21 = smov 110   ;;  %v248_v8 = vld [vmem:[%s460_s0 + $0x17] sm:$0x1]   ;;  %v249_v9 = vld [vmem:[%s460_s0 + $0xa] sm:$0x1]  }
   0x4   :  { %11 = vrot.lane.b32.xlu0 %v10_v2, %s308_s14  ;;  %s312_s26 = smov 102   ;;  %s313_s27 = smov 100   ;;  %v250_v10 = vld [vmem:[%s460_s0 + $0x16] sm:$0x1]   ;;  %v251_v11 = vld [vmem:[%s460_s0 + $0x9] sm:$0x1]  }
   0x5   :  { %s314_s3 = smov 92   ;;  %s315_s4 = smov 90   ;;  %v252_v12 = vld [vmem:[%s460_s0 + $0x15] sm:$0x1]   ;;  %v253_v13 = vld [vmem:[%s460_s0 + $0x8] sm:$0x1]  }
   0x6   :  { %41 = vrot.lane.b32.xlu1 %v247_v7, %s311_s21  ;;  %v2_v14 = vld [vmem:[%s460_s0] sm:$0x1]   ;;  %s316_s11 = smov 82   ;;  %s317_s12 = smov 80   ;;  %v254_v15 = vld [vmem:[%s460_s0 + $0x14] sm:$0x1]  }
   0x7   :  { %4 = vst.msk [vmem:[#allocation0] sm:$0x1] %vm3_vm2, %v2_v14   ;;  %v255_v16 = vld [vmem:[%s460_s0 + $0x7] sm:$0x1]   ;;  %s318_s17 = smov 72   ;;  %s319_s18 = smov 70  }
   0x8   :  { %25 = vrot.lane.b32.xlu0 %v24_v6, %s310_s20  ;;  %v256_v17 = vld [vmem:[%s460_s0 + $0x13] sm:$0x1]   ;;  %v257_v18 = vld [vmem:[%s460_s0 + $0x6] sm:$0x1]   ;;  %s320_s23 = smov 62   ;;  %s321_s24 = smov 60  }
   0x9   :  { %v258_v19 = vld [vmem:[%s460_s0 + $0x1f] sm:$0x1]   ;;  %v259_v20 = vld [vmem:[%s460_s0 + $0x12] sm:$0x1]   ;;  %s322_s29 = smov 54   ;;  %s323_s30 = smov 52  }
   0xa   :  { %54 = vrot.lane.b32.xlu1 %v249_v9, %s313_s27  ;;  %v260_v21 = vld [vmem:[%s460_s0 + $0x5] sm:$0x1]   ;;  %v261_v22 = vld [vmem:[%s460_s0 + $0x1e] sm:$0x1]   ;;  %s324_s6 = smov 50   ;;  %s325_s7 = smov 44  }
   0xb   :  { %v262_v23 = vld [vmem:[%s460_s0 + $0x11] sm:$0x1]   ;;  %v263_v24 = vld [vmem:[%s460_s0 + $0x4] sm:$0x1]   ;;  %s327_s13 = smov 40   ;;  %s329_s19 = smov 32  }
   0xc   :  { %47 = vrot.lane.b32.xlu0 %v248_v8, %s312_s26  ;;  %v264_v25 = vld [vmem:[%s460_s0 + $0x1d] sm:$0x1]   ;;  %v265_v26 = vld [vmem:[%s460_s0 + $0x10] sm:$0x1]   ;;  %v266_v27 = vld [vmem:[%s460_s0 + $0x3] sm:$0x1]  }
   0xd   :  { %v267_v28 = vld [vmem:[%s460_s0 + $0x1c] sm:$0x1]   ;;  %s331_s25 = smov 24   ;;  %v268_v29 = vld [vmem:[%s460_s0 + $0xf] sm:$0x1]   ;;  %s333_s2 = smov 20  }
   0xe   :  { %67 = vrot.lane.b32.xlu1 %v251_v11, %s315_s4  ;;  %v269_v30 = vld [vmem:[%s460_s0 + $0x2] sm:$0x1]   ;;  %v270_v31 = vld [vmem:[%s460_s0 + $0x1b] sm:$0x1]   ;;  %v271_v32 = vld [vmem:[%s460_s0 + $0xe] sm:$0x1]  }
   0xf   :  { %s335_s8 = smov 12   ;;  %v272_v33 = vld [vmem:[%s460_s0 + $0x1] sm:$0x1]   ;;  %v273_v34 = vld [vmem:[%s460_s0 + $0x1a] sm:$0x1]   ;;  %s337_s14 = smov 4  }
  0x10   :  { %60 = vrot.lane.b32.xlu0 %v250_v10, %s314_s3  ;;  %v274_v35 = vld [vmem:[%s460_s0 + $0xd] sm:$0x1]   ;;  %s338_s0 = smov 2   ;;  %vm16_vm4 = vcmask 1048528   ;;  %vm27_vm5 = vcmask 15360   ;;  %vm30_vm6 = vcmask 1048512  }
  0x11   :  { %vm36_vm7 = vcmask 999296   ;;  %vm43_vm8 = vcmask 982896   ;;  %vm49_vm9 = vcmask 917296   ;;  %vm56_vm10 = vcmask 900896  }
  0x12   :  { %80 = vrot.lane.b32.xlu1 %v253_v13, %s317_s12  ;;  %s326_s12 = smov 42   ;;  %vm62_vm11 = vcmask 835296   ;;  %vm69_vm12 = vcmask 818896   ;;  %vm75_vm13 = vcmask 753296   ;;  %vm82_vm14 = vcmask 736896  }
  0x13   :  { %vm88_vm15 = vcmask 671296   ;;  %vm95_vm0 = vcmask 654896   ;;  %vm101_vm1 = vcmask 589296   ;;  %vm108_vm2 = vcmask 572896  }
  0x14   :  { %73 = vrot.lane.b32.xlu0 %v252_v12, %s316_s11 }
  0x16   :  { %93 = vrot.lane.b32.xlu1 %v255_v16, %s319_s18  ;;  %s328_s18 = smov 34  }
  0x18   :  { %86 = vrot.lane.b32.xlu0 %v254_v15, %s318_s17 }
  0x1a   :  { %106 = vrot.lane.b32.xlu1 %v257_v18, %s321_s24  ;;  %s330_s24 = smov 30  }
  0x1c   :  { %99 = vrot.lane.b32.xlu0 %v256_v17, %s320_s23 }
  0x1e   :  { %119 = vrot.lane.b32.xlu1 %v259_v20, %s323_s30  ;;  %s332_s30 = smov 22  }
  0x20   :  { %112 = vrot.lane.b32.xlu0 %v258_v19, %s322_s29 }
  0x22   :  { %132 = vrot.lane.b32.xlu1 %v261_v22, %s325_s7  ;;  %s334_s7 = smov 14  }
  0x24   :  { %126 = vrot.lane.b32.xlu0 %v260_v21, %s324_s6 }
  0x26   :  { %146 = vrot.lane.b32.xlu1 %v263_v24, %s327_s13  ;;  %s336_s13 = smov 10  }
  0x28   :  { %139 = vrot.lane.b32.xlu0 %v262_v23, %s326_s12 }
  0x2a   :  { %159 = vrot.lane.b32.xlu1 %v265_v26, %s329_s19 }
  0x2c   :  { %152 = vrot.lane.b32.xlu0 %v264_v25, %s328_s18 }
  0x2e   :  { %172 = vrot.lane.b32.xlu1 %v267_v28, %s331_s25 }
  0x30   :  { %166 = vrot.lane.b32.xlu0 %v266_v27, %s330_s24 }
  0x32   :  { %186 = vrot.lane.b32.xlu1 %v269_v30, %s333_s2 }
  0x34   :  { %179 = vrot.lane.b32.xlu0 %v268_v29, %s332_s30 }
  0x36   :  { %199 = vrot.lane.b32.xlu1 %v271_v32, %s335_s8 }
  0x38   :  { %192 = vrot.lane.b32.xlu0 %v270_v31, %s334_s7 }
  0x3a   :  { %212 = vrot.lane.b32.xlu1 %v273_v34, %s337_s14 }
  0x3c   :  { %206 = vrot.lane.b32.xlu0 %v272_v33, %s336_s13 }
  0x40   :  { %219 = vrot.lane.b32.xlu0 %v274_v35, %s338_s0 }
  0x74   :  { %v35_v37 = vpop.permute.xlu1 %34  }
  0x76   :  { %v12_v36 = vpop.permute.xlu0 %11  }
  0x77   :  { %15 = vst.msk [vmem:[#allocation0 + $0x10] sm:$0x1] %vm13_vm3, %v12_v36   ;;  %vm114_vm3 = vcmask 523696  }
  0x78   :  { %18 = vst.msk [vmem:[#allocation0 + $0x8] sm:$0x1] %vm16_vm4, %v12_v36   ;;  %v42_v39 = vpop.permute.xlu1 %41   ;;  %vm121_vm4 = vcmask 507296  }
  0x7a   :  { %v26_v38 = vpop.permute.xlu0 %25  }
  0x7b   :  { %29 = vst.msk [vmem:[#allocation0 + $0x8] sm:$0x1] %vm27_vm5, %v26_v38   ;;  %vm128_vm5 = vcmask 490896  }
  0x7c   :  { %31 = vst.msk [vmem:[#allocation0] sm:$0x1] %vm30_vm6, %v26_v38   ;;  %v55_v41 = vpop.permute.xlu1 %54   ;;  %vm134_vm6 = vcmask 441696  }
  0x7d   :  { %38 = vst.msk [vmem:[#allocation0 + $0x8] sm:$0x1] %vm36_vm7, %v35_v37   ;;  %vm141_vm7 = vcmask 425296  }
  0x7e   :  { %44 = vst.msk [vmem:[#allocation0] sm:$0x1] %vm43_vm8, %v42_v39   ;;  %v48_v40 = vpop.permute.xlu0 %47   ;;  %vm148_vm8 = vcmask 408896  }
  0x7f   :  { %51 = vst.msk [vmem:[#allocation0 + $0x8] sm:$0x1] %vm49_vm9, %v48_v40   ;;  %vm154_vm9 = vcmask 359696  }
  0x80   :  { %57 = vst.msk [vmem:[#allocation0] sm:$0x1] %vm56_vm10, %v55_v41   ;;  %v68_v43 = vpop.permute.xlu1 %67   ;;  %vm161_vm10 = vcmask 343296  }
  0x81   :  { %70 = vst.msk [vmem:[#allocation0] sm:$0x1] %vm69_vm12, %v68_v43   ;;  %vm174_vm12 = vcmask 277696  }
  0x82   :  { %v61_v42 = vpop.permute.xlu0 %60  }
  0x83   :  { %64 = vst.msk [vmem:[#allocation0 + $0x8] sm:$0x1] %vm62_vm11, %v61_v42   ;;  %vm168_vm11 = vcmask 326896  }
  0x84   :  { %v81_v45 = vpop.permute.xlu1 %80  }
  0x85   :  { %83 = vst.msk [vmem:[#allocation0] sm:$0x1] %vm82_vm14, %v81_v45   ;;  %vm188_vm14 = vcmask 244896  }
  0x86   :  { %v74_v44 = vpop.permute.xlu0 %73  }
  0x87   :  { %77 = vst.msk [vmem:[#allocation0 + $0x8] sm:$0x1] %vm75_vm13, %v74_v44   ;;  %vm181_vm13 = vcmask 261296  }
  0x88   :  { %v94_v47 = vpop.permute.xlu1 %93  }
  0x89   :  { %96 = vst.msk [vmem:[#allocation0] sm:$0x1] %vm95_vm0, %v94_v47   ;;  %vm201_vm0 = vcmask 179296  }
  0x8a   :  { %v87_v46 = vpop.permute.xlu0 %86  }
  0x8b   :  { %90 = vst.msk [vmem:[#allocation0 + $0x8] sm:$0x1] %vm88_vm15, %v87_v46   ;;  %vm194_vm15 = vcmask 195696  }
  0x8c   :  { %v107_v49 = vpop.permute.xlu1 %106  }
  0x8d   :  { %109 = vst.msk [vmem:[#allocation0] sm:$0x1] %vm108_vm2, %v107_v49   ;;  %vm214_vm2 = vcmask 113696  }
  0x8e   :  { %v100_v48 = vpop.permute.xlu0 %99  }
  0x8f   :  { %103 = vst.msk [vmem:[#allocation0 + $0x8] sm:$0x1] %vm101_vm1, %v100_v48   ;;  %vm208_vm1 = vcmask 162896  }
  0x90   :  { %v120_v51 = vpop.permute.xlu1 %119  }
  0x91   :  { %123 = vst.msk [vmem:[#allocation0 + $0x8] sm:$0x1] %vm121_vm4, %v120_v51  }
  0x92   :  { %v113_v50 = vpop.permute.xlu0 %112  }
  0x93   :  { %116 = vst.msk [vmem:[#allocation0 + $0x10] sm:$0x1] %vm114_vm3, %v113_v50   ;;  %vm221_vm3 = vcmask 97296  }
  0x94   :  { %v133_v53 = vpop.permute.xlu1 %132  }
  0x95   :  { %136 = vst.msk [vmem:[#allocation0 + $0x10] sm:$0x1] %vm134_vm6, %v133_v53  }
  0x96   :  { %v127_v52 = vpop.permute.xlu0 %126  }
  0x97   :  { %129 = vst.msk [vmem:[#allocation0] sm:$0x1] %vm128_vm5, %v127_v52  }
  0x98   :  { %v147_v55 = vpop.permute.xlu1 %146  }
  0x99   :  { %149 = vst.msk [vmem:[#allocation0] sm:$0x1] %vm148_vm8, %v147_v55  }
  0x9a   :  { %v140_v54 = vpop.permute.xlu0 %139  }
  0x9b   :  { %143 = vst.msk [vmem:[#allocation0 + $0x8] sm:$0x1] %vm141_vm7, %v140_v54  }
  0x9c   :  { %v160_v57 = vpop.permute.xlu1 %159  }
  0x9d   :  { %163 = vst.msk [vmem:[#allocation0 + $0x8] sm:$0x1] %vm161_vm10, %v160_v57  }
  0x9e   :  { %v153_v56 = vpop.permute.xlu0 %152  }
  0x9f   :  { %156 = vst.msk [vmem:[#allocation0 + $0x10] sm:$0x1] %vm154_vm9, %v153_v56  }
  0xa0   :  { %v173_v59 = vpop.permute.xlu1 %172  }
  0xa1   :  { %176 = vst.msk [vmem:[#allocation0 + $0x10] sm:$0x1] %vm174_vm12, %v173_v59  }
  0xa2   :  { %v167_v58 = vpop.permute.xlu0 %166  }
  0xa3   :  { %169 = vst.msk [vmem:[#allocation0] sm:$0x1] %vm168_vm11, %v167_v58  }
  0xa4   :  { %v187_v61 = vpop.permute.xlu1 %186  }
  0xa5   :  { %189 = vst.msk [vmem:[#allocation0] sm:$0x1] %vm188_vm14, %v187_v61  }
  0xa6   :  { %v180_v60 = vpop.permute.xlu0 %179  }
  0xa7   :  { %183 = vst.msk [vmem:[#allocation0 + $0x8] sm:$0x1] %vm181_vm13, %v180_v60  }
  0xa8   :  { %v200_v63 = vpop.permute.xlu1 %199  }
  0xa9   :  { %203 = vst.msk [vmem:[#allocation0 + $0x8] sm:$0x1] %vm201_vm0, %v200_v63  }
  0xaa   :  { %v193_v62 = vpop.permute.xlu0 %192  }
  0xab   :  { %196 = vst.msk [vmem:[#allocation0 + $0x10] sm:$0x1] %vm194_vm15, %v193_v62  }
  0xac   :  { %v213_v1 = vpop.permute.xlu1 %212  }
  0xad   :  { %216 = vst.msk [vmem:[#allocation0 + $0x10] sm:$0x1] %vm214_vm2, %v213_v1  }
  0xae   :  { %v207_v0 = vpop.permute.xlu0 %206  }
  0xaf   :  { %209 = vst.msk [vmem:[#allocation0] sm:$0x1] %vm208_vm1, %v207_v0  }
  0xb2   :  { %v220_v2 = vpop.permute.xlu0 %219  }
  0xb3   :  { %223 = vst.msk [vmem:[#allocation0 + $0x8] sm:$0x1] %vm221_vm3, %v220_v2  }
  0xb4   :  { %v236_v4 = vld [vmem:[#allocation0 + $0x10] sm:$0x1] }
  0xb5   :  { %276 = vst [vmem:[%s461_s1 + $0x2] sm:$0x1] %v236_v4 }
  0xb6   :  { %v227_v3 = vld [vmem:[#allocation0] sm:$0x1] }
  0xb7   :  { %229 = vst [vmem:[%s461_s1] sm:$0x1] %v227_v3 }
  0xba   :  { %v231_v5 = vld [vmem:[#allocation0 + $0x8] sm:$0x1] }
  0xbb   :  { %275 = vst [vmem:[%s461_s1 + $0x1] sm:$0x1] %v231_v5 }

// kernel: vit_forward.6
= control target key start
LH: loop header
LB: loop body
LE: loop exit
PB: predicated region body
PF: predicated region fallthrough
CT: control target
= control target key end

     0   :  { %s1355_s12 = smov 0   ;;  %s1947_s0 = inlined_call_operand.vmem [shape: f32[2048,27], index: 0, kind: input, shape index: {}]   ;;  %s1948_s1 = inlined_call_operand.vmem [shape: f32[27,10], index: 1, kind: input, shape index: {}]   ;;  %s1949_s2 = inlined_call_operand.vmem [shape: f32[2048,10], index: 2, kind: output, shape index: {0}]   ;;  %s1950_s3 = inlined_call_operand.vmem [shape: f32[4,2,10], index: 3, kind: output, shape index: {1}]  }
   0x1 LB: > { %s1361_s13 = sadd.s32 4294967295, %s1332_s12   ;;  %p1171_p0 = scmp.ge.s32.totalorder %s1332_s12, 1  ;;  %s1332_s12 = sphi %s1355_s12, %s14_s12  }
   0x2   : > { %p141_p1 = scmp.lt.s32.totalorder %s1332_s12, 5 }
   0x4   : > { %p142_p2 = pnand %p1171_p0, %p141_p1 }
   0x5   : > { %v282_v0 = vld [vmem:[%s1948_s1] sm:$0xff] (!%p142_p2)  ;;  %v283_v1 = vld [vmem:[%s1948_s1 + $0x8] sm:$0xff] (!%p142_p2)  ;;  %v284_v2 = vld [vmem:[%s1948_s1 + $0x10] sm:$0xff] (!%p142_p2)  ;;  %vm385_vm0 = vcmask (!%p142_p2), 1044480   ;;  %vm386_vm1 = vcmask (!%p142_p2), 1045504   ;;  %v1334_v5 = vmov (!%p142_p2), 65535  }
   0x6   : > { %145 = sbr.rel (%p142_p2) target bundleno = 378 (0x17a), region = 28  ;;  %v286_v3 = vpack.c.bf16 (!%p142_p2), %v283_v1, %v282_v0  ;;  %v285_v4 = vld [vmem:[%s1948_s1 + $0x18] sm:$0x7] (!%p142_p2)  ;;  %v387_v6 = vsel (!%p142_p2), %vm385_vm0, 4294967295, %v1334_v5  ;;  %s1172_s22 = sshll.u32 (!%p142_p2), %s1361_s13, 6  ;;  %vm288_vm2 = vcmask (!%p142_p2), 220160  }
   0x7   : > { %v287_v7 = vpack.c.bf16 (!%p142_p2), %v285_v4, %v284_v2  ;;  %v388_v8 = vsel (!%p142_p2), %vm386_vm1, %v387_v6, 0  ;;  %p170_p3 = scmp.lt.s32.totalorder (!%p142_p2), %s1172_s22, 255  ;;  %vm681_vm3 = vcmask (!%p142_p2), 80896   ;;  %p181_p4 = scmp.lt.s32.totalorder (!%p142_p2), %s1361_s13, 3  ;;  %vm1076_vm4 = vcmask (!%p142_p2), 1040384  }
   0x8   : > { %1245 = vmatprep.subr.bf16.mxu0 (!%p142_p2), %v286_v3  ;;  %1313 = vmatprep.subr.bf16.mxu1 (!%p142_p2), %v286_v3  ;;  %vm1078_vm5 = vcmask (!%p142_p2), 74752  }
   0x9   : > { %1246 = vmatpush3.bf16.msra.mxu0 (!%p142_p2), %v286_v3  ;;  %v390_v9 = vand.u32 (!%p142_p2), %v388_v8, %v287_v7  ;;  %1315 = vmatpush3.bf16.msra.mxu1 (!%p142_p2), %v286_v3 }
   0xb   : > { %1247 = vmatprep.subr.bf16.mxu0 (!%p142_p2), %v390_v9  ;;  %1314 = vmatprep.subr.bf16.mxu1 (!%p142_p2), %v390_v9 }
   0xd   : > { %s1952_s22 = smov (!%p170_p3, %s1172_s22), 255  ;;  %1248 = vmatpush3.bf16.msra.mxu0 %v390_v9  ;;  %1316 = vmatpush3.bf16.msra.mxu1 %v390_v9  ;;  %s1954_s13 = smov (!%p181_p4, %s1361_s13), 3 }
   0xe   : > { %s1173_s23 = sshll.u32 %s1952_s22, 3  ;;  %s1176_s30 = sshll.u32 %s1954_s13, 1 }
   0xf   : > { %s1386_s26 = scalar_lea.vmem %s1947_s0, %s1173_s23  ;;  %s1489_s29 = scalar_lea.vmem %s1949_s2, %s1173_s23 }
  0x10   : > { %v186_v10 = vld [vmem:[%s1386_s26] sm:$0xff]  ;;  %v187_v11 = vld [vmem:[%s1386_s26 + $0x8] sm:$0xff]  ;;  %v188_v12 = vld [vmem:[%s1386_s26 + $0x10] sm:$0xff]  ;;  %s184_s6 = scalar_lea.vmem %s1950_s3, %s1176_s30 }
  0x11   : > { %v250_v13 = vpack.c.bf16 %v187_v11, %v186_v10  ;;  %v189_v14 = vld [vmem:[%s1386_s26 + $0x18] sm:$0xff]  ;;  %v190_v15 = vld [vmem:[%s1386_s26 + $0x20] sm:$0xff]  ;;  %v191_v16 = vld [vmem:[%s1386_s26 + $0x28] sm:$0xff] }
  0x12   : > { %v251_v17 = vpack.c.bf16 %v189_v14, %v188_v12  ;;  %v252_v18 = vpack.c.bf16 %v191_v16, %v190_v15  ;;  %v192_v19 = vld [vmem:[%s1386_s26 + $0x30] sm:$0xff]  ;;  %v193_v20 = vld [vmem:[%s1386_s26 + $0x38] sm:$0xff]  ;;  %v194_v21 = vld [vmem:[%s1386_s26 + $0x40] sm:$0xff] }
  0x13   : > { %1249 = vmatprep.mubr.msk.bf16.mxu0 %vm288_vm2, %v250_v13  ;;  %v195_v22 = vld [vmem:[%s1386_s26 + $0x48] sm:$0xff]  ;;  %v253_v23 = vpack.c.bf16 %v193_v20, %v192_v19  ;;  %v218_v25 = vld [vmem:[%s1386_s26 + $0x100] sm:$0xff]  ;;  %v220_v27 = vld [vmem:[%s1386_s26 + $0x110] sm:$0xff] }
  0x14   : > { %1250 = vmatmul.mubr.msk.bf16.vlgmr.msra.gmra.mrb[0].mxu0 %vm288_vm2, %v251_v17  ;;  %v254_v24 = vpack.c.bf16 %v195_v22, %v194_v21  ;;  %v219_v26 = vld [vmem:[%s1386_s26 + $0x108] sm:$0xff]  ;;  %v221_v28 = vld [vmem:[%s1386_s26 + $0x118] sm:$0xff]  ;;  %v222_v31 = vld [vmem:[%s1386_s26 + $0x120] sm:$0xff] }
  0x15   : > { %1253 = vmatprep.mubr.msk.bf16.mxu0 %vm288_vm2, %v252_v18  ;;  %v266_v29 = vpack.c.bf16 %v219_v26, %v218_v25  ;;  %v267_v30 = vpack.c.bf16 %v221_v28, %v220_v27  ;;  %v223_v32 = vld [vmem:[%s1386_s26 + $0x128] sm:$0xff]  ;;  %v196_v33 = vld [vmem:[%s1386_s26 + $0x50] sm:$0xff]  ;;  %v197_v34 = vld [vmem:[%s1386_s26 + $0x58] sm:$0xff] }
  0x16   : > { %v268_v35 = vpack.c.bf16 %v223_v32, %v222_v31  ;;  %v198_v36 = vld [vmem:[%s1386_s26 + $0x60] sm:$0xff]  ;;  %v199_v37 = vld [vmem:[%s1386_s26 + $0x68] sm:$0xff]  ;;  %v255_v38 = vpack.c.bf16 %v197_v34, %v196_v33  ;;  %v224_v39 = vld [vmem:[%s1386_s26 + $0x130] sm:$0xff] }
  0x17   : > { %1281 = vmatprep.mubr.msk.bf16.mxu1 %vm288_vm2, %v266_v29  ;;  %v225_v40 = vld [vmem:[%s1386_s26 + $0x138] sm:$0xff]  ;;  %v256_v41 = vpack.c.bf16 %v199_v37, %v198_v36  ;;  %v226_v42 = vld [vmem:[%s1386_s26 + $0x140] sm:$0xff]  ;;  %v227_v43 = vld [vmem:[%s1386_s26 + $0x148] sm:$0xff] }
  0x18   : > { %1282 = vmatmul.mubr.msk.bf16.vlgmr.msra.gmra.mrb[0].mxu1 %vm288_vm2, %v267_v30  ;;  %v269_v44 = vpack.c.bf16 %v225_v40, %v224_v39  ;;  %v270_v45 = vpack.c.bf16 %v227_v43, %v226_v42  ;;  %v200_v46 = vld [vmem:[%s1386_s26 + $0x70] sm:$0xff]  ;;  %v201_v47 = vld [vmem:[%s1386_s26 + $0x78] sm:$0xff]  ;;  %v202_v48 = vld [vmem:[%s1386_s26 + $0x80] sm:$0xff] }
  0x19   : > { %1285 = vmatprep.mubr.msk.bf16.mxu1 %vm288_vm2, %v268_v35  ;;  %v203_v49 = vld [vmem:[%s1386_s26 + $0x88] sm:$0xff]  ;;  %v257_v50 = vpack.c.bf16 %v201_v47, %v200_v46  ;;  %v228_v51 = vld [vmem:[%s1386_s26 + $0x150] sm:$0xff]  ;;  %v229_v52 = vld [vmem:[%s1386_s26 + $0x158] sm:$0xff] }
  0x1a   : > { %v258_v53 = vpack.c.bf16 %v203_v49, %v202_v48  ;;  %v230_v54 = vld [vmem:[%s1386_s26 + $0x160] sm:$0xff]  ;;  %v231_v55 = vld [vmem:[%s1386_s26 + $0x168] sm:$0xff]  ;;  %v271_v56 = vpack.c.bf16 %v229_v52, %v228_v51  ;;  %v204_v58 = vld [vmem:[%s1386_s26 + $0x90] sm:$0xff] }
  0x1b   : > { %v272_v57 = vpack.c.bf16 %v231_v55, %v230_v54  ;;  %v205_v59 = vld [vmem:[%s1386_s26 + $0x98] sm:$0xff]  ;;  %v206_v60 = vld [vmem:[%s1386_s26 + $0xa0] sm:$0xff]  ;;  %v207_v61 = vld [vmem:[%s1386_s26 + $0xa8] sm:$0xff] }
  0x1c   : > { %1254 = vmatmul.mubr.msk.bf16.gmra.mrb[4].mxu0 %vm288_vm2, %v253_v23  ;;  %v259_v62 = vpack.c.bf16 %v205_v59, %v204_v58  ;;  %v232_v63 = vld [vmem:[%s1386_s26 + $0x170] sm:$0xff]  ;;  %v233_v0 = vld [vmem:[%s1386_s26 + $0x178] sm:$0xff]  ;;  %v260_v1 = vpack.c.bf16 %v207_v61, %v206_v60  ;;  %v234_v2 = vld [vmem:[%s1386_s26 + $0x180] sm:$0xff] }
  0x1d   : > { %1257 = vmatprep.mubr.msk.bf16.mxu0 %vm288_vm2, %v254_v24  ;;  %v235_v3 = vld [vmem:[%s1386_s26 + $0x188] sm:$0xff]  ;;  %v273_v4 = vpack.c.bf16 %v233_v0, %v232_v63  ;;  %v208_v6 = vld [vmem:[%s1386_s26 + $0xb0] sm:$0xff]  ;;  %v209_v7 = vld [vmem:[%s1386_s26 + $0xb8] sm:$0xff] }
  0x1e   : > { %v274_v5 = vpack.c.bf16 %v235_v3, %v234_v2  ;;  %v210_v8 = vld [vmem:[%s1386_s26 + $0xc0] sm:$0xff]  ;;  %v211_v9 = vld [vmem:[%s1386_s26 + $0xc8] sm:$0xff]  ;;  %v261_v10 = vpack.c.bf16 %v209_v7, %v208_v6  ;;  %v236_v11 = vld [vmem:[%s1386_s26 + $0x190] sm:$0xff] }
  0x1f   : > { %v237_v12 = vld [vmem:[%s1386_s26 + $0x198] sm:$0xff]  ;;  %v262_v13 = vpack.c.bf16 %v211_v9, %v210_v8  ;;  %v238_v14 = vld [vmem:[%s1386_s26 + $0x1a0] sm:$0xff]  ;;  %v239_v15 = vld [vmem:[%s1386_s26 + $0x1a8] sm:$0xff] }
  0x20   : > { %1286 = vmatmul.mubr.msk.bf16.gmra.mrb[4].mxu1 %vm288_vm2, %v269_v44  ;;  %v275_v16 = vpack.c.bf16 %v237_v12, %v236_v11  ;;  %v276_v17 = vpack.c.bf16 %v239_v15, %v238_v14  ;;  %v212_v18 = vld [vmem:[%s1386_s26 + $0xd0] sm:$0xff]  ;;  %v213_v19 = vld [vmem:[%s1386_s26 + $0xd8] sm:$0xff]  ;;  %v214_v20 = vld [vmem:[%s1386_s26 + $0xe0] sm:$0xff] }
  0x21   : > { %1289 = vmatprep.mubr.msk.bf16.mxu1 %vm288_vm2, %v270_v45  ;;  %v215_v21 = vld [vmem:[%s1386_s26 + $0xe8] sm:$0xff]  ;;  %v263_v22 = vpack.c.bf16 %v213_v19, %v212_v18  ;;  %v240_v23 = vld [vmem:[%s1386_s26 + $0x1b0] sm:$0xff]  ;;  %v241_v24 = vld [vmem:[%s1386_s26 + $0x1b8] sm:$0xff] }
  0x22   : > { %v264_v25 = vpack.c.bf16 %v215_v21, %v214_v20  ;;  %v242_v26 = vld [vmem:[%s1386_s26 + $0x1c0] sm:$0xff]  ;;  %v243_v27 = vld [vmem:[%s1386_s26 + $0x1c8] sm:$0xff]  ;;  %v277_v28 = vpack.c.bf16 %v241_v24, %v240_v23  ;;  %v216_v30 = vld [vmem:[%s1386_s26 + $0xf0] sm:$0xff] }
  0x23   : > { %v278_v29 = vpack.c.bf16 %v243_v27, %v242_v26  ;;  %v217_v31 = vld [vmem:[%s1386_s26 + $0xf8] sm:$0xff]  ;;  %v244_v33 = vld [vmem:[%s1386_s26 + $0x1d0] sm:$0xff]  ;;  %v246_v35 = vld [vmem:[%s1386_s26 + $0x1e0] sm:$0xff] }
  0x24   : > { %1258 = vmatmul.mubr.msk.bf16.gmra.mrb[8].mxu0 %vm288_vm2, %v255_v38  ;;  %v265_v32 = vpack.c.bf16 %v217_v31, %v216_v30  ;;  %v245_v34 = vld [vmem:[%s1386_s26 + $0x1d8] sm:$0xff]  ;;  %v247_v36 = vld [vmem:[%s1386_s26 + $0x1e8] sm:$0xff]  ;;  %v248_v39 = vld [vmem:[%s1386_s26 + $0x1f0] sm:$0xff] }
  0x25   : > { %1261 = vmatprep.mubr.msk.bf16.mxu0 %vm288_vm2, %v256_v41  ;;  %v279_v37 = vpack.c.bf16 %v245_v34, %v244_v33  ;;  %v280_v38 = vpack.c.bf16 %v247_v36, %v246_v35  ;;  %v249_v40 = vld [vmem:[%s1386_s26 + $0x1f8] sm:$0xff] }
  0x26   : > { %v281_v41 = vpack.c.bf16 %v249_v40, %v248_v39 }
  0x28   : > { %1290 = vmatmul.mubr.msk.bf16.gmra.mrb[8].mxu1 %vm288_vm2, %v271_v56 }
  0x29   : > { %1293 = vmatprep.mubr.msk.bf16.mxu1 %vm288_vm2, %v272_v57 }
  0x2c   : > { %1262 = vmatmul.mubr.msk.bf16.gmra.mrb[12].mxu0 %vm288_vm2, %v257_v50 }
  0x2d   : > { %1265 = vmatprep.mubr.msk.bf16.mxu0 %vm288_vm2, %v258_v53 }
  0x30   : > { %1294 = vmatmul.mubr.msk.bf16.gmra.mrb[12].mxu1 %vm288_vm2, %v273_v4 }
  0x31   : > { %1297 = vmatprep.mubr.msk.bf16.mxu1 %vm288_vm2, %v274_v5 }
  0x34   : > { %1266 = vmatmul.mubr.msk.bf16.gmra.mrb[16].mxu0 %vm288_vm2, %v259_v62 }
  0x35   : > { %1269 = vmatprep.mubr.msk.bf16.mxu0 %vm288_vm2, %v260_v1 }
  0x38   : > { %1298 = vmatmul.mubr.msk.bf16.gmra.mrb[16].mxu1 %vm288_vm2, %v275_v16 }
  0x39   : > { %1301 = vmatprep.mubr.msk.bf16.mxu1 %vm288_vm2, %v276_v17 }
  0x3c   : > { %1270 = vmatmul.mubr.msk.bf16.gmra.mrb[20].mxu0 %vm288_vm2, %v261_v10 }
  0x3d   : > { %1273 = vmatprep.mubr.msk.bf16.mxu0 %vm288_vm2, %v262_v13 }
  0x40   : > { %1302 = vmatmul.mubr.msk.bf16.gmra.mrb[20].mxu1 %vm288_vm2, %v277_v28 }
  0x41   : > { %1305 = vmatprep.mubr.msk.bf16.mxu1 %vm288_vm2, %v278_v29 }
  0x44   : > { %1274 = vmatmul.mubr.msk.bf16.gmra.mrb[24].mxu0 %vm288_vm2, %v263_v22 }
  0x45   : > { %1277 = vmatprep.mubr.msk.bf16.mxu0 %vm288_vm2, %v264_v25 }
  0x48   : > { %1306 = vmatmul.mubr.msk.bf16.gmra.mrb[24].mxu1 %vm288_vm2, %v279_v37 }
  0x49   : > { %1309 = vmatprep.mubr.msk.bf16.mxu1 %vm288_vm2, %v280_v38 }
  0x4c   : > { %1278 = vmatmul.mubr.msk.bf16.gmra.mrb[28].mxu0 %vm288_vm2, %v265_v32 }
  0x50   : > { %1310 = vmatmul.mubr.msk.bf16.gmra.mrb[28].mxu1 %vm288_vm2, %v281_v41 }
  0xe7   : > { %v1251_v42 = vpop.f32.mrb[0].mxu0 }
  0xe8   : > { %684 = vst.msk [vmem:[%s1489_s29 + $0x10] sm:$0xff] %vm681_vm3, %v1251_v42  ;;  %v426_v43 = vpop.f32.mrb[1].mxu0  ;;  %v881_v47 = vmul.f32 %v1251_v42, %v1251_v42  ;;  %v749_v52 = vsel %vm681_vm3, %v1251_v42, 0.0 }
  0xe9   : > { %682 = vst.msk [vmem:[%s1489_s29] sm:$0xff] %vm681_vm3, %v426_v43  ;;  %v879_v44 = vmul.f32 %v426_v43, %v426_v43  ;;  %v1252_v45 = vpop.f32.mrb[2].mxu0  ;;  %v746_v48 = vsel %vm681_vm3, %v426_v43, 0.0 }
  0xea   : > { %685 = vst.msk [vmem:[%s1489_s29 + $0x18] sm:$0xff] %vm681_vm3, %v1252_v45  ;;  %v429_v46 = vpop.f32.mrb[3].mxu0  ;;  %v882_v54 = vmul.f32 %v1252_v45, %v1252_v45  ;;  %v946_v58 = vsel %vm681_vm3, %v881_v47, 0.0  ;;  %v751_v59 = vsel %vm681_vm3, %v1252_v45, 0.0 }
  0xeb   : > { %683 = vst.msk [vmem:[%s1489_s29 + $0x8] sm:$0xff] %vm681_vm3, %v429_v46  ;;  %v747_v49 = vsel %vm681_vm3, %v429_v46, 0.0  ;;  %v880_v50 = vmul.f32 %v429_v46, %v429_v46  ;;  %v943_v53 = vsel %vm681_vm3, %v879_v44, 0.0  ;;  %v1514_v7 = vpop.f32.mrb[0].mxu1 }
  0xec   : > { %v748_v51 = vadd.f32 %v747_v49, %v746_v48  ;;  %v948_v0 = vsel %vm681_vm3, %v882_v54, 0.0  ;;  %716 = vst.msk [vmem:[%s1489_s29 + $0x110] sm:$0xff] %vm681_vm3, %v1514_v7  ;;  %v1523_v12 = vpop.f32.mrb[1].mxu1 }
  0xed   : > { %v944_v55 = vsel %vm681_vm3, %v880_v50, 0.0  ;;  %714 = vst.msk [vmem:[%s1489_s29 + $0x100] sm:$0xff] %vm681_vm3, %v1523_v12  ;;  %v1528_v15 = vpop.f32.mrb[2].mxu1 }
  0xee   : > { %v750_v56 = vadd.f32 %v749_v52, %v748_v51  ;;  %v945_v57 = vadd.f32 %v944_v55, %v943_v53  ;;  %717 = vst.msk [vmem:[%s1489_s29 + $0x118] sm:$0xff] %vm681_vm3, %v1528_v15  ;;  %v1535_v19 = vpop.f32.mrb[3].mxu1 }
  0xef   : > { %v1255_v60 = vpop.f32.mrb[4].mxu0  ;;  %715 = vst.msk [vmem:[%s1489_s29 + $0x108] sm:$0xff] %vm681_vm3, %v1535_v19 }
  0xf0   : > { %v947_v61 = vadd.f32 %v946_v58, %v945_v57  ;;  %688 = vst.msk [vmem:[%s1489_s29 + $0x30] sm:$0xff] %vm681_vm3, %v1255_v60  ;;  %v442_v62 = vpop.f32.mrb[5].mxu0  ;;  %v752_v63 = vadd.f32 %v751_v59, %v750_v56  ;;  %v885_v8 = vmul.f32 %v1255_v60, %v1255_v60  ;;  %v757_v16 = vsel %vm681_vm3, %v1255_v60, 0.0 }
  0xf1   : > { %686 = vst.msk [vmem:[%s1489_s29 + $0x20] sm:$0xff] %vm681_vm3, %v442_v62  ;;  %v753_v1 = vsel %vm681_vm3, %v442_v62, 0.0  ;;  %v883_v2 = vmul.f32 %v442_v62, %v442_v62  ;;  %v1256_v3 = vpop.f32.mrb[6].mxu0 }
  0xf2   : > { %v754_v4 = vadd.f32 %v753_v1, %v752_v63  ;;  %v949_v5 = vadd.f32 %v948_v0, %v947_v61  ;;  %689 = vst.msk [vmem:[%s1489_s29 + $0x38] sm:$0xff] %vm681_vm3, %v1256_v3  ;;  %v445_v6 = vpop.f32.mrb[7].mxu0  ;;  %v886_v17 = vmul.f32 %v1256_v3, %v1256_v3  ;;  %v954_v22 = vsel %vm681_vm3, %v885_v8, 0.0 }
  0xf3   : > { %v950_v9 = vsel %vm681_vm3, %v883_v2, 0.0  ;;  %687 = vst.msk [vmem:[%s1489_s29 + $0x28] sm:$0xff] %vm681_vm3, %v445_v6  ;;  %v755_v10 = vsel %vm681_vm3, %v445_v6, 0.0  ;;  %v884_v11 = vmul.f32 %v445_v6, %v445_v6  ;;  %v759_v23 = vsel %vm681_vm3, %v1256_v3, 0.0  ;;  %v1550_v35 = vpop.f32.mrb[4].mxu1 }
  0xf4   : > { %v951_v13 = vadd.f32 %v950_v9, %v949_v5  ;;  %v756_v14 = vadd.f32 %v755_v10, %v754_v4  ;;  %v956_v28 = vsel %vm681_vm3, %v886_v17, 0.0  ;;  %720 = vst.msk [vmem:[%s1489_s29 + $0x130] sm:$0xff] %vm681_vm3, %v1550_v35  ;;  %v1559_v40 = vpop.f32.mrb[5].mxu1 }
  0xf5   : > { %v952_v18 = vsel %vm681_vm3, %v884_v11, 0.0  ;;  %718 = vst.msk [vmem:[%s1489_s29 + $0x120] sm:$0xff] %vm681_vm3, %v1559_v40  ;;  %v1564_v43 = vpop.f32.mrb[6].mxu1 }
  0xf6   : > { %v758_v20 = vadd.f32 %v757_v16, %v756_v14  ;;  %v953_v21 = vadd.f32 %v952_v18, %v951_v13  ;;  %721 = vst.msk [vmem:[%s1489_s29 + $0x138] sm:$0xff] %vm681_vm3, %v1564_v43  ;;  %v1571_v47 = vpop.f32.mrb[7].mxu1 }
  0xf7   : > { %v1259_v24 = vpop.f32.mrb[8].mxu0  ;;  %719 = vst.msk [vmem:[%s1489_s29 + $0x128] sm:$0xff] %vm681_vm3, %v1571_v47 }
  0xf8   : > { %v955_v25 = vadd.f32 %v954_v22, %v953_v21  ;;  %692 = vst.msk [vmem:[%s1489_s29 + $0x50] sm:$0xff] %vm681_vm3, %v1259_v24  ;;  %v458_v26 = vpop.f32.mrb[9].mxu0  ;;  %v760_v27 = vadd.f32 %v759_v23, %v758_v20  ;;  %v889_v36 = vmul.f32 %v1259_v24, %v1259_v24  ;;  %v765_v44 = vsel %vm681_vm3, %v1259_v24, 0.0 }
  0xf9   : > { %690 = vst.msk [vmem:[%s1489_s29 + $0x40] sm:$0xff] %vm681_vm3, %v458_v26  ;;  %v761_v29 = vsel %vm681_vm3, %v458_v26, 0.0  ;;  %v887_v30 = vmul.f32 %v458_v26, %v458_v26  ;;  %v1260_v31 = vpop.f32.mrb[10].mxu0 }
  0xfa   : > { %v762_v32 = vadd.f32 %v761_v29, %v760_v27  ;;  %v957_v33 = vadd.f32 %v956_v28, %v955_v25  ;;  %693 = vst.msk [vmem:[%s1489_s29 + $0x58] sm:$0xff] %vm681_vm3, %v1260_v31  ;;  %v461_v34 = vpop.f32.mrb[11].mxu0  ;;  %v890_v45 = vmul.f32 %v1260_v31, %v1260_v31  ;;  %v962_v50 = vsel %vm681_vm3, %v889_v36, 0.0 }
  0xfb   : > { %v958_v37 = vsel %vm681_vm3, %v887_v30, 0.0  ;;  %691 = vst.msk [vmem:[%s1489_s29 + $0x48] sm:$0xff] %vm681_vm3, %v461_v34  ;;  %v763_v38 = vsel %vm681_vm3, %v461_v34, 0.0  ;;  %v888_v39 = vmul.f32 %v461_v34, %v461_v34  ;;  %v767_v51 = vsel %vm681_vm3, %v1260_v31, 0.0  ;;  %v1586_v63 = vpop.f32.mrb[8].mxu1 }
  0xfc   : > { %v959_v41 = vadd.f32 %v958_v37, %v957_v33  ;;  %v764_v42 = vadd.f32 %v763_v38, %v762_v32  ;;  %v964_v56 = vsel %vm681_vm3, %v890_v45, 0.0  ;;  %724 = vst.msk [vmem:[%s1489_s29 + $0x150] sm:$0xff] %vm681_vm3, %v1586_v63  ;;  %v1595_v4 = vpop.f32.mrb[9].mxu1 }
  0xfd   : > { %v960_v46 = vsel %vm681_vm3, %v888_v39, 0.0  ;;  %722 = vst.msk [vmem:[%s1489_s29 + $0x140] sm:$0xff] %vm681_vm3, %v1595_v4  ;;  %v1600_v8 = vpop.f32.mrb[10].mxu1 }
  0xfe   : > { %v766_v48 = vadd.f32 %v765_v44, %v764_v42  ;;  %v961_v49 = vadd.f32 %v960_v46, %v959_v41  ;;  %725 = vst.msk [vmem:[%s1489_s29 + $0x158] sm:$0xff] %vm681_vm3, %v1600_v8  ;;  %v1607_v13 = vpop.f32.mrb[11].mxu1 }
  0xff   : > { %v1263_v52 = vpop.f32.mrb[12].mxu0  ;;  %723 = vst.msk [vmem:[%s1489_s29 + $0x148] sm:$0xff] %vm681_vm3, %v1607_v13 }
 0x100   : > { %v963_v53 = vadd.f32 %v962_v50, %v961_v49  ;;  %696 = vst.msk [vmem:[%s1489_s29 + $0x70] sm:$0xff] %vm681_vm3, %v1263_v52  ;;  %v474_v54 = vpop.f32.mrb[13].mxu0  ;;  %v768_v55 = vadd.f32 %v767_v51, %v766_v48  ;;  %v893_v0 = vmul.f32 %v1263_v52, %v1263_v52  ;;  %v773_v9 = vsel %vm681_vm3, %v1263_v52, 0.0 }
 0x101   : > { %694 = vst.msk [vmem:[%s1489_s29 + $0x60] sm:$0xff] %vm681_vm3, %v474_v54  ;;  %v769_v57 = vsel %vm681_vm3, %v474_v54, 0.0  ;;  %v891_v58 = vmul.f32 %v474_v54, %v474_v54  ;;  %v1264_v59 = vpop.f32.mrb[14].mxu0 }
 0x102   : > { %v770_v60 = vadd.f32 %v769_v57, %v768_v55  ;;  %v965_v61 = vadd.f32 %v964_v56, %v963_v53  ;;  %697 = vst.msk [vmem:[%s1489_s29 + $0x78] sm:$0xff] %vm681_vm3, %v1264_v59  ;;  %v477_v62 = vpop.f32.mrb[15].mxu0  ;;  %v894_v10 = vmul.f32 %v1264_v59, %v1264_v59  ;;  %v970_v17 = vsel %vm681_vm3, %v893_v0, 0.0 }
 0x103   : > { %v966_v1 = vsel %vm681_vm3, %v891_v58, 0.0  ;;  %695 = vst.msk [vmem:[%s1489_s29 + $0x68] sm:$0xff] %vm681_vm3, %v477_v62  ;;  %v771_v2 = vsel %vm681_vm3, %v477_v62, 0.0  ;;  %v892_v3 = vmul.f32 %v477_v62, %v477_v62  ;;  %v775_v18 = vsel %vm681_vm3, %v1264_v59, 0.0  ;;  %v1622_v31 = vpop.f32.mrb[12].mxu1 }
 0x104   : > { %v967_v5 = vadd.f32 %v966_v1, %v965_v61  ;;  %v772_v6 = vadd.f32 %v771_v2, %v770_v60  ;;  %v972_v24 = vsel %vm681_vm3, %v894_v10, 0.0  ;;  %728 = vst.msk [vmem:[%s1489_s29 + $0x170] sm:$0xff] %vm681_vm3, %v1622_v31  ;;  %v1631_v37 = vpop.f32.mrb[13].mxu1 }
 0x105   : > { %v968_v11 = vsel %vm681_vm3, %v892_v3, 0.0  ;;  %726 = vst.msk [vmem:[%s1489_s29 + $0x160] sm:$0xff] %vm681_vm3, %v1631_v37  ;;  %v1636_v41 = vpop.f32.mrb[14].mxu1 }
 0x106   : > { %v774_v14 = vadd.f32 %v773_v9, %v772_v6  ;;  %v969_v16 = vadd.f32 %v968_v11, %v967_v5  ;;  %729 = vst.msk [vmem:[%s1489_s29 + $0x178] sm:$0xff] %vm681_vm3, %v1636_v41  ;;  %v1643_v46 = vpop.f32.mrb[15].mxu1 }
 0x107   : > { %v1267_v20 = vpop.f32.mrb[16].mxu0  ;;  %727 = vst.msk [vmem:[%s1489_s29 + $0x168] sm:$0xff] %vm681_vm3, %v1643_v46 }
 0x108   : > { %v971_v21 = vadd.f32 %v970_v17, %v969_v16  ;;  %700 = vst.msk [vmem:[%s1489_s29 + $0x90] sm:$0xff] %vm681_vm3, %v1267_v20  ;;  %v490_v22 = vpop.f32.mrb[17].mxu0  ;;  %v776_v23 = vadd.f32 %v775_v18, %v774_v14  ;;  %v897_v32 = vmul.f32 %v1267_v20, %v1267_v20  ;;  %v781_v42 = vsel %vm681_vm3, %v1267_v20, 0.0 }
 0x109   : > { %698 = vst.msk [vmem:[%s1489_s29 + $0x80] sm:$0xff] %vm681_vm3, %v490_v22  ;;  %v777_v25 = vsel %vm681_vm3, %v490_v22, 0.0  ;;  %v895_v26 = vmul.f32 %v490_v22, %v490_v22  ;;  %v1268_v27 = vpop.f32.mrb[18].mxu0 }
 0x10a   : > { %v778_v28 = vadd.f32 %v777_v25, %v776_v23  ;;  %v973_v29 = vadd.f32 %v972_v24, %v971_v21  ;;  %701 = vst.msk [vmem:[%s1489_s29 + $0x98] sm:$0xff] %vm681_vm3, %v1268_v27  ;;  %v493_v30 = vpop.f32.mrb[19].mxu0  ;;  %v898_v44 = vmul.f32 %v1268_v27, %v1268_v27  ;;  %v978_v50 = vsel %vm681_vm3, %v897_v32, 0.0 }
 0x10b   : > { %v974_v33 = vsel %vm681_vm3, %v895_v26, 0.0  ;;  %699 = vst.msk [vmem:[%s1489_s29 + $0x88] sm:$0xff] %vm681_vm3, %v493_v30  ;;  %v779_v34 = vsel %vm681_vm3, %v493_v30, 0.0  ;;  %v896_v36 = vmul.f32 %v493_v30, %v493_v30  ;;  %v783_v51 = vsel %vm681_vm3, %v1268_v27, 0.0  ;;  %v1658_v0 = vpop.f32.mrb[16].mxu1 }
 0x10c   : > { %v975_v38 = vadd.f32 %v974_v33, %v973_v29  ;;  %v780_v39 = vadd.f32 %v779_v34, %v778_v28  ;;  %v980_v56 = vsel %vm681_vm3, %v898_v44, 0.0  ;;  %732 = vst.msk [vmem:[%s1489_s29 + $0x190] sm:$0xff] %vm681_vm3, %v1658_v0  ;;  %v1667_v6 = vpop.f32.mrb[17].mxu1 }
 0x10d   : > { %v976_v45 = vsel %vm681_vm3, %v896_v36, 0.0  ;;  %730 = vst.msk [vmem:[%s1489_s29 + $0x180] sm:$0xff] %vm681_vm3, %v1667_v6  ;;  %v1672_v11 = vpop.f32.mrb[18].mxu1 }
 0x10e   : > { %v782_v48 = vadd.f32 %v781_v42, %v780_v39  ;;  %v977_v49 = vadd.f32 %v976_v45, %v975_v38  ;;  %733 = vst.msk [vmem:[%s1489_s29 + $0x198] sm:$0xff] %vm681_vm3, %v1672_v11  ;;  %v1679_v18 = vpop.f32.mrb[19].mxu1 }
 0x10f   : > { %v1271_v52 = vpop.f32.mrb[20].mxu0  ;;  %731 = vst.msk [vmem:[%s1489_s29 + $0x188] sm:$0xff] %vm681_vm3, %v1679_v18 }
 0x110   : > { %v979_v53 = vadd.f32 %v978_v50, %v977_v49  ;;  %704 = vst.msk [vmem:[%s1489_s29 + $0xb0] sm:$0xff] %vm681_vm3, %v1271_v52  ;;  %v506_v54 = vpop.f32.mrb[21].mxu0  ;;  %v784_v55 = vadd.f32 %v783_v51, %v782_v48  ;;  %v901_v1 = vmul.f32 %v1271_v52, %v1271_v52  ;;  %v789_v14 = vsel %vm681_vm3, %v1271_v52, 0.0 }
 0x111   : > { %702 = vst.msk [vmem:[%s1489_s29 + $0xa0] sm:$0xff] %vm681_vm3, %v506_v54  ;;  %v785_v57 = vsel %vm681_vm3, %v506_v54, 0.0  ;;  %v899_v58 = vmul.f32 %v506_v54, %v506_v54  ;;  %v1272_v59 = vpop.f32.mrb[22].mxu0 }
 0x112   : > { %v786_v60 = vadd.f32 %v785_v57, %v784_v55  ;;  %v981_v61 = vadd.f32 %v980_v56, %v979_v53  ;;  %705 = vst.msk [vmem:[%s1489_s29 + $0xb8] sm:$0xff] %vm681_vm3, %v1272_v59  ;;  %v509_v62 = vpop.f32.mrb[23].mxu0  ;;  %v902_v16 = vmul.f32 %v1272_v59, %v1272_v59  ;;  %v986_v22 = vsel %vm681_vm3, %v901_v1, 0.0 }
 0x113   : > { %v982_v2 = vsel %vm681_vm3, %v899_v58, 0.0  ;;  %703 = vst.msk [vmem:[%s1489_s29 + $0xa8] sm:$0xff] %vm681_vm3, %v509_v62  ;;  %v787_v3 = vsel %vm681_vm3, %v509_v62, 0.0  ;;  %v900_v5 = vmul.f32 %v509_v62, %v509_v62  ;;  %v791_v23 = vsel %vm681_vm3, %v1272_v59, 0.0  ;;  %v1694_v38 = vpop.f32.mrb[20].mxu1 }
 0x114   : > { %v983_v9 = vadd.f32 %v982_v2, %v981_v61  ;;  %v788_v10 = vadd.f32 %v787_v3, %v786_v60  ;;  %v988_v28 = vsel %vm681_vm3, %v902_v16, 0.0  ;;  %736 = vst.msk [vmem:[%s1489_s29 + $0x1b0] sm:$0xff] %vm681_vm3, %v1694_v38  ;;  %v1703_v48 = vpop.f32.mrb[21].mxu1 }
 0x115   : > { %v984_v17 = vsel %vm681_vm3, %v900_v5, 0.0  ;;  %734 = vst.msk [vmem:[%s1489_s29 + $0x1a0] sm:$0xff] %vm681_vm3, %v1703_v48  ;;  %v1708_v51 = vpop.f32.mrb[22].mxu1 }
 0x116   : > { %v790_v20 = vadd.f32 %v789_v14, %v788_v10  ;;  %v985_v21 = vadd.f32 %v984_v17, %v983_v9  ;;  %737 = vst.msk [vmem:[%s1489_s29 + $0x1b8] sm:$0xff] %vm681_vm3, %v1708_v51  ;;  %v1715_v55 = vpop.f32.mrb[23].mxu1 }
 0x117   : > { %v1275_v24 = vpop.f32.mrb[24].mxu0  ;;  %735 = vst.msk [vmem:[%s1489_s29 + $0x1a8] sm:$0xff] %vm681_vm3, %v1715_v55 }
 0x118   : > { %v987_v25 = vadd.f32 %v986_v22, %v985_v21  ;;  %708 = vst.msk [vmem:[%s1489_s29 + $0xd0] sm:$0xff] %vm681_vm3, %v1275_v24  ;;  %v522_v26 = vpop.f32.mrb[25].mxu0  ;;  %v792_v27 = vadd.f32 %v791_v23, %v790_v20  ;;  %v905_v39 = vmul.f32 %v1275_v24, %v1275_v24  ;;  %v797_v52 = vsel %vm681_vm3, %v1275_v24, 0.0 }
 0x119   : > { %706 = vst.msk [vmem:[%s1489_s29 + $0xc0] sm:$0xff] %vm681_vm3, %v522_v26  ;;  %v793_v29 = vsel %vm681_vm3, %v522_v26, 0.0  ;;  %v903_v30 = vmul.f32 %v522_v26, %v522_v26  ;;  %v1276_v32 = vpop.f32.mrb[26].mxu0 }
 0x11a   : > { %v794_v33 = vadd.f32 %v793_v29, %v792_v27  ;;  %v989_v34 = vadd.f32 %v988_v28, %v987_v25  ;;  %709 = vst.msk [vmem:[%s1489_s29 + $0xd8] sm:$0xff] %vm681_vm3, %v1276_v32  ;;  %v525_v36 = vpop.f32.mrb[27].mxu0  ;;  %v906_v53 = vmul.f32 %v1276_v32, %v1276_v32  ;;  %v994_v58 = vsel %vm681_vm3, %v905_v39, 0.0 }
 0x11b   : > { %v990_v42 = vsel %vm681_vm3, %v903_v30, 0.0  ;;  %707 = vst.msk [vmem:[%s1489_s29 + $0xc8] sm:$0xff] %vm681_vm3, %v525_v36  ;;  %v795_v44 = vsel %vm681_vm3, %v525_v36, 0.0  ;;  %v904_v45 = vmul.f32 %v525_v36, %v525_v36  ;;  %v799_v59 = vsel %vm681_vm3, %v1276_v32, 0.0  ;;  %v1730_v17 = vpop.f32.mrb[24].mxu1 }
 0x11c   : > { %v991_v49 = vadd.f32 %v990_v42, %v989_v34  ;;  %v796_v50 = vadd.f32 %v795_v44, %v794_v33  ;;  %v996_v2 = vsel %vm681_vm3, %v906_v53, 0.0  ;;  %740 = vst.msk [vmem:[%s1489_s29 + $0x1d0] sm:$0xff] %vm681_vm3, %v1730_v17  ;;  %v1739_v24 = vpop.f32.mrb[25].mxu1  ;;  %v911_v32 = vmul.f32 %v1523_v12, %v1523_v12 }
 0x11d   : > { %v992_v54 = vsel %vm681_vm3, %v904_v45, 0.0  ;;  %738 = vst.msk [vmem:[%s1489_s29 + $0x1c0] sm:$0xff] %vm681_vm3, %v1739_v24  ;;  %v1744_v27 = vpop.f32.mrb[26].mxu1  ;;  %v809_v44 = vsel %vm681_vm3, %v1523_v12, 0.0  ;;  %v912_v53 = vmul.f32 %v1535_v19, %v1535_v19  ;;  %v811_v12 = vsel %vm681_vm3, %v1535_v19, 0.0 }
 0x11e   : > { %v798_v56 = vadd.f32 %v797_v52, %v796_v50  ;;  %v993_v57 = vadd.f32 %v992_v54, %v991_v49  ;;  %741 = vst.msk [vmem:[%s1489_s29 + $0x1d8] sm:$0xff] %vm681_vm3, %v1744_v27  ;;  %v1753_v33 = vpop.f32.mrb[27].mxu1  ;;  %v1006_v52 = vsel %vm681_vm3, %v911_v32, 0.0 }
 0x11f   : > { %v1279_v60 = vpop.f32.mrb[28].mxu0  ;;  %739 = vst.msk [vmem:[%s1489_s29 + $0x1c8] sm:$0xff] %vm681_vm3, %v1753_v33  ;;  %v1008_v19 = vsel %vm681_vm3, %v912_v53, 0.0 }
 0x120   : > { %v995_v61 = vadd.f32 %v994_v58, %v993_v57  ;;  %712 = vst.msk [vmem:[%s1489_s29 + $0xf0] sm:$0xff] %vm681_vm3, %v1279_v60  ;;  %v538_v62 = vpop.f32.mrb[29].mxu0  ;;  %v800_v1 = vadd.f32 %v799_v59, %v798_v56  ;;  %v909_v20 = vmul.f32 %v1279_v60, %v1279_v60  ;;  %v805_v28 = vsel %vm681_vm3, %v1279_v60, 0.0 }
 0x121   : > { %710 = vst.msk [vmem:[%s1489_s29 + $0xe0] sm:$0xff] %vm681_vm3, %v538_v62  ;;  %v801_v3 = vsel %vm681_vm3, %v538_v62, 0.0  ;;  %v907_v5 = vmul.f32 %v538_v62, %v538_v62  ;;  %v1280_v9 = vpop.f32.mrb[30].mxu0  ;;  %v913_v58 = vmul.f32 %v1514_v7, %v1514_v7 }
 0x122   : > { %v802_v10 = vadd.f32 %v801_v3, %v800_v1  ;;  %v997_v14 = vadd.f32 %v996_v2, %v995_v61  ;;  %713 = vst.msk [vmem:[%s1489_s29 + $0xf8] sm:$0xff] %vm681_vm3, %v1280_v9  ;;  %v541_v16 = vpop.f32.mrb[31].mxu0  ;;  %v910_v29 = vmul.f32 %v1280_v9, %v1280_v9  ;;  %v1002_v39 = vsel %vm681_vm3, %v909_v20, 0.0 }
 0x123   : > { %v998_v21 = vsel %vm681_vm3, %v907_v5, 0.0  ;;  %711 = vst.msk [vmem:[%s1489_s29 + $0xe8] sm:$0xff] %vm681_vm3, %v541_v16  ;;  %v803_v22 = vsel %vm681_vm3, %v541_v16, 0.0  ;;  %v908_v23 = vmul.f32 %v541_v16, %v541_v16  ;;  %v807_v42 = vsel %vm681_vm3, %v1280_v9, 0.0  ;;  %v1766_v57 = vpop.f32.mrb[28].mxu1 }
 0x124   : > { %v999_v25 = vadd.f32 %v998_v21, %v997_v14  ;;  %v804_v26 = vadd.f32 %v803_v22, %v802_v10  ;;  %v1004_v50 = vsel %vm681_vm3, %v910_v29, 0.0  ;;  %744 = vst.msk [vmem:[%s1489_s29 + $0x1f0] sm:$0xff] %vm681_vm3, %v1766_v57  ;;  %v1775_v59 = vpop.f32.mrb[29].mxu1  ;;  %v813_v1 = vsel %vm681_vm3, %v1514_v7, 0.0 }
 0x125   : > { %v1000_v30 = vsel %vm681_vm3, %v908_v23, 0.0  ;;  %742 = vst.msk [vmem:[%s1489_s29 + $0x1e0] sm:$0xff] %vm681_vm3, %v1775_v59  ;;  %v1780_v62 = vpop.f32.mrb[30].mxu1  ;;  %v914_v2 = vmul.f32 %v1528_v15, %v1528_v15  ;;  %v915_v3 = vmul.f32 %v1559_v40, %v1559_v40  ;;  %v1010_v7 = vsel %vm681_vm3, %v913_v58, 0.0 }
 0x126   : > { %v806_v34 = vadd.f32 %v805_v28, %v804_v26  ;;  %v1001_v36 = vadd.f32 %v1000_v30, %v999_v25  ;;  %745 = vst.msk [vmem:[%s1489_s29 + $0x1f8] sm:$0xff] %vm681_vm3, %v1780_v62  ;;  %v1792_v5 = vpop.f32.mrb[31].mxu1  ;;  %v815_v14 = vsel %vm681_vm3, %v1528_v15, 0.0  ;;  %v817_v16 = vsel %vm681_vm3, %v1559_v40, 0.0 }
 0x127   : > { %743 = vst.msk [vmem:[%s1489_s29 + $0x1e8] sm:$0xff] %vm681_vm3, %v1792_v5  ;;  %v1012_v22 = vsel %vm681_vm3, %v914_v2, 0.0  ;;  %v1014_v23 = vsel %vm681_vm3, %v915_v3, 0.0  ;;  %v916_v25 = vmul.f32 %v1571_v47, %v1571_v47  ;;  %v917_v29 = vmul.f32 %v1550_v35, %v1550_v35 }
 0x128   : > { %v1003_v45 = vadd.f32 %v1002_v39, %v1001_v36  ;;  %v808_v49 = vadd.f32 %v807_v42, %v806_v34  ;;  %v819_v15 = vsel %vm681_vm3, %v1571_v47, 0.0  ;;  %v821_v40 = vsel %vm681_vm3, %v1550_v35, 0.0 }
 0x129   : > { %v918_v34 = vmul.f32 %v1564_v43, %v1564_v43  ;;  %v1016_v36 = vsel %vm681_vm3, %v916_v25, 0.0  ;;  %v919_v39 = vmul.f32 %v1595_v4, %v1595_v4  ;;  %v823_v47 = vsel %vm681_vm3, %v1564_v43, 0.0 }
 0x12a   : > { %v810_v54 = vadd.f32 %v809_v44, %v808_v49  ;;  %v1005_v56 = vadd.f32 %v1004_v50, %v1003_v45  ;;  %v1018_v45 = vsel %vm681_vm3, %v917_v29, 0.0  ;;  %v825_v49 = vsel %vm681_vm3, %v1595_v4, 0.0 }
 0x12b   : > { %v1022_v53 = vsel %vm681_vm3, %v919_v39, 0.0  ;;  %v827_v43 = vsel %vm681_vm3, %v1607_v13, 0.0  ;;  %v829_v4 = vsel %vm681_vm3, %v1586_v63, 0.0  ;;  %v925_v25 = vmul.f32 %v1622_v31, %v1622_v31 }
 0x12c   : > { %v1007_v60 = vadd.f32 %v1006_v52, %v1005_v56  ;;  %v812_v61 = vadd.f32 %v811_v12, %v810_v54  ;;  %v1020_v52 = vsel %vm681_vm3, %v918_v34, 0.0  ;;  %v920_v54 = vmul.f32 %v1607_v13, %v1607_v13 }
 0x12d   : > { %v921_v12 = vmul.f32 %v1586_v63, %v1586_v63  ;;  %v831_v13 = vsel %vm681_vm3, %v1600_v8, 0.0  ;;  %v926_v29 = vmul.f32 %v1636_v41, %v1636_v41  ;;  %v1034_v34 = vsel %vm681_vm3, %v925_v25, 0.0 }
 0x12e   : > { %v814_v9 = vadd.f32 %v813_v1, %v812_v61  ;;  %v1009_v10 = vadd.f32 %v1008_v19, %v1007_v60  ;;  %v922_v1 = vmul.f32 %v1600_v8, %v1600_v8  ;;  %v1024_v2 = vsel %vm681_vm3, %v920_v54, 0.0 }
 0x12f   : > { %v923_v19 = vmul.f32 %v1631_v37, %v1631_v37  ;;  %v835_v8 = vsel %vm681_vm3, %v1643_v46, 0.0 }
 0x130   : > { %v1011_v20 = vadd.f32 %v1010_v7, %v1009_v10  ;;  %v816_v21 = vadd.f32 %v815_v14, %v814_v9  ;;  %v1026_v10 = vsel %vm681_vm3, %v921_v12, 0.0  ;;  %v833_v7 = vsel %vm681_vm3, %v1631_v37, 0.0 }
 0x131   : > { %v837_v37 = vsel %vm681_vm3, %v1622_v31, 0.0 }
 0x132   : > { %v818_v26 = vadd.f32 %v817_v16, %v816_v21  ;;  %v1013_v28 = vadd.f32 %v1012_v22, %v1011_v20  ;;  %v1028_v16 = vsel %vm681_vm3, %v922_v1, 0.0  ;;  %v1030_v20 = vsel %vm681_vm3, %v923_v19, 0.0 }
 0x133   : > { %v924_v21 = vmul.f32 %v1643_v46, %v1643_v46  ;;  %v839_v46 = vsel %vm681_vm3, %v1636_v41, 0.0  ;;  %v843_v41 = vsel %vm681_vm3, %v1679_v18, 0.0 }
 0x134   : > { %v1015_v30 = vadd.f32 %v1014_v23, %v1013_v28  ;;  %v820_v32 = vadd.f32 %v819_v15, %v818_v26 }
 0x135   : > { %v1032_v15 = vsel %vm681_vm3, %v924_v21, 0.0 }
 0x136   : > { %v822_v42 = vadd.f32 %v821_v40, %v820_v32  ;;  %v1017_v44 = vadd.f32 %v1016_v36, %v1015_v30  ;;  %v927_v30 = vmul.f32 %v1667_v6, %v1667_v6  ;;  %v841_v36 = vsel %vm681_vm3, %v1667_v6, 0.0 }
 0x137   : > { %v845_v6 = vsel %vm681_vm3, %v1658_v0, 0.0 }
 0x138   : > { %v1019_v50 = vadd.f32 %v1018_v45, %v1017_v44  ;;  %v824_v35 = vadd.f32 %v823_v47, %v822_v42  ;;  %v1036_v42 = vsel %vm681_vm3, %v926_v29, 0.0  ;;  %v1038_v44 = vsel %vm681_vm3, %v927_v30, 0.0 }
 0x139   : > { %v928_v45 = vmul.f32 %v1679_v18, %v1679_v18  ;;  %v847_v18 = vsel %vm681_vm3, %v1672_v11, 0.0  ;;  %v937_v29 = vmul.f32 %v1730_v17, %v1730_v17 }
 0x13a   : > { %v826_v56 = vadd.f32 %v825_v49, %v824_v35  ;;  %v1021_v58 = vadd.f32 %v1020_v52, %v1019_v50  ;;  %v929_v50 = vmul.f32 %v1658_v0, %v1658_v0 }
 0x13b   : > { %v1040_v54 = vsel %vm681_vm3, %v928_v45, 0.0 }
 0x13c   : > { %v1023_v60 = vadd.f32 %v1022_v53, %v1021_v58  ;;  %v828_v61 = vadd.f32 %v827_v43, %v826_v56  ;;  %v930_v53 = vmul.f32 %v1672_v11, %v1672_v11  ;;  %v931_v56 = vmul.f32 %v1703_v48, %v1703_v48 }
 0x13d   : > { %v1042_v43 = vsel %vm681_vm3, %v929_v50, 0.0  ;;  %v851_v11 = vsel %vm681_vm3, %v1715_v55, 0.0 }
 0x13e   : > { %v830_v3 = vadd.f32 %v829_v4, %v828_v61  ;;  %v1025_v9 = vadd.f32 %v1024_v2, %v1023_v60  ;;  %v849_v60 = vsel %vm681_vm3, %v1703_v48, 0.0  ;;  %v1044_v4 = vsel %vm681_vm3, %v930_v53, 0.0 }
 0x13f   : > { %v1046_v1 = vsel %vm681_vm3, %v931_v56, 0.0  ;;  %v932_v2 = vmul.f32 %v1715_v55, %v1715_v55  ;;  %v853_v48 = vsel %vm681_vm3, %v1694_v38, 0.0  ;;  %v855_v55 = vsel %vm681_vm3, %v1708_v51, 0.0 }
 0x140   : > { %v1027_v14 = vadd.f32 %v1026_v10, %v1025_v9  ;;  %v832_v63 = vadd.f32 %v831_v13, %v830_v3  ;;  %v933_v9 = vmul.f32 %v1694_v38, %v1694_v38 }
 0x142   : > { %v834_v22 = vadd.f32 %v833_v7, %v832_v63  ;;  %v1029_v23 = vadd.f32 %v1028_v16, %v1027_v14  ;;  %v934_v7 = vmul.f32 %v1708_v51, %v1708_v51  ;;  %v1048_v14 = vsel %vm681_vm3, %v932_v2, 0.0 }
 0x143   : > { %v935_v63 = vmul.f32 %v1739_v24, %v1739_v24  ;;  %v1050_v21 = vsel %vm681_vm3, %v933_v9, 0.0  ;;  %v859_v51 = vsel %vm681_vm3, %v1753_v33, 0.0 }
 0x144   : > { %v1031_v26 = vadd.f32 %v1030_v20, %v1029_v23  ;;  %v836_v28 = vadd.f32 %v835_v8, %v834_v22  ;;  %v857_v22 = vsel %vm681_vm3, %v1739_v24, 0.0  ;;  %v1052_v25 = vsel %vm681_vm3, %v934_v7, 0.0 }
 0x145   : > { %v1054_v8 = vsel %vm681_vm3, %v935_v63, 0.0  ;;  %v861_v24 = vsel %vm681_vm3, %v1730_v17, 0.0 }
 0x146   : > { %v838_v32 = vadd.f32 %v837_v37, %v836_v28  ;;  %v1033_v40 = vadd.f32 %v1032_v15, %v1031_v26  ;;  %v936_v26 = vmul.f32 %v1753_v33, %v1753_v33  ;;  %v863_v33 = vsel %vm681_vm3, %v1744_v27, 0.0 }
 0x148   : > { %v1035_v39 = vadd.f32 %v1034_v34, %v1033_v40  ;;  %v840_v31 = vadd.f32 %v839_v46, %v838_v32  ;;  %v938_v32 = vmul.f32 %v1744_v27, %v1744_v27  ;;  %v1056_v40 = vsel %vm681_vm3, %v936_v26, 0.0 }
 0x149   : > { %v939_v34 = vmul.f32 %v1775_v59, %v1775_v59  ;;  %v867_v27 = vsel %vm681_vm3, %v1792_v5, 0.0 }
 0x14a   : > { %v842_v47 = vadd.f32 %v841_v36, %v840_v31  ;;  %v1037_v49 = vadd.f32 %v1036_v42, %v1035_v39  ;;  %v1058_v39 = vsel %vm681_vm3, %v937_v29, 0.0  ;;  %v865_v31 = vsel %vm681_vm3, %v1775_v59, 0.0 }
 0x14b   : > { %v1062_v45 = vsel %vm681_vm3, %v939_v34, 0.0 }
 0x14c   : > { %v1039_v35 = vadd.f32 %v1038_v44, %v1037_v49  ;;  %v844_v52 = vadd.f32 %v843_v41, %v842_v47  ;;  %v1060_v44 = vsel %vm681_vm3, %v938_v32, 0.0  ;;  %v940_v47 = vmul.f32 %v1792_v5, %v1792_v5 }
 0x14d   : > { %v941_v41 = vmul.f32 %v1766_v57, %v1766_v57 }
 0x14e   : > { %v846_v58 = vadd.f32 %v845_v6, %v844_v52  ;;  %v1041_v12 = vadd.f32 %v1040_v54, %v1039_v35  ;;  %v869_v52 = vsel %vm681_vm3, %v1766_v57, 0.0  ;;  %v942_v6 = vmul.f32 %v1780_v62, %v1780_v62 }
 0x14f   : > { %v1064_v53 = vsel %vm681_vm3, %v940_v47, 0.0 }
 0x150   : > { %v1043_v61 = vadd.f32 %v1042_v43, %v1041_v12  ;;  %v848_v0 = vadd.f32 %v847_v18, %v846_v58  ;;  %v1066_v58 = vsel %vm681_vm3, %v941_v41, 0.0  ;;  %v871_v12 = vsel %vm681_vm3, %v1780_v62, 0.0 }
 0x151   : > { %v1068_v18 = vsel %vm681_vm3, %v942_v6, 0.0 }
 0x152   : > { %v850_v19 = vadd.f32 %v849_v60, %v848_v0  ;;  %v1045_v3 = vadd.f32 %v1044_v4, %v1043_v61 }
 0x154   : > { %v1047_v10 = vadd.f32 %v1046_v1, %v1045_v3  ;;  %v852_v13 = vadd.f32 %v851_v11, %v850_v19 }
 0x156   : > { %v854_v16 = vadd.f32 %v853_v48, %v852_v13  ;;  %v1049_v20 = vadd.f32 %v1048_v14, %v1047_v10 }
 0x158   : > { %v1051_v23 = vadd.f32 %v1050_v21, %v1049_v20  ;;  %v856_v38 = vadd.f32 %v855_v55, %v854_v16 }
 0x15a   : > { %v858_v28 = vadd.f32 %v857_v22, %v856_v38  ;;  %v1053_v37 = vadd.f32 %v1052_v25, %v1051_v23 }
 0x15c   : > { %v1055_v15 = vadd.f32 %v1054_v8, %v1053_v37  ;;  %v860_v30 = vadd.f32 %v859_v51, %v858_v28 }
 0x15e   : > { %v862_v46 = vadd.f32 %v861_v24, %v860_v30  ;;  %v1057_v36 = vadd.f32 %v1056_v40, %v1055_v15 }
 0x160   : > { %v1059_v42 = vadd.f32 %v1058_v39, %v1057_v36  ;;  %v864_v17 = vadd.f32 %v863_v33, %v862_v46 }
 0x162   : > { %v866_v49 = vadd.f32 %v865_v31, %v864_v17  ;;  %v1061_v50 = vadd.f32 %v1060_v44, %v1059_v42 }
 0x164   : > { %v1063_v35 = vadd.f32 %v1062_v45, %v1061_v50  ;;  %v868_v59 = vadd.f32 %v867_v27, %v866_v49 }
 0x166   : > { %v870_v54 = vadd.f32 %v869_v52, %v868_v59  ;;  %v1065_v56 = vadd.f32 %v1064_v53, %v1063_v35 }
 0x168   : > { %v872_v43 = vadd.f32 %v871_v12, %v870_v54  ;;  %v1067_v5 = vadd.f32 %v1066_v58, %v1065_v56 }
 0x16a   : > { %v873_v60 = vrot.slane %v872_v43, 4  ;;  %v1069_v61 = vadd.f32 %v1068_v18, %v1067_v5 }
 0x16c   : > { %v874_v57 = vadd.f32 %v873_v60, %v872_v43  ;;  %v1070_v0 = vrot.slane %v1069_v61, 4 }
 0x16e   : > { %v875_v4 = vrot.slane %v874_v57, 2  ;;  %v1071_v1 = vadd.f32 %v1070_v0, %v1069_v61 }
 0x170   : > { %v876_v2 = vadd.f32 %v875_v4, %v874_v57  ;;  %v1072_v19 = vrot.slane %v1071_v1, 2 }
 0x172   : > { %v877_v3 = vrot.slane %v876_v2, 1  ;;  %v1073_v9 = vadd.f32 %v1072_v19, %v1071_v1 }
 0x174   : > { %v1074_v11 = vrot.slane %v1073_v9, 1  ;;  %v878_v62 = vadd.f32 %v877_v3, %v876_v2 }
 0x176   : > { %v1075_v10 = vadd.f32 %v1074_v11, %v1073_v9 }
 0x178   : > { %v1077_v13 = vsel %vm1076_vm4, %v878_v62, %v1075_v10 }
 0x179   : > { %1079 = vst.msk [vmem:[%s184_s6] sm:$0x3] %vm1078_vm5, %v1077_v13 }
 0x17a PF: > { %s14_s12 = sadd.s32 1, %s1332_s12  }
 0x17b   : > { %p11_p5 = scmp.ge.s32.totalorder %s14_s12, 6  }
 0x17d   :  { %13 = sbr.rel (!%p11_p5) target bundleno = 1 (0x1), region = 70 }

// kernel: vit_forward.7
= control target key start
LH: loop header
LB: loop body
LE: loop exit
PB: predicated region body
PF: predicated region fallthrough
CT: control target
= control target key end

     0   :  { %v62_v0 = vlaneseq  ;;  %vm145_vm0 = vcmask 523264   ;;  %vm633_vm1 = vcmask 261120   ;;  %s1672_s1 = inlined_call_operand.vmem [shape: f32[1,320], index: 1, kind: input, shape index: {}]   ;;  %s1673_s2 = inlined_call_operand.vmem [shape: f32[1,320], index: 2, kind: input, shape index: {}]   ;;  %s1674_s0 = inlined_call_operand.vmem [shape: f32[64,320], index: 0, kind: input, shape index: {}]   ;;  %s1675_s5 = inlined_call_operand.vmem [shape: f32[320,32], index: 5, kind: input, shape index: {}]   ;;  %s1676_s3 = inlined_call_operand.vmem [shape: f32[1,320], index: 3, kind: input, shape index: {}]   ;;  %s1677_s4 = inlined_call_operand.vmem [shape: f32[1,320], index: 4, kind: input, shape index: {}]   ;;  %s1678_s6 = inlined_call_operand.vmem [shape: f32[1,32], index: 6, kind: input, shape index: {}]   ;;  %s1679_s7 = inlined_call_operand.vmem [shape: f32[1,32], index: 7, kind: input, shape index: {}]   ;;  %s1680_s8 = inlined_call_operand.vmem [shape: f32[1,32], index: 8, kind: input, shape index: {}]   ;;  %s1681_s9 = inlined_call_operand.vmem [shape: f32[64,32], index: 9, kind: input, shape index: {}]   ;;  %s1682_s10 = inlined_call_operand.vmem [shape: f32[64,32], index: 10, kind: output, shape index: {}]  }
   0x1   :  { %v60_v2 = vld [vmem:[%s1672_s1] sm:$0x7]  ;;  %v37_v5 = vld [vmem:[%s1674_s0 + $0x8] sm:$0xff]  ;;  %v38_v9 = vld [vmem:[%s1674_s0 + $0x10] sm:$0xff] }
   0x2   :  { %v63_v1 = vshrl.u32 %v62_v0, 7  ;;  %v101_v3 = vld [vmem:[%s1673_s2] sm:$0x7]  ;;  %v42_v10 = vld [vmem:[%s1674_s0 + $0x30] sm:$0xff]  ;;  %v43_v11 = vld [vmem:[%s1674_s0 + $0x38] sm:$0xff] }
   0x3   :  { %v36_v4 = vld [vmem:[%s1674_s0] sm:$0xff]  ;;  %v39_v17 = vld [vmem:[%s1674_s0 + $0x18] sm:$0xff]  ;;  %v41_v25 = vld [vmem:[%s1674_s0 + $0x28] sm:$0xff] }
   0x4   :  { %v965_v6 = vsub.s32 0, %v63_v1  ;;  %v967_v7 = vsub.s32 1, %v63_v1  ;;  %v969_v8 = vsub.s32 2, %v63_v1  ;;  %v44_v16 = vld [vmem:[%s1674_s0 + $0x40] sm:$0xff]  ;;  %v45_v30 = vld [vmem:[%s1674_s0 + $0x48] sm:$0xff]  ;;  %v46_v35 = vld [vmem:[%s1674_s0 + $0x50] sm:$0xff] }
   0x5   :  { %v40_v18 = vld [vmem:[%s1674_s0 + $0x20] sm:$0xff]  ;;  %v47_v40 = vld [vmem:[%s1674_s0 + $0x58] sm:$0xff]  ;;  %v49_v50 = vld [vmem:[%s1674_s0 + $0x68] sm:$0xff] }
   0x6   :  { %v981_v12 = vrot.slane %v60_v2, %v965_v6  ;;  %v984_v13 = vrot.slane %v60_v2, %v967_v7  ;;  %v987_v14 = vrot.slane %v60_v2, %v969_v8  ;;  %v990_v15 = vrot.slane %v101_v3, %v965_v6  ;;  %v48_v45 = vld [vmem:[%s1674_s0 + $0x60] sm:$0xff]  ;;  %v50_v51 = vld [vmem:[%s1674_s0 + $0x70] sm:$0xff]  ;;  %v51_v56 = vld [vmem:[%s1674_s0 + $0x78] sm:$0xff] }
   0x7   :  { %v1002_v19 = vrot.slane %v101_v3, %v967_v7  ;;  %v1005_v20 = vrot.slane %v101_v3, %v969_v8  ;;  %v52_v57 = vld [vmem:[%s1674_s0 + $0x80] sm:$0xff]  ;;  %v53_v62 = vld [vmem:[%s1674_s0 + $0x88] sm:$0xff]  ;;  %v54_v3 = vld [vmem:[%s1674_s0 + $0x90] sm:$0xff] }
   0x8   :  { %v77_v21 = vmul.f32 %v981_v12, %v36_v4  ;;  %v78_v22 = vmul.f32 %v984_v13, %v37_v5  ;;  %v79_v23 = vmul.f32 %v987_v14, %v38_v9  ;;  %v83_v24 = vmul.f32 %v981_v12, %v42_v10 }
   0x9   :  { %v84_v26 = vmul.f32 %v984_v13, %v43_v11  ;;  %v85_v27 = vmul.f32 %v987_v14, %v44_v16  ;;  %v80_v28 = vmul.f32 %v981_v12, %v39_v17  ;;  %v81_v29 = vmul.f32 %v984_v13, %v40_v18  ;;  %v55_v11 = vld [vmem:[%s1674_s0 + $0x98] sm:$0xff] }
   0xa   :  { %v1022_v31 = vadd.f32 %v990_v15, %v77_v21  ;;  %v1025_v32 = vadd.f32 %v1002_v19, %v78_v22  ;;  %v1028_v33 = vadd.f32 %v1005_v20, %v79_v23  ;;  %v1031_v34 = vadd.f32 %v990_v15, %v83_v24  ;;  %v56_v22 = vld [vmem:[%s1674_s0 + $0xa0] sm:$0xff]  ;;  %v57_v23 = vld [vmem:[%s1674_s0 + $0xa8] sm:$0xff] }
   0xb   :  { %v1037_v36 = vadd.f32 %v1002_v19, %v84_v26  ;;  %v1040_v37 = vadd.f32 %v1005_v20, %v85_v27  ;;  %v82_v38 = vmul.f32 %v987_v14, %v41_v25  ;;  %v1044_v39 = vadd.f32 %v990_v15, %v80_v28  ;;  %v58_v28 = vld [vmem:[%s1674_s0 + $0xb0] sm:$0xff] }
   0xc   :  { %v144_v41 = vadd.f32 %v1025_v32, %v1022_v31  ;;  %v146_v42 = vsel %vm145_vm0, %v1028_v33, 0.0  ;;  %v1054_v43 = vadd.f32 %v1002_v19, %v81_v29  ;;  %v86_v44 = vmul.f32 %v981_v12, %v45_v30 }
   0xd   :  { %v155_v46 = vadd.f32 %v1037_v36, %v1031_v34  ;;  %v156_v47 = vsel %vm145_vm0, %v1040_v37, 0.0  ;;  %v1065_v48 = vadd.f32 %v1005_v20, %v82_v38  ;;  %v87_v49 = vmul.f32 %v984_v13, %v46_v35 }
   0xe   :  { %v147_v52 = vadd.f32 %v146_v42, %v144_v41  ;;  %v150_v53 = vadd.f32 %v1054_v43, %v1044_v39  ;;  %v88_v54 = vmul.f32 %v987_v14, %v47_v40  ;;  %v1078_v55 = vadd.f32 %v990_v15, %v86_v44  ;;  %v59_v40 = vld [vmem:[%s1674_s0 + $0xb8] sm:$0xff] }
   0xf   :  { %v157_v58 = vadd.f32 %v156_v47, %v155_v46  ;;  %v151_v59 = vsel %vm145_vm0, %v1065_v48, 0.0  ;;  %v1089_v60 = vadd.f32 %v1002_v19, %v87_v49  ;;  %v89_v61 = vmul.f32 %v981_v12, %v48_v45 }
  0x10   :  { %148 = vadd.xlane.f32.xlu0 %v147_v52  ;;  %v152_v63 = vadd.f32 %v151_v59, %v150_v53  ;;  %v1096_v0 = vadd.f32 %v1005_v20, %v88_v54  ;;  %v90_v1 = vmul.f32 %v984_v13, %v49_v50  ;;  %v91_v2 = vmul.f32 %v987_v14, %v50_v51 }
  0x11   :  { %158 = vadd.xlane.f32.xlu1 %v157_v58  ;;  %v160_v4 = vadd.f32 %v1089_v60, %v1078_v55  ;;  %v1106_v5 = vadd.f32 %v990_v15, %v89_v61  ;;  %v92_v9 = vmul.f32 %v981_v12, %v51_v56  ;;  %v93_v10 = vmul.f32 %v984_v13, %v52_v57  ;;  %v439_v61 = vld [vmem:[%s1675_s5 + $0x88] sm:$0xff] }
  0x12   :  { %v161_v16 = vsel %vm145_vm0, %v1096_v0, 0.0  ;;  %v1116_v17 = vadd.f32 %v1002_v19, %v90_v1  ;;  %v1119_v18 = vadd.f32 %v1005_v20, %v91_v2  ;;  %v94_v21 = vmul.f32 %v987_v14, %v53_v62 }
  0x13   :  { %v162_v24 = vadd.f32 %v161_v16, %v160_v4  ;;  %v1129_v25 = vadd.f32 %v990_v15, %v92_v9  ;;  %v1132_v26 = vadd.f32 %v1002_v19, %v93_v10  ;;  %v95_v27 = vmul.f32 %v981_v12, %v54_v3 }
  0x14   :  { %153 = vadd.xlane.f32.xlu0 %v152_v63  ;;  %v165_v29 = vadd.f32 %v1116_v17, %v1106_v5  ;;  %v166_v30 = vsel %vm145_vm0, %v1119_v18, 0.0  ;;  %v1143_v35 = vadd.f32 %v1005_v20, %v94_v21  ;;  %v96_v38 = vmul.f32 %v984_v13, %v55_v11  ;;  %v423_v63 = vld [vmem:[%s1675_s5 + $0x8] sm:$0xff] }
  0x15   :  { %163 = vadd.xlane.f32.xlu1 %v162_v24  ;;  %v170_v41 = vadd.f32 %v1132_v26, %v1129_v25  ;;  %v97_v42 = vmul.f32 %v987_v14, %v56_v22  ;;  %v1153_v44 = vadd.f32 %v990_v15, %v95_v27  ;;  %v98_v45 = vmul.f32 %v981_v12, %v57_v23 }
  0x16   :  { %v167_v46 = vadd.f32 %v166_v30, %v165_v29  ;;  %v171_v47 = vsel %vm145_vm0, %v1143_v35, 0.0  ;;  %v1159_v49 = vadd.f32 %v1002_v19, %v96_v38  ;;  %v99_v50 = vmul.f32 %v984_v13, %v58_v28 }
  0x17   :  { %v172_v51 = vadd.f32 %v171_v47, %v170_v41  ;;  %v1163_v52 = vadd.f32 %v1005_v20, %v97_v42  ;;  %v100_v53 = vmul.f32 %v987_v14, %v59_v40  ;;  %v1167_v54 = vadd.f32 %v990_v15, %v98_v45 }
  0x18   :  { %168 = vadd.xlane.f32.xlu0 %v167_v46  ;;  %v175_v12 = vadd.f32 %v1159_v49, %v1153_v44  ;;  %v1172_v56 = vadd.f32 %v1002_v19, %v99_v50  ;;  %v438_v19 = vld [vmem:[%s1675_s5 + $0x80] sm:$0xff] }
  0x19   :  { %173 = vadd.xlane.f32.xlu1 %v172_v51  ;;  %v176_v13 = vsel %vm145_vm0, %v1163_v52, 0.0  ;;  %v1177_v57 = vadd.f32 %v1005_v20, %v100_v53  ;;  %v422_v20 = vld [vmem:[%s1675_s5] sm:$0xff]  ;;  %v470_v62 = vpack.c.bf16 %v439_v61, %v438_v19 }
  0x1a   :  { %v177_v58 = vadd.f32 %v176_v13, %v175_v12  ;;  %v180_v14 = vadd.f32 %v1172_v56, %v1167_v54  ;;  %v462_v1 = vpack.c.bf16 %v423_v63, %v422_v20 }
  0x1b   :  { %v181_v15 = vsel %vm145_vm0, %v1177_v57, 0.0  ;;  %802 = vmatprep.subr.bf16.mxu0 %v470_v62 }
  0x1c   :  { %178 = vadd.xlane.f32.xlu0 %v177_v58  ;;  %v182_v59 = vadd.f32 %v181_v15, %v180_v14  ;;  %803 = vmatpush3.bf16.msra.mxu0 %v462_v1 }
  0x1e   :  { %183 = vadd.xlane.f32.xlu1 %v182_v59 }
  0x9d   :  { %v149_v2 = vpop.xlane.xlu0 %148 }
  0x9e   :  { %v186_v3 = vmul.f32 0.003125, %v149_v2  ;;  %v159_v4 = vpop.xlane.xlu1 %158 }
  0x9f   :  { %v188_v9 = vmul.f32 0.003125, %v159_v4 }
  0xa0   :  { %v1196_v10 = vsub.f32 %v1022_v31, %v186_v3  ;;  %v1199_v11 = vsub.f32 %v1025_v32, %v186_v3  ;;  %v1202_v16 = vsub.f32 %v1028_v33, %v186_v3 }
  0xa1   :  { %v1205_v21 = vsub.f32 %v1031_v34, %v188_v9  ;;  %v1208_v22 = vsub.f32 %v1037_v36, %v188_v9  ;;  %v1211_v23 = vsub.f32 %v1040_v37, %v188_v9  ;;  %v154_v24 = vpop.xlane.xlu0 %153 }
  0xa2   :  { %v187_v27 = vmul.f32 0.003125, %v154_v24  ;;  %v164_v28 = vpop.xlane.xlu1 %163  ;;  %v218_v31 = vmul.f32 %v1196_v10, %v1196_v10  ;;  %v219_v32 = vmul.f32 %v1199_v11, %v1199_v11  ;;  %v220_v33 = vmul.f32 %v1202_v16, %v1202_v16 }
  0xa3   :  { %v189_v34 = vmul.f32 0.003125, %v164_v28  ;;  %v224_v36 = vmul.f32 %v1205_v21, %v1205_v21  ;;  %v225_v37 = vmul.f32 %v1208_v22, %v1208_v22  ;;  %v226_v29 = vmul.f32 %v1211_v23, %v1211_v23 }
  0xa4   :  { %v1226_v30 = vsub.f32 %v1044_v39, %v187_v27  ;;  %v1229_v38 = vsub.f32 %v1054_v43, %v187_v27  ;;  %v1232_v40 = vsub.f32 %v1065_v48, %v187_v27  ;;  %v242_v41 = vadd.f32 %v219_v32, %v218_v31 }
  0xa5   :  { %v1235_v42 = vsub.f32 %v1078_v55, %v189_v34  ;;  %v1238_v45 = vsub.f32 %v1089_v60, %v189_v34  ;;  %v1241_v46 = vsub.f32 %v1096_v0, %v189_v34  ;;  %v169_v47 = vpop.xlane.xlu0 %168  ;;  %v243_v39 = vsel %vm145_vm0, %v220_v33, 0.0 }
  0xa6   :  { %v190_v50 = vmul.f32 0.003125, %v169_v47  ;;  %v244_v51 = vadd.f32 %v243_v39, %v242_v41  ;;  %v174_v43 = vpop.xlane.xlu1 %173  ;;  %v252_v53 = vadd.f32 %v225_v37, %v224_v36  ;;  %v253_v48 = vsel %vm145_vm0, %v226_v29, 0.0 }
  0xa7   :  { %v191_v12 = vmul.f32 0.003125, %v174_v43  ;;  %v221_v55 = vmul.f32 %v1226_v30, %v1226_v30  ;;  %v222_v60 = vmul.f32 %v1229_v38, %v1229_v38  ;;  %v223_v0 = vmul.f32 %v1232_v40, %v1232_v40 }
  0xa8   :  { %v1252_v13 = vsub.f32 %v1106_v5, %v190_v50  ;;  %v1255_v58 = vsub.f32 %v1116_v17, %v190_v50  ;;  %v1258_v14 = vsub.f32 %v1119_v18, %v190_v50  ;;  %245 = vadd.xlane.f32.xlu0 %v244_v51  ;;  %v254_v15 = vadd.f32 %v253_v48, %v252_v53 }
  0xa9   :  { %v1261_v59 = vsub.f32 %v1129_v25, %v191_v12  ;;  %v1264_v19 = vsub.f32 %v1132_v26, %v191_v12  ;;  %v1267_v61 = vsub.f32 %v1143_v35, %v191_v12  ;;  %v179_v20 = vpop.xlane.xlu0 %178  ;;  %v247_v5 = vadd.f32 %v222_v60, %v221_v55 }
  0xaa   :  { %v192_v62 = vmul.f32 0.003125, %v179_v20  ;;  %v248_v17 = vsel %vm145_vm0, %v223_v0, 0.0  ;;  %v227_v18 = vmul.f32 %v1235_v42, %v1235_v42  ;;  %v228_v63 = vmul.f32 %v1238_v45, %v1238_v45  ;;  %v440_v20 = vld [vmem:[%s1675_s5 + $0x90] sm:$0xff] }
  0xab   :  { %v249_v1 = vadd.f32 %v248_v17, %v247_v5  ;;  %v184_v25 = vpop.xlane.xlu1 %183  ;;  %v229_v26 = vmul.f32 %v1241_v46, %v1241_v46  ;;  %v230_v35 = vmul.f32 %v1252_v13, %v1252_v13  ;;  %v231_v2 = vmul.f32 %v1255_v58, %v1255_v58  ;;  %v441_v5 = vld [vmem:[%s1675_s5 + $0x98] sm:$0xff]  ;;  %v424_v17 = vld [vmem:[%s1675_s5 + $0x10] sm:$0xff] }
  0xac   :  { %v1281_v3 = vsub.f32 %v1153_v44, %v192_v62  ;;  %v1284_v4 = vsub.f32 %v1159_v49, %v192_v62  ;;  %v1287_v9 = vsub.f32 %v1163_v52, %v192_v62  ;;  %255 = vadd.xlane.f32.xlu0 %v254_v15  ;;  %v193_v24 = vmul.f32 0.003125, %v184_v25  ;;  %v443_v25 = vld [vmem:[%s1675_s5 + $0xa8] sm:$0xff] }
  0xad   :  { %250 = vadd.xlane.f32.xlu1 %v249_v1  ;;  %v257_v27 = vadd.f32 %v228_v63, %v227_v18  ;;  %v258_v28 = vsel %vm145_vm0, %v229_v26, 0.0  ;;  %v232_v31 = vmul.f32 %v1258_v14, %v1258_v14  ;;  %v262_v32 = vadd.f32 %v231_v2, %v230_v35  ;;  %v425_v18 = vld [vmem:[%s1675_s5 + $0x18] sm:$0xff]  ;;  %v442_v1 = vld [vmem:[%s1675_s5 + $0xa0] sm:$0xff]  ;;  %v427_v2 = vld [vmem:[%s1675_s5 + $0x28] sm:$0xff] }
  0xae   :  { %v1293_v33 = vsub.f32 %v1167_v54, %v193_v24  ;;  %v1296_v44 = vsub.f32 %v1172_v56, %v193_v24  ;;  %v1299_v49 = vsub.f32 %v1177_v57, %v193_v24  ;;  %v233_v52 = vmul.f32 %v1261_v59, %v1261_v59  ;;  %v426_v35 = vld [vmem:[%s1675_s5 + $0x20] sm:$0xff] }
  0xaf   :  { %v259_v34 = vadd.f32 %v258_v28, %v257_v27  ;;  %v263_v36 = vsel %vm145_vm0, %v232_v31, 0.0  ;;  %v234_v37 = vmul.f32 %v1264_v19, %v1264_v19  ;;  %v235_v29 = vmul.f32 %v1267_v61, %v1267_v61  ;;  %v444_v27 = vld [vmem:[%s1675_s5 + $0xb0] sm:$0xff]  ;;  %v445_v28 = vld [vmem:[%s1675_s5 + $0xb8] sm:$0xff] }
  0xb0   :  { %v264_v54 = vadd.f32 %v263_v36, %v262_v32  ;;  %v236_v56 = vmul.f32 %v1281_v3, %v1281_v3  ;;  %v237_v57 = vmul.f32 %v1284_v4, %v1284_v4  ;;  %v238_v41 = vmul.f32 %v1287_v9, %v1287_v9  ;;  %v428_v32 = vld [vmem:[%s1675_s5 + $0x30] sm:$0xff]  ;;  %v446_v36 = vld [vmem:[%s1675_s5 + $0xc0] sm:$0xff] }
  0xb1   :  { %260 = vadd.xlane.f32.xlu1 %v259_v34  ;;  %v267_v47 = vadd.f32 %v234_v37, %v233_v52  ;;  %v268_v39 = vsel %vm145_vm0, %v235_v29, 0.0  ;;  %v239_v50 = vmul.f32 %v1293_v33, %v1293_v33  ;;  %v240_v51 = vmul.f32 %v1296_v44, %v1296_v44  ;;  %v429_v52 = vld [vmem:[%s1675_s5 + $0x38] sm:$0xff]  ;;  %v447_v37 = vld [vmem:[%s1675_s5 + $0xc8] sm:$0xff] }
  0xb2   :  { %265 = vadd.xlane.f32.xlu0 %v264_v54  ;;  %v272_v43 = vadd.f32 %v237_v57, %v236_v56  ;;  %v273_v53 = vsel %vm145_vm0, %v238_v41, 0.0  ;;  %v241_v48 = vmul.f32 %v1299_v49, %v1299_v49  ;;  %v471_v62 = vpack.c.bf16 %v441_v5, %v440_v20  ;;  %v430_v54 = vld [vmem:[%s1675_s5 + $0x40] sm:$0xff]  ;;  %v431_v56 = vld [vmem:[%s1675_s5 + $0x48] sm:$0xff] }
  0xb3   :  { %v269_v12 = vadd.f32 %v268_v39, %v267_v47  ;;  %v277_v55 = vadd.f32 %v240_v51, %v239_v50  ;;  %v463_v63 = vpack.c.bf16 %v425_v18, %v424_v17  ;;  %v472_v26 = vpack.c.bf16 %v443_v25, %v442_v1  ;;  %v454_v41 = vld [vmem:[%s1675_s5 + $0x100] sm:$0xff]  ;;  %v455_v47 = vld [vmem:[%s1675_s5 + $0x108] sm:$0xff]  ;;  %v448_v50 = vld [vmem:[%s1675_s5 + $0xd0] sm:$0xff] }
  0xb4   :  { %v274_v60 = vadd.f32 %v273_v53, %v272_v43  ;;  %v278_v0 = vsel %vm145_vm0, %v241_v48, 0.0  ;;  %804 = vmatprep.subr.bf16.mxu0 %v471_v62  ;;  %v464_v24 = vpack.c.bf16 %v427_v2, %v426_v35  ;;  %v473_v31 = vpack.c.bf16 %v445_v28, %v444_v27  ;;  %v449_v51 = vld [vmem:[%s1675_s5 + $0xd8] sm:$0xff]  ;;  %v432_v53 = vld [vmem:[%s1675_s5 + $0x50] sm:$0xff]  ;;  %v451_v20 = vld [vmem:[%s1675_s5 + $0xe8] sm:$0xff] }
  0xb5   :  { %270 = vadd.xlane.f32.xlu1 %v269_v12  ;;  %v279_v15 = vadd.f32 %v278_v0, %v277_v55  ;;  %805 = vmatpush3.bf16.msra.mxu0 %v463_v63  ;;  %v465_v34 = vpack.c.bf16 %v429_v52, %v428_v32  ;;  %v474_v29 = vpack.c.bf16 %v447_v37, %v446_v36  ;;  %v433_v48 = vld [vmem:[%s1675_s5 + $0x58] sm:$0xff]  ;;  %v456_v55 = vld [vmem:[%s1675_s5 + $0x110] sm:$0xff]  ;;  %v434_v62 = vld [vmem:[%s1675_s5 + $0x60] sm:$0xff] }
  0xb6   :  { %275 = vadd.xlane.f32.xlu0 %v274_v60  ;;  %806 = vmatprep.subr.bf16.mxu0 %v472_v26  ;;  %v466_v57 = vpack.c.bf16 %v431_v56, %v430_v54  ;;  %v478_v39 = vpack.c.bf16 %v455_v47, %v454_v41  ;;  %v475_v43 = vpack.c.bf16 %v449_v51, %v448_v50  ;;  %v457_v60 = vld [vmem:[%s1675_s5 + $0x118] sm:$0xff]  ;;  %v435_v17 = vld [vmem:[%s1675_s5 + $0x68] sm:$0xff]  ;;  %v458_v63 = vld [vmem:[%s1675_s5 + $0x120] sm:$0xff] }
  0xb7   :  { %v467_v12 = vpack.c.bf16 %v433_v48, %v432_v53  ;;  %v479_v0 = vpack.c.bf16 %v457_v60, %v456_v55  ;;  %v468_v18 = vpack.c.bf16 %v435_v17, %v434_v62  ;;  %v459_v1 = vld [vmem:[%s1675_s5 + $0x128] sm:$0xff]  ;;  %v452_v25 = vld [vmem:[%s1675_s5 + $0xf0] sm:$0xff]  ;;  %v453_v35 = vld [vmem:[%s1675_s5 + $0xf8] sm:$0xff] }
  0xb8   :  { %850 = vmatprep.subr.bf16.mxu1 %v478_v39  ;;  %v480_v26 = vpack.c.bf16 %v459_v1, %v458_v63  ;;  %v436_v2 = vld [vmem:[%s1675_s5 + $0x70] sm:$0xff]  ;;  %v477_v27 = vpack.c.bf16 %v453_v35, %v452_v25  ;;  %v461_v32 = vld [vmem:[%s1675_s5 + $0x138] sm:$0xff]  ;;  %v142_v53 = vld [vmem:[%s1676_s3] sm:$0x7] }
  0xb9   :  { %280 = vadd.xlane.f32.xlu1 %v279_v15  ;;  %807 = vmatpush3.bf16.msra.mxu0 %v464_v24  ;;  %v450_v15 = vld [vmem:[%s1675_s5 + $0xe0] sm:$0xff]  ;;  %v437_v24 = vld [vmem:[%s1675_s5 + $0x78] sm:$0xff]  ;;  %v1441_v17 = vrot.slane %v142_v53, %v969_v8 }
  0xba   :  { %808 = vmatprep.subr.bf16.mxu0 %v473_v31  ;;  %851 = vmatpush3.bf16.msra.mxu1 %v478_v39  ;;  %v476_v5 = vpack.c.bf16 %v451_v20, %v450_v15  ;;  %v469_v28 = vpack.c.bf16 %v437_v24, %v436_v2  ;;  %v460_v31 = vld [vmem:[%s1675_s5 + $0x130] sm:$0xff]  ;;  %v1435_v15 = vrot.slane %v142_v53, %v967_v7  ;;  %v143_v62 = vld [vmem:[%s1677_s4] sm:$0x7] }
  0xbb   :  { %852 = vmatprep.subr.bf16.mxu1 %v479_v0  ;;  %v481_v52 = vpack.c.bf16 %v461_v32, %v460_v31  ;;  %v1454_v32 = vrot.slane %v143_v62, %v969_v8 }
  0xbd   :  { %809 = vmatpush3.bf16.msra.mxu0 %v465_v34 }
  0xbe   :  { %810 = vmatprep.subr.bf16.mxu0 %v474_v29  ;;  %853 = vmatpush3.bf16.msra.mxu1 %v479_v0 }
  0xbf   :  { %854 = vmatprep.subr.bf16.mxu1 %v480_v26 }
  0xc1   :  { %811 = vmatpush3.bf16.msra.mxu0 %v466_v57 }
  0xc2   :  { %812 = vmatprep.subr.bf16.mxu0 %v475_v43  ;;  %855 = vmatpush3.bf16.msra.mxu1 %v480_v26 }
  0xc3   :  { %856 = vmatprep.subr.bf16.mxu1 %v481_v52 }
  0xc5   :  { %813 = vmatpush3.bf16.msra.mxu0 %v467_v12 }
  0xc6   :  { %814 = vmatprep.subr.bf16.mxu0 %v476_v5  ;;  %857 = vmatpush3.bf16.msra.mxu1 %v481_v52 }
  0xc9   :  { %815 = vmatpush3.bf16.msra.mxu0 %v468_v18  ;;  %v1444_v18 = vrot.slane %v142_v53, %v965_v6 }
  0xca   :  { %816 = vmatprep.subr.bf16.mxu0 %v477_v27  ;;  %v1450_v27 = vrot.slane %v143_v62, %v967_v7 }
  0xcd   :  { %817 = vmatpush3.bf16.msra.mxu0 %v469_v28 }
 0x135   :  { %v246_v34 = vpop.xlane.xlu0 %245 }
 0x136   :  { %v282_v36 = vmul.f32 0.003125, %v246_v34 }
 0x138   :  { %v290_v37 = vadd.f32 1e-05, %v282_v36 }
 0x139   :  { %v256_v29 = vpop.xlane.xlu0 %255 }
 0x13a   :  { %866 = vrsqrt.f32 %v290_v37  ;;  %v251_v54 = vpop.xlane.xlu1 %250  ;;  %v284_v56 = vmul.f32 0.003125, %v256_v29 }
 0x13b   :  { %v283_v57 = vmul.f32 0.003125, %v251_v54 }
 0x13c   :  { %v292_v41 = vadd.f32 1e-05, %v284_v56 }
 0x13d   :  { %v291_v47 = vadd.f32 1e-05, %v283_v57 }
 0x13e   :  { %868 = vrsqrt.f32 %v292_v41  ;;  %v261_v39 = vpop.xlane.xlu1 %260 }
 0x13f   :  { %870 = vrsqrt.f32 %v291_v47  ;;  %v285_v50 = vmul.f32 0.003125, %v261_v39  ;;  %v266_v51 = vpop.xlane.xlu0 %265 }
 0x140   :  { %v286_v43 = vmul.f32 0.003125, %v266_v51 }
 0x141   :  { %v293_v48 = vadd.f32 1e-05, %v285_v50 }
 0x142   :  { %v294_v12 = vadd.f32 1e-05, %v286_v43  ;;  %v271_v55 = vpop.xlane.xlu1 %270 }
 0x143   :  { %872 = vrsqrt.f32 %v293_v48  ;;  %v287_v60 = vmul.f32 0.003125, %v271_v55  ;;  %v276_v0 = vpop.xlane.xlu0 %275 }
 0x144   :  { %v867_v20 = vpop.eup %866  ;;  %874 = vrsqrt.f32 %v294_v12  ;;  %v288_v5 = vmul.f32 0.003125, %v276_v0 }
 0x145   :  { %v295_v63 = vadd.f32 1e-05, %v287_v60  ;;  %v307_v1 = vmul.f32 %v867_v20, %v1199_v11  ;;  %v308_v25 = vmul.f32 %v867_v20, %v1202_v16  ;;  %v306_v26 = vmul.f32 %v867_v20, %v1196_v10 }
 0x146   :  { %v296_v35 = vadd.f32 1e-05, %v288_v5  ;;  %v281_v2 = vpop.xlane.xlu1 %280  ;;  %v1457_v11 = vrot.slane %v143_v62, %v965_v6 }
 0x147   :  { %876 = vrsqrt.f32 %v295_v63  ;;  %v289_v24 = vmul.f32 0.003125, %v281_v2  ;;  %v347_v31 = vmul.f32 %v1435_v15, %v307_v1  ;;  %v348_v10 = vmul.f32 %v1441_v17, %v308_v25 }
 0x148   :  { %v869_v28 = vpop.eup %868  ;;  %878 = vrsqrt.f32 %v296_v35  ;;  %v346_v34 = vmul.f32 %v1444_v18, %v306_v26 }
 0x149   :  { %v871_v16 = vpop.eup %870  ;;  %v297_v52 = vadd.f32 1e-05, %v289_v24  ;;  %v313_v36 = vmul.f32 %v869_v28, %v1208_v22  ;;  %v314_v6 = vmul.f32 %v869_v28, %v1211_v23  ;;  %v387_v56 = vadd.f32 %v1450_v27, %v347_v31 }
 0x14a   :  { %v310_v7 = vmul.f32 %v871_v16, %v1229_v38  ;;  %v311_v37 = vmul.f32 %v871_v16, %v1232_v40  ;;  %v309_v29 = vmul.f32 %v871_v16, %v1226_v30  ;;  %v388_v38 = vadd.f32 %v1454_v32, %v348_v10 }
 0x14b   :  { %880 = vrsqrt.f32 %v297_v52  ;;  %v353_v8 = vmul.f32 %v1435_v15, %v313_v36  ;;  %v386_v40 = vadd.f32 %v1457_v11, %v346_v34  ;;  %v312_v47 = vmul.f32 %v869_v28, %v1205_v21 }
 0x14c   :  { %v350_v54 = vmul.f32 %v1435_v15, %v310_v7  ;;  %v351_v57 = vmul.f32 %v1441_v17, %v311_v37  ;;  %v349_v41 = vmul.f32 %v1444_v18, %v309_v29  ;;  %v354_v48 = vmul.f32 %v1441_v17, %v314_v6 }
 0x14d   :  { %v873_v22 = vpop.eup %872  ;;  %v393_v30 = vadd.f32 %v1450_v27, %v353_v8 }
 0x14e   :  { %v875_v39 = vpop.eup %874  ;;  %v390_v23 = vadd.f32 %v1450_v27, %v350_v54  ;;  %v391_v50 = vadd.f32 %v1454_v32, %v351_v57  ;;  %v389_v51 = vadd.f32 %v1457_v11, %v349_v41  ;;  %v316_v43 = vmul.f32 %v873_v22, %v1238_v45 }
 0x14f   :  { %v317_v53 = vmul.f32 %v873_v22, %v1241_v46  ;;  %v320_v12 = vmul.f32 %v875_v39, %v1258_v14  ;;  %v315_v55 = vmul.f32 %v873_v22, %v1235_v42  ;;  %v352_v45 = vmul.f32 %v1444_v18, %v312_v47 }
 0x150   :  { %v411_v60 = vpack.c.bf16 %v390_v23, %v387_v56  ;;  %v412_v0 = vpack.c.bf16 %v391_v50, %v388_v38  ;;  %v410_v21 = vpack.c.bf16 %v389_v51, %v386_v40  ;;  %v356_v20 = vmul.f32 %v1435_v15, %v316_v43 }
 0x151   :  { %v877_v5 = vpop.eup %876  ;;  %v357_v62 = vmul.f32 %v1441_v17, %v317_v53  ;;  %v360_v63 = vmul.f32 %v1441_v17, %v320_v12  ;;  %v355_v46 = vmul.f32 %v1444_v18, %v315_v55  ;;  %v319_v25 = vmul.f32 %v875_v39, %v1255_v58 }
 0x152   :  { %v879_v1 = vpop.eup %878  ;;  %533 = vmatprep.mubr.bf16.mxu0 %v411_v60  ;;  %858 = vmatprep.mubr.msk.bf16.mxu1 %vm145_vm0, %v412_v0  ;;  %v396_v42 = vadd.f32 %v1450_v27, %v356_v20  ;;  %v323_v14 = vmul.f32 %v877_v5, %v1267_v61  ;;  %v394_v26 = vadd.f32 %v1454_v32, %v354_v48 }
 0x153   :  { %534 = vmatmul.mubr.bf16.vlgmr.msra.gmra.mrb[0].mxu0 %v410_v21  ;;  %v397_v35 = vadd.f32 %v1454_v32, %v357_v62  ;;  %v322_v2 = vmul.f32 %v877_v5, %v1264_v19  ;;  %v359_v31 = vmul.f32 %v1435_v15, %v319_v25  ;;  %v326_v16 = vmul.f32 %v879_v1, %v1287_v9 }
 0x154   :  { %v414_v24 = vpack.c.bf16 %v396_v42, %v393_v30  ;;  %v363_v28 = vmul.f32 %v1441_v17, %v323_v14  ;;  %v392_v61 = vadd.f32 %v1457_v11, %v352_v45  ;;  %v395_v58 = vadd.f32 %v1457_v11, %v355_v46 }
 0x155   :  { %v881_v52 = vpop.eup %880  ;;  %v415_v10 = vpack.c.bf16 %v397_v35, %v394_v26  ;;  %v362_v34 = vmul.f32 %v1435_v15, %v322_v2  ;;  %v400_v36 = vadd.f32 %v1454_v32, %v360_v63  ;;  %v366_v37 = vmul.f32 %v1441_v17, %v326_v16 }
 0x156   :  { %541 = vmatprep.mubr.bf16.mxu0 %v414_v24  ;;  %v403_v19 = vadd.f32 %v1454_v32, %v363_v28  ;;  %v329_v7 = vmul.f32 %v881_v52, %v1299_v49  ;;  %v399_v9 = vadd.f32 %v1450_v27, %v359_v31  ;;  %v318_v8 = vmul.f32 %v875_v39, %v1252_v13 }
 0x157   :  { %859 = vmatmul.mubr.msk.bf16.vlgmr.msra.gmra.mrb[0].mxu1 %vm145_vm0, %v415_v10  ;;  %v402_v29 = vadd.f32 %v1450_v27, %v362_v34  ;;  %v321_v6 = vmul.f32 %v877_v5, %v1261_v59  ;;  %v325_v57 = vmul.f32 %v879_v1, %v1284_v4  ;;  %v328_v41 = vmul.f32 %v881_v52, %v1296_v44 }
 0x158   :  { %v418_v54 = vpack.c.bf16 %v403_v19, %v400_v36  ;;  %v369_v56 = vmul.f32 %v1441_v17, %v329_v7  ;;  %v413_v49 = vpack.c.bf16 %v395_v58, %v392_v61  ;;  %v406_v40 = vadd.f32 %v1454_v32, %v366_v37 }
 0x159   :  { %v361_v22 = vmul.f32 %v1444_v18, %v321_v6  ;;  %v417_v38 = vpack.c.bf16 %v402_v29, %v399_v9  ;;  %v368_v13 = vmul.f32 %v1435_v15, %v328_v41  ;;  %v358_v59 = vmul.f32 %v1444_v18, %v318_v8 }
 0x15a   :  { %862 = vmatprep.mubr.msk.bf16.mxu1 %vm145_vm0, %v418_v54  ;;  %v409_v30 = vadd.f32 %v1454_v32, %v369_v56  ;;  %v365_v4 = vmul.f32 %v1435_v15, %v325_v57  ;;  %v327_v47 = vmul.f32 %v881_v52, %v1293_v33  ;;  %v324_v32 = vmul.f32 %v879_v1, %v1281_v3  ;;  %v795_v3 = vld [vmem:[%s1678_s6] ss:$0 sm:$0xff] }
 0x15b   :  { %542 = vmatmul.mubr.bf16.gmra.mrb[4].mxu0 %v413_v49  ;;  %v401_v44 = vadd.f32 %v1457_v11, %v361_v22  ;;  %v408_v39 = vadd.f32 %v1450_v27, %v368_v13  ;;  %v398_v23 = vadd.f32 %v1457_v11, %v358_v59 }
 0x15c   :  { %549 = vmatprep.mubr.bf16.mxu0 %v417_v38  ;;  %v421_v17 = vpack.c.bf16 %v409_v30, %v406_v40  ;;  %v405_v50 = vadd.f32 %v1450_v27, %v365_v4  ;;  %v367_v43 = vmul.f32 %v1444_v18, %v327_v47  ;;  %v364_v15 = vmul.f32 %v1444_v18, %v324_v32 }
 0x15d   :  { %v416_v51 = vpack.c.bf16 %v401_v44, %v398_v23 }
 0x15e   :  { %v420_v53 = vpack.c.bf16 %v408_v39, %v405_v50  ;;  %v407_v33 = vadd.f32 %v1457_v11, %v367_v43  ;;  %v404_v48 = vadd.f32 %v1457_v11, %v364_v15 }
 0x15f   :  { %863 = vmatmul.mubr.msk.bf16.gmra.mrb[4].mxu1 %vm145_vm0, %v421_v17 }
 0x160   :  { %v419_v12 = vpack.c.bf16 %v407_v33, %v404_v48 }
 0x163   :  { %550 = vmatmul.mubr.bf16.gmra.mrb[8].mxu0 %v416_v51 }
 0x164   :  { %557 = vmatprep.mubr.bf16.mxu0 %v420_v53 }
 0x16b   :  { %558 = vmatmul.mubr.bf16.gmra.mrb[12].mxu0 %v419_v12 }
 0x226   :  { %v818_v55 = vpop.f32.mrb[0].mxu0 }
 0x227   :  { %v819_v60 = vpop.f32.mrb[1].mxu0 }
 0x228   :  { %v820_v27 = vadd.f32 %v819_v60, %v818_v55  ;;  %v821_v0 = vpop.f32.mrb[2].mxu0 }
 0x229   :  { %v822_v21 = vpop.f32.mrb[3].mxu0 }
 0x22a   :  { %v823_v20 = vadd.f32 %v822_v21, %v821_v0  ;;  %v860_v5 = vpop.f32.mrb[0].mxu1  ;;  %v536_v62 = vadd.f32 %v820_v27, %v795_v3 }
 0x22b   :  { %v600_v18 = vpop.f32.mrb[1].mxu1 }
 0x22c   :  { %v601_v63 = vadd.f32 %v600_v18, %v536_v62  ;;  %v861_v45 = vpop.f32.mrb[2].mxu1  ;;  %v539_v46 = vadd.f32 %v823_v20, %v795_v3 }
 0x22d   :  { %v603_v11 = vpop.f32.mrb[3].mxu1 }
 0x22e   :  { %v604_v1 = vadd.f32 %v603_v11, %v539_v46  ;;  %v824_v42 = vpop.f32.mrb[4].mxu0  ;;  %v634_v14 = vsel %vm633_vm1, %v601_v63, 0.0 }
 0x22f   :  { %635 = vadd.xlane.f32.xlu0 %v634_v14  ;;  %v825_v25 = vpop.f32.mrb[5].mxu0 }
 0x230   :  { %v826_v26 = vadd.f32 %v825_v25, %v824_v42  ;;  %v827_v35 = vpop.f32.mrb[6].mxu0  ;;  %v637_v2 = vsel %vm633_vm1, %v604_v1, 0.0 }
 0x231   :  { %638 = vadd.xlane.f32.xlu1 %v637_v2  ;;  %v828_v24 = vpop.f32.mrb[7].mxu0 }
 0x232   :  { %v544_v28 = vadd.f32 %v826_v26, %v795_v3  ;;  %v829_v31 = vadd.f32 %v828_v24, %v827_v35  ;;  %v864_v16 = vpop.f32.mrb[4].mxu1 }
 0x233   :  { %v616_v52 = vpop.f32.mrb[5].mxu1 }
 0x234   :  { %v547_v10 = vadd.f32 %v829_v31, %v795_v3  ;;  %v865_v61 = vpop.f32.mrb[6].mxu1  ;;  %v609_v58 = vadd.f32 %v860_v5, %v544_v28 }
 0x235   :  { %v619_v34 = vpop.f32.mrb[7].mxu1 }
 0x236   :  { %v830_v36 = vpop.f32.mrb[8].mxu0  ;;  %v640_v19 = vsel %vm633_vm1, %v609_v58, 0.0  ;;  %v612_v7 = vadd.f32 %v861_v45, %v547_v10 }
 0x237   :  { %641 = vadd.xlane.f32.xlu0 %v640_v19  ;;  %v831_v37 = vpop.f32.mrb[9].mxu0 }
 0x238   :  { %v832_v9 = vadd.f32 %v831_v37, %v830_v36  ;;  %v833_v29 = vpop.f32.mrb[10].mxu0  ;;  %v643_v8 = vsel %vm633_vm1, %v612_v7, 0.0 }
 0x239   :  { %644 = vadd.xlane.f32.xlu1 %v643_v8  ;;  %v834_v6 = vpop.f32.mrb[11].mxu0 }
 0x23a   :  { %v552_v54 = vadd.f32 %v832_v9, %v795_v3  ;;  %v835_v56 = vadd.f32 %v834_v6, %v833_v29 }
 0x23c   :  { %v555_v57 = vadd.f32 %v835_v56, %v795_v3  ;;  %v617_v41 = vadd.f32 %v616_v52, %v552_v54 }
 0x23e   :  { %v836_v49 = vpop.f32.mrb[12].mxu0  ;;  %v646_v22 = vsel %vm633_vm1, %v617_v41, 0.0  ;;  %v620_v38 = vadd.f32 %v619_v34, %v555_v57 }
 0x23f   :  { %647 = vadd.xlane.f32.xlu0 %v646_v22  ;;  %v837_v40 = vpop.f32.mrb[13].mxu0 }
 0x240   :  { %v838_v30 = vadd.f32 %v837_v40, %v836_v49  ;;  %v839_v13 = vpop.f32.mrb[14].mxu0  ;;  %v649_v59 = vsel %vm633_vm1, %v620_v38, 0.0 }
 0x241   :  { %650 = vadd.xlane.f32.xlu1 %v649_v59  ;;  %v840_v17 = vpop.f32.mrb[15].mxu0 }
 0x242   :  { %v560_v4 = vadd.f32 %v838_v30, %v795_v3  ;;  %v841_v44 = vadd.f32 %v840_v17, %v839_v13  ;;  %v1585_v30 = vld [vmem:[%s1679_s7] ss:$0 sm:$0xff] }
 0x244   :  { %v563_v47 = vadd.f32 %v841_v44, %v795_v3  ;;  %v625_v39 = vadd.f32 %v864_v16, %v560_v4  ;;  %v1591_v4 = vld [vmem:[%s1680_s8] ss:$0 sm:$0xff] }
 0x246   :  { %v652_v23 = vsel %vm633_vm1, %v625_v39, 0.0  ;;  %v628_v32 = vadd.f32 %v865_v61, %v563_v47 }
 0x247   :  { %653 = vadd.xlane.f32.xlu0 %v652_v23 }
 0x248   :  { %v655_v50 = vsel %vm633_vm1, %v628_v32, 0.0 }
 0x249   :  { %656 = vadd.xlane.f32.xlu1 %v655_v50 }
 0x2bc   :  { %v636_v51 = vpop.xlane.xlu0 %635 }
 0x2bd   :  { %v659_v43 = vmul.f32 0.03125, %v636_v51 }
 0x2be   :  { %v639_v53 = vpop.xlane.xlu1 %638 }
 0x2bf   :  { %v1542_v15 = vsub.f32 %v601_v63, %v659_v43  ;;  %v660_v33 = vmul.f32 0.03125, %v639_v53 }
 0x2c1   :  { %v1544_v48 = vsub.f32 %v604_v1, %v660_v33  ;;  %v675_v12 = vmul.f32 %v1542_v15, %v1542_v15 }
 0x2c3   :  { %v683_v55 = vsel %vm633_vm1, %v675_v12, 0.0  ;;  %v676_v60 = vmul.f32 %v1544_v48, %v1544_v48 }
 0x2c4   :  { %684 = vadd.xlane.f32.xlu0 %v683_v55  ;;  %v642_v3 = vpop.xlane.xlu0 %641 }
 0x2c5   :  { %v661_v27 = vmul.f32 0.03125, %v642_v3  ;;  %v686_v0 = vsel %vm633_vm1, %v676_v60, 0.0 }
 0x2c6   :  { %v645_v21 = vpop.xlane.xlu1 %644  ;;  %687 = vadd.xlane.f32.xlu1 %v686_v0 }
 0x2c7   :  { %v1552_v20 = vsub.f32 %v609_v58, %v661_v27  ;;  %v662_v5 = vmul.f32 0.03125, %v645_v21 }
 0x2c9   :  { %v1554_v62 = vsub.f32 %v612_v7, %v662_v5  ;;  %v677_v18 = vmul.f32 %v1552_v20, %v1552_v20 }
 0x2cb   :  { %v689_v63 = vsel %vm633_vm1, %v677_v18, 0.0  ;;  %v678_v45 = vmul.f32 %v1554_v62, %v1554_v62 }
 0x2cc   :  { %690 = vadd.xlane.f32.xlu0 %v689_v63  ;;  %v648_v46 = vpop.xlane.xlu0 %647 }
 0x2cd   :  { %v663_v11 = vmul.f32 0.03125, %v648_v46  ;;  %v692_v1 = vsel %vm633_vm1, %v678_v45, 0.0  ;;  %v769_v45 = vld [vmem:[%s1681_s9 + $0x10] sm:$0xff] }
 0x2ce   :  { %v651_v42 = vpop.xlane.xlu1 %650  ;;  %693 = vadd.xlane.f32.xlu1 %v692_v1 }
 0x2cf   :  { %v1562_v14 = vsub.f32 %v617_v41, %v663_v11  ;;  %v664_v25 = vmul.f32 0.03125, %v651_v42  ;;  %v770_v42 = vld [vmem:[%s1681_s9 + $0x18] sm:$0xff] }
 0x2d1   :  { %v1564_v26 = vsub.f32 %v620_v38, %v664_v25  ;;  %v679_v35 = vmul.f32 %v1562_v14, %v1562_v14 }
 0x2d3   :  { %v695_v2 = vsel %vm633_vm1, %v679_v35, 0.0  ;;  %v680_v24 = vmul.f32 %v1564_v26, %v1564_v26 }
 0x2d4   :  { %696 = vadd.xlane.f32.xlu0 %v695_v2  ;;  %v654_v28 = vpop.xlane.xlu0 %653 }
 0x2d5   :  { %v665_v31 = vmul.f32 0.03125, %v654_v28  ;;  %v698_v16 = vsel %vm633_vm1, %v680_v24, 0.0 }
 0x2d6   :  { %699 = vadd.xlane.f32.xlu1 %v698_v16  ;;  %v657_v52 = vpop.xlane.xlu1 %656 }
 0x2d7   :  { %v1572_v10 = vsub.f32 %v625_v39, %v665_v31  ;;  %v666_v61 = vmul.f32 0.03125, %v657_v52 }
 0x2d9   :  { %v1574_v58 = vsub.f32 %v628_v32, %v666_v61  ;;  %v681_v34 = vmul.f32 %v1572_v10, %v1572_v10  ;;  %v767_v32 = vld [vmem:[%s1681_s9] sm:$0xff] }
 0x2da   :  { %v771_v61 = vld [vmem:[%s1681_s9 + $0x20] sm:$0xff] }
 0x2db   :  { %v701_v36 = vsel %vm633_vm1, %v681_v34, 0.0  ;;  %v682_v19 = vmul.f32 %v1574_v58, %v1574_v58 }
 0x2dc   :  { %702 = vadd.xlane.f32.xlu0 %v701_v36 }
 0x2dd   :  { %v704_v7 = vsel %vm633_vm1, %v682_v19, 0.0 }
 0x2de   :  { %705 = vadd.xlane.f32.xlu1 %v704_v7 }
 0x351   :  { %v685_v37 = vpop.xlane.xlu0 %684 }
 0x352   :  { %v707_v9 = vmul.f32 0.03125, %v685_v37 }
 0x353   :  { %v688_v29 = vpop.xlane.xlu1 %687 }
 0x354   :  { %v715_v8 = vadd.f32 1e-05, %v707_v9  ;;  %v708_v6 = vmul.f32 0.03125, %v688_v29 }
 0x356   :  { %882 = vrsqrt.f32 %v715_v8  ;;  %v716_v54 = vadd.f32 1e-05, %v708_v6 }
 0x358   :  { %884 = vrsqrt.f32 %v716_v54  ;;  %v773_v54 = vld [vmem:[%s1681_s9 + $0x30] sm:$0xff] }
 0x359   :  { %v691_v56 = vpop.xlane.xlu0 %690 }
 0x35a   :  { %v709_v57 = vmul.f32 0.03125, %v691_v56 }
 0x35b   :  { %v694_v41 = vpop.xlane.xlu1 %693 }
 0x35c   :  { %v717_v49 = vadd.f32 1e-05, %v709_v57  ;;  %v710_v22 = vmul.f32 0.03125, %v694_v41 }
 0x35e   :  { %886 = vrsqrt.f32 %v717_v49  ;;  %v718_v38 = vadd.f32 1e-05, %v710_v22 }
 0x360   :  { %v883_v40 = vpop.eup %882  ;;  %888 = vrsqrt.f32 %v718_v38 }
 0x361   :  { %v731_v13 = vmul.f32 %v883_v40, %v1542_v15  ;;  %v697_v59 = vpop.xlane.xlu0 %696  ;;  %v768_v15 = vld [vmem:[%s1681_s9 + $0x8] sm:$0xff] }
 0x362   :  { %v885_v17 = vpop.eup %884  ;;  %v711_v44 = vmul.f32 0.03125, %v697_v59 }
 0x363   :  { %v745_v47 = vmul.f32 %v1585_v30, %v731_v13  ;;  %v732_v39 = vmul.f32 %v885_v17, %v1544_v48  ;;  %v700_v23 = vpop.xlane.xlu1 %699 }
 0x364   :  { %v719_v50 = vadd.f32 1e-05, %v711_v44  ;;  %v712_v51 = vmul.f32 0.03125, %v700_v23 }
 0x365   :  { %v759_v43 = vadd.f32 %v1591_v4, %v745_v47  ;;  %v746_v53 = vmul.f32 %v1585_v30, %v732_v39 }
 0x366   :  { %890 = vrsqrt.f32 %v719_v50  ;;  %v720_v33 = vadd.f32 1e-05, %v712_v51 }
 0x367   :  { %v775_v12 = vadd.f32 %v767_v32, %v759_v43  ;;  %v760_v48 = vadd.f32 %v1591_v4, %v746_v53 }
 0x368   :  { %v887_v55 = vpop.eup %886  ;;  %892 = vrsqrt.f32 %v720_v33 }
 0x369   :  { %783 = vst.msk [vmem:[%s1682_s10] sm:$0xff] %vm633_vm1, %v775_v12  ;;  %v776_v60 = vadd.f32 %v768_v15, %v760_v48  ;;  %v733_v3 = vmul.f32 %v887_v55, %v1552_v20  ;;  %v703_v27 = vpop.xlane.xlu0 %702 }
 0x36a   :  { %v889_v0 = vpop.eup %888  ;;  %v713_v21 = vmul.f32 0.03125, %v703_v27 }
 0x36b   :  { %784 = vst.msk [vmem:[%s1682_s10 + $0x8] sm:$0xff] %vm633_vm1, %v776_v60  ;;  %v747_v5 = vmul.f32 %v1585_v30, %v733_v3  ;;  %v734_v18 = vmul.f32 %v889_v0, %v1554_v62  ;;  %v706_v63 = vpop.xlane.xlu1 %705 }
 0x36c   :  { %v721_v46 = vadd.f32 1e-05, %v713_v21  ;;  %v714_v11 = vmul.f32 0.03125, %v706_v63 }
 0x36d   :  { %v761_v20 = vadd.f32 %v1591_v4, %v747_v5  ;;  %v748_v1 = vmul.f32 %v1585_v30, %v734_v18 }
 0x36e   :  { %894 = vrsqrt.f32 %v721_v46  ;;  %v722_v25 = vadd.f32 1e-05, %v714_v11 }
 0x36f   :  { %v777_v35 = vadd.f32 %v769_v45, %v761_v20  ;;  %v762_v62 = vadd.f32 %v1591_v4, %v748_v1 }
 0x370   :  { %v891_v2 = vpop.eup %890  ;;  %896 = vrsqrt.f32 %v722_v25 }
 0x371   :  { %785 = vst.msk [vmem:[%s1682_s10 + $0x10] sm:$0xff] %vm633_vm1, %v777_v35  ;;  %v778_v24 = vadd.f32 %v770_v42, %v762_v62  ;;  %v735_v28 = vmul.f32 %v891_v2, %v1562_v14  ;;  %v772_v14 = vld [vmem:[%s1681_s9 + $0x28] sm:$0xff] }
 0x372   :  { %v893_v31 = vpop.eup %892 }
 0x373   :  { %786 = vst.msk [vmem:[%s1682_s10 + $0x18] sm:$0xff] %vm633_vm1, %v778_v24  ;;  %v749_v16 = vmul.f32 %v1585_v30, %v735_v28  ;;  %v736_v52 = vmul.f32 %v893_v31, %v1564_v26 }
 0x375   :  { %v763_v34 = vadd.f32 %v1591_v4, %v749_v16  ;;  %v750_v36 = vmul.f32 %v1585_v30, %v736_v52 }
 0x377   :  { %v779_v19 = vadd.f32 %v771_v61, %v763_v34  ;;  %v764_v7 = vadd.f32 %v1591_v4, %v750_v36 }
 0x378   :  { %v895_v37 = vpop.eup %894 }
 0x379   :  { %787 = vst.msk [vmem:[%s1682_s10 + $0x20] sm:$0xff] %vm633_vm1, %v779_v19  ;;  %v780_v26 = vadd.f32 %v772_v14, %v764_v7  ;;  %v737_v9 = vmul.f32 %v895_v37, %v1572_v10  ;;  %v774_v10 = vld [vmem:[%s1681_s9 + $0x38] sm:$0xff] }
 0x37a   :  { %v897_v29 = vpop.eup %896 }
 0x37b   :  { %788 = vst.msk [vmem:[%s1682_s10 + $0x28] sm:$0xff] %vm633_vm1, %v780_v26  ;;  %v751_v8 = vmul.f32 %v1585_v30, %v737_v9  ;;  %v738_v6 = vmul.f32 %v897_v29, %v1574_v58 }
 0x37d   :  { %v765_v56 = vadd.f32 %v1591_v4, %v751_v8  ;;  %v752_v57 = vmul.f32 %v1585_v30, %v738_v6 }
 0x37f   :  { %v781_v41 = vadd.f32 %v773_v54, %v765_v56  ;;  %v766_v49 = vadd.f32 %v1591_v4, %v752_v57 }
 0x381   :  { %789 = vst.msk [vmem:[%s1682_s10 + $0x30] sm:$0xff] %vm633_vm1, %v781_v41  ;;  %v782_v58 = vadd.f32 %v774_v10, %v766_v49 }
 0x383   :  { %790 = vst.msk [vmem:[%s1682_s10 + $0x38] sm:$0xff] %vm633_vm1, %v782_v58 }

// kernel: vit_forward.10
= control target key start
LH: loop header
LB: loop body
LE: loop exit
PB: predicated region body
PF: predicated region fallthrough
CT: control target
= control target key end

     0   :  { %vm37_vm0 = vcmask 261120   ;;  %vm363_vm1 = vcmask 523264   ;;  %s1296_s0 = inlined_call_operand.vmem [shape: f32[64,32], index: 0, kind: input, shape index: {}]   ;;  %s1297_s3 = inlined_call_operand.vmem [shape: f32[32,320], index: 3, kind: input, shape index: {}]   ;;  %s1298_s1 = inlined_call_operand.vmem [shape: f32[1,32], index: 1, kind: input, shape index: {}]   ;;  %s1299_s2 = inlined_call_operand.vmem [shape: f32[1,32], index: 2, kind: input, shape index: {}]   ;;  %s1300_s4 = inlined_call_operand.vmem [shape: f32[1,320], index: 4, kind: input, shape index: {}]   ;;  %s1301_s5 = inlined_call_operand.vmem [shape: f32[1,320], index: 5, kind: input, shape index: {}]   ;;  %s1302_s6 = inlined_call_operand.vmem [shape: f32[1,320], index: 6, kind: input, shape index: {}]   ;;  %s1303_s7 = inlined_call_operand.vmem [shape: f32[64,320], index: 7, kind: output, shape index: {}]  }
   0x1   :  { %v27_v0 = vld [vmem:[%s1296_s0] sm:$0xff]  ;;  %v33_v1 = vld [vmem:[%s1296_s0 + $0x30] sm:$0xff]  ;;  %v28_v2 = vld [vmem:[%s1296_s0 + $0x8] sm:$0xff] }
   0x2   :  { %v38_v3 = vsel %vm37_vm0, %v27_v0, 0.0  ;;  %v56_v4 = vsel %vm37_vm0, %v33_v1, 0.0  ;;  %v34_v5 = vld [vmem:[%s1296_s0 + $0x38] sm:$0xff]  ;;  %v41_v6 = vsel %vm37_vm0, %v28_v2, 0.0  ;;  %v29_v8 = vld [vmem:[%s1296_s0 + $0x10] sm:$0xff]  ;;  %v31_v12 = vld [vmem:[%s1296_s0 + $0x20] sm:$0xff] }
   0x3   :  { %39 = vadd.xlane.f32.xlu0 %v38_v3  ;;  %57 = vadd.xlane.f32.xlu1 %v56_v4  ;;  %v59_v7 = vsel %vm37_vm0, %v34_v5, 0.0  ;;  %v30_v9 = vld [vmem:[%s1296_s0 + $0x18] sm:$0xff]  ;;  %v44_v10 = vsel %vm37_vm0, %v29_v8, 0.0  ;;  %v32_v13 = vld [vmem:[%s1296_s0 + $0x28] sm:$0xff]  ;;  %v50_v14 = vsel %vm37_vm0, %v31_v12, 0.0  ;;  %v179_v57 = vld [vmem:[%s1297_s3 + $0x20] sm:$0xff] }
   0x4   :  { %v47_v11 = vsel %vm37_vm0, %v30_v9, 0.0  ;;  %v53_v15 = vsel %vm37_vm0, %v32_v13, 0.0  ;;  %v176_v56 = vld [vmem:[%s1297_s3 + $0x8] sm:$0xff]  ;;  %v175_v59 = vld [vmem:[%s1297_s3] sm:$0xff]  ;;  %v178_v60 = vld [vmem:[%s1297_s3 + $0x18] sm:$0xff]  ;;  %v721_v4 = vmov 0  }
   0x5   :  { %v188_v58 = vpack.c.bf16 %v179_v57, %v176_v56  ;;  %v187_v61 = vpack.c.bf16 %v178_v60, %v175_v59  ;;  %v182_v62 = vld [vmem:[%s1297_s3 + $0x38] sm:$0xff]  ;;  %v185_v63 = vld [vmem:[%s1297_s3 + $0x50] sm:$0xff]  ;;  %254 = vmatprep.mubr.bf16.mxu0 %v721_v4  ;;  %284 = vmatprep.mubr.bf16.mxu1 %v721_v4 }
   0x7   :  { %42 = vadd.xlane.f32.xlu0 %v41_v6  ;;  %60 = vadd.xlane.f32.xlu1 %v59_v7  ;;  %v180_v6 = vld [vmem:[%s1297_s3 + $0x28] sm:$0xff] }
   0x8   :  { %222 = vmatprep.subr.bf16.mxu0 %v188_v58  ;;  %684 = vmatprep.subr.bf16.mxu1 %v188_v58  ;;  %v186_v58 = vld [vmem:[%s1297_s3 + $0x58] sm:$0xff] }
   0x9   :  { %223 = vmatpush1.bf16.msra.mxu0 %v187_v61  ;;  %686 = vmatpush1.bf16.msra.mxu1 %v187_v61 }
   0xb   :  { %45 = vadd.xlane.f32.xlu0 %v44_v10  ;;  %48 = vadd.xlane.f32.xlu1 %v47_v11 }
   0xf   :  { %51 = vadd.xlane.f32.xlu0 %v50_v14  ;;  %54 = vadd.xlane.f32.xlu1 %v53_v15 }
  0x90   :  { %v40_v16 = vpop.xlane.xlu0 %39  ;;  %v58_v17 = vpop.xlane.xlu1 %57 }
  0x91   :  { %v63_v18 = vmul.f32 0.03125, %v40_v16  ;;  %v69_v19 = vmul.f32 0.03125, %v58_v17 }
  0x93   :  { %v794_v20 = vsub.f32 %v27_v0, %v63_v18  ;;  %v796_v21 = vsub.f32 %v33_v1, %v69_v19  ;;  %v191_v0 = vpack.c.bf16 %v185_v63, %v182_v62  ;;  %v181_v1 = vld [vmem:[%s1297_s3 + $0x30] sm:$0xff] }
  0x94   :  { %v43_v22 = vpop.xlane.xlu0 %42  ;;  %v61_v23 = vpop.xlane.xlu1 %60 }
  0x95   :  { %v64_v24 = vmul.f32 0.03125, %v43_v22  ;;  %v70_v25 = vmul.f32 0.03125, %v61_v23  ;;  %v79_v26 = vmul.f32 %v794_v20, %v794_v20  ;;  %v85_v27 = vmul.f32 %v796_v21, %v796_v21  ;;  %224 = vmatprep.subr.bf16.mxu0 %v191_v0  ;;  %685 = vmatprep.subr.bf16.mxu1 %v191_v0 }
  0x97   :  { %v802_v28 = vsub.f32 %v28_v2, %v64_v24  ;;  %v804_v29 = vsub.f32 %v34_v5, %v70_v25  ;;  %v87_v30 = vsel %vm37_vm0, %v79_v26, 0.0  ;;  %v105_v33 = vsel %vm37_vm0, %v85_v27, 0.0  ;;  %v184_v2 = vld [vmem:[%s1297_s3 + $0x48] sm:$0xff]  ;;  %v177_v5 = vld [vmem:[%s1297_s3 + $0x10] sm:$0xff] }
  0x98   :  { %88 = vadd.xlane.f32.xlu0 %v87_v30  ;;  %v46_v31 = vpop.xlane.xlu0 %45  ;;  %v49_v32 = vpop.xlane.xlu1 %48  ;;  %v190_v3 = vpack.c.bf16 %v184_v2, %v181_v1  ;;  %v866_v7 = vpack.c.bf16 %v180_v6, %v177_v5 }
  0x99   :  { %v65_v34 = vmul.f32 0.03125, %v46_v31  ;;  %v66_v35 = vmul.f32 0.03125, %v49_v32  ;;  %v80_v36 = vmul.f32 %v802_v28, %v802_v28  ;;  %v86_v37 = vmul.f32 %v804_v29, %v804_v29 }
  0x9a   :  { %225 = vmatpush1.bf16.msra.mxu0 %v190_v3  ;;  %687 = vmatpush1.bf16.msra.mxu1 %v190_v3 }
  0x9b   :  { %v812_v38 = vsub.f32 %v29_v8, %v65_v34  ;;  %v814_v39 = vsub.f32 %v30_v9, %v66_v35  ;;  %v90_v40 = vsel %vm37_vm0, %v80_v36, 0.0  ;;  %v108_v43 = vsel %vm37_vm0, %v86_v37, 0.0  ;;  %672 = vmatprep.subr.bf16.mxu1 %v866_v7  ;;  %v656_v37 = vld [vmem:[%s1298_s1] ss:$0 sm:$0xff] }
  0x9c   :  { %106 = vadd.xlane.f32.xlu0 %v105_v33  ;;  %91 = vadd.xlane.f32.xlu1 %v90_v40  ;;  %v52_v41 = vpop.xlane.xlu0 %51  ;;  %v55_v42 = vpop.xlane.xlu1 %54 }
  0x9d   :  { %v67_v44 = vmul.f32 0.03125, %v52_v41  ;;  %v68_v45 = vmul.f32 0.03125, %v55_v42  ;;  %v81_v46 = vmul.f32 %v812_v38, %v812_v38  ;;  %v82_v47 = vmul.f32 %v814_v39, %v814_v39 }
  0x9f   :  { %v822_v48 = vsub.f32 %v31_v12, %v67_v44  ;;  %v824_v49 = vsub.f32 %v32_v13, %v68_v45  ;;  %v93_v50 = vsel %vm37_vm0, %v81_v46, 0.0  ;;  %v96_v51 = vsel %vm37_vm0, %v82_v47, 0.0 }
  0xa0   :  { %109 = vadd.xlane.f32.xlu1 %v108_v43  ;;  %94 = vadd.xlane.f32.xlu0 %v93_v50 }
  0xa1   :  { %v83_v52 = vmul.f32 %v822_v48, %v822_v48  ;;  %v84_v53 = vmul.f32 %v824_v49, %v824_v49 }
  0xa3   :  { %v99_v54 = vsel %vm37_vm0, %v83_v52, 0.0  ;;  %v102_v55 = vsel %vm37_vm0, %v84_v53, 0.0 }
  0xa4   :  { %97 = vadd.xlane.f32.xlu1 %v96_v51  ;;  %100 = vadd.xlane.f32.xlu0 %v99_v54 }
  0xa8   :  { %103 = vadd.xlane.f32.xlu1 %v102_v55 }
 0x125   :  { %v89_v8 = vpop.xlane.xlu0 %88 }
 0x126   :  { %v111_v9 = vmul.f32 0.03125, %v89_v8 }
 0x128   :  { %v119_v10 = vadd.f32 1e-05, %v111_v9 }
 0x129   :  { %v92_v11 = vpop.xlane.xlu1 %91  ;;  %v107_v12 = vpop.xlane.xlu0 %106 }
 0x12a   :  { %689 = vrsqrt.f32 %v119_v10  ;;  %v112_v13 = vmul.f32 0.03125, %v92_v11  ;;  %v117_v14 = vmul.f32 0.03125, %v107_v12 }
 0x12c   :  { %v120_v15 = vadd.f32 1e-05, %v112_v13  ;;  %v125_v16 = vadd.f32 1e-05, %v117_v14 }
 0x12d   :  { %v110_v17 = vpop.xlane.xlu1 %109  ;;  %v95_v18 = vpop.xlane.xlu0 %94 }
 0x12e   :  { %691 = vrsqrt.f32 %v120_v15  ;;  %v118_v19 = vmul.f32 0.03125, %v110_v17  ;;  %v113_v22 = vmul.f32 0.03125, %v95_v18 }
 0x12f   :  { %693 = vrsqrt.f32 %v125_v16 }
 0x130   :  { %v126_v23 = vadd.f32 1e-05, %v118_v19  ;;  %v121_v24 = vadd.f32 1e-05, %v113_v22 }
 0x131   :  { %v98_v25 = vpop.xlane.xlu1 %97  ;;  %v101_v26 = vpop.xlane.xlu0 %100 }
 0x132   :  { %695 = vrsqrt.f32 %v126_v23  ;;  %v114_v27 = vmul.f32 0.03125, %v98_v25  ;;  %v115_v30 = vmul.f32 0.03125, %v101_v26 }
 0x133   :  { %697 = vrsqrt.f32 %v121_v24 }
 0x134   :  { %v690_v31 = vpop.eup %689  ;;  %v122_v32 = vadd.f32 1e-05, %v114_v27  ;;  %v123_v33 = vadd.f32 1e-05, %v115_v30 }
 0x135   :  { %v135_v34 = vmul.f32 %v690_v31, %v794_v20  ;;  %v104_v35 = vpop.xlane.xlu1 %103  ;;  %v657_v20 = vld [vmem:[%s1299_s2] ss:$0 sm:$0xff] }
 0x136   :  { %699 = vrsqrt.f32 %v122_v32  ;;  %v116_v36 = vmul.f32 0.03125, %v104_v35 }
 0x137   :  { %701 = vrsqrt.f32 %v123_v33  ;;  %v149_v44 = vmul.f32 %v656_v37, %v135_v34 }
 0x138   :  { %v692_v40 = vpop.eup %691  ;;  %v124_v41 = vadd.f32 1e-05, %v116_v36 }
 0x139   :  { %v694_v42 = vpop.eup %693  ;;  %v136_v43 = vmul.f32 %v692_v40, %v802_v28  ;;  %v163_v52 = vadd.f32 %v657_v20, %v149_v44 }
 0x13a   :  { %v141_v45 = vmul.f32 %v694_v42, %v796_v21  ;;  %703 = vrsqrt.f32 %v124_v41  ;;  %v183_v21 = vld [vmem:[%s1297_s3 + $0x40] sm:$0xff] }
 0x13b   :  { %v150_v46 = vmul.f32 %v656_v37, %v136_v43  ;;  %v192_v0 = vpack.c.bf16 %v186_v58, %v183_v21 }
 0x13c   :  { %v696_v47 = vpop.eup %695  ;;  %v155_v54 = vmul.f32 %v656_v37, %v141_v45 }
 0x13d   :  { %v698_v50 = vpop.eup %697  ;;  %v142_v51 = vmul.f32 %v696_v47, %v804_v29  ;;  %v164_v53 = vadd.f32 %v657_v20, %v150_v46 }
 0x13e   :  { %v137_v55 = vmul.f32 %v698_v50, %v812_v38  ;;  %v169_v29 = vadd.f32 %v657_v20, %v155_v54 }
 0x13f   :  { %v171_v56 = vpack.c.bf16 %v164_v53, %v163_v52  ;;  %v156_v28 = vmul.f32 %v656_v37, %v142_v51 }
 0x140   :  { %v700_v57 = vpop.eup %699  ;;  %v151_v62 = vmul.f32 %v656_v37, %v137_v55 }
 0x141   :  { %v702_v59 = vpop.eup %701  ;;  %v138_v60 = vmul.f32 %v700_v57, %v814_v39  ;;  %658 = vmatmul.mubr.msk.bf16.vlgmr.msra.gmra.mrb[0].mxu0 %vm37_vm0, %v171_v56  ;;  %v170_v61 = vadd.f32 %v657_v20, %v156_v28 }
 0x142   :  { %v139_v38 = vmul.f32 %v702_v59, %v822_v48  ;;  %264 = vmatprep.mubr.bf16.mxu0 %v721_v4  ;;  %v165_v5 = vadd.f32 %v657_v20, %v151_v62 }
 0x143   :  { %v174_v63 = vpack.c.bf16 %v170_v61, %v169_v29  ;;  %v152_v1 = vmul.f32 %v656_v37, %v138_v60 }
 0x144   :  { %v704_v2 = vpop.eup %703  ;;  %v153_v39 = vmul.f32 %v656_v37, %v139_v38 }
 0x145   :  { %v140_v3 = vmul.f32 %v704_v2, %v824_v49  ;;  %661 = vmatmul.mubr.msk.bf16.vlgmr.msra.gmra.mrb[0].mxu1 %vm37_vm0, %v174_v63  ;;  %v166_v6 = vadd.f32 %v657_v20, %v152_v1 }
 0x146   :  { %673 = vmatpush3.bf16.msra.mxu1 %v866_v7  ;;  %676 = vmatprep.mubr.msk.bf16.mxu1 %vm37_vm0, %v171_v56  ;;  %v167_v9 = vadd.f32 %v657_v20, %v153_v39  ;;  %v195_v7 = vlaneseq }
 0x147   :  { %674 = vmatprep.subr.bf16.mxu1 %v192_v0  ;;  %v172_v8 = vpack.c.bf16 %v166_v6, %v165_v5  ;;  %v154_v48 = vmul.f32 %v656_v37, %v140_v3 }
 0x148   :  { %v196_v11 = vshrl.u32 %v195_v7, 7 }
 0x149   :  { %659 = vmatmul.mubr.msk.bf16.gmra.mrb[4].mxu0 %vm37_vm0, %v172_v8  ;;  %v168_v10 = vadd.f32 %v657_v20, %v154_v48 }
 0x14a   :  { %675 = vmatpush3.bf16.msra.mxu1 %v192_v0  ;;  %274 = vmatprep.mubr.bf16.mxu0 %v721_v4  ;;  %v900_v15 = vsub.s32 0, %v196_v11  ;;  %v902_v16 = vsub.s32 1, %v196_v11  ;;  %v193_v4 = vld [vmem:[%s1300_s4] sm:$0x7]  ;;  %v907_v23 = vsub.s32 2, %v196_v11 }
 0x14b   :  { %v173_v49 = vpack.c.bf16 %v168_v10, %v167_v9 }
 0x14c   :  { %v198_v24 = vrot.slane %v193_v4, %v900_v15  ;;  %v202_v25 = vrot.slane %v193_v4, %v902_v16  ;;  %v206_v32 = vrot.slane %v193_v4, %v907_v23 }
 0x14d   :  { %677 = vmatmul.mubr.msk.bf16.vlgmr.msra.gmra.mrb[4].mxu1 %vm37_vm0, %v172_v8 }
 0x14e   :  { %680 = vmatprep.mubr.msk.bf16.mxu1 %vm37_vm0, %v173_v49 }
 0x151   :  { %660 = vmatmul.mubr.msk.bf16.gmra.mrb[8].mxu0 %vm37_vm0, %v173_v49 }
 0x155   :  { %681 = vmatmul.mubr.msk.bf16.gmra.mrb[8].mxu1 %vm37_vm0, %v174_v63 }
 0x214   :  { %v256_v12 = vpop.f32.mrb[0].mxu0 }
 0x215   :  { %v258_v13 = vpop.f32.mrb[1].mxu0  ;;  %v912_v33 = vadd.f32 %v256_v12, %v198_v24 }
 0x216   :  { %v260_v14 = vpop.f32.mrb[2].mxu0  ;;  %v914_v34 = vadd.f32 %v258_v13, %v202_v25 }
 0x217   :  { %v262_v17 = vpop.f32.mrb[3].mxu0  ;;  %v916_v37 = vadd.f32 %v260_v14, %v198_v24 }
 0x218   :  { %v286_v18 = vpop.f32.mrb[0].mxu1  ;;  %v918_v40 = vadd.f32 %v262_v17, %v202_v25  ;;  %v362_v45 = vadd.f32 %v914_v34, %v912_v33 }
 0x219   :  { %v288_v19 = vpop.f32.mrb[1].mxu1  ;;  %v964_v9 = vadd.f32 %v286_v18, %v198_v24 }
 0x21a   :  { %v290_v22 = vpop.f32.mrb[2].mxu1  ;;  %v368_v54 = vadd.f32 %v918_v40, %v916_v37  ;;  %v966_v10 = vadd.f32 %v288_v19, %v202_v25 }
 0x21b   :  { %v292_v26 = vpop.f32.mrb[3].mxu1  ;;  %v976_v17 = vadd.f32 %v290_v22, %v198_v24 }
 0x21c   :  { %v266_v27 = vpop.f32.mrb[4].mxu0  ;;  %v978_v4 = vadd.f32 %v292_v26, %v202_v25 }
 0x21d   :  { %v268_v30 = vpop.f32.mrb[5].mxu0  ;;  %v926_v20 = vadd.f32 %v266_v27, %v198_v24 }
 0x21e   :  { %v270_v31 = vpop.f32.mrb[6].mxu0  ;;  %v928_v46 = vadd.f32 %v268_v30, %v202_v25 }
 0x21f   :  { %v272_v35 = vpop.f32.mrb[7].mxu0  ;;  %v938_v55 = vadd.f32 %v270_v31, %v198_v24  ;;  %v393_v31 = vadd.f32 %v966_v10, %v964_v9 }
 0x220   :  { %v678_v36 = vpop.f32.mrb[4].mxu1  ;;  %v940_v56 = vadd.f32 %v272_v35, %v202_v25  ;;  %v373_v60 = vadd.f32 %v928_v46, %v926_v20 }
 0x221   :  { %v329_v41 = vpop.f32.mrb[5].mxu1  ;;  %v920_v42 = vadd.f32 %v678_v36, %v206_v32 }
 0x222   :  { %v922_v43 = vadd.f32 %v329_v41, %v206_v32  ;;  %v679_v44 = vpop.f32.mrb[6].mxu1  ;;  %v378_v1 = vadd.f32 %v940_v56, %v938_v55 }
 0x223   :  { %v332_v47 = vpop.f32.mrb[7].mxu1  ;;  %v930_v50 = vadd.f32 %v679_v44, %v206_v32  ;;  %v374_v59 = vsel %vm363_vm1, %v920_v42, 0.0 }
 0x224   :  { %v932_v51 = vadd.f32 %v332_v47, %v206_v32  ;;  %v276_v52 = vpop.f32.mrb[8].mxu0  ;;  %v364_v53 = vsel %vm363_vm1, %v922_v43, 0.0  ;;  %v375_v6 = vadd.f32 %v374_v59, %v373_v60 }
 0x225   :  { %v278_v28 = vpop.f32.mrb[9].mxu0  ;;  %v365_v57 = vadd.f32 %v364_v53, %v362_v45  ;;  %v948_v29 = vadd.f32 %v276_v52, %v198_v24  ;;  %v379_v0 = vsel %vm363_vm1, %v930_v50, 0.0 }
 0x226   :  { %v280_v21 = vpop.f32.mrb[10].mxu0  ;;  %v369_v58 = vsel %vm363_vm1, %v932_v51, 0.0  ;;  %v950_v61 = vadd.f32 %v278_v28, %v202_v25  ;;  %v380_v11 = vadd.f32 %v379_v0, %v378_v1 }
 0x227   :  { %366 = vadd.xlane.f32.xlu0 %v365_v57  ;;  %v282_v62 = vpop.f32.mrb[11].mxu0  ;;  %v370_v38 = vadd.f32 %v369_v58, %v368_v54  ;;  %v956_v2 = vadd.f32 %v280_v21, %v198_v24  ;;  %v398_v24 = vadd.f32 %v978_v4, %v976_v17 }
 0x228   :  { %v682_v63 = vpop.f32.mrb[8].mxu1  ;;  %v958_v3 = vadd.f32 %v282_v62, %v202_v25  ;;  %v383_v49 = vadd.f32 %v950_v61, %v948_v29 }
 0x229   :  { %371 = vadd.xlane.f32.xlu1 %v370_v38  ;;  %v345_v5 = vpop.f32.mrb[9].mxu1  ;;  %v960_v39 = vadd.f32 %v682_v63, %v206_v32 }
 0x22a   :  { %v962_v8 = vadd.f32 %v345_v5, %v206_v32  ;;  %v683_v48 = vpop.f32.mrb[10].mxu1  ;;  %v388_v18 = vadd.f32 %v958_v3, %v956_v2 }
 0x22b   :  { %376 = vadd.xlane.f32.xlu0 %v375_v6  ;;  %v348_v7 = vpop.f32.mrb[11].mxu1  ;;  %v970_v12 = vadd.f32 %v683_v48, %v206_v32  ;;  %v394_v30 = vsel %vm363_vm1, %v960_v39, 0.0 }
 0x22c   :  { %v972_v13 = vadd.f32 %v348_v7, %v206_v32  ;;  %v384_v14 = vsel %vm363_vm1, %v962_v8, 0.0  ;;  %v395_v25 = vadd.f32 %v394_v30, %v393_v31 }
 0x22d   :  { %381 = vadd.xlane.f32.xlu1 %v380_v11  ;;  %v385_v19 = vadd.f32 %v384_v14, %v383_v49  ;;  %v399_v22 = vsel %vm363_vm1, %v970_v12, 0.0 }
 0x22e   :  { %v389_v27 = vsel %vm363_vm1, %v972_v13, 0.0  ;;  %v400_v26 = vadd.f32 %v399_v22, %v398_v24 }
 0x22f   :  { %386 = vadd.xlane.f32.xlu0 %v385_v19  ;;  %v390_v32 = vadd.f32 %v389_v27, %v388_v18 }
 0x231   :  { %391 = vadd.xlane.f32.xlu1 %v390_v32 }
 0x233   :  { %396 = vadd.xlane.f32.xlu0 %v395_v25 }
 0x235   :  { %401 = vadd.xlane.f32.xlu1 %v400_v26 }
 0x2b4   :  { %v367_v35 = vpop.xlane.xlu0 %366 }
 0x2b5   :  { %v404_v36 = vmul.f32 0.003125, %v367_v35 }
 0x2b6   :  { %v372_v41 = vpop.xlane.xlu1 %371 }
 0x2b7   :  { %v993_v44 = vsub.f32 %v912_v33, %v404_v36  ;;  %v996_v45 = vsub.f32 %v914_v34, %v404_v36  ;;  %v999_v47 = vsub.f32 %v922_v43, %v404_v36  ;;  %v405_v52 = vmul.f32 0.003125, %v372_v41 }
 0x2b8   :  { %v377_v53 = vpop.xlane.xlu0 %376 }
 0x2b9   :  { %v1002_v54 = vsub.f32 %v916_v37, %v405_v52  ;;  %v1005_v28 = vsub.f32 %v918_v40, %v405_v52  ;;  %v406_v57 = vmul.f32 0.003125, %v377_v53  ;;  %v1008_v21 = vsub.f32 %v932_v51, %v405_v52 }
 0x2ba   :  { %v382_v33 = vpop.xlane.xlu1 %381  ;;  %v436_v34 = vmul.f32 %v993_v44, %v993_v44  ;;  %v437_v43 = vmul.f32 %v996_v45, %v996_v45  ;;  %v438_v58 = vmul.f32 %v999_v47, %v999_v47 }
 0x2bb   :  { %v1017_v37 = vsub.f32 %v926_v20, %v406_v57  ;;  %v1020_v40 = vsub.f32 %v928_v46, %v406_v57  ;;  %v1023_v59 = vsub.f32 %v920_v42, %v406_v57  ;;  %v407_v51 = vmul.f32 0.003125, %v382_v33 }
 0x2bc   :  { %v387_v60 = vpop.xlane.xlu0 %386  ;;  %v460_v62 = vadd.f32 %v437_v43, %v436_v34  ;;  %v461_v38 = vsel %vm363_vm1, %v438_v58, 0.0  ;;  %v439_v63 = vmul.f32 %v1002_v54, %v1002_v54  ;;  %v440_v0 = vmul.f32 %v1005_v28, %v1005_v28 }
 0x2bd   :  { %v1031_v20 = vsub.f32 %v938_v55, %v407_v51  ;;  %v1034_v46 = vsub.f32 %v940_v56, %v407_v51  ;;  %v1037_v42 = vsub.f32 %v930_v50, %v407_v51  ;;  %v408_v1 = vmul.f32 0.003125, %v387_v60 }
 0x2be   :  { %v392_v5 = vpop.xlane.xlu1 %391  ;;  %v462_v6 = vadd.f32 %v461_v38, %v460_v62  ;;  %v441_v48 = vmul.f32 %v1008_v21, %v1008_v21  ;;  %v465_v49 = vadd.f32 %v440_v0, %v439_v63  ;;  %v442_v7 = vmul.f32 %v1017_v37, %v1017_v37 }
 0x2bf   :  { %v1044_v11 = vsub.f32 %v948_v29, %v408_v1  ;;  %v1047_v55 = vsub.f32 %v950_v61, %v408_v1  ;;  %v1050_v56 = vsub.f32 %v962_v8, %v408_v1  ;;  %v409_v50 = vmul.f32 0.003125, %v392_v5 }
 0x2c0   :  { %463 = vadd.xlane.f32.xlu0 %v462_v6  ;;  %v397_v14 = vpop.xlane.xlu0 %396  ;;  %v466_v18 = vsel %vm363_vm1, %v441_v48, 0.0  ;;  %v443_v19 = vmul.f32 %v1020_v40, %v1020_v40  ;;  %v444_v27 = vmul.f32 %v1023_v59, %v1023_v59  ;;  %v445_v29 = vmul.f32 %v1031_v20, %v1031_v20 }
 0x2c1   :  { %v1060_v61 = vsub.f32 %v956_v2, %v409_v50  ;;  %v1063_v8 = vsub.f32 %v958_v3, %v409_v50  ;;  %v1066_v30 = vsub.f32 %v972_v13, %v409_v50  ;;  %v410_v31 = vmul.f32 0.003125, %v397_v14 }
 0x2c2   :  { %v467_v32 = vadd.f32 %v466_v18, %v465_v49  ;;  %v402_v22 = vpop.xlane.xlu1 %401  ;;  %v470_v24 = vadd.f32 %v443_v19, %v442_v7  ;;  %v471_v25 = vsel %vm363_vm1, %v444_v27, 0.0  ;;  %v446_v26 = vmul.f32 %v1034_v46, %v1034_v46 }
 0x2c3   :  { %v1072_v35 = vsub.f32 %v964_v9, %v410_v31  ;;  %v1075_v2 = vsub.f32 %v966_v10, %v410_v31  ;;  %v1078_v3 = vsub.f32 %v960_v39, %v410_v31  ;;  %v411_v13 = vmul.f32 0.003125, %v402_v22 }
 0x2c4   :  { %468 = vadd.xlane.f32.xlu1 %v467_v32  ;;  %v472_v36 = vadd.f32 %v471_v25, %v470_v24  ;;  %v447_v41 = vmul.f32 %v1037_v42, %v1037_v42  ;;  %v475_v52 = vadd.f32 %v446_v26, %v445_v29  ;;  %v448_v53 = vmul.f32 %v1044_v11, %v1044_v11 }
 0x2c5   :  { %v1085_v57 = vsub.f32 %v976_v17, %v411_v13  ;;  %v1088_v9 = vsub.f32 %v978_v4, %v411_v13  ;;  %v1091_v10 = vsub.f32 %v970_v12, %v411_v13  ;;  %v449_v39 = vmul.f32 %v1047_v55, %v1047_v55 }
 0x2c6   :  { %473 = vadd.xlane.f32.xlu0 %v472_v36  ;;  %v476_v33 = vsel %vm363_vm1, %v447_v41, 0.0  ;;  %v450_v34 = vmul.f32 %v1050_v56, %v1050_v56  ;;  %v451_v43 = vmul.f32 %v1060_v61, %v1060_v61  ;;  %v452_v17 = vmul.f32 %v1063_v8, %v1063_v8 }
 0x2c7   :  { %v477_v4 = vadd.f32 %v476_v33, %v475_v52  ;;  %v480_v58 = vadd.f32 %v449_v39, %v448_v53  ;;  %v453_v12 = vmul.f32 %v1066_v30, %v1066_v30  ;;  %v454_v51 = vmul.f32 %v1072_v35, %v1072_v35  ;;  %v360_v52 = vld [vmem:[%s1301_s5] sm:$0x7] }
 0x2c8   :  { %v481_v60 = vsel %vm363_vm1, %v450_v34, 0.0  ;;  %v485_v62 = vadd.f32 %v452_v17, %v451_v43  ;;  %v455_v38 = vmul.f32 %v1075_v2, %v1075_v2  ;;  %v456_v63 = vmul.f32 %v1078_v3, %v1078_v3  ;;  %v361_v33 = vld [vmem:[%s1302_s6] sm:$0x7] }
 0x2c9   :  { %478 = vadd.xlane.f32.xlu1 %v477_v4  ;;  %v482_v0 = vadd.f32 %v481_v60, %v480_v58  ;;  %v486_v1 = vsel %vm363_vm1, %v453_v12, 0.0  ;;  %v457_v5 = vmul.f32 %v1085_v57, %v1085_v57  ;;  %v458_v6 = vmul.f32 %v1088_v9, %v1088_v9 }
 0x2ca   :  { %v487_v48 = vadd.f32 %v486_v1, %v485_v62  ;;  %v490_v49 = vadd.f32 %v455_v38, %v454_v51  ;;  %v491_v7 = vsel %vm363_vm1, %v456_v63, 0.0  ;;  %v459_v50 = vmul.f32 %v1091_v10, %v1091_v10 }
 0x2cb   :  { %483 = vadd.xlane.f32.xlu0 %v482_v0  ;;  %v495_v14 = vadd.f32 %v458_v6, %v457_v5  ;;  %v1127_v17 = vrot.slane %v360_v52, %v900_v15  ;;  %v1130_v4 = vrot.slane %v360_v52, %v902_v16  ;;  %v1133_v12 = vrot.slane %v360_v52, %v907_v23 }
 0x2cc   :  { %v492_v18 = vadd.f32 %v491_v7, %v490_v49  ;;  %v496_v19 = vsel %vm363_vm1, %v459_v50, 0.0  ;;  %v1136_v38 = vrot.slane %v361_v33, %v900_v15  ;;  %v1139_v63 = vrot.slane %v361_v33, %v902_v16 }
 0x2cd   :  { %488 = vadd.xlane.f32.xlu1 %v487_v48  ;;  %v497_v27 = vadd.f32 %v496_v19, %v495_v14  ;;  %v1142_v0 = vrot.slane %v361_v33, %v907_v23 }
 0x2cf   :  { %493 = vadd.xlane.f32.xlu0 %v492_v18 }
 0x2d1   :  { %498 = vadd.xlane.f32.xlu1 %v497_v27 }
 0x34d   :  { %v464_v29 = vpop.xlane.xlu0 %463 }
 0x34e   :  { %v500_v31 = vmul.f32 0.003125, %v464_v29 }
 0x350   :  { %v508_v32 = vadd.f32 1e-05, %v500_v31 }
 0x351   :  { %v469_v22 = vpop.xlane.xlu1 %468 }
 0x352   :  { %705 = vrsqrt.f32 %v508_v32  ;;  %v501_v24 = vmul.f32 0.003125, %v469_v22 }
 0x353   :  { %v474_v25 = vpop.xlane.xlu0 %473 }
 0x354   :  { %v509_v26 = vadd.f32 1e-05, %v501_v24  ;;  %v502_v13 = vmul.f32 0.003125, %v474_v25 }
 0x356   :  { %707 = vrsqrt.f32 %v509_v26  ;;  %v510_v36 = vadd.f32 1e-05, %v502_v13  ;;  %v479_v41 = vpop.xlane.xlu1 %478 }
 0x357   :  { %v503_v53 = vmul.f32 0.003125, %v479_v41 }
 0x358   :  { %709 = vrsqrt.f32 %v510_v36  ;;  %v484_v39 = vpop.xlane.xlu0 %483 }
 0x359   :  { %v511_v34 = vadd.f32 1e-05, %v503_v53  ;;  %v504_v43 = vmul.f32 0.003125, %v484_v39 }
 0x35a   :  { %v489_v58 = vpop.xlane.xlu1 %488 }
 0x35b   :  { %711 = vrsqrt.f32 %v511_v34  ;;  %v512_v51 = vadd.f32 1e-05, %v504_v43  ;;  %v505_v60 = vmul.f32 0.003125, %v489_v58 }
 0x35c   :  { %v706_v62 = vpop.eup %705  ;;  %v494_v1 = vpop.xlane.xlu0 %493 }
 0x35d   :  { %v524_v5 = vmul.f32 %v706_v62, %v993_v44  ;;  %v525_v6 = vmul.f32 %v706_v62, %v996_v45  ;;  %v526_v48 = vmul.f32 %v706_v62, %v999_v47  ;;  %713 = vrsqrt.f32 %v512_v51 }
 0x35e   :  { %v513_v49 = vadd.f32 1e-05, %v505_v60  ;;  %v506_v7 = vmul.f32 0.003125, %v494_v1  ;;  %v499_v50 = vpop.xlane.xlu1 %498 }
 0x35f   :  { %v564_v15 = vmul.f32 %v1127_v17, %v524_v5  ;;  %v565_v14 = vmul.f32 %v1130_v4, %v525_v6  ;;  %v566_v16 = vmul.f32 %v1133_v12, %v526_v48  ;;  %v507_v18 = vmul.f32 0.003125, %v499_v50 }
 0x360   :  { %v708_v23 = vpop.eup %707  ;;  %715 = vrsqrt.f32 %v513_v49  ;;  %v514_v19 = vadd.f32 1e-05, %v506_v7 }
 0x361   :  { %v604_v44 = vadd.f32 %v1136_v38, %v564_v15  ;;  %v605_v45 = vadd.f32 %v1139_v63, %v565_v14  ;;  %v606_v47 = vadd.f32 %v1142_v0, %v566_v16  ;;  %v527_v27 = vmul.f32 %v708_v23, %v1002_v54 }
 0x362   :  { %v710_v29 = vpop.eup %709  ;;  %v528_v31 = vmul.f32 %v708_v23, %v1005_v28  ;;  %v529_v32 = vmul.f32 %v708_v23, %v1008_v21  ;;  %717 = vrsqrt.f32 %v514_v19  ;;  %v515_v22 = vadd.f32 1e-05, %v507_v18 }
 0x363   :  { %628 = vst [vmem:[%s1303_s7] sm:$0xff] %v604_v44  ;;  %629 = vst [vmem:[%s1303_s7 + $0x8] sm:$0xff] %v605_v45  ;;  %v567_v54 = vmul.f32 %v1127_v17, %v527_v27  ;;  %v530_v28 = vmul.f32 %v710_v29, %v1017_v37  ;;  %v531_v21 = vmul.f32 %v710_v29, %v1020_v40 }
 0x364   :  { %630 = vst.msk [vmem:[%s1303_s7 + $0x10] sm:$0xff] %vm363_vm1, %v606_v47  ;;  %v532_v24 = vmul.f32 %v710_v29, %v1023_v59  ;;  %v568_v25 = vmul.f32 %v1130_v4, %v528_v31  ;;  %v569_v26 = vmul.f32 %v1133_v12, %v529_v32  ;;  %719 = vrsqrt.f32 %v515_v22 }
 0x365   :  { %v712_v13 = vpop.eup %711  ;;  %v607_v36 = vadd.f32 %v1136_v38, %v567_v54  ;;  %v570_v41 = vmul.f32 %v1127_v17, %v530_v28  ;;  %v571_v52 = vmul.f32 %v1130_v4, %v531_v21 }
 0x366   :  { %v572_v53 = vmul.f32 %v1133_v12, %v532_v24  ;;  %v608_v37 = vadd.f32 %v1139_v63, %v568_v25  ;;  %v609_v40 = vadd.f32 %v1142_v0, %v569_v26  ;;  %v533_v59 = vmul.f32 %v712_v13, %v1031_v20 }
 0x367   :  { %v534_v39 = vmul.f32 %v712_v13, %v1034_v46  ;;  %v714_v33 = vpop.eup %713  ;;  %631 = vst [vmem:[%s1303_s7 + $0x18] sm:$0xff] %v607_v36  ;;  %v610_v34 = vadd.f32 %v1136_v38, %v570_v41  ;;  %v611_v43 = vadd.f32 %v1139_v63, %v571_v52  ;;  %v535_v51 = vmul.f32 %v712_v13, %v1037_v42 }
 0x368   :  { %v612_v58 = vadd.f32 %v1142_v0, %v572_v53  ;;  %632 = vst [vmem:[%s1303_s7 + $0x20] sm:$0xff] %v608_v37  ;;  %633 = vst.msk [vmem:[%s1303_s7 + $0x28] sm:$0xff] %vm363_vm1, %v609_v40  ;;  %v573_v20 = vmul.f32 %v1127_v17, %v533_v59  ;;  %v536_v60 = vmul.f32 %v714_v33, %v1044_v11 }
 0x369   :  { %v574_v46 = vmul.f32 %v1130_v4, %v534_v39  ;;  %v537_v62 = vmul.f32 %v714_v33, %v1047_v55  ;;  %634 = vst [vmem:[%s1303_s7 + $0x30] sm:$0xff] %v610_v34  ;;  %635 = vst [vmem:[%s1303_s7 + $0x38] sm:$0xff] %v611_v43  ;;  %v575_v42 = vmul.f32 %v1133_v12, %v535_v51 }
 0x36a   :  { %636 = vst.msk [vmem:[%s1303_s7 + $0x40] sm:$0xff] %vm363_vm1, %v612_v58  ;;  %v538_v1 = vmul.f32 %v714_v33, %v1050_v56  ;;  %v716_v11 = vpop.eup %715  ;;  %v613_v55 = vadd.f32 %v1136_v38, %v573_v20  ;;  %v576_v6 = vmul.f32 %v1127_v17, %v536_v60 }
 0x36b   :  { %v614_v5 = vadd.f32 %v1139_v63, %v574_v46  ;;  %v577_v48 = vmul.f32 %v1130_v4, %v537_v62  ;;  %v615_v49 = vadd.f32 %v1142_v0, %v575_v42  ;;  %v539_v50 = vmul.f32 %v716_v11, %v1060_v61 }
 0x36c   :  { %v578_v7 = vmul.f32 %v1133_v12, %v538_v1  ;;  %v540_v15 = vmul.f32 %v716_v11, %v1063_v8  ;;  %v718_v14 = vpop.eup %717  ;;  %637 = vst [vmem:[%s1303_s7 + $0x48] sm:$0xff] %v613_v55  ;;  %v616_v56 = vadd.f32 %v1136_v38, %v576_v6  ;;  %v541_v18 = vmul.f32 %v716_v11, %v1066_v30 }
 0x36d   :  { %638 = vst [vmem:[%s1303_s7 + $0x50] sm:$0xff] %v614_v5  ;;  %v617_v16 = vadd.f32 %v1139_v63, %v577_v48  ;;  %639 = vst.msk [vmem:[%s1303_s7 + $0x58] sm:$0xff] %vm363_vm1, %v615_v49  ;;  %v579_v8 = vmul.f32 %v1127_v17, %v539_v50  ;;  %v542_v19 = vmul.f32 %v718_v14, %v1072_v35 }
 0x36e   :  { %v618_v61 = vadd.f32 %v1142_v0, %v578_v7  ;;  %v580_v23 = vmul.f32 %v1130_v4, %v540_v15  ;;  %v720_v44 = vpop.eup %719  ;;  %640 = vst [vmem:[%s1303_s7 + $0x60] sm:$0xff] %v616_v56  ;;  %v581_v30 = vmul.f32 %v1133_v12, %v541_v18  ;;  %v543_v45 = vmul.f32 %v718_v14, %v1075_v2 }
 0x36f   :  { %641 = vst [vmem:[%s1303_s7 + $0x68] sm:$0xff] %v617_v16  ;;  %v544_v47 = vmul.f32 %v718_v14, %v1078_v3  ;;  %v619_v35 = vadd.f32 %v1136_v38, %v579_v8  ;;  %v582_v29 = vmul.f32 %v1127_v17, %v542_v19  ;;  %v545_v31 = vmul.f32 %v720_v44, %v1085_v57 }
 0x370   :  { %642 = vst.msk [vmem:[%s1303_s7 + $0x70] sm:$0xff] %vm363_vm1, %v618_v61  ;;  %v620_v27 = vadd.f32 %v1139_v63, %v580_v23  ;;  %v621_v32 = vadd.f32 %v1142_v0, %v581_v30  ;;  %v583_v22 = vmul.f32 %v1130_v4, %v543_v45  ;;  %v546_v3 = vmul.f32 %v720_v44, %v1088_v9 }
 0x371   :  { %v584_v2 = vmul.f32 %v1133_v12, %v544_v47  ;;  %643 = vst [vmem:[%s1303_s7 + $0x78] sm:$0xff] %v619_v35  ;;  %v622_v54 = vadd.f32 %v1136_v38, %v582_v29  ;;  %v547_v57 = vmul.f32 %v720_v44, %v1091_v10  ;;  %v585_v28 = vmul.f32 %v1127_v17, %v545_v31 }
 0x372   :  { %644 = vst [vmem:[%s1303_s7 + $0x80] sm:$0xff] %v620_v27  ;;  %645 = vst.msk [vmem:[%s1303_s7 + $0x88] sm:$0xff] %vm363_vm1, %v621_v32  ;;  %v623_v9 = vadd.f32 %v1139_v63, %v583_v22  ;;  %v586_v24 = vmul.f32 %v1130_v4, %v546_v3 }
 0x373   :  { %v624_v21 = vadd.f32 %v1142_v0, %v584_v2  ;;  %646 = vst [vmem:[%s1303_s7 + $0x90] sm:$0xff] %v622_v54  ;;  %v587_v25 = vmul.f32 %v1133_v12, %v547_v57  ;;  %v625_v10 = vadd.f32 %v1136_v38, %v585_v28 }
 0x374   :  { %647 = vst [vmem:[%s1303_s7 + $0x98] sm:$0xff] %v623_v9  ;;  %v626_v17 = vadd.f32 %v1139_v63, %v586_v24 }
 0x375   :  { %648 = vst.msk [vmem:[%s1303_s7 + $0xa0] sm:$0xff] %vm363_vm1, %v624_v21  ;;  %v627_v4 = vadd.f32 %v1142_v0, %v587_v25  ;;  %649 = vst [vmem:[%s1303_s7 + $0xa8] sm:$0xff] %v625_v10 }
 0x376   :  { %650 = vst [vmem:[%s1303_s7 + $0xb0] sm:$0xff] %v626_v17 }
 0x377   :  { %651 = vst.msk [vmem:[%s1303_s7 + $0xb8] sm:$0xff] %vm363_vm1, %v627_v4 }

// kernel: vit_forward.8
= control target key start
LH: loop header
LB: loop body
LE: loop exit
PB: predicated region body
PF: predicated region fallthrough
CT: control target
= control target key end

     0   :  { %vm52_vm0 = vcmask 261120   ;;  %vm287_vm1 = vcmask 64512   ;;  %s3307_s30 = smov 120   ;;  %s3308_s13 = smov 80   ;;  %vm648_vm2 = vcmask 1043456   ;;  %vm2573_vm3 = vcmask 523264   ;;  %s4278_s0 = inlined_call_operand.vmem [shape: f32[64,32], index: 0, kind: input, shape index: {}]   ;;  %s4279_s3 = inlined_call_operand.vmem [shape: f32[32,96], index: 3, kind: input, shape index: {}]   ;;  %s4280_s1 = inlined_call_operand.vmem [shape: f32[1,32], index: 1, kind: input, shape index: {}]   ;;  %s4281_s2 = inlined_call_operand.vmem [shape: f32[1,32], index: 2, kind: input, shape index: {}]   ;;  %s4282_s4 = inlined_call_operand.vmem [shape: f32[32,32], index: 4, kind: input, shape index: {}]   ;;  %s4283_s5 = inlined_call_operand.vmem [shape: f32[1,32], index: 5, kind: input, shape index: {}]   ;;  %s4284_s8 = inlined_call_operand.vmem [shape: f32[32,64], index: 8, kind: input, shape index: {}]   ;;  %s4285_s6 = inlined_call_operand.vmem [shape: f32[1,32], index: 6, kind: input, shape index: {}]   ;;  %s4286_s7 = inlined_call_operand.vmem [shape: f32[1,32], index: 7, kind: input, shape index: {}]   ;;  %s4287_s10 = inlined_call_operand.vmem [shape: f32[64,32], index: 10, kind: input, shape index: {}]   ;;  %s4288_s9 = inlined_call_operand.vmem [shape: f32[1,64], index: 9, kind: input, shape index: {}]   ;;  %s4289_s11 = inlined_call_operand.vmem [shape: f32[1,32], index: 11, kind: input, shape index: {}]   ;;  %s4290_s12 = inlined_call_operand.vmem [shape: f32[64,32], index: 12, kind: output, shape index: {}]  }
   0x1   :  { %v42_v0 = vld [vmem:[%s4278_s0] sm:$0xff]  ;;  %v44_v1 = vld [vmem:[%s4278_s0 + $0x10] sm:$0xff]  ;;  %v43_v2 = vld [vmem:[%s4278_s0 + $0x8] sm:$0xff]  ;;  %s3309_s14 = smov 112   ;;  %s3310_s15 = smov 64  }
   0x2   :  { %v53_v3 = vsel %vm52_vm0, %v42_v0, 0.0  ;;  %v59_v4 = vsel %vm52_vm0, %v44_v1, 0.0  ;;  %v45_v5 = vld [vmem:[%s4278_s0 + $0x18] sm:$0xff]  ;;  %v56_v6 = vsel %vm52_vm0, %v43_v2, 0.0  ;;  %v46_v26 = vld [vmem:[%s4278_s0 + $0x20] sm:$0xff]  ;;  %v47_v30 = vld [vmem:[%s4278_s0 + $0x28] sm:$0xff] }
   0x3   :  { %54 = vadd.xlane.f32.xlu0 %v53_v3  ;;  %60 = vadd.xlane.f32.xlu1 %v59_v4  ;;  %v62_v7 = vsel %vm52_vm0, %v45_v5, 0.0  ;;  %v65_v29 = vsel %vm52_vm0, %v46_v26, 0.0  ;;  %v48_v31 = vld [vmem:[%s4278_s0 + $0x30] sm:$0xff]  ;;  %v68_v32 = vsel %vm52_vm0, %v47_v30, 0.0  ;;  %v49_v34 = vld [vmem:[%s4278_s0 + $0x38] sm:$0xff]  ;;  %v190_v36 = vld [vmem:[%s4279_s3] sm:$0xff] }
   0x4   :  { %v71_v33 = vsel %vm52_vm0, %v48_v31, 0.0  ;;  %v74_v35 = vsel %vm52_vm0, %v49_v34, 0.0  ;;  %v191_v37 = vld [vmem:[%s4279_s3 + $0x8] sm:$0xff]  ;;  %v192_v38 = vld [vmem:[%s4279_s3 + $0x10] sm:$0xff]  ;;  %v193_v40 = vld [vmem:[%s4279_s3 + $0x18] sm:$0xff]  ;;  %s3311_s16 = smov 56  }
   0x5   :  { %v194_v39 = vpack.c.bf16 %v191_v37, %v190_v36  ;;  %v195_v41 = vpack.c.bf16 %v193_v40, %v192_v38  ;;  %v2671_v4 = vld [vmem:[%s4280_s1] ss:$0 sm:$0xff]  ;;  %s3305_s1 = smov 96   ;;  %s3312_s17 = smov 72  }
   0x6   :  { %s3313_s18 = smov 104   ;;  %s3314_s19 = smov 48  }
   0x7   :  { %57 = vadd.xlane.f32.xlu0 %v56_v6  ;;  %63 = vadd.xlane.f32.xlu1 %v62_v7  ;;  %s3315_s24 = smov 40  }
   0x8   :  { %2846 = vmatprep.subr.bf16.mxu0 %v194_v39 }
   0x9   :  { %2847 = vmatpush3.bf16.msra.mxu0 %v194_v39 }
   0xa   :  { %2848 = vmatprep.subr.bf16.mxu0 %v195_v41 }
   0xd   :  { %2849 = vmatpush3.bf16.msra.mxu0 %v195_v41 }
  0x90   :  { %v55_v8 = vpop.xlane.xlu0 %54  ;;  %v61_v9 = vpop.xlane.xlu1 %60 }
  0x91   :  { %v78_v10 = vmul.f32 0.03125, %v55_v8  ;;  %v80_v11 = vmul.f32 0.03125, %v61_v9 }
  0x93   :  { %v3397_v12 = vsub.f32 %v42_v0, %v78_v10  ;;  %v3399_v13 = vsub.f32 %v44_v1, %v80_v11 }
  0x94   :  { %v58_v14 = vpop.xlane.xlu0 %57  ;;  %v64_v15 = vpop.xlane.xlu1 %63 }
  0x95   :  { %v79_v16 = vmul.f32 0.03125, %v58_v14  ;;  %v81_v17 = vmul.f32 0.03125, %v64_v15  ;;  %v94_v18 = vmul.f32 %v3397_v12, %v3397_v12  ;;  %v96_v19 = vmul.f32 %v3399_v13, %v3399_v13 }
  0x97   :  { %v3405_v20 = vsub.f32 %v43_v2, %v79_v16  ;;  %v3407_v21 = vsub.f32 %v45_v5, %v81_v17  ;;  %v102_v22 = vsel %vm52_vm0, %v94_v18, 0.0  ;;  %v108_v23 = vsel %vm52_vm0, %v96_v19, 0.0 }
  0x98   :  { %103 = vadd.xlane.f32.xlu0 %v102_v22 }
  0x99   :  { %v95_v24 = vmul.f32 %v3405_v20, %v3405_v20  ;;  %v97_v25 = vmul.f32 %v3407_v21, %v3407_v21 }
  0x9b   :  { %v105_v27 = vsel %vm52_vm0, %v95_v24, 0.0  ;;  %v111_v28 = vsel %vm52_vm0, %v97_v25, 0.0 }
  0x9c   :  { %109 = vadd.xlane.f32.xlu0 %v108_v23  ;;  %106 = vadd.xlane.f32.xlu1 %v105_v27 }
  0xa0   :  { %112 = vadd.xlane.f32.xlu1 %v111_v28  ;;  %66 = vadd.xlane.f32.xlu0 %v65_v29 }
  0xa4   :  { %69 = vadd.xlane.f32.xlu1 %v68_v32  ;;  %72 = vadd.xlane.f32.xlu0 %v71_v33 }
  0xa8   :  { %75 = vadd.xlane.f32.xlu1 %v74_v35 }
 0x125   :  { %v104_v42 = vpop.xlane.xlu0 %103 }
 0x126   :  { %v126_v43 = vmul.f32 0.03125, %v104_v42 }
 0x128   :  { %v134_v44 = vadd.f32 1e-05, %v126_v43 }
 0x129   :  { %v107_v45 = vpop.xlane.xlu1 %106  ;;  %v110_v46 = vpop.xlane.xlu0 %109 }
 0x12a   :  { %3121 = vrsqrt.f32 %v134_v44  ;;  %v127_v47 = vmul.f32 0.03125, %v107_v45  ;;  %v128_v48 = vmul.f32 0.03125, %v110_v46 }
 0x12c   :  { %v135_v49 = vadd.f32 1e-05, %v127_v47  ;;  %v136_v50 = vadd.f32 1e-05, %v128_v48 }
 0x12d   :  { %v113_v51 = vpop.xlane.xlu1 %112  ;;  %v67_v52 = vpop.xlane.xlu0 %66 }
 0x12e   :  { %3123 = vrsqrt.f32 %v135_v49  ;;  %v129_v53 = vmul.f32 0.03125, %v113_v51  ;;  %v82_v54 = vmul.f32 0.03125, %v67_v52 }
 0x12f   :  { %3125 = vrsqrt.f32 %v136_v50 }
 0x130   :  { %v137_v55 = vadd.f32 1e-05, %v129_v53  ;;  %v3445_v56 = vsub.f32 %v46_v26, %v82_v54 }
 0x131   :  { %v70_v57 = vpop.xlane.xlu1 %69  ;;  %v73_v58 = vpop.xlane.xlu0 %72 }
 0x132   :  { %3127 = vrsqrt.f32 %v137_v55  ;;  %v83_v59 = vmul.f32 0.03125, %v70_v57  ;;  %v84_v60 = vmul.f32 0.03125, %v73_v58  ;;  %v98_v61 = vmul.f32 %v3445_v56, %v3445_v56 }
 0x134   :  { %v3122_v62 = vpop.eup %3121  ;;  %v91_v63 = vsub.f32 %v47_v30, %v83_v59  ;;  %v92_v0 = vsub.f32 %v48_v31, %v84_v60  ;;  %v114_v1 = vsel %vm52_vm0, %v98_v61, 0.0 }
 0x135   :  { %v150_v2 = vmul.f32 %v3122_v62, %v3397_v12  ;;  %v76_v3 = vpop.xlane.xlu1 %75  ;;  %115 = vadd.xlane.f32.xlu0 %v114_v1  ;;  %v2672_v12 = vld [vmem:[%s4281_s2] ss:$0 sm:$0xff]  ;;  %s3306_s2 = smov 88  }
 0x136   :  { %v85_v5 = vmul.f32 0.03125, %v76_v3  ;;  %v99_v6 = vmul.f32 %v91_v63, %v91_v63  ;;  %v100_v7 = vmul.f32 %v92_v0, %v92_v0 }
 0x137   :  { %v164_v16 = vmul.f32 %v2671_v4, %v150_v2 }
 0x138   :  { %v3124_v8 = vpop.eup %3123  ;;  %v93_v9 = vsub.f32 %v49_v34, %v85_v5  ;;  %v117_v10 = vsel %vm52_vm0, %v99_v6, 0.0  ;;  %v120_v11 = vsel %vm52_vm0, %v100_v7, 0.0 }
 0x139   :  { %v3126_v14 = vpop.eup %3125  ;;  %v151_v15 = vmul.f32 %v3124_v8, %v3405_v20  ;;  %118 = vadd.xlane.f32.xlu1 %v117_v10  ;;  %121 = vadd.xlane.f32.xlu0 %v120_v11  ;;  %v178_v24 = vadd.f32 %v2672_v12, %v164_v16 }
 0x13a   :  { %v152_v17 = vmul.f32 %v3126_v14, %v3399_v13  ;;  %v101_v18 = vmul.f32 %v93_v9, %v93_v9 }
 0x13b   :  { %v165_v19 = vmul.f32 %v2671_v4, %v151_v15 }
 0x13c   :  { %v3128_v22 = vpop.eup %3127  ;;  %v123_v23 = vsel %vm52_vm0, %v101_v18, 0.0  ;;  %v166_v27 = vmul.f32 %v2671_v4, %v152_v17 }
 0x13d   :  { %v179_v25 = vadd.f32 %v2672_v12, %v165_v19  ;;  %v153_v26 = vmul.f32 %v3128_v22, %v3407_v21  ;;  %124 = vadd.xlane.f32.xlu1 %v123_v23 }
 0x13e   :  { %v180_v29 = vadd.f32 %v2672_v12, %v166_v27 }
 0x13f   :  { %v186_v20 = vpack.c.bf16 %v179_v25, %v178_v24  ;;  %v167_v28 = vmul.f32 %v2671_v4, %v153_v26 }
 0x141   :  { %2850 = vmatprep.mubr.msk.bf16.mxu0 %vm52_vm0, %v186_v20  ;;  %v181_v30 = vadd.f32 %v2672_v12, %v167_v28 }
 0x143   :  { %v187_v31 = vpack.c.bf16 %v181_v30, %v180_v29 }
 0x145   :  { %2851 = vmatmul.mubr.msk.bf16.vlgmr.msra.gmra.mrb[0].mxu0 %vm52_vm0, %v187_v31 }
 0x1c2   :  { %v116_v13 = vpop.xlane.xlu0 %115 }
 0x1c3   :  { %v130_v32 = vmul.f32 0.03125, %v116_v13 }
 0x1c5   :  { %v138_v33 = vadd.f32 1e-05, %v130_v32 }
 0x1c6   :  { %v119_v34 = vpop.xlane.xlu1 %118  ;;  %v122_v35 = vpop.xlane.xlu0 %121 }
 0x1c7   :  { %v131_v36 = vmul.f32 0.03125, %v119_v34  ;;  %3129 = vrsqrt.f32 %v138_v33  ;;  %v132_v37 = vmul.f32 0.03125, %v122_v35 }
 0x1c9   :  { %v139_v21 = vadd.f32 1e-05, %v131_v36  ;;  %v140_v38 = vadd.f32 1e-05, %v132_v37 }
 0x1ca   :  { %v125_v39 = vpop.xlane.xlu1 %124 }
 0x1cb   :  { %3131 = vrsqrt.f32 %v139_v21  ;;  %v133_v40 = vmul.f32 0.03125, %v125_v39 }
 0x1cc   :  { %3133 = vrsqrt.f32 %v140_v38 }
 0x1cd   :  { %v141_v41 = vadd.f32 1e-05, %v133_v40 }
 0x1cf   :  { %3135 = vrsqrt.f32 %v141_v41 }
 0x1d1   :  { %v3130_v42 = vpop.eup %3129 }
 0x1d2   :  { %v154_v43 = vmul.f32 %v3130_v42, %v3445_v56 }
 0x1d4   :  { %v168_v44 = vmul.f32 %v2671_v4, %v154_v43 }
 0x1d5   :  { %v3132_v45 = vpop.eup %3131 }
 0x1d6   :  { %v3134_v46 = vpop.eup %3133  ;;  %v155_v47 = vmul.f32 %v3132_v45, %v91_v63  ;;  %v182_v50 = vadd.f32 %v2672_v12, %v168_v44 }
 0x1d7   :  { %v156_v48 = vmul.f32 %v3134_v46, %v92_v0 }
 0x1d8   :  { %v169_v49 = vmul.f32 %v2671_v4, %v155_v47 }
 0x1d9   :  { %v3136_v51 = vpop.eup %3135  ;;  %v170_v52 = vmul.f32 %v2671_v4, %v156_v48 }
 0x1da   :  { %v183_v53 = vadd.f32 %v2672_v12, %v169_v49  ;;  %v157_v54 = vmul.f32 %v3136_v51, %v93_v9 }
 0x1db   :  { %v184_v58 = vadd.f32 %v2672_v12, %v170_v52 }
 0x1dc   :  { %v188_v55 = vpack.c.bf16 %v183_v53, %v182_v50  ;;  %v171_v57 = vmul.f32 %v2671_v4, %v157_v54 }
 0x1de   :  { %2854 = vmatprep.mubr.msk.bf16.mxu0 %vm52_vm0, %v188_v55  ;;  %v185_v59 = vadd.f32 %v2672_v12, %v171_v57 }
 0x1e0   :  { %v189_v60 = vpack.c.bf16 %v185_v59, %v184_v58 }
 0x1e2   :  { %2855 = vmatmul.mubr.msk.bf16.gmra.mrb[4].mxu0 %vm52_vm0, %v189_v60 }
 0x218   :  { %v2852_v56 = vpop.f32.mrb[0].mxu0 }
 0x219   :  { %v242_v61 = vpop.f32.mrb[1].mxu0  ;;  %v275_v63 = vmul.f32 0.35355338, %v2852_v56 }
 0x21a   :  { %v2853_v62 = vpop.f32.mrb[2].mxu0  ;;  %v273_v3 = vmul.f32 0.35355338, %v242_v61 }
 0x21b   :  { %v276_v0 = vmul.f32 0.35355338, %v2853_v62  ;;  %v3468_v1 = vpack.c.bf16 %v2853_v62, %v2852_v56  ;;  %v245_v2 = vpop.f32.mrb[3].mxu0 }
 0x21c   :  { %v274_v5 = vmul.f32 0.35355338, %v245_v2  ;;  %v3470_v6 = vpack.c.bf16 %v245_v2, %v242_v61 }
 0x21d   :  { %v3472_v4 = vpack.c.bf16 %v276_v0, %v275_v63  ;;  %285 = vrot.lane.b32.xlu1 %v3468_v1, %s3305_s1 }
 0x21e   :  { %v3476_v7 = vpack.c.bf16 %v274_v5, %v273_v3  ;;  %283 = vrot.lane.b32.xlu0 %v3470_v6, %s3305_s1 }
 0x220   :  { %2862 = vmatprep.mubr.msk.bf16.mxu0 %vm287_vm1, %v3476_v7 }
 0x221   :  { %466 = vrot.lane.b32.xlu1 %v3470_v6, %s3306_s2 }
 0x222   :  { %462 = vrot.lane.b32.xlu0 %v3476_v7, %s3307_s30 }
 0x225   :  { %468 = vrot.lane.b32.xlu1 %v3468_v1, %s3306_s2 }
 0x226   :  { %763 = vrot.lane.b32.xlu0 %v3470_v6, %s3308_s13 }
 0x229   :  { %464 = vrot.lane.b32.xlu1 %v3472_v4, %s3307_s30 }
 0x22a   :  { %759 = vrot.lane.b32.xlu0 %v3476_v7, %s3309_s14 }
 0x22d   :  { %765 = vrot.lane.b32.xlu1 %v3468_v1, %s3308_s13 }
 0x231   :  { %761 = vrot.lane.b32.xlu1 %v3472_v4, %s3309_s14 }
 0x235   :  { %393 = vrot.lane.b32.xlu1 %v3468_v1, %s3310_s15 }
 0x239   :  { %573 = vrot.lane.b32.xlu1 %v3470_v6, %s3311_s16 }
 0x28f   :  { %v286_v8 = vpop.permute.xlu1 %285 }
 0x290   :  { %v284_v9 = vpop.permute.xlu0 %283  ;;  %v298_v12 = vsel %vm287_vm1, %v286_v8, 0 }
 0x291   :  { %3086 = vmatprep.subr.msk.bf16.mxu0 %vm287_vm1, %v284_v9  ;;  %v295_v10 = vsel %vm287_vm1, %v284_v9, 0 }
 0x292   :  { %2859 = vmatpush3.bf16.xpose.msra.mxu0 %v295_v10 }
 0x293   :  { %v467_v11 = vpop.permute.xlu1 %466  ;;  %3087 = vmatprep.subr.msk.bf16.mxu0 %vm287_vm1, %v286_v8 }
 0x294   :  { %3088 = vmatprep.subr.msk.bf16.mxu1 %vm287_vm1, %v467_v11  ;;  %v463_v14 = vpop.permute.xlu0 %462  ;;  %v477_v15 = vsel %vm287_vm1, %v467_v11, 0 }
 0x295   :  { %2875 = vmatpush3.bf16.xpose.msra.mxu1 %v477_v15  ;;  %2878 = vmatprep.mubr.msk.bf16.mxu1 %vm287_vm1, %v463_v14 }
 0x297   :  { %v469_v16 = vpop.permute.xlu1 %468 }
 0x298   :  { %3089 = vmatprep.subr.msk.bf16.mxu1 %vm287_vm1, %v469_v16  ;;  %v480_v17 = vsel %vm287_vm1, %v469_v16, 0  ;;  %v764_v18 = vpop.permute.xlu0 %763 }
 0x299   :  { %v774_v23 = vsel %vm287_vm1, %v764_v18, 0 }
 0x29a   :  { %2861 = vmatpush3.bf16.xpose.msra.mxu0 %v298_v12 }
 0x29b   :  { %v465_v19 = vpop.permute.xlu1 %464 }
 0x29c   :  { %v760_v22 = vpop.permute.xlu0 %759 }
 0x29d   :  { %2877 = vmatpush3.bf16.xpose.msra.mxu1 %v480_v17 }
 0x29e   :  { %3092 = vmatprep.subr.msk.bf16.mxu1 %vm287_vm1, %v764_v18 }
 0x29f   :  { %v766_v24 = vpop.permute.xlu1 %765 }
 0x2a0   :  { %v777_v25 = vsel %vm287_vm1, %v766_v24, 0 }
 0x2a1   :  { %2863 = vmatmul.mubr.msk.bf16.vlgmr.msra.gmra.mrb[8].mxu0 %vm287_vm1, %v3472_v4 }
 0x2a3   :  { %v762_v26 = vpop.permute.xlu1 %761 }
 0x2a4   :  { %2879 = vmatmul.mubr.msk.bf16.vlgmr.msra.gmra.mrb[0].mxu1 %vm287_vm1, %v465_v19 }
 0x2a5   :  { %2903 = vmatpush3.bf16.xpose.msra.mxu1 %v774_v23  ;;  %2906 = vmatprep.mubr.msk.bf16.mxu1 %vm287_vm1, %v760_v22 }
 0x2a6   :  { %3093 = vmatprep.subr.msk.bf16.mxu1 %vm287_vm1, %v766_v24 }
 0x2a7   :  { %v394_v57 = vpop.permute.xlu1 %393 }
 0x2ab   :  { %v3559_v59 = vpop.permute.xlu1 %573 }
 0x2ad   :  { %2905 = vmatpush3.bf16.xpose.msra.mxu1 %v777_v25 }
 0x2b4   :  { %2907 = vmatmul.mubr.msk.bf16.vlgmr.msra.gmra.mrb[4].mxu1 %vm287_vm1, %v762_v26 }
 0x2b5   :  { %v2856_v27 = vpop.f32.mrb[4].mxu0 }
 0x2b6   :  { %v1249_v20 = vmul.f32 0.35355338, %v2856_v27  ;;  %v258_v28 = vpop.f32.mrb[5].mxu0 }
 0x2b7   :  { %v1247_v29 = vmul.f32 0.35355338, %v258_v28  ;;  %v2857_v30 = vpop.f32.mrb[6].mxu0 }
 0x2b8   :  { %v1250_v31 = vmul.f32 0.35355338, %v2857_v30  ;;  %v3520_v13 = vpack.c.bf16 %v2857_v30, %v2856_v27  ;;  %v261_v32 = vpop.f32.mrb[7].mxu0 }
 0x2b9   :  { %v1248_v33 = vmul.f32 0.35355338, %v261_v32  ;;  %v3522_v34 = vpack.c.bf16 %v261_v32, %v258_v28 }
 0x2ba   :  { %v3524_v35 = vpack.c.bf16 %v1250_v31, %v1249_v20 }
 0x2bb   :  { %v3526_v36 = vpack.c.bf16 %v1248_v33, %v1247_v29 }
 0x374   :  { %v2864_v37 = vpop.f32.mrb[8].mxu0 }
 0x375   :  { %v334_v21 = vpop.f32.mrb[9].mxu0  ;;  %v355_v38 = vsel %vm52_vm0, %v2864_v37, -inf }
 0x376   :  { %356 = vmax.xlane.f32.xlu0 %v355_v38  ;;  %v3529_v39 = vpop.f32.mrb[10].mxu0  ;;  %v349_v47 = vsel %vm52_vm0, %v334_v21, -inf }
 0x377   :  { %v337_v40 = vpop.f32.mrb[11].mxu0  ;;  %v2880_v41 = vpop.f32.mrb[0].mxu1  ;;  %v358_v51 = vsel %vm52_vm0, %v3529_v39, -inf }
 0x378   :  { %v516_v42 = vpop.f32.mrb[1].mxu1  ;;  %v537_v43 = vsel %vm52_vm0, %v2880_v41, -inf  ;;  %v352_v48 = vsel %vm52_vm0, %v337_v40, -inf }
 0x379   :  { %v2881_v44 = vpop.f32.mrb[2].mxu1  ;;  %v531_v49 = vsel %vm52_vm0, %v516_v42, -inf }
 0x37a   :  { %538 = vmax.xlane.f32.xlu0 %v537_v43  ;;  %v519_v45 = vpop.f32.mrb[3].mxu1  ;;  %v540_v46 = vsel %vm52_vm0, %v2881_v44, -inf }
 0x37b   :  { %541 = vmax.xlane.f32.xlu1 %v540_v46  ;;  %v534_v50 = vsel %vm52_vm0, %v519_v45, -inf }
 0x37e   :  { %350 = vmax.xlane.f32.xlu0 %v349_v47 }
 0x37f   :  { %353 = vmax.xlane.f32.xlu1 %v352_v48 }
 0x382   :  { %532 = vmax.xlane.f32.xlu0 %v531_v49 }
 0x383   :  { %535 = vmax.xlane.f32.xlu1 %v534_v50 }
 0x386   :  { %359 = vmax.xlane.f32.xlu0 %v358_v51 }
 0x387   :  { %v3539_v52 = vpop.f32.mrb[4].mxu1 }
 0x388   :  { %v3541_v53 = vpop.f32.mrb[5].mxu1 }
 0x389   :  { %v3543_v54 = vpop.f32.mrb[6].mxu1 }
 0x38a   :  { %v3545_v55 = vpop.f32.mrb[7].mxu1 }
 0x38b   :  { %v831_v50 = vsel %vm52_vm0, %v3545_v55, -inf }
 0x394   :  { %575 = vrot.lane.b32.xlu1 %v3468_v1, %s3311_s16 }
 0x398   :  { %1007 = vrot.lane.b32.xlu1 %v3468_v1, %s3312_s17 }
 0x39c   :  { %391 = vrot.lane.b32.xlu0 %v3470_v6, %s3310_s15  ;;  %1003 = vrot.lane.b32.xlu1 %v3472_v4, %s3313_s18 }
 0x3a0   :  { %1005 = vrot.lane.b32.xlu0 %v3470_v6, %s3312_s17 }
 0x3a4   :  { %1001 = vrot.lane.b32.xlu0 %v3476_v7, %s3313_s18 }
 0x403   :  { %v357_v58 = vpop.xlane.xlu0 %356 }
 0x404   :  { %v363_v9 = vsub.f32 %v2864_v37, %v357_v58  ;;  %v837_v58 = vsel %vm52_vm0, %v3543_v54, -inf }
 0x406   :  { %v369_v12 = vmul.f32 1.442695, %v363_v9 }
 0x407   :  { %v539_v60 = vpop.xlane.xlu0 %538 }
 0x408   :  { %v545_v56 = vsub.f32 %v2880_v41, %v539_v60  ;;  %v542_v61 = vpop.xlane.xlu1 %541 }
 0x409   :  { %v546_v62 = vsub.f32 %v2881_v44, %v542_v61 }
 0x40a   :  { %v551_v63 = vmul.f32 1.442695, %v545_v56  ;;  %v640_v56 = vld [vmem:[%s4282_s4 + $0x8] sm:$0xff] }
 0x40b   :  { %v553_v0 = vmul.f32 1.442695, %v546_v62  ;;  %v351_v2 = vpop.xlane.xlu0 %350  ;;  %v3611_v61 = vpack.c.bf16 %v640_v56, %v640_v56 }
 0x40c   :  { %3137 = vpow2.f32 %v551_v63  ;;  %v361_v3 = vsub.f32 %v334_v21, %v351_v2  ;;  %v354_v5 = vpop.xlane.xlu1 %353  ;;  %v458_v63 = vld [vmem:[%s4282_s4] sm:$0xff] }
 0x40d   :  { %3139 = vpow2.f32 %v553_v0  ;;  %v362_v4 = vsub.f32 %v337_v40, %v354_v5  ;;  %v3617_v62 = vsel %vm648_vm2, %v3611_v61, 0  ;;  %v3623_v0 = vpack.c.bf16 %v458_v63, %v458_v63 }
 0x40e   :  { %v365_v8 = vmul.f32 1.442695, %v361_v3 }
 0x40f   :  { %v367_v10 = vmul.f32 1.442695, %v362_v4  ;;  %v533_v7 = vpop.xlane.xlu0 %532 }
 0x410   :  { %3141 = vpow2.f32 %v365_v8  ;;  %v543_v11 = vsub.f32 %v516_v42, %v533_v7  ;;  %v536_v14 = vpop.xlane.xlu1 %535 }
 0x411   :  { %3143 = vpow2.f32 %v367_v10  ;;  %v544_v15 = vsub.f32 %v519_v45, %v536_v14 }
 0x412   :  { %v547_v16 = vmul.f32 1.442695, %v543_v11 }
 0x413   :  { %v549_v17 = vmul.f32 1.442695, %v544_v15  ;;  %v360_v18 = vpop.xlane.xlu0 %359 }
 0x414   :  { %3145 = vpow2.f32 %v547_v16  ;;  %v364_v19 = vsub.f32 %v3529_v39, %v360_v18  ;;  %v576_v27 = vpop.permute.xlu1 %575 }
 0x415   :  { %3147 = vpow2.f32 %v549_v17 }
 0x416   :  { %v3138_v22 = vpop.eup %3137  ;;  %v371_v23 = vmul.f32 1.442695, %v364_v19  ;;  %3149 = vpow2.f32 %v369_v12 }
 0x417   :  { %v3140_v24 = vpop.eup %3139  ;;  %v392_v25 = vpop.permute.xlu0 %391  ;;  %v561_v26 = vsel %vm52_vm0, %v3138_v22, 0.0 }
 0x418   :  { %3151 = vpow2.f32 %v371_v23  ;;  %562 = vadd.xlane.f32.xlu0 %v561_v26  ;;  %2866 = vmatprep.subr.bf16.mxu0 %v392_v25  ;;  %v572_v20 = vpack.c.bf16 %v3140_v24, %v3138_v22  ;;  %v1008_v37 = vpop.permute.xlu1 %1007  ;;  %v564_v47 = vsel %vm52_vm0, %v3140_v24, 0.0 }
 0x419   :  { %2867 = vmatpush3.bf16.msra.mxu0 %v392_v25  ;;  %v1019_v46 = vsel %vm287_vm1, %v1008_v37, 0 }
 0x41a   :  { %v3142_v28 = vpop.eup %3141  ;;  %2868 = vmatprep.subr.bf16.mxu0 %v394_v57 }
 0x41b   :  { %v3144_v29 = vpop.eup %3143  ;;  %v1006_v30 = vpop.permute.xlu0 %1005  ;;  %v373_v43 = vsel %vm52_vm0, %v3142_v28, 0.0 }
 0x41c   :  { %3095 = vmatprep.subr.msk.bf16.mxu1 %vm287_vm1, %v1006_v30  ;;  %v1016_v31 = vsel %vm287_vm1, %v1006_v30, 0  ;;  %v389_v32 = vpack.c.bf16 %v3144_v29, %v3142_v28  ;;  %v1004_v51 = vpop.permute.xlu1 %1003  ;;  %v376_v60 = vsel %vm52_vm0, %v3144_v29, 0.0 }
 0x41d   :  { %2869 = vmatpush3.bf16.msra.mxu0 %v394_v57  ;;  %2925 = vmatpush3.bf16.xpose.msra.mxu1 %v1016_v31  ;;  %v828_v57 = vsel %vm52_vm0, %v3541_v53, -inf }
 0x41e   :  { %v3146_v33 = vpop.eup %3145  ;;  %2870 = vmatprep.mubr.msk.bf16.mxu0 %vm52_vm0, %v389_v32  ;;  %2882 = vmatprep.subr.bf16.mxu0 %v3559_v59 }
 0x41f   :  { %v3148_v21 = vpop.eup %3147  ;;  %3096 = vmatprep.subr.msk.bf16.mxu1 %vm287_vm1, %v1008_v37  ;;  %v1002_v38 = vpop.permute.xlu0 %1001  ;;  %v555_v39 = vsel %vm52_vm0, %v3146_v33, 0.0 }
 0x420   :  { %556 = vadd.xlane.f32.xlu0 %v555_v39  ;;  %2928 = vmatprep.mubr.msk.bf16.mxu1 %vm287_vm1, %v1002_v38  ;;  %v571_v40 = vpack.c.bf16 %v3148_v21, %v3146_v33  ;;  %v3150_v41 = vpop.eup %3149  ;;  %v558_v48 = vsel %vm52_vm0, %v3148_v21, 0.0 }
 0x421   :  { %v379_v49 = vsel %vm52_vm0, %v3150_v41, 0.0 }
 0x422   :  { %v3152_v42 = vpop.eup %3151 }
 0x423   :  { %v382_v44 = vsel %vm52_vm0, %v3152_v42, 0.0  ;;  %v390_v45 = vpack.c.bf16 %v3152_v42, %v3150_v41 }
 0x424   :  { %374 = vadd.xlane.f32.xlu0 %v373_v43  ;;  %383 = vadd.xlane.f32.xlu1 %v382_v44 }
 0x425   :  { %2871 = vmatmul.mubr.msk.bf16.vlgmr.msra.gmra.mrb[12].mxu0 %vm52_vm0, %v390_v45  ;;  %2927 = vmatpush3.bf16.xpose.msra.mxu1 %v1019_v46 }
 0x426   :  { %2883 = vmatpush3.bf16.msra.mxu0 %v3559_v59  ;;  %2886 = vmatprep.mubr.msk.bf16.mxu0 %vm52_vm0, %v571_v40  ;;  %v834_v59 = vsel %vm52_vm0, %v3539_v52, -inf }
 0x427   :  { %2884 = vmatprep.subr.bf16.mxu0 %v576_v27 }
 0x428   :  { %565 = vadd.xlane.f32.xlu0 %v564_v47  ;;  %559 = vadd.xlane.f32.xlu1 %v558_v48 }
 0x42a   :  { %2885 = vmatpush3.bf16.msra.mxu0 %v576_v27 }
 0x42b   :  { %3090 = vmatprep.subr.msk.bf16.mxu0 %vm648_vm2, %v3611_v61 }
 0x42c   :  { %380 = vadd.xlane.f32.xlu0 %v379_v49  ;;  %832 = vmax.xlane.f32.xlu1 %v831_v50 }
 0x42d   :  { %2929 = vmatmul.mubr.msk.bf16.vlgmr.msra.gmra.mrb[8].mxu1 %vm287_vm1, %v1004_v51  ;;  %2887 = vmatmul.mubr.msk.bf16.vlgmr.msra.gmra.mrb[16].mxu0 %vm52_vm0, %v572_v20 }
 0x42e   :  { %2950 = vmatprep.mubr.msk.bf16.mxu1 %vm287_vm1, %v3526_v36  ;;  %2891 = vmatpush3.bf16.msra.mxu0 %v3617_v62 }
 0x42f   :  { %3091 = vmatprep.subr.msk.bf16.mxu0 %vm648_vm2, %v3623_v0 }
 0x430   :  { %829 = vmax.xlane.f32.xlu0 %v828_v57  ;;  %838 = vmax.xlane.f32.xlu1 %v837_v58 }
 0x434   :  { %835 = vmax.xlane.f32.xlu0 %v834_v59  ;;  %377 = vadd.xlane.f32.xlu1 %v376_v60 }
 0x445   :  { %872 = vrot.lane.b32.xlu1 %v3468_v1, %s3314_s19 }
 0x449   :  { %1257 = vrot.lane.b32.xlu1 %v3522_v34, %s3305_s1 }
 0x44a   :  { %870 = vrot.lane.b32.xlu0 %v3470_v6, %s3314_s19 }
 0x44d   :  { %1259 = vrot.lane.b32.xlu1 %v3520_v13, %s3305_s1 }
 0x44e   :  { %1439 = vrot.lane.b32.xlu0 %v3522_v34, %s3306_s2 }
 0x451   :  { %1441 = vrot.lane.b32.xlu1 %v3520_v13, %s3306_s2 }
 0x452   :  { %1435 = vrot.lane.b32.xlu0 %v3526_v36, %s3307_s30 }
 0x455   :  { %1437 = vrot.lane.b32.xlu1 %v3524_v35, %s3307_s30 }
 0x4a5   :  { %v563_v2 = vpop.xlane.xlu0 %562 }
 0x4ad   :  { %v557_v3 = vpop.xlane.xlu0 %556 }
 0x4b1   :  { %v384_v5 = vpop.xlane.xlu1 %383  ;;  %v375_v4 = vpop.xlane.xlu0 %374 }
 0x4b5   :  { %v560_v8 = vpop.xlane.xlu1 %559  ;;  %v566_v9 = vpop.xlane.xlu0 %565 }
 0x4b9   :  { %v833_v10 = vpop.xlane.xlu1 %832  ;;  %v381_v7 = vpop.xlane.xlu0 %380 }
 0x4ba   :  { %v841_v11 = vsub.f32 %v3545_v55, %v833_v10 }
 0x4bc   :  { %v846_v16 = vmul.f32 1.442695, %v841_v11 }
 0x4bd   :  { %v839_v14 = vpop.xlane.xlu1 %838  ;;  %v830_v15 = vpop.xlane.xlu0 %829 }
 0x4be   :  { %v843_v12 = vsub.f32 %v3543_v54, %v839_v14  ;;  %v840_v17 = vsub.f32 %v3541_v53, %v830_v15  ;;  %3153 = vpow2.f32 %v846_v16 }
 0x4c0   :  { %v844_v18 = vmul.f32 1.442695, %v840_v17  ;;  %v850_v19 = vmul.f32 1.442695, %v843_v12 }
 0x4c1   :  { %v378_v22 = vpop.xlane.xlu1 %377  ;;  %v836_v23 = vpop.xlane.xlu0 %835 }
 0x4c2   :  { %v842_v24 = vsub.f32 %v3539_v52, %v836_v23  ;;  %3155 = vpow2.f32 %v844_v18 }
 0x4c3   :  { %3157 = vpow2.f32 %v850_v19 }
 0x4c4   :  { %v848_v25 = vmul.f32 1.442695, %v842_v24  ;;  %v3669_v24 = vsel %vm648_vm2, %v3623_v0, 0 }
 0x4c5   :  { %v3631_v26 = vpop.permute.xlu1 %872  ;;  %v3639_v20 = vpop.permute.xlu0 %870 }
 0x4c6   :  { %3159 = vpow2.f32 %v848_v25 }
 0x4c7   :  { %3161 = vrcp.f32 %v381_v7 }
 0x4c8   :  { %v3635_v53 = vpop.eup %3153  ;;  %3163 = vrcp.f32 %v384_v5 }
 0x4c9   :  { %v1258_v55 = vpop.permute.xlu1 %1257  ;;  %v1440_v33 = vpop.permute.xlu0 %1439  ;;  %3165 = vrcp.f32 %v375_v4 }
 0x4ca   :  { %v1268_v27 = vsel %vm287_vm1, %v1258_v55, 0  ;;  %3098 = vmatprep.subr.msk.bf16.mxu1 %vm287_vm1, %v1258_v55  ;;  %v1450_v37 = vsel %vm287_vm1, %v1440_v33, 0  ;;  %3167 = vrcp.f32 %v378_v22 }
 0x4cb   :  { %2947 = vmatpush3.bf16.xpose.msra.mxu1 %v1268_v27  ;;  %3169 = vrcp.f32 %v563_v2  ;;  %v855_v27 = vsel %vm52_vm0, %v3635_v53, 0.0 }
 0x4cc   :  { %v3637_v54 = vpop.eup %3155  ;;  %3171 = vrcp.f32 %v557_v3 }
 0x4cd   :  { %v1260_v28 = vpop.permute.xlu1 %1259  ;;  %v868_v52 = vpack.c.bf16 %v3635_v53, %v3637_v54  ;;  %v3644_v29 = vpop.eup %3157  ;;  %3173 = vrcp.f32 %v566_v9 }
 0x4ce   :  { %3099 = vmatprep.subr.msk.bf16.mxu1 %vm287_vm1, %v1260_v28  ;;  %v1271_v32 = vsel %vm287_vm1, %v1260_v28, 0  ;;  %v1436_v21 = vpop.permute.xlu0 %1435  ;;  %3175 = vrcp.f32 %v560_v8  ;;  %v852_v28 = vsel %vm52_vm0, %v3637_v54, 0.0 }
 0x4d0   :  { %v3646_v30 = vpop.eup %3159 }
 0x4d1   :  { %v869_v31 = vpack.c.bf16 %v3644_v29, %v3646_v30  ;;  %v1442_v38 = vpop.permute.xlu1 %1441  ;;  %v3162_v41 = vpop.eup %3161  ;;  %v858_v55 = vsel %vm52_vm0, %v3646_v30, 0.0 }
 0x4d2   :  { %v1453_v39 = vsel %vm287_vm1, %v1442_v38, 0  ;;  %v3164_v43 = vpop.eup %3163 }
 0x4d3   :  { %2949 = vmatpush3.bf16.xpose.msra.mxu1 %v1271_v32  ;;  %v3166_v46 = vpop.eup %3165  ;;  %v861_v32 = vsel %vm52_vm0, %v3644_v29, 0.0 }
 0x4d4   :  { %3100 = vmatprep.subr.msk.bf16.mxu1 %vm287_vm1, %v1440_v33  ;;  %v3168_v48 = vpop.eup %3167 }
 0x4d5   :  { %v1438_v40 = vpop.permute.xlu1 %1437  ;;  %v3170_v60 = vpop.eup %3169 }
 0x4d6   :  { %v3172_v2 = vpop.eup %3171 }
 0x4d7   :  { %v3174_v4 = vpop.eup %3173 }
 0x4d8   :  { %v3176_v11 = vpop.eup %3175 }
 0x4da   :  { %2951 = vmatmul.mubr.msk.bf16.vlgmr.msra.gmra.mrb[12].mxu1 %vm287_vm1, %v3524_v35 }
 0x4db   :  { %2963 = vmatpush3.bf16.xpose.msra.mxu1 %v1450_v37  ;;  %2966 = vmatprep.mubr.msk.bf16.mxu1 %vm287_vm1, %v1436_v21 }
 0x4dc   :  { %3101 = vmatprep.subr.msk.bf16.mxu1 %vm287_vm1, %v1442_v38 }
 0x4e3   :  { %2965 = vmatpush3.bf16.xpose.msra.mxu1 %v1453_v39 }
 0x4ea   :  { %2967 = vmatmul.mubr.msk.bf16.vlgmr.msra.gmra.mrb[16].mxu1 %vm287_vm1, %v1438_v40 }
 0x4f8   :  { %v2872_v42 = vpop.f32.mrb[12].mxu0 }
 0x4f9   :  { %v454_v44 = vmul.f32 %v3162_v41, %v2872_v42  ;;  %v437_v45 = vpop.f32.mrb[13].mxu0 }
 0x4fa   :  { %v2873_v47 = vpop.f32.mrb[14].mxu0  ;;  %v452_v51 = vmul.f32 %v3166_v46, %v437_v45 }
 0x4fb   :  { %v455_v49 = vmul.f32 %v3164_v43, %v2873_v47  ;;  %v440_v50 = vpop.f32.mrb[15].mxu0 }
 0x4fc   :  { %v453_v57 = vmul.f32 %v3168_v48, %v440_v50 }
 0x4fd   :  { %v457_v58 = vpack.c.bf16 %v455_v49, %v454_v44 }
 0x4fe   :  { %v456_v59 = vpack.c.bf16 %v453_v57, %v452_v51 }
 0x500   :  { %v3659_v56 = vpop.f32.mrb[8].mxu1  ;;  %v2888_v63 = vpop.f32.mrb[16].mxu0 }
 0x501   :  { %v1055_v3 = vpop.f32.mrb[9].mxu1  ;;  %v619_v5 = vpop.f32.mrb[17].mxu0  ;;  %v636_v14 = vmul.f32 %v3170_v60, %v2888_v63  ;;  %v1076_v23 = vsel %vm52_vm0, %v3659_v56, -inf }
 0x502   :  { %v634_v8 = vmul.f32 %v3172_v2, %v619_v5  ;;  %v3661_v9 = vpop.f32.mrb[10].mxu1  ;;  %v2889_v10 = vpop.f32.mrb[18].mxu0  ;;  %v1070_v7 = vsel %vm52_vm0, %v1055_v3, -inf }
 0x503   :  { %v637_v15 = vmul.f32 %v3174_v4, %v2889_v10  ;;  %1071 = vmax.xlane.f32.xlu0 %v1070_v7  ;;  %v1058_v16 = vpop.f32.mrb[11].mxu1  ;;  %v622_v12 = vpop.f32.mrb[19].mxu0  ;;  %v1079_v25 = vsel %vm52_vm0, %v3661_v9, -inf }
 0x504   :  { %v635_v17 = vmul.f32 %v3176_v11, %v622_v12  ;;  %v1073_v18 = vsel %vm52_vm0, %v1058_v16, -inf }
 0x505   :  { %v639_v19 = vpack.c.bf16 %v637_v15, %v636_v14  ;;  %1074 = vmax.xlane.f32.xlu1 %v1073_v18 }
 0x506   :  { %v638_v22 = vpack.c.bf16 %v635_v17, %v634_v8 }
 0x507   :  { %1077 = vmax.xlane.f32.xlu0 %v1076_v23 }
 0x508   :  { %2892 = vmatprep.mubr.msk.bf16.mxu0 %vm287_vm1, %v638_v22 }
 0x509   :  { %1080 = vmax.xlane.f32.xlu1 %v1079_v25  ;;  %2893 = vmatmul.mubr.msk.bf16.vlgmr.msra.gmra.mrb[20].mxu0 %vm287_vm1, %v639_v19 }
 0x50a   :  { %2897 = vmatpush3.bf16.msra.mxu0 %v3669_v24  ;;  %2898 = vmatprep.mubr.msk.bf16.mxu0 %vm287_vm1, %v456_v59 }
 0x50b   :  { %859 = vadd.xlane.f32.xlu0 %v858_v55  ;;  %2910 = vmatprep.subr.bf16.mxu0 %v3639_v20 }
 0x50d   :  { %856 = vadd.xlane.f32.xlu1 %v855_v27 }
 0x50f   :  { %853 = vadd.xlane.f32.xlu0 %v852_v28 }
 0x513   :  { %862 = vadd.xlane.f32.xlu0 %v861_v32 }
 0x515   :  { %2899 = vmatmul.mubr.msk.bf16.vlgmr.msra.gmra.mrb[20].mxu0 %vm287_vm1, %v457_v58 }
 0x516   :  { %2911 = vmatpush3.bf16.msra.mxu0 %v3639_v20  ;;  %2914 = vmatprep.mubr.msk.bf16.mxu0 %vm52_vm0, %v868_v52  ;;  %v937_v20 = vld [vmem:[%s4282_s4 + $0x10] sm:$0xff] }
 0x517   :  { %2912 = vmatprep.subr.bf16.mxu0 %v3631_v26  ;;  %v3705_v53 = vpack.c.bf16 %v937_v20, %v937_v20 }
 0x51a   :  { %2913 = vmatpush3.bf16.msra.mxu0 %v3631_v26  ;;  %v3711_v26 = vsel %vm648_vm2, %v3705_v53, 0 }
 0x51b   :  { %3094 = vmatprep.subr.msk.bf16.mxu0 %vm648_vm2, %v3705_v53 }
 0x51d   :  { %2915 = vmatmul.mubr.msk.bf16.vlgmr.msra.gmra.mrb[24].mxu0 %vm52_vm0, %v869_v31 }
 0x51e   :  { %1114 = vrot.lane.b32.xlu1 %v3468_v1, %s3315_s24  ;;  %2919 = vmatpush3.bf16.msra.mxu0 %v3711_v26 }
 0x522   :  { %1735 = vrot.lane.b32.xlu1 %v3522_v34, %s3308_s13 }
 0x526   :  { %1737 = vrot.lane.b32.xlu1 %v3520_v13, %s3308_s13 }
 0x529   :  { %1112 = vrot.lane.b32.xlu0 %v3470_v6, %s3315_s24 }
 0x52a   :  { %1733 = vrot.lane.b32.xlu1 %v3524_v35, %s3309_s14 }
 0x52d   :  { %1731 = vrot.lane.b32.xlu0 %v3526_v36, %s3309_s14 }
 0x590   :  { %v1072_v1 = vpop.xlane.xlu0 %1071 }
 0x591   :  { %v1082_v54 = vsub.f32 %v1055_v3, %v1072_v1 }
 0x592   :  { %v1075_v52 = vpop.xlane.xlu1 %1074 }
 0x593   :  { %v1086_v29 = vmul.f32 1.442695, %v1082_v54  ;;  %v1083_v30 = vsub.f32 %v1058_v16, %v1075_v52 }
 0x594   :  { %v1078_v31 = vpop.xlane.xlu0 %1077 }
 0x595   :  { %v1088_v33 = vmul.f32 1.442695, %v1083_v30  ;;  %v1084_v37 = vsub.f32 %v3659_v56, %v1078_v31  ;;  %3177 = vpow2.f32 %v1086_v29 }
 0x596   :  { %v1081_v21 = vpop.xlane.xlu1 %1080 }
 0x597   :  { %3179 = vpow2.f32 %v1088_v33  ;;  %v1090_v38 = vmul.f32 1.442695, %v1084_v37  ;;  %v1085_v6 = vsub.f32 %v3661_v9, %v1081_v21 }
 0x598   :  { %v860_v39 = vpop.xlane.xlu0 %859 }
 0x599   :  { %v1092_v40 = vmul.f32 1.442695, %v1085_v6  ;;  %3181 = vpow2.f32 %v1090_v38 }
 0x59a   :  { %v3724_v41 = vpop.xlane.xlu1 %856 }
 0x59b   :  { %3183 = vpow2.f32 %v1092_v40 }
 0x59c   :  { %v854_v42 = vpop.xlane.xlu0 %853  ;;  %3185 = vrcp.f32 %v860_v39 }
 0x59d   :  { %3187 = vrcp.f32 %v854_v42 }
 0x59e   :  { %v3726_v43 = vpop.permute.xlu1 %1114 }
 0x59f   :  { %v3728_v44 = vpop.eup %3177 }
 0x5a0   :  { %v863_v45 = vpop.xlane.xlu0 %862  ;;  %v1094_v25 = vsel %vm52_vm0, %v3728_v44, 0.0 }
 0x5a1   :  { %v3730_v46 = vpop.eup %3179  ;;  %3189 = vrcp.f32 %v863_v45 }
 0x5a2   :  { %v1736_v47 = vpop.permute.xlu1 %1735  ;;  %v1110_v48 = vpack.c.bf16 %v3730_v46, %v3728_v44  ;;  %v1097_v23 = vsel %vm52_vm0, %v3730_v46, 0.0  ;;  %3191 = vrcp.f32 %v3724_v41 }
 0x5a3   :  { %v1746_v49 = vsel %vm287_vm1, %v1736_v47, 0  ;;  %3104 = vmatprep.subr.msk.bf16.mxu1 %vm287_vm1, %v1736_v47  ;;  %v3736_v50 = vpop.eup %3181 }
 0x5a4   :  { %2991 = vmatpush3.bf16.xpose.msra.mxu1 %v1746_v49  ;;  %v3738_v51 = vpop.permute.xlu0 %1112  ;;  %v1100_v22 = vsel %vm52_vm0, %v3736_v50, 0.0 }
 0x5a5   :  { %v3740_v57 = vpop.eup %3183  ;;  %2932 = vmatprep.subr.bf16.mxu0 %v3738_v51 }
 0x5a6   :  { %v1738_v58 = vpop.permute.xlu1 %1737  ;;  %v1111_v59 = vpack.c.bf16 %v3740_v57, %v3736_v50  ;;  %v1103_v55 = vsel %vm52_vm0, %v3740_v57, 0.0  ;;  %v3186_v27 = vpop.eup %3185 }
 0x5a7   :  { %3105 = vmatprep.subr.msk.bf16.mxu1 %vm287_vm1, %v1738_v58  ;;  %v1749_v56 = vsel %vm287_vm1, %v1738_v58, 0  ;;  %v3188_v32 = vpop.eup %3187 }
 0x5a8   :  { %v1732_v60 = vpop.permute.xlu0 %1731 }
 0x5a9   :  { %2994 = vmatprep.mubr.msk.bf16.mxu1 %vm287_vm1, %v1732_v60 }
 0x5aa   :  { %v1734_v9 = vpop.permute.xlu1 %1733 }
 0x5ab   :  { %v3190_v54 = vpop.eup %3189 }
 0x5ac   :  { %2993 = vmatpush3.bf16.xpose.msra.mxu1 %v1749_v56  ;;  %v3192_v30 = vpop.eup %3191 }
 0x5ad   :  { %v3748_v63 = vpop.f32.mrb[12].mxu1 }
 0x5ae   :  { %v3750_v2 = vpop.f32.mrb[13].mxu1  ;;  %v1328_v10 = vsel %vm52_vm0, %v3748_v63, -inf }
 0x5af   :  { %v3752_v3 = vpop.f32.mrb[14].mxu1  ;;  %v1322_v5 = vsel %vm52_vm0, %v3750_v2, -inf }
 0x5b0   :  { %v3756_v4 = vpop.f32.mrb[15].mxu1  ;;  %1323 = vmax.xlane.f32.xlu0 %v1322_v5  ;;  %v1331_v7 = vsel %vm52_vm0, %v3752_v3, -inf }
 0x5b1   :  { %v1325_v8 = vsel %vm52_vm0, %v3756_v4, -inf }
 0x5b2   :  { %1326 = vmax.xlane.f32.xlu1 %v1325_v8 }
 0x5b3   :  { %2995 = vmatmul.mubr.msk.bf16.vlgmr.msra.gmra.mrb[20].mxu1 %vm287_vm1, %v1734_v9 }
 0x5b4   :  { %1329 = vmax.xlane.f32.xlu0 %v1328_v10 }
 0x5b6   :  { %1332 = vmax.xlane.f32.xlu1 %v1331_v7 }
 0x5bd   :  { %v3765_v11 = vpop.f32.mrb[16].mxu1 }
 0x5be   :  { %v3767_v14 = vpop.f32.mrb[17].mxu1  ;;  %v1510_v18 = vsel %vm52_vm0, %v3765_v11, -inf }
 0x5bf   :  { %v3769_v15 = vpop.f32.mrb[18].mxu1  ;;  %v1504_v16 = vsel %vm52_vm0, %v3767_v14, -inf }
 0x5c0   :  { %1505 = vmax.xlane.f32.xlu0 %v1504_v16  ;;  %v3773_v12 = vpop.f32.mrb[19].mxu1  ;;  %v1513_v19 = vsel %vm52_vm0, %v3769_v15, -inf }
 0x5c1   :  { %v1507_v17 = vsel %vm52_vm0, %v3773_v12, -inf }
 0x5c2   :  { %1508 = vmax.xlane.f32.xlu1 %v1507_v17 }
 0x5c4   :  { %1511 = vmax.xlane.f32.xlu0 %v1510_v18 }
 0x5c6   :  { %1514 = vmax.xlane.f32.xlu1 %v1513_v19 }
 0x5c8   :  { %1101 = vadd.xlane.f32.xlu0 %v1100_v22 }
 0x5ca   :  { %1098 = vadd.xlane.f32.xlu1 %v1097_v23 }
 0x5cc   :  { %1095 = vadd.xlane.f32.xlu0 %v1094_v25 }
 0x5d0   :  { %1104 = vadd.xlane.f32.xlu0 %v1103_v55 }
 0x5db   :  { %1366 = vrot.lane.b32.xlu1 %v3520_v13, %s3310_s15 }
 0x5df   :  { %1546 = vrot.lane.b32.xlu1 %v3522_v34, %s3311_s16 }
 0x5e3   :  { %1548 = vrot.lane.b32.xlu1 %v3520_v13, %s3311_s16 }
 0x5e6   :  { %1364 = vrot.lane.b32.xlu0 %v3522_v34, %s3310_s15 }
 0x5e7   :  { %1979 = vrot.lane.b32.xlu1 %v3520_v13, %s3312_s17 }
 0x5ea   :  { %1977 = vrot.lane.b32.xlu0 %v3522_v34, %s3312_s17 }
 0x5eb   :  { %1975 = vrot.lane.b32.xlu1 %v3524_v35, %s3313_s18  ;;  %v1179_v35 = vld [vmem:[%s4282_s4 + $0x18] sm:$0xff] }
 0x5ee   :  { %1973 = vrot.lane.b32.xlu0 %v3526_v36, %s3313_s18  ;;  %v3817_v36 = vpack.c.bf16 %v1179_v35, %v1179_v35 }
 0x5f0   :  { %v2916_v28 = vpop.f32.mrb[24].mxu0  ;;  %v3824_v6 = vsel %vm648_vm2, %v3817_v36, 0 }
 0x5f1   :  { %v933_v20 = vmul.f32 %v3186_v27, %v2916_v28  ;;  %v916_v1 = vpop.f32.mrb[25].mxu0 }
 0x5f2   :  { %v931_v52 = vmul.f32 %v3188_v32, %v916_v1  ;;  %v2917_v29 = vpop.f32.mrb[26].mxu0 }
 0x5f3   :  { %v934_v31 = vmul.f32 %v3190_v54, %v2917_v29  ;;  %v919_v33 = vpop.f32.mrb[27].mxu0 }
 0x5f4   :  { %v932_v37 = vmul.f32 %v3192_v30, %v919_v33 }
 0x5f5   :  { %v936_v21 = vpack.c.bf16 %v934_v31, %v933_v20 }
 0x5f6   :  { %v935_v38 = vpack.c.bf16 %v932_v37, %v931_v52 }
 0x5f8   :  { %2920 = vmatprep.mubr.msk.bf16.mxu0 %vm287_vm1, %v935_v38 }
 0x5f9   :  { %2921 = vmatmul.mubr.msk.bf16.vlgmr.msra.gmra.mrb[20].mxu0 %vm287_vm1, %v936_v21 }
 0x5fa   :  { %2933 = vmatpush3.bf16.msra.mxu0 %v3738_v51  ;;  %2936 = vmatprep.mubr.msk.bf16.mxu0 %vm52_vm0, %v1110_v48 }
 0x5fb   :  { %2934 = vmatprep.subr.bf16.mxu0 %v3726_v43 }
 0x5fe   :  { %2935 = vmatpush3.bf16.msra.mxu0 %v3726_v43 }
 0x5ff   :  { %3097 = vmatprep.subr.msk.bf16.mxu0 %vm648_vm2, %v3817_v36 }
 0x601   :  { %2937 = vmatmul.mubr.msk.bf16.vlgmr.msra.gmra.mrb[28].mxu0 %vm52_vm0, %v1111_v59 }
 0x602   :  { %2941 = vmatpush3.bf16.msra.mxu0 %v3824_v6 }
 0x63d   :  { %v1324_v39 = vpop.xlane.xlu0 %1323 }
 0x63e   :  { %v1334_v40 = vsub.f32 %v3750_v2, %v1324_v39 }
 0x63f   :  { %v1327_v41 = vpop.xlane.xlu1 %1326 }
 0x640   :  { %v1338_v42 = vmul.f32 1.442695, %v1334_v40  ;;  %v1335_v43 = vsub.f32 %v3756_v4, %v1327_v41 }
 0x641   :  { %v1330_v44 = vpop.xlane.xlu0 %1329 }
 0x642   :  { %3193 = vpow2.f32 %v1338_v42  ;;  %v1340_v45 = vmul.f32 1.442695, %v1335_v43  ;;  %v1336_v46 = vsub.f32 %v3748_v63, %v1330_v44 }
 0x643   :  { %v1333_v47 = vpop.xlane.xlu1 %1332 }
 0x644   :  { %3195 = vpow2.f32 %v1340_v45  ;;  %v1342_v48 = vmul.f32 1.442695, %v1336_v46  ;;  %v1337_v49 = vsub.f32 %v3752_v3, %v1333_v47 }
 0x646   :  { %v1344_v50 = vmul.f32 1.442695, %v1337_v49  ;;  %3197 = vpow2.f32 %v1342_v48 }
 0x648   :  { %3199 = vpow2.f32 %v1344_v50 }
 0x64c   :  { %v3835_v51 = vpop.eup %3193 }
 0x64d   :  { %v1506_v57 = vpop.xlane.xlu0 %1505  ;;  %v1346_v58 = vsel %vm52_vm0, %v3835_v51, 0.0 }
 0x64e   :  { %v3839_v59 = vpop.eup %3195  ;;  %v1516_v60 = vsub.f32 %v3767_v14, %v1506_v57  ;;  %1347 = vadd.xlane.f32.xlu0 %v1346_v58 }
 0x64f   :  { %v1509_v56 = vpop.xlane.xlu1 %1508  ;;  %v1349_v63 = vsel %vm52_vm0, %v3839_v59, 0.0  ;;  %v1362_v2 = vpack.c.bf16 %v3839_v59, %v3835_v51 }
 0x650   :  { %v1520_v3 = vmul.f32 1.442695, %v1516_v60  ;;  %v1517_v5 = vsub.f32 %v3773_v12, %v1509_v56  ;;  %1350 = vadd.xlane.f32.xlu1 %v1349_v63  ;;  %v3847_v4 = vpop.eup %3197 }
 0x651   :  { %v1512_v8 = vpop.xlane.xlu0 %1511  ;;  %v1352_v40 = vsel %vm52_vm0, %v3847_v4, 0.0 }
 0x652   :  { %v3849_v9 = vpop.eup %3199  ;;  %v1522_v10 = vmul.f32 1.442695, %v1517_v5  ;;  %v1518_v7 = vsub.f32 %v3765_v11, %v1512_v8  ;;  %3201 = vpow2.f32 %v1520_v3 }
 0x653   :  { %v1515_v14 = vpop.xlane.xlu1 %1514  ;;  %v1363_v16 = vpack.c.bf16 %v3849_v9, %v3847_v4  ;;  %v1355_v30 = vsel %vm52_vm0, %v3849_v9, 0.0 }
 0x654   :  { %3203 = vpow2.f32 %v1522_v10  ;;  %v1524_v17 = vmul.f32 1.442695, %v1518_v7  ;;  %v1519_v18 = vsub.f32 %v3769_v15, %v1515_v14 }
 0x655   :  { %v1102_v19 = vpop.xlane.xlu0 %1101 }
 0x656   :  { %3205 = vpow2.f32 %v1524_v17  ;;  %v1526_v12 = vmul.f32 1.442695, %v1519_v18 }
 0x657   :  { %v1099_v22 = vpop.xlane.xlu1 %1098 }
 0x658   :  { %3207 = vpow2.f32 %v1526_v12 }
 0x659   :  { %v1096_v23 = vpop.xlane.xlu0 %1095  ;;  %3209 = vrcp.f32 %v1102_v19 }
 0x65a   :  { %3211 = vrcp.f32 %v1096_v23 }
 0x65b   :  { %v3855_v25 = vpop.permute.xlu1 %1366 }
 0x65c   :  { %v3857_v55 = vpop.eup %3201 }
 0x65d   :  { %v1105_v11 = vpop.xlane.xlu0 %1104  ;;  %v1528_v37 = vsel %vm52_vm0, %v3857_v55, 0.0 }
 0x65e   :  { %v3859_v27 = vpop.eup %3203  ;;  %3213 = vrcp.f32 %v1105_v11 }
 0x65f   :  { %v3861_v28 = vpop.permute.xlu1 %1546  ;;  %v1531_v32 = vsel %vm52_vm0, %v3859_v27, 0.0  ;;  %v1544_v15 = vpack.c.bf16 %v3859_v27, %v3857_v55  ;;  %3215 = vrcp.f32 %v1099_v22 }
 0x660   :  { %v3867_v20 = vpop.eup %3205  ;;  %1532 = vadd.xlane.f32.xlu1 %v1531_v32 }
 0x661   :  { %v1365_v1 = vpop.permute.xlu0 %1364  ;;  %v1534_v54 = vsel %vm52_vm0, %v3867_v20, 0.0 }
 0x662   :  { %v3871_v52 = vpop.eup %3207  ;;  %1535 = vadd.xlane.f32.xlu0 %v1534_v54  ;;  %2954 = vmatprep.subr.bf16.mxu0 %v1365_v1 }
 0x663   :  { %v3873_v29 = vpop.permute.xlu1 %1548  ;;  %v1545_v31 = vpack.c.bf16 %v3871_v52, %v3867_v20  ;;  %v1537_v39 = vsel %vm52_vm0, %v3871_v52, 0.0  ;;  %v3210_v57 = vpop.eup %3209 }
 0x664   :  { %1356 = vadd.xlane.f32.xlu1 %v1355_v30  ;;  %v3212_v60 = vpop.eup %3211 }
 0x665   :  { %v1978_v33 = vpop.permute.xlu0 %1977 }
 0x666   :  { %v1988_v21 = vsel %vm287_vm1, %v1978_v33, 0  ;;  %1529 = vadd.xlane.f32.xlu0 %v1528_v37  ;;  %3107 = vmatprep.subr.msk.bf16.mxu1 %vm287_vm1, %v1978_v33 }
 0x667   :  { %v1980_v38 = vpop.permute.xlu1 %1979  ;;  %3013 = vmatpush3.bf16.xpose.msra.mxu1 %v1988_v21 }
 0x668   :  { %3108 = vmatprep.subr.msk.bf16.mxu1 %vm287_vm1, %v1980_v38  ;;  %v1991_v41 = vsel %vm287_vm1, %v1980_v38, 0  ;;  %v3214_v3 = vpop.eup %3213 }
 0x669   :  { %v1974_v35 = vpop.permute.xlu0 %1973  ;;  %v3216_v10 = vpop.eup %3215 }
 0x66a   :  { %1538 = vadd.xlane.f32.xlu0 %v1537_v39  ;;  %3016 = vmatprep.mubr.msk.bf16.mxu1 %vm287_vm1, %v1974_v35 }
 0x66b   :  { %v1976_v42 = vpop.permute.xlu1 %1975 }
 0x66e   :  { %1353 = vadd.xlane.f32.xlu0 %v1352_v40 }
 0x66f   :  { %3015 = vmatpush3.bf16.xpose.msra.mxu1 %v1991_v41 }
 0x676   :  { %3017 = vmatmul.mubr.msk.bf16.vlgmr.msra.gmra.mrb[24].mxu1 %vm287_vm1, %v1976_v42 }
 0x686   :  { %v3891_v43 = vpop.f32.mrb[20].mxu1 }
 0x687   :  { %v1785_v44 = vpop.f32.mrb[21].mxu1  ;;  %v1806_v49 = vsel %vm52_vm0, %v3891_v43, -inf }
 0x688   :  { %v3893_v45 = vpop.f32.mrb[22].mxu1  ;;  %v1800_v46 = vsel %vm52_vm0, %v1785_v44, -inf }
 0x689   :  { %v1788_v47 = vpop.f32.mrb[23].mxu1  ;;  %1801 = vmax.xlane.f32.xlu0 %v1800_v46  ;;  %v1809_v50 = vsel %vm52_vm0, %v3893_v45, -inf }
 0x68a   :  { %v1803_v48 = vsel %vm52_vm0, %v1788_v47, -inf }
 0x68b   :  { %1804 = vmax.xlane.f32.xlu1 %v1803_v48 }
 0x68d   :  { %1807 = vmax.xlane.f32.xlu0 %v1806_v49 }
 0x68f   :  { %1810 = vmax.xlane.f32.xlu1 %v1809_v50 }
 0x6a0   :  { %1844 = vrot.lane.b32.xlu1 %v3520_v13, %s3314_s19 }
 0x6a3   :  { %1842 = vrot.lane.b32.xlu0 %v3522_v34, %s3314_s19 }
 0x6d4   :  { %v2938_v58 = vpop.f32.mrb[28].mxu0 }
 0x6d5   :  { %v1175_v56 = vmul.f32 %v3210_v57, %v2938_v58  ;;  %v1158_v63 = vpop.f32.mrb[29].mxu0 }
 0x6d6   :  { %v1173_v5 = vmul.f32 %v3212_v60, %v1158_v63  ;;  %v2939_v8 = vpop.f32.mrb[30].mxu0 }
 0x6d7   :  { %v1176_v7 = vmul.f32 %v3214_v3, %v2939_v8  ;;  %v1161_v14 = vpop.f32.mrb[31].mxu0 }
 0x6d8   :  { %v1174_v17 = vmul.f32 %v3216_v10, %v1161_v14 }
 0x6d9   :  { %v1178_v18 = vpack.c.bf16 %v1176_v7, %v1175_v56 }
 0x6da   :  { %v1177_v12 = vpack.c.bf16 %v1174_v17, %v1173_v5 }
 0x6db   :  { %v1348_v51 = vpop.xlane.xlu0 %1347 }
 0x6dc   :  { %2942 = vmatprep.mubr.msk.bf16.mxu0 %vm287_vm1, %v1177_v12 }
 0x6dd   :  { %2943 = vmatmul.mubr.msk.bf16.vlgmr.msra.gmra.mrb[20].mxu0 %vm287_vm1, %v1178_v18  ;;  %v1351_v4 = vpop.xlane.xlu1 %1350 }
 0x6de   :  { %2955 = vmatpush3.bf16.msra.mxu0 %v1365_v1  ;;  %2958 = vmatprep.mubr.msk.bf16.mxu0 %vm52_vm0, %v1362_v2 }
 0x6df   :  { %2956 = vmatprep.subr.bf16.mxu0 %v3855_v25 }
 0x6e2   :  { %2957 = vmatpush3.bf16.msra.mxu0 %v3855_v25 }
 0x6e3   :  { %2970 = vmatprep.subr.bf16.mxu0 %v3861_v28 }
 0x6e5   :  { %2959 = vmatmul.mubr.msk.bf16.vlgmr.msra.gmra.mrb[32].mxu0 %vm52_vm0, %v1363_v16 }
 0x6e6   :  { %2971 = vmatpush3.bf16.msra.mxu0 %v3861_v28  ;;  %2974 = vmatprep.mubr.msk.bf16.mxu0 %vm52_vm0, %v1544_v15 }
 0x6e7   :  { %2972 = vmatprep.subr.bf16.mxu0 %v3873_v29 }
 0x6ea   :  { %2973 = vmatpush3.bf16.msra.mxu0 %v3873_v29 }
 0x6eb   :  { %3102 = vmatprep.subr.msk.bf16.mxu0 %vm648_vm2, %v3611_v61 }
 0x6ed   :  { %2975 = vmatmul.mubr.msk.bf16.vlgmr.msra.gmra.mrb[36].mxu0 %vm52_vm0, %v1545_v31  ;;  %v3936_v16 = vpop.xlane.xlu1 %1532 }
 0x6ee   :  { %2979 = vmatpush3.bf16.msra.mxu0 %v3617_v62 }
 0x6ef   :  { %3103 = vmatprep.subr.msk.bf16.mxu0 %vm648_vm2, %v3623_v0  ;;  %v3934_v59 = vpop.xlane.xlu0 %1535 }
 0x6f1   :  { %v1357_v61 = vpop.xlane.xlu1 %1356 }
 0x6f3   :  { %v1530_v2 = vpop.xlane.xlu0 %1529 }
 0x6f7   :  { %v1539_v9 = vpop.xlane.xlu0 %1538 }
 0x6fb   :  { %v1354_v19 = vpop.xlane.xlu0 %1353 }
 0x716   :  { %v1802_v22 = vpop.xlane.xlu0 %1801 }
 0x717   :  { %v1812_v23 = vsub.f32 %v1785_v44, %v1802_v22 }
 0x718   :  { %v1805_v25 = vpop.xlane.xlu1 %1804 }
 0x719   :  { %v1816_v55 = vmul.f32 1.442695, %v1812_v23  ;;  %v1813_v11 = vsub.f32 %v1788_v47, %v1805_v25 }
 0x71a   :  { %v1808_v27 = vpop.xlane.xlu0 %1807 }
 0x71b   :  { %v1818_v62 = vmul.f32 1.442695, %v1813_v11  ;;  %v1814_v28 = vsub.f32 %v3891_v43, %v1808_v27  ;;  %3217 = vpow2.f32 %v1816_v55 }
 0x71c   :  { %v1811_v0 = vpop.xlane.xlu1 %1810 }
 0x71d   :  { %3219 = vpow2.f32 %v1818_v62  ;;  %v1820_v32 = vmul.f32 1.442695, %v1814_v28  ;;  %v1815_v15 = vsub.f32 %v3893_v45, %v1811_v0 }
 0x71e   :  { %v1843_v55 = vpop.permute.xlu0 %1842 }
 0x71f   :  { %v1822_v20 = vmul.f32 1.442695, %v1815_v15  ;;  %3221 = vpow2.f32 %v1820_v32 }
 0x720   :  { %v1845_v11 = vpop.permute.xlu1 %1844 }
 0x721   :  { %3223 = vpow2.f32 %v1822_v20 }
 0x722   :  { %3225 = vrcp.f32 %v1354_v19 }
 0x723   :  { %3227 = vrcp.f32 %v1348_v51 }
 0x724   :  { %3229 = vrcp.f32 %v1357_v61 }
 0x725   :  { %v3940_v1 = vpop.eup %3217  ;;  %3231 = vrcp.f32 %v1351_v4 }
 0x726   :  { %v1824_v43 = vsel %vm52_vm0, %v3940_v1, 0.0  ;;  %3233 = vrcp.f32 %v3934_v59 }
 0x727   :  { %v3942_v54 = vpop.eup %3219  ;;  %3235 = vrcp.f32 %v1530_v2 }
 0x728   :  { %v1840_v52 = vpack.c.bf16 %v3942_v54, %v3940_v1  ;;  %v1827_v44 = vsel %vm52_vm0, %v3942_v54, 0.0  ;;  %3237 = vrcp.f32 %v1539_v9 }
 0x729   :  { %v3946_v29 = vpop.eup %3221  ;;  %3239 = vrcp.f32 %v3936_v16 }
 0x72a   :  { %v1830_v42 = vsel %vm52_vm0, %v3946_v29, 0.0 }
 0x72b   :  { %v3948_v30 = vpop.eup %3223 }
 0x72c   :  { %v1841_v31 = vpack.c.bf16 %v3948_v30, %v3946_v29  ;;  %v1833_v45 = vsel %vm52_vm0, %v3948_v30, 0.0 }
 0x749   :  { %v3952_v33 = vpop.f32.mrb[24].mxu1 }
 0x74a   :  { %v3954_v37 = vpop.f32.mrb[25].mxu1  ;;  %v2048_v40 = vsel %vm52_vm0, %v3952_v33, -inf }
 0x74b   :  { %v3956_v21 = vpop.f32.mrb[26].mxu1  ;;  %v2042_v38 = vsel %vm52_vm0, %v3954_v37, -inf }
 0x74c   :  { %2043 = vmax.xlane.f32.xlu0 %v2042_v38  ;;  %v3960_v35 = vpop.f32.mrb[27].mxu1  ;;  %v2051_v41 = vsel %vm52_vm0, %v3956_v21, -inf }
 0x74d   :  { %v2045_v39 = vsel %vm52_vm0, %v3960_v35, -inf }
 0x74e   :  { %2046 = vmax.xlane.f32.xlu1 %v2045_v39 }
 0x750   :  { %2049 = vmax.xlane.f32.xlu0 %v2048_v40 }
 0x752   :  { %2052 = vmax.xlane.f32.xlu1 %v2051_v41  ;;  %v3298_v41 = vld [vmem:[%s4278_s0 + $0x8] sm:$0xff] }
 0x754   :  { %1831 = vadd.xlane.f32.xlu0 %v1830_v42 }
 0x756   :  { %1825 = vadd.xlane.f32.xlu1 %v1824_v43  ;;  %v4020_v43 = vld [vmem:[%s4283_s5] ss:$0 sm:$0xff] }
 0x758   :  { %1828 = vadd.xlane.f32.xlu0 %v1827_v44 }
 0x75a   :  { %1834 = vadd.xlane.f32.xlu1 %v1833_v45 }
 0x76b   :  { %2086 = vrot.lane.b32.xlu1 %v3520_v13, %s3315_s24  ;;  %v3226_v13 = vpop.eup %3225 }
 0x76c   :  { %v3228_v50 = vpop.eup %3227 }
 0x76d   :  { %v3230_v60 = vpop.eup %3229 }
 0x76e   :  { %2084 = vrot.lane.b32.xlu0 %v3522_v34, %s3315_s24  ;;  %v3232_v3 = vpop.eup %3231 }
 0x76f   :  { %v3234_v17 = vpop.eup %3233 }
 0x770   :  { %v3236_v12 = vpop.eup %3235 }
 0x771   :  { %v3238_v2 = vpop.eup %3237 }
 0x772   :  { %v3240_v16 = vpop.eup %3239 }
 0x7b0   :  { %v2944_v46 = vpop.f32.mrb[20].mxu0 }
 0x7b1   :  { %1245 = vst.msk [vmem:[#allocation2 + $0x10] sm:$0xff] %vm52_vm0, %v2944_v46  ;;  %v1224_v47 = vpop.f32.mrb[21].mxu0 }
 0x7b2   :  { %1243 = vst.msk [vmem:[#allocation2] sm:$0xff] %vm52_vm0, %v1224_v47  ;;  %v2945_v48 = vpop.f32.mrb[22].mxu0 }
 0x7b3   :  { %1246 = vst.msk [vmem:[#allocation2 + $0x18] sm:$0xff] %vm52_vm0, %v2945_v48  ;;  %v1227_v49 = vpop.f32.mrb[23].mxu0 }
 0x7b4   :  { %1244 = vst.msk [vmem:[#allocation2 + $0x8] sm:$0xff] %vm52_vm0, %v1227_v49 }
 0x7b8   :  { %v2960_v34 = vpop.f32.mrb[32].mxu0  ;;  %v2221_v45 = vld [vmem:[#allocation2 + $0x10] sm:$0xff] }
 0x7b9   :  { %v1427_v57 = vmul.f32 %v3226_v13, %v2960_v34  ;;  %v1410_v58 = vpop.f32.mrb[33].mxu0  ;;  %v2219_v29 = vld [vmem:[#allocation2] sm:$0xff]  ;;  %v3299_v13 = vld [vmem:[%s4278_s0 + $0x18] sm:$0xff] }
 0x7ba   :  { %v1425_v56 = vmul.f32 %v3228_v50, %v1410_v58  ;;  %v2961_v63 = vpop.f32.mrb[34].mxu0  ;;  %v2222_v44 = vld [vmem:[#allocation2 + $0x18] sm:$0xff]  ;;  %v3300_v50 = vld [vmem:[%s4278_s0 + $0x10] sm:$0xff] }
 0x7bb   :  { %v1428_v5 = vmul.f32 %v3230_v60, %v2961_v63  ;;  %v1413_v8 = vpop.f32.mrb[35].mxu0  ;;  %v2230_v34 = vadd.f32 %v3299_v13, %v2222_v44 }
 0x7bc   :  { %v1426_v10 = vmul.f32 %v3232_v3, %v1413_v8 }
 0x7bd   :  { %v1430_v7 = vpack.c.bf16 %v1428_v5, %v1427_v57  ;;  %v2229_v57 = vadd.f32 %v3300_v50, %v2221_v45  ;;  %v4042_v8 = vadd.f32 %v4020_v43, %v2230_v34  ;;  %v3301_v45 = vld [vmem:[%s4278_s0 + $0x20] sm:$0xff] }
 0x7be   :  { %v1429_v14 = vpack.c.bf16 %v1426_v10, %v1425_v56 }
 0x7bf   :  { %v4045_v10 = vadd.f32 %v4020_v43, %v2229_v57 }
 0x7c0   :  { %v2976_v18 = vpop.f32.mrb[36].mxu0 }
 0x7c1   :  { %v1609_v51 = vmul.f32 %v3234_v17, %v2976_v18  ;;  %v1592_v59 = vpop.f32.mrb[37].mxu0 }
 0x7c2   :  { %v1607_v4 = vmul.f32 %v3236_v12, %v1592_v59  ;;  %v2977_v9 = vpop.f32.mrb[38].mxu0 }
 0x7c3   :  { %v1610_v19 = vmul.f32 %v3238_v2, %v2977_v9  ;;  %v1595_v61 = vpop.f32.mrb[39].mxu0 }
 0x7c4   :  { %v1608_v22 = vmul.f32 %v3240_v16, %v1595_v61 }
 0x7c5   :  { %v1612_v23 = vpack.c.bf16 %v1610_v19, %v1609_v51 }
 0x7c6   :  { %v1611_v25 = vpack.c.bf16 %v1608_v22, %v1607_v4 }
 0x7c8   :  { %2980 = vmatprep.mubr.msk.bf16.mxu0 %vm287_vm1, %v1611_v25 }
 0x7c9   :  { %2981 = vmatmul.mubr.msk.bf16.vlgmr.msra.gmra.mrb[40].mxu0 %vm287_vm1, %v1612_v23 }
 0x7ca   :  { %2985 = vmatpush3.bf16.msra.mxu0 %v3669_v24  ;;  %2986 = vmatprep.mubr.msk.bf16.mxu0 %vm287_vm1, %v1429_v14  ;;  %v2258_v14 = vsel %vm52_vm0, %v4045_v10, 0.0 }
 0x7cb   :  { %2998 = vmatprep.subr.bf16.mxu0 %v1843_v55 }
 0x7d5   :  { %2987 = vmatmul.mubr.msk.bf16.vlgmr.msra.gmra.mrb[40].mxu0 %vm287_vm1, %v1430_v7  ;;  %v2261_v7 = vsel %vm52_vm0, %v4042_v8, 0.0 }
 0x7d6   :  { %2999 = vmatpush3.bf16.msra.mxu0 %v1843_v55  ;;  %3002 = vmatprep.mubr.msk.bf16.mxu0 %vm52_vm0, %v1840_v52 }
 0x7d7   :  { %3000 = vmatprep.subr.bf16.mxu0 %v1845_v11 }
 0x7d9   :  { %v2044_v27 = vpop.xlane.xlu0 %2043 }
 0x7da   :  { %3001 = vmatpush3.bf16.msra.mxu0 %v1845_v11  ;;  %v2054_v62 = vsub.f32 %v3954_v37, %v2044_v27 }
 0x7db   :  { %v2047_v28 = vpop.xlane.xlu1 %2046  ;;  %3106 = vmatprep.subr.msk.bf16.mxu0 %vm648_vm2, %v3705_v53 }
 0x7dc   :  { %v2058_v24 = vmul.f32 1.442695, %v2054_v62  ;;  %v2055_v0 = vsub.f32 %v3960_v35, %v2047_v28 }
 0x7dd   :  { %3003 = vmatmul.mubr.msk.bf16.vlgmr.msra.gmra.mrb[44].mxu0 %vm52_vm0, %v1841_v31  ;;  %v2050_v32 = vpop.xlane.xlu0 %2049  ;;  %v2220_v31 = vld [vmem:[#allocation2 + $0x8] sm:$0xff] }
 0x7de   :  { %3241 = vpow2.f32 %v2058_v24  ;;  %v2060_v15 = vmul.f32 1.442695, %v2055_v0  ;;  %v2056_v20 = vsub.f32 %v3952_v33, %v2050_v32  ;;  %3007 = vmatpush3.bf16.msra.mxu0 %v3711_v26  ;;  %v3297_v26 = vld [vmem:[%s4278_s0] sm:$0xff]  ;;  %v2228_v42 = vadd.f32 %v3298_v41, %v2220_v31 }
 0x7df   :  { %v2053_v1 = vpop.xlane.xlu1 %2052 }
 0x7e0   :  { %3243 = vpow2.f32 %v2060_v15  ;;  %v2062_v54 = vmul.f32 1.442695, %v2056_v20  ;;  %v2057_v53 = vsub.f32 %v3956_v21, %v2053_v1  ;;  %v2227_v21 = vadd.f32 %v3297_v26, %v2219_v29 }
 0x7e1   :  { %v1832_v52 = vpop.xlane.xlu0 %1831  ;;  %v4035_v56 = vadd.f32 %v4020_v43, %v2228_v42 }
 0x7e2   :  { %3245 = vpow2.f32 %v2062_v54  ;;  %v2064_v37 = vmul.f32 1.442695, %v2057_v53  ;;  %v4024_v49 = vadd.f32 %v4020_v43, %v2227_v21 }
 0x7e3   :  { %v2255_v3 = vsel %vm52_vm0, %v4035_v56, 0.0  ;;  %v1826_v17 = vpop.xlane.xlu1 %1825 }
 0x7e4   :  { %3247 = vpow2.f32 %v2064_v37  ;;  %v2252_v5 = vsel %vm52_vm0, %v4024_v49, 0.0 }
 0x7e5   :  { %v1829_v38 = vpop.xlane.xlu0 %1828  ;;  %3249 = vrcp.f32 %v1832_v52 }
 0x7e6   :  { %3251 = vrcp.f32 %v1826_v17 }
 0x7e7   :  { %v1835_v18 = vpop.xlane.xlu1 %1834 }
 0x7e8   :  { %v4006_v30 = vpop.eup %3241  ;;  %3253 = vrcp.f32 %v1835_v18 }
 0x7e9   :  { %v2085_v35 = vpop.permute.xlu0 %2084  ;;  %v2066_v33 = vsel %vm52_vm0, %v4006_v30, 0.0  ;;  %3255 = vrcp.f32 %v1829_v38 }
 0x7ea   :  { %v3244_v39 = vpop.eup %3243  ;;  %2067 = vadd.xlane.f32.xlu1 %v2066_v33  ;;  %3020 = vmatprep.subr.bf16.mxu0 %v2085_v35 }
 0x7eb   :  { %v2069_v40 = vsel %vm52_vm0, %v3244_v39, 0.0  ;;  %v2082_v46 = vpack.c.bf16 %v3244_v39, %v4006_v30  ;;  %v2087_v27 = vpop.permute.xlu1 %2086 }
 0x7ec   :  { %v3246_v47 = vpop.eup %3245  ;;  %2070 = vadd.xlane.f32.xlu0 %v2069_v40 }
 0x7ed   :  { %v2072_v60 = vsel %vm52_vm0, %v3246_v47, 0.0 }
 0x7ee   :  { %v3248_v48 = vpop.eup %3247 }
 0x7ef   :  { %v2075_v58 = vsel %vm52_vm0, %v3248_v48, 0.0  ;;  %v2083_v63 = vpack.c.bf16 %v3248_v48, %v3246_v47  ;;  %v3250_v12 = vpop.eup %3249  ;;  %v3302_v47 = vld [vmem:[%s4278_s0 + $0x30] sm:$0xff] }
 0x7f0   :  { %2076 = vadd.xlane.f32.xlu1 %v2075_v58  ;;  %2073 = vadd.xlane.f32.xlu0 %v2072_v60  ;;  %v3252_v59 = vpop.eup %3251  ;;  %v3303_v60 = vld [vmem:[%s4278_s0 + $0x28] sm:$0xff] }
 0x7f2   :  { %v3254_v9 = vpop.eup %3253 }
 0x7f3   :  { %v3256_v19 = vpop.eup %3255 }
 0x7f4   :  { %2256 = vadd.xlane.f32.xlu1 %v2255_v3  ;;  %2253 = vadd.xlane.f32.xlu0 %v2252_v5  ;;  %v3304_v3 = vld [vmem:[%s4278_s0 + $0x38] sm:$0xff] }
 0x7f8   :  { %2262 = vadd.xlane.f32.xlu1 %v2261_v7  ;;  %2259 = vadd.xlane.f32.xlu0 %v2258_v14 }
 0x877   :  { %v2068_v28 = vpop.xlane.xlu1 %2067 }
 0x878   :  { %3257 = vrcp.f32 %v2068_v28 }
 0x879   :  { %v2071_v62 = vpop.xlane.xlu0 %2070 }
 0x87d   :  { %v2077_v24 = vpop.xlane.xlu1 %2076  ;;  %v2074_v0 = vpop.xlane.xlu0 %2073 }
 0x87e   :  { %3259 = vrcp.f32 %v2077_v24  ;;  %v2388_v24 = vld [vmem:[%s4284_s8] sm:$0xff] }
 0x87f   :  { %3261 = vrcp.f32 %v2074_v0  ;;  %v2389_v0 = vld [vmem:[%s4284_s8 + $0x8] sm:$0xff] }
 0x880   :  { %3263 = vrcp.f32 %v2071_v62 }
 0x881   :  { %v2254_v21 = vpop.xlane.xlu0 %2253  ;;  %v2257_v40 = vpop.xlane.xlu1 %2256 }
 0x882   :  { %v3258_v32 = vpop.eup %3257  ;;  %v2276_v42 = vmul.f32 0.03125, %v2254_v21  ;;  %v2277_v57 = vmul.f32 0.03125, %v2257_v40 }
 0x884   :  { %v4080_v7 = vsub.f32 %v4024_v49, %v2276_v42 }
 0x885   :  { %v2260_v34 = vpop.xlane.xlu0 %2259  ;;  %v2263_v14 = vpop.xlane.xlu1 %2262 }
 0x886   :  { %v2278_v17 = vmul.f32 0.03125, %v2260_v34 }
 0x888   :  { %v3260_v20 = vpop.eup %3259 }
 0x889   :  { %v3262_v54 = vpop.eup %3261 }
 0x88a   :  { %v3264_v52 = vpop.eup %3263 }
 0x8b0   :  { %v3004_v51 = vpop.f32.mrb[44].mxu0 }
 0x8b1   :  { %v1905_v2 = vmul.f32 %v3250_v12, %v3004_v51  ;;  %v1888_v4 = vpop.f32.mrb[45].mxu0 }
 0x8b2   :  { %v3005_v16 = vpop.f32.mrb[46].mxu0  ;;  %v1903_v23 = vmul.f32 %v3252_v59, %v1888_v4  ;;  %v4091_v59 = vsub.f32 %v4035_v56, %v2277_v57 }
 0x8b3   :  { %v1906_v61 = vmul.f32 %v3254_v9, %v3005_v16  ;;  %v1891_v22 = vpop.f32.mrb[47].mxu0  ;;  %v4099_v16 = vsub.f32 %v4045_v10, %v2278_v17 }
 0x8b4   :  { %v1904_v25 = vmul.f32 %v3256_v19, %v1891_v22 }
 0x8b5   :  { %v1908_v55 = vpack.c.bf16 %v1906_v61, %v1905_v2  ;;  %v2279_v2 = vmul.f32 0.03125, %v2263_v14  ;;  %v2292_v61 = vmul.f32 %v4080_v7, %v4080_v7 }
 0x8b6   :  { %v1907_v11 = vpack.c.bf16 %v1904_v25, %v1903_v23 }
 0x8b7   :  { %v4106_v22 = vsub.f32 %v4042_v8, %v2279_v2  ;;  %v2300_v25 = vsel %vm52_vm0, %v2292_v61, 0.0 }
 0x8b8   :  { %3008 = vmatprep.mubr.msk.bf16.mxu0 %vm287_vm1, %v1907_v11 }
 0x8b9   :  { %3009 = vmatmul.mubr.msk.bf16.vlgmr.msra.gmra.mrb[40].mxu0 %vm287_vm1, %v1908_v55  ;;  %v2294_v55 = vmul.f32 %v4099_v16, %v4099_v16 }
 0x8ba   :  { %3021 = vmatpush3.bf16.msra.mxu0 %v2085_v35  ;;  %3024 = vmatprep.mubr.msk.bf16.mxu0 %vm52_vm0, %v2082_v46 }
 0x8bb   :  { %3022 = vmatprep.subr.bf16.mxu0 %v2087_v27  ;;  %v2306_v62 = vsel %vm52_vm0, %v2294_v55, 0.0 }
 0x8be   :  { %3023 = vmatpush3.bf16.msra.mxu0 %v2087_v27  ;;  %v2295_v27 = vmul.f32 %v4106_v22, %v4106_v22 }
 0x8bf   :  { %3109 = vmatprep.subr.msk.bf16.mxu0 %vm648_vm2, %v3817_v36 }
 0x8c0   :  { %v2309_v28 = vsel %vm52_vm0, %v2295_v27, 0.0 }
 0x8c1   :  { %3025 = vmatmul.mubr.msk.bf16.vlgmr.msra.gmra.mrb[48].mxu0 %vm52_vm0, %v2083_v63 }
 0x8c2   :  { %3029 = vmatpush3.bf16.msra.mxu0 %v3824_v6 }
 0x994   :  { %v3026_v15 = vpop.f32.mrb[48].mxu0 }
 0x995   :  { %v2130_v1 = vpop.f32.mrb[49].mxu0  ;;  %v2147_v36 = vmul.f32 %v3262_v54, %v3026_v15  ;;  %v2390_v15 = vld [vmem:[%s4284_s8 + $0x10] sm:$0xff] }
 0x996   :  { %v3027_v53 = vpop.f32.mrb[50].mxu0  ;;  %v2145_v29 = vmul.f32 %v3258_v32, %v2130_v1  ;;  %v2392_v32 = vpack.c.bf16 %v2389_v0, %v2388_v24 }
 0x997   :  { %v2148_v37 = vmul.f32 %v3260_v20, %v3027_v53  ;;  %v2133_v38 = vpop.f32.mrb[51].mxu0  ;;  %v2391_v20 = vld [vmem:[%s4284_s8 + $0x18] sm:$0xff] }
 0x998   :  { %v2146_v6 = vmul.f32 %v3264_v52, %v2133_v38  ;;  %3034 = vmatprep.subr.bf16.mxu1 %v2392_v32  ;;  %v2393_v1 = vpack.c.bf16 %v2391_v20, %v2390_v15  ;;  %v2555_v15 = vld [vmem:[%s4287_s10 + $0x8] sm:$0xff] }
 0x999   :  { %v2150_v30 = vpack.c.bf16 %v2148_v37, %v2147_v36  ;;  %3035 = vmatpush3.bf16.msra.mxu1 %v2392_v32 }
 0x99a   :  { %v2149_v31 = vpack.c.bf16 %v2146_v6, %v2145_v29  ;;  %3036 = vmatprep.subr.bf16.mxu1 %v2393_v1 }
 0x99c   :  { %3030 = vmatprep.mubr.msk.bf16.mxu0 %vm287_vm1, %v2149_v31 }
 0x99d   :  { %3031 = vmatmul.mubr.msk.bf16.vlgmr.msra.gmra.mrb[40].mxu0 %vm287_vm1, %v2150_v30  ;;  %3037 = vmatpush3.bf16.msra.mxu1 %v2393_v1  ;;  %v2556_v1 = vld [vmem:[%s4287_s10 + $0x10] sm:$0xff] }
 0xa70   :  { %v3032_v35 = vpop.f32.mrb[40].mxu0 }
 0xa71   :  { %2217 = vst.msk [vmem:[#allocation2 + $0x30] sm:$0xff] %vm52_vm0, %v3032_v35  ;;  %v2196_v33 = vpop.f32.mrb[41].mxu0 }
 0xa72   :  { %2215 = vst.msk [vmem:[#allocation2 + $0x20] sm:$0xff] %vm52_vm0, %v2196_v33  ;;  %v3033_v39 = vpop.f32.mrb[42].mxu0 }
 0xa73   :  { %2218 = vst.msk [vmem:[#allocation2 + $0x38] sm:$0xff] %vm52_vm0, %v3033_v39  ;;  %v2199_v26 = vpop.f32.mrb[43].mxu0 }
 0xa74   :  { %2216 = vst.msk [vmem:[#allocation2 + $0x28] sm:$0xff] %vm52_vm0, %v2199_v26 }
 0xa78   :  { %v2225_v41 = vld [vmem:[#allocation2 + $0x30] sm:$0xff] }
 0xa79   :  { %v2223_v44 = vld [vmem:[#allocation2 + $0x20] sm:$0xff]  ;;  %v2233_v48 = vadd.f32 %v3302_v47, %v2225_v41 }
 0xa7a   :  { %v2231_v46 = vadd.f32 %v3301_v45, %v2223_v44  ;;  %v2226_v13 = vld [vmem:[#allocation2 + $0x38] sm:$0xff] }
 0xa7b   :  { %v2224_v50 = vld [vmem:[#allocation2 + $0x28] sm:$0xff]  ;;  %v2234_v5 = vadd.f32 %v3304_v3, %v2226_v13  ;;  %v4088_v51 = vadd.f32 %v4020_v43, %v2233_v48 }
 0xa7c   :  { %v4071_v58 = vadd.f32 %v4020_v43, %v2231_v46  ;;  %v2232_v63 = vadd.f32 %v3303_v60, %v2224_v50 }
 0xa7d   :  { %v4096_v9 = vadd.f32 %v4020_v43, %v2234_v5  ;;  %v2270_v19 = vsel %vm52_vm0, %v4088_v51, 0.0 }
 0xa7e   :  { %v2264_v18 = vsel %vm52_vm0, %v4071_v58, 0.0  ;;  %v4085_v12 = vadd.f32 %v4020_v43, %v2232_v63  ;;  %v2293_v43 = vmul.f32 %v4091_v59, %v4091_v59 }
 0xa7f   :  { %2265 = vadd.xlane.f32.xlu0 %v2264_v18  ;;  %v2273_v23 = vsel %vm52_vm0, %v4096_v9, 0.0  ;;  %v4159_v18 = vld [vmem:[%s4285_s6] ss:$0 sm:$0xff] }
 0xa80   :  { %v2267_v4 = vsel %vm52_vm0, %v4085_v12, 0.0  ;;  %v2303_v11 = vsel %vm52_vm0, %v2293_v43, 0.0  ;;  %v4167_v43 = vld [vmem:[%s4286_s7] ss:$0 sm:$0xff] }
 0xa81   :  { %2268 = vadd.xlane.f32.xlu1 %v2267_v4 }
 0xa83   :  { %2271 = vadd.xlane.f32.xlu0 %v2270_v19 }
 0xa85   :  { %2274 = vadd.xlane.f32.xlu1 %v2273_v23 }
 0xa87   :  { %2301 = vadd.xlane.f32.xlu0 %v2300_v25 }
 0xa89   :  { %2304 = vadd.xlane.f32.xlu1 %v2303_v11 }
 0xa8b   :  { %2307 = vadd.xlane.f32.xlu0 %v2306_v62 }
 0xa8d   :  { %2310 = vadd.xlane.f32.xlu1 %v2309_v28 }
 0xb0c   :  { %v2266_v54 = vpop.xlane.xlu0 %2265 }
 0xb0d   :  { %v2280_v53 = vmul.f32 0.03125, %v2266_v54  ;;  %v2557_v54 = vld [vmem:[%s4287_s10 + $0x18] sm:$0xff] }
 0xb0e   :  { %v2269_v52 = vpop.xlane.xlu1 %2268 }
 0xb0f   :  { %v4133_v36 = vsub.f32 %v4071_v58, %v2280_v53  ;;  %v2281_v37 = vmul.f32 0.03125, %v2269_v52  ;;  %v2563_v53 = vpack.c.bf16 %v2557_v54, %v2556_v1  ;;  %v2558_v52 = vld [vmem:[%s4287_s10 + $0x20] sm:$0xff] }
 0xb10   :  { %v2272_v38 = vpop.xlane.xlu0 %2271 }
 0xb11   :  { %v4136_v29 = vsub.f32 %v4085_v12, %v2281_v37  ;;  %v2282_v6 = vmul.f32 0.03125, %v2272_v38  ;;  %v2296_v30 = vmul.f32 %v4133_v36, %v4133_v36  ;;  %v2559_v37 = vld [vmem:[%s4287_s10 + $0x28] sm:$0xff] }
 0xb12   :  { %v2275_v31 = vpop.xlane.xlu1 %2274  ;;  %v2564_v38 = vpack.c.bf16 %v2559_v37, %v2558_v52 }
 0xb13   :  { %v4141_v35 = vsub.f32 %v4088_v51, %v2282_v6  ;;  %v2283_v33 = vmul.f32 0.03125, %v2275_v31  ;;  %v2312_v39 = vsel %vm52_vm0, %v2296_v30, 0.0  ;;  %v2297_v26 = vmul.f32 %v4136_v29, %v4136_v29  ;;  %v2560_v31 = vld [vmem:[%s4287_s10 + $0x30] sm:$0xff] }
 0xb14   :  { %2313 = vadd.xlane.f32.xlu0 %v2312_v39  ;;  %v2302_v21 = vpop.xlane.xlu0 %2301 }
 0xb15   :  { %v4147_v40 = vsub.f32 %v4096_v9, %v2283_v33  ;;  %v2324_v41 = vmul.f32 0.03125, %v2302_v21  ;;  %v2315_v42 = vsel %vm52_vm0, %v2297_v26, 0.0  ;;  %v2298_v44 = vmul.f32 %v4141_v35, %v4141_v35  ;;  %v2561_v33 = vld [vmem:[%s4287_s10 + $0x38] sm:$0xff] }
 0xb16   :  { %2316 = vadd.xlane.f32.xlu1 %v2315_v42  ;;  %v2305_v45 = vpop.xlane.xlu1 %2304  ;;  %v2565_v26 = vpack.c.bf16 %v2561_v33, %v2560_v31 }
 0xb17   :  { %v2332_v46 = vadd.f32 1e-05, %v2324_v41  ;;  %v2325_v47 = vmul.f32 0.03125, %v2305_v45  ;;  %v2318_v48 = vsel %vm52_vm0, %v2298_v44, 0.0  ;;  %v2299_v13 = vmul.f32 %v4147_v40, %v4147_v40 }
 0xb18   :  { %2319 = vadd.xlane.f32.xlu0 %v2318_v48  ;;  %v2308_v34 = vpop.xlane.xlu0 %2307 }
 0xb19   :  { %3265 = vrsqrt.f32 %v2332_v46  ;;  %v2333_v50 = vadd.f32 1e-05, %v2325_v47  ;;  %v2326_v57 = vmul.f32 0.03125, %v2308_v34  ;;  %v2321_v60 = vsel %vm52_vm0, %v2299_v13, 0.0 }
 0xb1a   :  { %2322 = vadd.xlane.f32.xlu1 %v2321_v60  ;;  %v2311_v63 = vpop.xlane.xlu1 %2310 }
 0xb1b   :  { %3267 = vrsqrt.f32 %v2333_v50  ;;  %v2334_v3 = vadd.f32 1e-05, %v2326_v57  ;;  %v2327_v5 = vmul.f32 0.03125, %v2311_v63 }
 0xb1d   :  { %3269 = vrsqrt.f32 %v2334_v3  ;;  %v2335_v14 = vadd.f32 1e-05, %v2327_v5 }
 0xb1f   :  { %3271 = vrsqrt.f32 %v2335_v14 }
 0xb23   :  { %v3266_v17 = vpop.eup %3265 }
 0xb24   :  { %v2348_v2 = vmul.f32 %v3266_v17, %v4080_v7 }
 0xb25   :  { %v3268_v4 = vpop.eup %3267 }
 0xb26   :  { %v2349_v19 = vmul.f32 %v3268_v4, %v4091_v59  ;;  %v2362_v61 = vmul.f32 %v4159_v18, %v2348_v2 }
 0xb27   :  { %v3270_v23 = vpop.eup %3269 }
 0xb28   :  { %v2350_v25 = vmul.f32 %v3270_v23, %v4099_v16  ;;  %v2363_v55 = vmul.f32 %v4159_v18, %v2349_v19  ;;  %v2376_v62 = vadd.f32 %v4167_v43, %v2362_v61 }
 0xb29   :  { %v3272_v11 = vpop.eup %3271 }
 0xb2a   :  { %v2364_v27 = vmul.f32 %v4159_v18, %v2350_v25  ;;  %v2351_v7 = vmul.f32 %v3272_v11, %v4106_v22  ;;  %v2377_v59 = vadd.f32 %v4167_v43, %v2363_v55  ;;  %v2554_v22 = vld [vmem:[%s4287_s10] sm:$0xff] }
 0xb2b   :  { %v2562_v20 = vpack.c.bf16 %v2555_v15, %v2554_v22 }
 0xb2c   :  { %v2365_v28 = vmul.f32 %v4159_v18, %v2351_v7  ;;  %v2384_v24 = vpack.c.bf16 %v2377_v59, %v2376_v62  ;;  %v2378_v0 = vadd.f32 %v4167_v43, %v2364_v27 }
 0xb2d   :  { %3046 = vmatprep.subr.bf16.mxu1 %v2562_v20 }
 0xb2e   :  { %3038 = vmatprep.mubr.msk.bf16.mxu1 %vm52_vm0, %v2384_v24  ;;  %v2379_v16 = vadd.f32 %v4167_v43, %v2365_v28 }
 0xb30   :  { %v2385_v32 = vpack.c.bf16 %v2379_v16, %v2378_v0 }
 0xb32   :  { %3039 = vmatmul.mubr.msk.bf16.vlgmr.msra.gmra.mrb[28].mxu1 %vm52_vm0, %v2385_v32 }
 0xb33   :  { %3047 = vmatpush3.bf16.msra.mxu1 %v2562_v20 }
 0xb34   :  { %3048 = vmatprep.subr.bf16.mxu1 %v2563_v53 }
 0xb37   :  { %3049 = vmatpush3.bf16.msra.mxu1 %v2563_v53 }
 0xb38   :  { %3050 = vmatprep.subr.bf16.mxu1 %v2564_v38 }
 0xb3b   :  { %3051 = vmatpush3.bf16.msra.mxu1 %v2564_v38 }
 0xb3c   :  { %3052 = vmatprep.subr.bf16.mxu1 %v2565_v26 }
 0xb3f   :  { %3053 = vmatpush3.bf16.msra.mxu1 %v2565_v26 }
 0xba1   :  { %v2314_v6 = vpop.xlane.xlu0 %2313 }
 0xba2   :  { %v2328_v30 = vmul.f32 0.03125, %v2314_v6 }
 0xba3   :  { %v2317_v39 = vpop.xlane.xlu1 %2316 }
 0xba4   :  { %v2336_v21 = vadd.f32 1e-05, %v2328_v30  ;;  %v2329_v41 = vmul.f32 0.03125, %v2317_v39 }
 0xba5   :  { %v2320_v42 = vpop.xlane.xlu0 %2319 }
 0xba6   :  { %3273 = vrsqrt.f32 %v2336_v21  ;;  %v2337_v44 = vadd.f32 1e-05, %v2329_v41  ;;  %v2330_v45 = vmul.f32 0.03125, %v2320_v42 }
 0xba7   :  { %v2323_v46 = vpop.xlane.xlu1 %2322 }
 0xba8   :  { %3275 = vrsqrt.f32 %v2337_v44  ;;  %v2338_v47 = vadd.f32 1e-05, %v2330_v45  ;;  %v2331_v48 = vmul.f32 0.03125, %v2323_v46 }
 0xbaa   :  { %3277 = vrsqrt.f32 %v2338_v47  ;;  %v2339_v13 = vadd.f32 1e-05, %v2331_v48 }
 0xbac   :  { %3279 = vrsqrt.f32 %v2339_v13 }
 0xbb0   :  { %v3274_v34 = vpop.eup %3273 }
 0xbb1   :  { %v2352_v50 = vmul.f32 %v3274_v34, %v4133_v36 }
 0xbb2   :  { %v3276_v57 = vpop.eup %3275 }
 0xbb3   :  { %v2353_v60 = vmul.f32 %v3276_v57, %v4136_v29  ;;  %v2366_v63 = vmul.f32 %v4159_v18, %v2352_v50 }
 0xbb4   :  { %v3278_v3 = vpop.eup %3277 }
 0xbb5   :  { %v2354_v5 = vmul.f32 %v3278_v3, %v4141_v35  ;;  %v2367_v14 = vmul.f32 %v4159_v18, %v2353_v60  ;;  %v2380_v4 = vadd.f32 %v4167_v43, %v2366_v63 }
 0xbb6   :  { %v3280_v17 = vpop.eup %3279 }
 0xbb7   :  { %v2355_v2 = vmul.f32 %v3280_v17, %v4147_v40  ;;  %v2381_v19 = vadd.f32 %v4167_v43, %v2367_v14  ;;  %v2368_v61 = vmul.f32 %v4159_v18, %v2354_v5  ;;  %v4221_v40 = vld [vmem:[%s4288_s9] ss:$0 sm:$0xff] }
 0xbb9   :  { %v2386_v36 = vpack.c.bf16 %v2381_v19, %v2380_v4  ;;  %v2369_v23 = vmul.f32 %v4159_v18, %v2355_v2  ;;  %v2382_v29 = vadd.f32 %v4167_v43, %v2368_v61 }
 0xbbb   :  { %3042 = vmatprep.mubr.msk.bf16.mxu1 %vm52_vm0, %v2386_v36  ;;  %v2383_v35 = vadd.f32 %v4167_v43, %v2369_v23 }
 0xbbd   :  { %v2387_v25 = vpack.c.bf16 %v2383_v35, %v2382_v29 }
 0xbbf   :  { %3043 = vmatmul.mubr.msk.bf16.gmra.mrb[32].mxu1 %vm52_vm0, %v2387_v25 }
 0xc05   :  { %v3040_v55 = vpop.f32.mrb[28].mxu1 }
 0xc06   :  { %v2456_v11 = vadd.f32 %v3040_v55, %v4221_v40  ;;  %v2447_v27 = vpop.f32.mrb[29].mxu1 }
 0xc07   :  { %v2448_v18 = vadd.f32 %v4221_v40, %v2447_v27  ;;  %v3041_v7 = vpop.f32.mrb[30].mxu1 }
 0xc08   :  { %v2488_v62 = vmul.f32 0.044715, %v2456_v11  ;;  %v2459_v59 = vadd.f32 %v3041_v7, %v4221_v40  ;;  %v2450_v28 = vpop.f32.mrb[31].mxu1  ;;  %v2480_v47 = vmul.f32 0.5, %v2456_v11 }
 0xc09   :  { %v2486_v43 = vmul.f32 0.044715, %v2448_v18  ;;  %v2451_v24 = vadd.f32 %v4221_v40, %v2450_v28  ;;  %v2478_v34 = vmul.f32 0.5, %v2448_v18 }
 0xc0a   :  { %v2496_v0 = vmul.f32 %v2488_v62, %v2456_v11  ;;  %v2489_v16 = vmul.f32 0.044715, %v2459_v59  ;;  %v2481_v48 = vmul.f32 0.5, %v2459_v59 }
 0xc0b   :  { %v2494_v32 = vmul.f32 %v2486_v43, %v2448_v18  ;;  %v2487_v22 = vmul.f32 0.044715, %v2451_v24  ;;  %v2479_v50 = vmul.f32 0.5, %v2451_v24 }
 0xc0c   :  { %v2504_v15 = vmul.f32 %v2496_v0, %v2456_v11  ;;  %v2497_v20 = vmul.f32 %v2489_v16, %v2459_v59 }
 0xc0d   :  { %v2502_v1 = vmul.f32 %v2494_v32, %v2448_v18  ;;  %v2495_v54 = vmul.f32 %v2487_v22, %v2451_v24 }
 0xc0e   :  { %v2512_v53 = vadd.f32 %v2504_v15, %v2456_v11  ;;  %v2505_v52 = vmul.f32 %v2497_v20, %v2459_v59 }
 0xc0f   :  { %v2510_v37 = vadd.f32 %v2502_v1, %v2448_v18  ;;  %v2503_v38 = vmul.f32 %v2495_v54, %v2451_v24 }
 0xc10   :  { %v2520_v6 = vmul.f32 0.7978846, %v2512_v53  ;;  %v2513_v30 = vadd.f32 %v2505_v52, %v2459_v59 }
 0xc11   :  { %v2518_v31 = vmul.f32 0.7978846, %v2510_v37  ;;  %v2511_v33 = vadd.f32 %v2503_v38, %v2451_v24 }
 0xc12   :  { %3281 = vtanh.f32 %v2520_v6  ;;  %v2521_v39 = vmul.f32 0.7978846, %v2513_v30 }
 0xc13   :  { %3283 = vtanh.f32 %v2518_v31  ;;  %v2519_v26 = vmul.f32 0.7978846, %v2511_v33 }
 0xc14   :  { %3285 = vtanh.f32 %v2521_v39 }
 0xc15   :  { %3287 = vtanh.f32 %v2519_v26 }
 0xc1c   :  { %v3282_v21 = vpop.eup %3281 }
 0xc1d   :  { %v3284_v41 = vpop.eup %3283  ;;  %v2536_v42 = vadd.f32 1.0, %v3282_v21 }
 0xc1e   :  { %v3286_v44 = vpop.eup %3285  ;;  %v2534_v45 = vadd.f32 1.0, %v3284_v41 }
 0xc1f   :  { %v3288_v46 = vpop.eup %3287  ;;  %v2537_v13 = vadd.f32 1.0, %v3286_v44  ;;  %v2544_v60 = vmul.f32 %v2536_v42, %v2480_v47 }
 0xc20   :  { %v2535_v57 = vadd.f32 1.0, %v3288_v46  ;;  %v2542_v3 = vmul.f32 %v2534_v45, %v2478_v34 }
 0xc21   :  { %v2545_v63 = vmul.f32 %v2537_v13, %v2481_v48  ;;  %v2733_v13 = vld [vmem:[%s4289_s11] ss:$0 sm:$0xff] }
 0xc22   :  { %v2543_v5 = vmul.f32 %v2535_v57, %v2479_v50 }
 0xc23   :  { %v2551_v14 = vpack.c.bf16 %v2545_v63, %v2544_v60 }
 0xc24   :  { %v2550_v17 = vpack.c.bf16 %v2543_v5, %v2542_v3 }
 0xc26   :  { %3054 = vmatprep.mubr.msk.bf16.mxu1 %vm2573_vm3, %v2550_v17 }
 0xc27   :  { %3055 = vmatmul.mubr.msk.bf16.vlgmr.msra.gmra.mrb[36].mxu1 %vm2573_vm3, %v2551_v14 }
 0xc92   :  { %v3044_v2 = vpop.f32.mrb[32].mxu1 }
 0xc93   :  { %v2472_v4 = vadd.f32 %v3044_v2, %v4221_v40  ;;  %v2463_v19 = vpop.f32.mrb[33].mxu1 }
 0xc94   :  { %v2464_v61 = vadd.f32 %v4221_v40, %v2463_v19  ;;  %v3045_v36 = vpop.f32.mrb[34].mxu1 }
 0xc95   :  { %v2492_v23 = vmul.f32 0.044715, %v2472_v4  ;;  %v2475_v29 = vadd.f32 %v3045_v36, %v4221_v40  ;;  %v2466_v35 = vpop.f32.mrb[35].mxu1  ;;  %v2484_v31 = vmul.f32 0.5, %v2472_v4 }
 0xc96   :  { %v2490_v25 = vmul.f32 0.044715, %v2464_v61  ;;  %v2467_v55 = vadd.f32 %v4221_v40, %v2466_v35  ;;  %v2482_v26 = vmul.f32 0.5, %v2464_v61 }
 0xc97   :  { %v2500_v11 = vmul.f32 %v2492_v23, %v2472_v4  ;;  %v2493_v27 = vmul.f32 0.044715, %v2475_v29  ;;  %v2485_v33 = vmul.f32 0.5, %v2475_v29 }
 0xc98   :  { %v2498_v18 = vmul.f32 %v2490_v25, %v2464_v61  ;;  %v2491_v7 = vmul.f32 0.044715, %v2467_v55  ;;  %v2483_v21 = vmul.f32 0.5, %v2467_v55 }
 0xc99   :  { %v2508_v62 = vmul.f32 %v2500_v11, %v2472_v4  ;;  %v2501_v59 = vmul.f32 %v2493_v27, %v2475_v29 }
 0xc9a   :  { %v2506_v28 = vmul.f32 %v2498_v18, %v2464_v61  ;;  %v2499_v43 = vmul.f32 %v2491_v7, %v2467_v55 }
 0xc9b   :  { %v2516_v24 = vadd.f32 %v2508_v62, %v2472_v4  ;;  %v2509_v0 = vmul.f32 %v2501_v59, %v2475_v29 }
 0xc9c   :  { %v2514_v16 = vadd.f32 %v2506_v28, %v2464_v61  ;;  %v2507_v32 = vmul.f32 %v2499_v43, %v2467_v55 }
 0xc9d   :  { %v2524_v22 = vmul.f32 0.7978846, %v2516_v24  ;;  %v2517_v15 = vadd.f32 %v2509_v0, %v2475_v29 }
 0xc9e   :  { %v2522_v20 = vmul.f32 0.7978846, %v2514_v16  ;;  %v2515_v1 = vadd.f32 %v2507_v32, %v2467_v55 }
 0xc9f   :  { %3289 = vtanh.f32 %v2524_v22  ;;  %v2525_v54 = vmul.f32 0.7978846, %v2517_v15 }
 0xca0   :  { %3291 = vtanh.f32 %v2522_v20  ;;  %v2523_v40 = vmul.f32 0.7978846, %v2515_v1 }
 0xca1   :  { %3293 = vtanh.f32 %v2525_v54 }
 0xca2   :  { %3295 = vtanh.f32 %v2523_v40 }
 0xca9   :  { %v3290_v53 = vpop.eup %3289 }
 0xcaa   :  { %v3292_v52 = vpop.eup %3291  ;;  %v2540_v37 = vadd.f32 1.0, %v3290_v53 }
 0xcab   :  { %v3294_v38 = vpop.eup %3293  ;;  %v2538_v6 = vadd.f32 1.0, %v3292_v52 }
 0xcac   :  { %v3296_v30 = vpop.eup %3295  ;;  %v2541_v39 = vadd.f32 1.0, %v3294_v38  ;;  %v2548_v42 = vmul.f32 %v2540_v37, %v2484_v31 }
 0xcad   :  { %v2539_v41 = vadd.f32 1.0, %v3296_v30  ;;  %v2546_v45 = vmul.f32 %v2538_v6, %v2482_v26 }
 0xcae   :  { %v2549_v44 = vmul.f32 %v2541_v39, %v2485_v33 }
 0xcaf   :  { %v2547_v46 = vmul.f32 %v2539_v41, %v2483_v21 }
 0xcb0   :  { %v2553_v47 = vpack.c.bf16 %v2549_v44, %v2548_v42 }
 0xcb1   :  { %v2552_v48 = vpack.c.bf16 %v2547_v46, %v2546_v45 }
 0xcb3   :  { %3058 = vmatprep.mubr.msk.bf16.mxu1 %vm2573_vm3, %v2552_v48 }
 0xcb4   :  { %3059 = vmatmul.mubr.msk.bf16.gmra.mrb[40].mxu1 %vm2573_vm3, %v2553_v47 }
 0xcfa   :  { %v3056_v34 = vpop.f32.mrb[36].mxu1 }
 0xcfb   :  { %v2629_v50 = vadd.f32 %v3056_v34, %v2733_v13  ;;  %v2620_v57 = vpop.f32.mrb[37].mxu1 }
 0xcfc   :  { %v2621_v60 = vadd.f32 %v2733_v13, %v2620_v57  ;;  %v3057_v63 = vpop.f32.mrb[38].mxu1 }
 0xcfd   :  { %v2653_v3 = vadd.f32 %v2629_v50, %v4045_v10  ;;  %v2632_v5 = vadd.f32 %v3057_v63, %v2733_v13  ;;  %v2623_v14 = vpop.f32.mrb[39].mxu1 }
 0xcfe   :  { %v2651_v17 = vadd.f32 %v2621_v60, %v4024_v49  ;;  %v2624_v2 = vadd.f32 %v2733_v13, %v2623_v14 }
 0xcff   :  { %2661 = vst.msk [vmem:[%s4290_s12 + $0x10] sm:$0xff] %vm52_vm0, %v2653_v3  ;;  %v2654_v4 = vadd.f32 %v2632_v5, %v4042_v8 }
 0xd00   :  { %2659 = vst.msk [vmem:[%s4290_s12] sm:$0xff] %vm52_vm0, %v2651_v17  ;;  %v2652_v19 = vadd.f32 %v2624_v2, %v4035_v56 }
 0xd01   :  { %2662 = vst.msk [vmem:[%s4290_s12 + $0x18] sm:$0xff] %vm52_vm0, %v2654_v4 }
 0xd02   :  { %2660 = vst.msk [vmem:[%s4290_s12 + $0x8] sm:$0xff] %vm52_vm0, %v2652_v19 }
 0xd87   :  { %v3060_v49 = vpop.f32.mrb[40].mxu1 }
 0xd88   :  { %v2645_v10 = vadd.f32 %v3060_v49, %v2733_v13  ;;  %v2636_v8 = vpop.f32.mrb[41].mxu1 }
 0xd89   :  { %v2637_v61 = vadd.f32 %v2733_v13, %v2636_v8  ;;  %v3061_v36 = vpop.f32.mrb[42].mxu1 }
 0xd8a   :  { %v2657_v23 = vadd.f32 %v2645_v10, %v4088_v51  ;;  %v2648_v29 = vadd.f32 %v3061_v36, %v2733_v13  ;;  %v2639_v35 = vpop.f32.mrb[43].mxu1 }
 0xd8b   :  { %v2655_v56 = vadd.f32 %v2637_v61, %v4071_v58  ;;  %v2640_v25 = vadd.f32 %v2733_v13, %v2639_v35 }
 0xd8c   :  { %2665 = vst.msk [vmem:[%s4290_s12 + $0x30] sm:$0xff] %vm52_vm0, %v2657_v23  ;;  %v2658_v55 = vadd.f32 %v2648_v29, %v4096_v9 }
 0xd8d   :  { %2663 = vst.msk [vmem:[%s4290_s12 + $0x20] sm:$0xff] %vm52_vm0, %v2655_v56  ;;  %v2656_v11 = vadd.f32 %v2640_v25, %v4085_v12 }
 0xd8e   :  { %2666 = vst.msk [vmem:[%s4290_s12 + $0x38] sm:$0xff] %vm52_vm0, %v2658_v55 }
 0xd8f   :  { %2664 = vst.msk [vmem:[%s4290_s12 + $0x28] sm:$0xff] %vm52_vm0, %v2656_v11 }

// kernel: vit_forward.11
= control target key start
LH: loop header
LB: loop body
LE: loop exit
PB: predicated region body
PF: predicated region fallthrough
CT: control target
= control target key end

     0   :  { %s1571_s0 = inlined_call_operand.vmem [shape: f32[1,270], index: 0, kind: input, shape index: {}]   ;;  %s1572_s1 = inlined_call_operand.vmem [shape: f32[270,2048], index: 1, kind: input, shape index: {}]   ;;  %s1573_s2 = inlined_call_operand.<no memory space> [shape: f32[1,1], index: 2, kind: input, shape index: {}]   ;;  %s1574_s3 = inlined_call_operand.vmem [shape: f32[1,2048], index: 3, kind: output, shape index: {}]  }
   0x1   :  { %v8_v0 = vstv %s1573_s2 }
   0x2   :  { %9 = vst [vmem:[#allocation2] sm:$0x1] %v8_v0 }
   0x3   :  { %s1086_s14 = smov 0   ;;  %s1088_s15 = smov 0  }
   0x4   :  { %s1090_s16 = smov 0  }
   0x5 LB: > { %s973_s2 = sadd.s32 4294967295, %s1059_s16   ;;  %s1103_s17 = sadd.s32 1, %s1059_s16   ;;  %s1059_s16 = sphi %s1090_s16, %s1577_s16   ;;  %s1055_s15 = sphi %s1088_s15, %s1576_s15   ;;  %s1051_s14 = sphi %s1086_s14, %s1575_s14  }
   0x6   : > { %s40_s18 = ssub.s32 %s1059_s16, %s1103_s17  ;;  %s43_s19 = sadd.s32 1, %s1055_s15 }
   0x7   : > { %p41_p0 = scmp.eq.s32.totalorder %s40_s18, 0  ;;  %p50_p1 = scmp.ne.s32.totalorder %s1055_s15, %s1051_s14 }
   0x8   : > { %p51_p2 = scmp.eq.s32.totalorder %s1059_s16, 0  ;;  %p976_p4 = scmp.ge.s32.totalorder %s1059_s16, 4 }
   0x9   : > { %s1112_s20 = scalar_select %p41_p0, %s1055_s15, %s43_s19  }
   0xa   : > { %p52_p3 = por %p51_p2, %p50_p1  ;;  %129 = sbr.rel (%p976_p4) target bundleno = 90 (0x5a), region = 24 }
  0x11   : > { %132 = sbr.rel (!%p52_p3) target bundleno = 90 (0x5a), region = 28  ;;  %s134_s21 = sand.u32 (%p52_p3), 1, %s1055_s15  }
  0x12   : > { %s987_s22 = sshll.u32 (%p52_p3), %s1059_s16, 5  ;;  %s1000_s23 = smul.u32 (%p52_p3), 1088, %s134_s21 }
  0x13   : > { %s1120_s26 = scalar_lea.vmem (%p52_p3), %s1572_s1, %s987_s22 }
  0x14   : > { %v152_v1 = vld [vmem:[%s1120_s26] sm:$0xff] (%p52_p3)  ;;  %v154_v2 = vld [vmem:[%s1120_s26 + $0x8] sm:$0xff] (%p52_p3)  ;;  %v156_v3 = vld [vmem:[%s1120_s26 + $0x10] sm:$0xff] (%p52_p3)  ;;  %s1128_s27 = scalar_lea.vmem (%p52_p3), [#allocation3], %s1000_s23 }
  0x15   : > { %v158_v4 = vld [vmem:[%s1120_s26 + $0x18] sm:$0xff] (%p52_p3)  ;;  %v160_v5 = vld [vmem:[%s1120_s26 + $0x80] sm:$0xff] (%p52_p3)  ;;  %v162_v6 = vld [vmem:[%s1120_s26 + $0x88] sm:$0xff] (%p52_p3)  ;;  %153 = vst [vmem:[%s1128_s27] sm:$0xff] (%p52_p3), %v152_v1 }
  0x16   : > { %155 = vst [vmem:[%s1128_s27 + $0x8] sm:$0xff] (%p52_p3), %v154_v2  ;;  %157 = vst [vmem:[%s1128_s27 + $0x10] sm:$0xff] (%p52_p3), %v156_v3  ;;  %v164_v7 = vld [vmem:[%s1120_s26 + $0x90] sm:$0xff] (%p52_p3)  ;;  %v166_v8 = vld [vmem:[%s1120_s26 + $0x98] sm:$0xff] (%p52_p3) }
  0x17   : > { %159 = vst [vmem:[%s1128_s27 + $0x18] sm:$0xff] (%p52_p3), %v158_v4  ;;  %161 = vst [vmem:[%s1128_s27 + $0x20] sm:$0xff] (%p52_p3), %v160_v5  ;;  %v168_v9 = vld [vmem:[%s1120_s26 + $0x100] sm:$0xff] (%p52_p3)  ;;  %v170_v10 = vld [vmem:[%s1120_s26 + $0x108] sm:$0xff] (%p52_p3) }
  0x18   : > { %163 = vst [vmem:[%s1128_s27 + $0x28] sm:$0xff] %v162_v6  ;;  %165 = vst [vmem:[%s1128_s27 + $0x30] sm:$0xff] %v164_v7  ;;  %v172_v11 = vld [vmem:[%s1120_s26 + $0x110] sm:$0xff]  ;;  %v174_v12 = vld [vmem:[%s1120_s26 + $0x118] sm:$0xff] }
  0x19   : > { %167 = vst [vmem:[%s1128_s27 + $0x38] sm:$0xff] %v166_v8  ;;  %169 = vst [vmem:[%s1128_s27 + $0x40] sm:$0xff] %v168_v9  ;;  %v176_v13 = vld [vmem:[%s1120_s26 + $0x180] sm:$0xff]  ;;  %v178_v14 = vld [vmem:[%s1120_s26 + $0x188] sm:$0xff] }
  0x1a   : > { %171 = vst [vmem:[%s1128_s27 + $0x48] sm:$0xff] %v170_v10  ;;  %173 = vst [vmem:[%s1128_s27 + $0x50] sm:$0xff] %v172_v11  ;;  %v180_v15 = vld [vmem:[%s1120_s26 + $0x190] sm:$0xff]  ;;  %v182_v16 = vld [vmem:[%s1120_s26 + $0x198] sm:$0xff] }
  0x1b   : > { %175 = vst [vmem:[%s1128_s27 + $0x58] sm:$0xff] %v174_v12  ;;  %177 = vst [vmem:[%s1128_s27 + $0x60] sm:$0xff] %v176_v13  ;;  %v184_v17 = vld [vmem:[%s1120_s26 + $0x200] sm:$0xff]  ;;  %v186_v18 = vld [vmem:[%s1120_s26 + $0x208] sm:$0xff] }
  0x1c   : > { %179 = vst [vmem:[%s1128_s27 + $0x68] sm:$0xff] %v178_v14  ;;  %181 = vst [vmem:[%s1128_s27 + $0x70] sm:$0xff] %v180_v15  ;;  %v188_v19 = vld [vmem:[%s1120_s26 + $0x210] sm:$0xff]  ;;  %v190_v20 = vld [vmem:[%s1120_s26 + $0x218] sm:$0xff] }
  0x1d   : > { %183 = vst [vmem:[%s1128_s27 + $0x78] sm:$0xff] %v182_v16  ;;  %185 = vst [vmem:[%s1128_s27 + $0x80] sm:$0xff] %v184_v17  ;;  %v192_v21 = vld [vmem:[%s1120_s26 + $0x280] sm:$0xff]  ;;  %v194_v22 = vld [vmem:[%s1120_s26 + $0x288] sm:$0xff] }
  0x1e   : > { %187 = vst [vmem:[%s1128_s27 + $0x88] sm:$0xff] %v186_v18  ;;  %189 = vst [vmem:[%s1128_s27 + $0x90] sm:$0xff] %v188_v19  ;;  %v196_v23 = vld [vmem:[%s1120_s26 + $0x290] sm:$0xff]  ;;  %v198_v24 = vld [vmem:[%s1120_s26 + $0x298] sm:$0xff] }
  0x1f   : > { %191 = vst [vmem:[%s1128_s27 + $0x98] sm:$0xff] %v190_v20  ;;  %193 = vst [vmem:[%s1128_s27 + $0xa0] sm:$0xff] %v192_v21  ;;  %v200_v25 = vld [vmem:[%s1120_s26 + $0x300] sm:$0xff]  ;;  %v202_v26 = vld [vmem:[%s1120_s26 + $0x308] sm:$0xff] }
  0x20   : > { %195 = vst [vmem:[%s1128_s27 + $0xa8] sm:$0xff] %v194_v22  ;;  %197 = vst [vmem:[%s1128_s27 + $0xb0] sm:$0xff] %v196_v23  ;;  %v204_v27 = vld [vmem:[%s1120_s26 + $0x310] sm:$0xff]  ;;  %v206_v28 = vld [vmem:[%s1120_s26 + $0x318] sm:$0xff] }
  0x21   : > { %199 = vst [vmem:[%s1128_s27 + $0xb8] sm:$0xff] %v198_v24  ;;  %201 = vst [vmem:[%s1128_s27 + $0xc0] sm:$0xff] %v200_v25  ;;  %v208_v29 = vld [vmem:[%s1120_s26 + $0x380] sm:$0xff]  ;;  %v210_v30 = vld [vmem:[%s1120_s26 + $0x388] sm:$0xff] }
  0x22   : > { %203 = vst [vmem:[%s1128_s27 + $0xc8] sm:$0xff] %v202_v26  ;;  %205 = vst [vmem:[%s1128_s27 + $0xd0] sm:$0xff] %v204_v27  ;;  %v212_v31 = vld [vmem:[%s1120_s26 + $0x390] sm:$0xff]  ;;  %v214_v32 = vld [vmem:[%s1120_s26 + $0x398] sm:$0xff] }
  0x23   : > { %207 = vst [vmem:[%s1128_s27 + $0xd8] sm:$0xff] %v206_v28  ;;  %209 = vst [vmem:[%s1128_s27 + $0xe0] sm:$0xff] %v208_v29  ;;  %v216_v33 = vld [vmem:[%s1120_s26 + $0x400] sm:$0xff]  ;;  %v218_v34 = vld [vmem:[%s1120_s26 + $0x408] sm:$0xff] }
  0x24   : > { %211 = vst [vmem:[%s1128_s27 + $0xe8] sm:$0xff] %v210_v30  ;;  %213 = vst [vmem:[%s1128_s27 + $0xf0] sm:$0xff] %v212_v31  ;;  %v220_v35 = vld [vmem:[%s1120_s26 + $0x410] sm:$0xff]  ;;  %v222_v36 = vld [vmem:[%s1120_s26 + $0x418] sm:$0xff] }
  0x25   : > { %215 = vst [vmem:[%s1128_s27 + $0xf8] sm:$0xff] %v214_v32  ;;  %217 = vst [vmem:[%s1128_s27 + $0x100] sm:$0xff] %v216_v33  ;;  %v224_v37 = vld [vmem:[%s1120_s26 + $0x480] sm:$0xff]  ;;  %v226_v38 = vld [vmem:[%s1120_s26 + $0x488] sm:$0xff] }
  0x26   : > { %219 = vst [vmem:[%s1128_s27 + $0x108] sm:$0xff] %v218_v34  ;;  %221 = vst [vmem:[%s1128_s27 + $0x110] sm:$0xff] %v220_v35  ;;  %v228_v39 = vld [vmem:[%s1120_s26 + $0x490] sm:$0xff]  ;;  %v230_v40 = vld [vmem:[%s1120_s26 + $0x498] sm:$0xff] }
  0x27   : > { %223 = vst [vmem:[%s1128_s27 + $0x118] sm:$0xff] %v222_v36  ;;  %225 = vst [vmem:[%s1128_s27 + $0x120] sm:$0xff] %v224_v37  ;;  %v232_v41 = vld [vmem:[%s1120_s26 + $0x500] sm:$0xff]  ;;  %v234_v42 = vld [vmem:[%s1120_s26 + $0x508] sm:$0xff] }
  0x28   : > { %227 = vst [vmem:[%s1128_s27 + $0x128] sm:$0xff] %v226_v38  ;;  %229 = vst [vmem:[%s1128_s27 + $0x130] sm:$0xff] %v228_v39  ;;  %v236_v43 = vld [vmem:[%s1120_s26 + $0x510] sm:$0xff]  ;;  %v238_v44 = vld [vmem:[%s1120_s26 + $0x518] sm:$0xff] }
  0x29   : > { %231 = vst [vmem:[%s1128_s27 + $0x138] sm:$0xff] %v230_v40  ;;  %233 = vst [vmem:[%s1128_s27 + $0x140] sm:$0xff] %v232_v41  ;;  %v240_v45 = vld [vmem:[%s1120_s26 + $0x580] sm:$0xff]  ;;  %v242_v46 = vld [vmem:[%s1120_s26 + $0x588] sm:$0xff] }
  0x2a   : > { %235 = vst [vmem:[%s1128_s27 + $0x148] sm:$0xff] %v234_v42  ;;  %237 = vst [vmem:[%s1128_s27 + $0x150] sm:$0xff] %v236_v43  ;;  %v244_v47 = vld [vmem:[%s1120_s26 + $0x590] sm:$0xff]  ;;  %v246_v48 = vld [vmem:[%s1120_s26 + $0x598] sm:$0xff] }
  0x2b   : > { %239 = vst [vmem:[%s1128_s27 + $0x158] sm:$0xff] %v238_v44  ;;  %241 = vst [vmem:[%s1128_s27 + $0x160] sm:$0xff] %v240_v45  ;;  %v248_v49 = vld [vmem:[%s1120_s26 + $0x600] sm:$0xff]  ;;  %v250_v50 = vld [vmem:[%s1120_s26 + $0x608] sm:$0xff] }
  0x2c   : > { %243 = vst [vmem:[%s1128_s27 + $0x168] sm:$0xff] %v242_v46  ;;  %245 = vst [vmem:[%s1128_s27 + $0x170] sm:$0xff] %v244_v47  ;;  %v252_v51 = vld [vmem:[%s1120_s26 + $0x610] sm:$0xff]  ;;  %v254_v52 = vld [vmem:[%s1120_s26 + $0x618] sm:$0xff] }
  0x2d   : > { %247 = vst [vmem:[%s1128_s27 + $0x178] sm:$0xff] %v246_v48  ;;  %249 = vst [vmem:[%s1128_s27 + $0x180] sm:$0xff] %v248_v49  ;;  %v256_v53 = vld [vmem:[%s1120_s26 + $0x680] sm:$0xff]  ;;  %v258_v54 = vld [vmem:[%s1120_s26 + $0x688] sm:$0xff] }
  0x2e   : > { %251 = vst [vmem:[%s1128_s27 + $0x188] sm:$0xff] %v250_v50  ;;  %253 = vst [vmem:[%s1128_s27 + $0x190] sm:$0xff] %v252_v51  ;;  %v260_v55 = vld [vmem:[%s1120_s26 + $0x690] sm:$0xff]  ;;  %v262_v56 = vld [vmem:[%s1120_s26 + $0x698] sm:$0xff] }
  0x2f   : > { %255 = vst [vmem:[%s1128_s27 + $0x198] sm:$0xff] %v254_v52  ;;  %257 = vst [vmem:[%s1128_s27 + $0x1a0] sm:$0xff] %v256_v53  ;;  %v264_v57 = vld [vmem:[%s1120_s26 + $0x700] sm:$0xff]  ;;  %v266_v58 = vld [vmem:[%s1120_s26 + $0x708] sm:$0xff] }
  0x30   : > { %259 = vst [vmem:[%s1128_s27 + $0x1a8] sm:$0xff] %v258_v54  ;;  %261 = vst [vmem:[%s1128_s27 + $0x1b0] sm:$0xff] %v260_v55  ;;  %v268_v59 = vld [vmem:[%s1120_s26 + $0x710] sm:$0xff]  ;;  %v270_v60 = vld [vmem:[%s1120_s26 + $0x718] sm:$0xff] }
  0x31   : > { %263 = vst [vmem:[%s1128_s27 + $0x1b8] sm:$0xff] %v262_v56  ;;  %265 = vst [vmem:[%s1128_s27 + $0x1c0] sm:$0xff] %v264_v57  ;;  %v272_v61 = vld [vmem:[%s1120_s26 + $0x780] sm:$0xff]  ;;  %v274_v62 = vld [vmem:[%s1120_s26 + $0x788] sm:$0xff] }
  0x32   : > { %267 = vst [vmem:[%s1128_s27 + $0x1c8] sm:$0xff] %v266_v58  ;;  %269 = vst [vmem:[%s1128_s27 + $0x1d0] sm:$0xff] %v268_v59  ;;  %v276_v63 = vld [vmem:[%s1120_s26 + $0x790] sm:$0xff]  ;;  %v278_v0 = vld [vmem:[%s1120_s26 + $0x798] sm:$0xff] }
  0x33   : > { %271 = vst [vmem:[%s1128_s27 + $0x1d8] sm:$0xff] %v270_v60  ;;  %273 = vst [vmem:[%s1128_s27 + $0x1e0] sm:$0xff] %v272_v61  ;;  %v280_v1 = vld [vmem:[%s1120_s26 + $0x800] sm:$0xff]  ;;  %v282_v2 = vld [vmem:[%s1120_s26 + $0x808] sm:$0xff] }
  0x34   : > { %275 = vst [vmem:[%s1128_s27 + $0x1e8] sm:$0xff] %v274_v62  ;;  %277 = vst [vmem:[%s1128_s27 + $0x1f0] sm:$0xff] %v276_v63  ;;  %v284_v3 = vld [vmem:[%s1120_s26 + $0x810] sm:$0xff]  ;;  %v286_v4 = vld [vmem:[%s1120_s26 + $0x818] sm:$0xff] }
  0x35   : > { %279 = vst [vmem:[%s1128_s27 + $0x1f8] sm:$0xff] %v278_v0  ;;  %281 = vst [vmem:[%s1128_s27 + $0x200] sm:$0xff] %v280_v1  ;;  %v288_v5 = vld [vmem:[%s1120_s26 + $0x880] sm:$0xff]  ;;  %v290_v6 = vld [vmem:[%s1120_s26 + $0x888] sm:$0xff] }
  0x36   : > { %283 = vst [vmem:[%s1128_s27 + $0x208] sm:$0xff] %v282_v2  ;;  %285 = vst [vmem:[%s1128_s27 + $0x210] sm:$0xff] %v284_v3  ;;  %v292_v7 = vld [vmem:[%s1120_s26 + $0x890] sm:$0xff]  ;;  %v294_v8 = vld [vmem:[%s1120_s26 + $0x898] sm:$0xff] }
  0x37   : > { %287 = vst [vmem:[%s1128_s27 + $0x218] sm:$0xff] %v286_v4  ;;  %289 = vst [vmem:[%s1128_s27 + $0x220] sm:$0xff] %v288_v5  ;;  %v296_v9 = vld [vmem:[%s1120_s26 + $0x900] sm:$0xff]  ;;  %v298_v10 = vld [vmem:[%s1120_s26 + $0x908] sm:$0xff] }
  0x38   : > { %291 = vst [vmem:[%s1128_s27 + $0x228] sm:$0xff] %v290_v6  ;;  %293 = vst [vmem:[%s1128_s27 + $0x230] sm:$0xff] %v292_v7  ;;  %v300_v11 = vld [vmem:[%s1120_s26 + $0x910] sm:$0xff]  ;;  %v302_v12 = vld [vmem:[%s1120_s26 + $0x918] sm:$0xff] }
  0x39   : > { %295 = vst [vmem:[%s1128_s27 + $0x238] sm:$0xff] %v294_v8  ;;  %297 = vst [vmem:[%s1128_s27 + $0x240] sm:$0xff] %v296_v9  ;;  %v304_v13 = vld [vmem:[%s1120_s26 + $0x980] sm:$0xff]  ;;  %v306_v14 = vld [vmem:[%s1120_s26 + $0x988] sm:$0xff] }
  0x3a   : > { %299 = vst [vmem:[%s1128_s27 + $0x248] sm:$0xff] %v298_v10  ;;  %301 = vst [vmem:[%s1128_s27 + $0x250] sm:$0xff] %v300_v11  ;;  %v308_v15 = vld [vmem:[%s1120_s26 + $0x990] sm:$0xff]  ;;  %v310_v16 = vld [vmem:[%s1120_s26 + $0x998] sm:$0xff] }
  0x3b   : > { %303 = vst [vmem:[%s1128_s27 + $0x258] sm:$0xff] %v302_v12  ;;  %305 = vst [vmem:[%s1128_s27 + $0x260] sm:$0xff] %v304_v13  ;;  %v312_v17 = vld [vmem:[%s1120_s26 + $0xa00] sm:$0xff]  ;;  %v314_v18 = vld [vmem:[%s1120_s26 + $0xa08] sm:$0xff] }
  0x3c   : > { %307 = vst [vmem:[%s1128_s27 + $0x268] sm:$0xff] %v306_v14  ;;  %309 = vst [vmem:[%s1128_s27 + $0x270] sm:$0xff] %v308_v15  ;;  %v316_v19 = vld [vmem:[%s1120_s26 + $0xa10] sm:$0xff]  ;;  %v318_v20 = vld [vmem:[%s1120_s26 + $0xa18] sm:$0xff] }
  0x3d   : > { %311 = vst [vmem:[%s1128_s27 + $0x278] sm:$0xff] %v310_v16  ;;  %313 = vst [vmem:[%s1128_s27 + $0x280] sm:$0xff] %v312_v17  ;;  %v320_v21 = vld [vmem:[%s1120_s26 + $0xa80] sm:$0xff]  ;;  %v322_v22 = vld [vmem:[%s1120_s26 + $0xa88] sm:$0xff] }
  0x3e   : > { %315 = vst [vmem:[%s1128_s27 + $0x288] sm:$0xff] %v314_v18  ;;  %317 = vst [vmem:[%s1128_s27 + $0x290] sm:$0xff] %v316_v19  ;;  %v324_v23 = vld [vmem:[%s1120_s26 + $0xa90] sm:$0xff]  ;;  %v326_v24 = vld [vmem:[%s1120_s26 + $0xa98] sm:$0xff] }
  0x3f   : > { %319 = vst [vmem:[%s1128_s27 + $0x298] sm:$0xff] %v318_v20  ;;  %321 = vst [vmem:[%s1128_s27 + $0x2a0] sm:$0xff] %v320_v21  ;;  %v328_v25 = vld [vmem:[%s1120_s26 + $0xb00] sm:$0xff]  ;;  %v330_v26 = vld [vmem:[%s1120_s26 + $0xb08] sm:$0xff] }
  0x40   : > { %323 = vst [vmem:[%s1128_s27 + $0x2a8] sm:$0xff] %v322_v22  ;;  %325 = vst [vmem:[%s1128_s27 + $0x2b0] sm:$0xff] %v324_v23  ;;  %v332_v27 = vld [vmem:[%s1120_s26 + $0xb10] sm:$0xff]  ;;  %v334_v28 = vld [vmem:[%s1120_s26 + $0xb18] sm:$0xff] }
  0x41   : > { %327 = vst [vmem:[%s1128_s27 + $0x2b8] sm:$0xff] %v326_v24  ;;  %329 = vst [vmem:[%s1128_s27 + $0x2c0] sm:$0xff] %v328_v25  ;;  %v336_v29 = vld [vmem:[%s1120_s26 + $0xb80] sm:$0xff]  ;;  %v338_v30 = vld [vmem:[%s1120_s26 + $0xb88] sm:$0xff] }
  0x42   : > { %331 = vst [vmem:[%s1128_s27 + $0x2c8] sm:$0xff] %v330_v26  ;;  %333 = vst [vmem:[%s1128_s27 + $0x2d0] sm:$0xff] %v332_v27  ;;  %v340_v31 = vld [vmem:[%s1120_s26 + $0xb90] sm:$0xff]  ;;  %v342_v32 = vld [vmem:[%s1120_s26 + $0xb98] sm:$0xff] }
  0x43   : > { %335 = vst [vmem:[%s1128_s27 + $0x2d8] sm:$0xff] %v334_v28  ;;  %337 = vst [vmem:[%s1128_s27 + $0x2e0] sm:$0xff] %v336_v29  ;;  %v344_v33 = vld [vmem:[%s1120_s26 + $0xc00] sm:$0xff]  ;;  %v346_v34 = vld [vmem:[%s1120_s26 + $0xc08] sm:$0xff] }
  0x44   : > { %339 = vst [vmem:[%s1128_s27 + $0x2e8] sm:$0xff] %v338_v30  ;;  %341 = vst [vmem:[%s1128_s27 + $0x2f0] sm:$0xff] %v340_v31  ;;  %v348_v35 = vld [vmem:[%s1120_s26 + $0xc10] sm:$0xff]  ;;  %v350_v36 = vld [vmem:[%s1120_s26 + $0xc18] sm:$0xff] }
  0x45   : > { %343 = vst [vmem:[%s1128_s27 + $0x2f8] sm:$0xff] %v342_v32  ;;  %345 = vst [vmem:[%s1128_s27 + $0x300] sm:$0xff] %v344_v33  ;;  %v352_v37 = vld [vmem:[%s1120_s26 + $0xc80] sm:$0xff]  ;;  %v354_v38 = vld [vmem:[%s1120_s26 + $0xc88] sm:$0xff] }
  0x46   : > { %347 = vst [vmem:[%s1128_s27 + $0x308] sm:$0xff] %v346_v34  ;;  %349 = vst [vmem:[%s1128_s27 + $0x310] sm:$0xff] %v348_v35  ;;  %v356_v39 = vld [vmem:[%s1120_s26 + $0xc90] sm:$0xff]  ;;  %v358_v40 = vld [vmem:[%s1120_s26 + $0xc98] sm:$0xff] }
  0x47   : > { %351 = vst [vmem:[%s1128_s27 + $0x318] sm:$0xff] %v350_v36  ;;  %353 = vst [vmem:[%s1128_s27 + $0x320] sm:$0xff] %v352_v37  ;;  %v360_v41 = vld [vmem:[%s1120_s26 + $0xd00] sm:$0xff]  ;;  %v362_v42 = vld [vmem:[%s1120_s26 + $0xd08] sm:$0xff] }
  0x48   : > { %355 = vst [vmem:[%s1128_s27 + $0x328] sm:$0xff] %v354_v38  ;;  %357 = vst [vmem:[%s1128_s27 + $0x330] sm:$0xff] %v356_v39  ;;  %v364_v43 = vld [vmem:[%s1120_s26 + $0xd10] sm:$0xff]  ;;  %v366_v44 = vld [vmem:[%s1120_s26 + $0xd18] sm:$0xff] }
  0x49   : > { %359 = vst [vmem:[%s1128_s27 + $0x338] sm:$0xff] %v358_v40  ;;  %361 = vst [vmem:[%s1128_s27 + $0x340] sm:$0xff] %v360_v41  ;;  %v368_v45 = vld [vmem:[%s1120_s26 + $0xd80] sm:$0xff]  ;;  %v370_v46 = vld [vmem:[%s1120_s26 + $0xd88] sm:$0xff] }
  0x4a   : > { %363 = vst [vmem:[%s1128_s27 + $0x348] sm:$0xff] %v362_v42  ;;  %365 = vst [vmem:[%s1128_s27 + $0x350] sm:$0xff] %v364_v43  ;;  %v372_v47 = vld [vmem:[%s1120_s26 + $0xd90] sm:$0xff]  ;;  %v374_v48 = vld [vmem:[%s1120_s26 + $0xd98] sm:$0xff] }
  0x4b   : > { %367 = vst [vmem:[%s1128_s27 + $0x358] sm:$0xff] %v366_v44  ;;  %369 = vst [vmem:[%s1128_s27 + $0x360] sm:$0xff] %v368_v45  ;;  %v376_v49 = vld [vmem:[%s1120_s26 + $0xe00] sm:$0xff]  ;;  %v378_v50 = vld [vmem:[%s1120_s26 + $0xe08] sm:$0xff] }
  0x4c   : > { %371 = vst [vmem:[%s1128_s27 + $0x368] sm:$0xff] %v370_v46  ;;  %373 = vst [vmem:[%s1128_s27 + $0x370] sm:$0xff] %v372_v47  ;;  %v380_v51 = vld [vmem:[%s1120_s26 + $0xe10] sm:$0xff]  ;;  %v382_v52 = vld [vmem:[%s1120_s26 + $0xe18] sm:$0xff] }
  0x4d   : > { %375 = vst [vmem:[%s1128_s27 + $0x378] sm:$0xff] %v374_v48  ;;  %377 = vst [vmem:[%s1128_s27 + $0x380] sm:$0xff] %v376_v49  ;;  %v384_v53 = vld [vmem:[%s1120_s26 + $0xe80] sm:$0xff]  ;;  %v386_v54 = vld [vmem:[%s1120_s26 + $0xe88] sm:$0xff] }
  0x4e   : > { %379 = vst [vmem:[%s1128_s27 + $0x388] sm:$0xff] %v378_v50  ;;  %381 = vst [vmem:[%s1128_s27 + $0x390] sm:$0xff] %v380_v51  ;;  %v388_v55 = vld [vmem:[%s1120_s26 + $0xe90] sm:$0xff]  ;;  %v390_v56 = vld [vmem:[%s1120_s26 + $0xe98] sm:$0xff] }
  0x4f   : > { %383 = vst [vmem:[%s1128_s27 + $0x398] sm:$0xff] %v382_v52  ;;  %385 = vst [vmem:[%s1128_s27 + $0x3a0] sm:$0xff] %v384_v53  ;;  %v392_v57 = vld [vmem:[%s1120_s26 + $0xf00] sm:$0xff]  ;;  %v394_v58 = vld [vmem:[%s1120_s26 + $0xf08] sm:$0xff] }
  0x50   : > { %387 = vst [vmem:[%s1128_s27 + $0x3a8] sm:$0xff] %v386_v54  ;;  %389 = vst [vmem:[%s1128_s27 + $0x3b0] sm:$0xff] %v388_v55  ;;  %v396_v59 = vld [vmem:[%s1120_s26 + $0xf10] sm:$0xff]  ;;  %v398_v60 = vld [vmem:[%s1120_s26 + $0xf18] sm:$0xff] }
  0x51   : > { %391 = vst [vmem:[%s1128_s27 + $0x3b8] sm:$0xff] %v390_v56  ;;  %393 = vst [vmem:[%s1128_s27 + $0x3c0] sm:$0xff] %v392_v57  ;;  %v400_v61 = vld [vmem:[%s1120_s26 + $0xf80] sm:$0xff]  ;;  %v402_v62 = vld [vmem:[%s1120_s26 + $0xf88] sm:$0xff] }
  0x52   : > { %395 = vst [vmem:[%s1128_s27 + $0x3c8] sm:$0xff] %v394_v58  ;;  %397 = vst [vmem:[%s1128_s27 + $0x3d0] sm:$0xff] %v396_v59  ;;  %v404_v63 = vld [vmem:[%s1120_s26 + $0xf90] sm:$0xff]  ;;  %v406_v0 = vld [vmem:[%s1120_s26 + $0xf98] sm:$0xff] }
  0x53   : > { %399 = vst [vmem:[%s1128_s27 + $0x3d8] sm:$0xff] %v398_v60  ;;  %401 = vst [vmem:[%s1128_s27 + $0x3e0] sm:$0xff] %v400_v61  ;;  %v408_v1 = vld [vmem:[%s1120_s26 + $0x1000] sm:$0xff]  ;;  %v410_v2 = vld [vmem:[%s1120_s26 + $0x1008] sm:$0xff] }
  0x54   : > { %403 = vst [vmem:[%s1128_s27 + $0x3e8] sm:$0xff] %v402_v62  ;;  %405 = vst [vmem:[%s1128_s27 + $0x3f0] sm:$0xff] %v404_v63  ;;  %v412_v3 = vld [vmem:[%s1120_s26 + $0x1010] sm:$0xff]  ;;  %v414_v4 = vld [vmem:[%s1120_s26 + $0x1018] sm:$0xff] }
  0x55   : > { %407 = vst [vmem:[%s1128_s27 + $0x3f8] sm:$0xff] %v406_v0  ;;  %409 = vst [vmem:[%s1128_s27 + $0x400] sm:$0xff] %v408_v1  ;;  %v416_v5 = vld [vmem:[%s1120_s26 + $0x1080] sm:$0xff]  ;;  %v418_v6 = vld [vmem:[%s1120_s26 + $0x1088] sm:$0xff] }
  0x56   : > { %411 = vst [vmem:[%s1128_s27 + $0x408] sm:$0xff] %v410_v2  ;;  %413 = vst [vmem:[%s1128_s27 + $0x410] sm:$0xff] %v412_v3  ;;  %v420_v7 = vld [vmem:[%s1120_s26 + $0x1090] sm:$0xff]  ;;  %v422_v8 = vld [vmem:[%s1120_s26 + $0x1098] sm:$0xff] }
  0x57   : > { %415 = vst [vmem:[%s1128_s27 + $0x418] sm:$0xff] %v414_v4  ;;  %417 = vst [vmem:[%s1128_s27 + $0x420] sm:$0xff] %v416_v5 }
  0x58   : > { %419 = vst [vmem:[%s1128_s27 + $0x428] sm:$0xff] %v418_v6  ;;  %421 = vst [vmem:[%s1128_s27 + $0x430] sm:$0xff] %v420_v7 }
  0x59   : > { %423 = vst [vmem:[%s1128_s27 + $0x438] sm:$0xff] %v422_v8 }
  0x5a PF: > { %p979_p5 = scmp.ge.s32.totalorder %s1059_s16, 1  ;;  %p428_p6 = scmp.lt.s32.totalorder %s1059_s16, 5 }
  0x5c   : > { %p429_p7 = pnand %p979_p5, %p428_p6 }
  0x5d   : > { %s435_s28 = sand.u32 (!%p429_p7), 1, %s1051_s14   ;;  %v466_v9 = vlaneseq (!%p429_p7)  ;;  %v1061_v10 = vmov (!%p429_p7), 0   ;;  %v688_v11 = vld [vmem:[#allocation2] sm:$0x1] (!%p429_p7)  ;;  %vm702_vm0 = vcmask (!%p429_p7), 1046528   ;;  %vm698_vm1 = vcmask (!%p429_p7), 113664  }
  0x5e   : > { %432 = sbr.rel (%p429_p7) target bundleno = 415 (0x19f), region = 51  ;;  %1028 = vset.pattern.permute.xlu0 (!%p429_p7), %v1061_v10  ;;  %v1406_v13 = vld [vmem:[%s1571_s0] sm:$0x7] (!%p429_p7)  ;;  %s980_s6 = sshll.u32 (!%p429_p7), %s973_s2, 2 }
  0x5f   : > { %s1001_s29 = smul.u32 (!%p429_p7), 1088, %s435_s28  ;;  %v1401_v12 = vshrl.u32 (!%p429_p7), %v466_v9, 7  ;;  %691 = vperm.xlu0 (!%p429_p7), %1028, %v688_v11   ;;  %p459_p8 = scmp.lt.s32.totalorder (!%p429_p7), %s980_s6, 15  ;;  %vm914_vm2 = vcmp.lt.s32.totalorder (!%p429_p7), %v466_v9, 512 }
  0x61   : > { %s1408_s5 = scalar_lea.vmem (!%p429_p7), [#allocation3], %s1001_s29  ;;  %v472_v17 = vsub.s32 (!%p429_p7), 1, %v1401_v12 }
  0x62   : > { %v485_v14 = vld [vmem:[%s1408_s5 + $0x8] sm:$0xff] (!%p429_p7)  ;;  %v487_v16 = vld [vmem:[%s1408_s5 + $0x18] sm:$0xff] (!%p429_p7)  ;;  %v484_v20 = vld [vmem:[%s1408_s5] sm:$0xff] (!%p429_p7) }
  0x63   : > { %v489_v15 = vld [vmem:[%s1408_s5 + $0x28] sm:$0xff] (!%p429_p7)  ;;  %v491_v19 = vld [vmem:[%s1408_s5 + $0x38] sm:$0xff] (!%p429_p7)  ;;  %v488_v21 = vld [vmem:[%s1408_s5 + $0x20] sm:$0xff] (!%p429_p7)  ;;  %v473_v27 = vrot.slane (!%p429_p7), %v1406_v13, %v472_v17 }
  0x64   : > { %v621_v18 = vpack.c.bf16 (!%p429_p7), %v489_v15, %v485_v14  ;;  %v623_v22 = vpack.c.bf16 (!%p429_p7), %v491_v19, %v487_v16  ;;  %v620_v23 = vpack.c.bf16 (!%p429_p7), %v488_v21, %v484_v20  ;;  %v486_v24 = vld [vmem:[%s1408_s5 + $0x10] sm:$0xff] (!%p429_p7)  ;;  %v493_v26 = vld [vmem:[%s1408_s5 + $0x48] sm:$0xff] (!%p429_p7)  ;;  %v495_v30 = vld [vmem:[%s1408_s5 + $0x58] sm:$0xff] (!%p429_p7) }
  0x65   : > { %v490_v25 = vld [vmem:[%s1408_s5 + $0x30] sm:$0xff]  ;;  %v497_v29 = vld [vmem:[%s1408_s5 + $0x68] sm:$0xff]  ;;  %v499_v31 = vld [vmem:[%s1408_s5 + $0x78] sm:$0xff]  ;;  %v482_v37 = vpack.c.bf16 %v473_v27, %v473_v27  ;;  %s1579_s6 = smov (!%p459_p8, %s980_s6), 15 }
  0x66   : > { %715 = vmatprep.subr.bf16.mxu0 %v621_v18  ;;  %v622_v28 = vpack.c.bf16 %v490_v25, %v486_v24  ;;  %797 = vmatprep.subr.bf16.mxu1 %v623_v22  ;;  %v625_v32 = vpack.c.bf16 %v497_v29, %v493_v26  ;;  %v627_v33 = vpack.c.bf16 %v499_v31, %v495_v30  ;;  %v492_v34 = vld [vmem:[%s1408_s5 + $0x40] sm:$0xff]  ;;  %v494_v36 = vld [vmem:[%s1408_s5 + $0x50] sm:$0xff]  ;;  %v501_v40 = vld [vmem:[%s1408_s5 + $0x88] sm:$0xff]  ;;  %s461_s9 = scalar_lea.vmem %s1574_s3, %s1579_s6 }
  0x67   : > { %716 = vmatpush1.bf16.msra.mxu0 %v620_v23  ;;  %v496_v35 = vld [vmem:[%s1408_s5 + $0x60] sm:$0xff]  ;;  %v498_v39 = vld [vmem:[%s1408_s5 + $0x70] sm:$0xff]  ;;  %v505_v41 = vld [vmem:[%s1408_s5 + $0xa8] sm:$0xff]  ;;  %747 = vmatprep.mubr.bf16.mxu0 %v482_v37 }
  0x68   : > { %798 = vmatpush1.bf16.msra.mxu1 %v622_v28  ;;  %v624_v38 = vpack.c.bf16 %v496_v35, %v492_v34  ;;  %717 = vmatprep.subr.bf16.mxu0 %v625_v32  ;;  %v626_v42 = vpack.c.bf16 %v498_v39, %v494_v36  ;;  %v629_v43 = vpack.c.bf16 %v505_v41, %v501_v40  ;;  %v503_v44 = vld [vmem:[%s1408_s5 + $0x98] sm:$0xff]  ;;  %v500_v46 = vld [vmem:[%s1408_s5 + $0x80] sm:$0xff]  ;;  %v502_v49 = vld [vmem:[%s1408_s5 + $0x90] sm:$0xff] }
  0x69   : > { %799 = vmatprep.subr.bf16.mxu1 %v627_v33  ;;  %v507_v45 = vld [vmem:[%s1408_s5 + $0xb8] sm:$0xff]  ;;  %v504_v48 = vld [vmem:[%s1408_s5 + $0xa0] sm:$0xff]  ;;  %v506_v50 = vld [vmem:[%s1408_s5 + $0xb0] sm:$0xff]  ;;  %829 = vmatprep.mubr.bf16.mxu1 %v482_v37 }
  0x6a   : > { %v631_v47 = vpack.c.bf16 %v507_v45, %v503_v44  ;;  %v628_v51 = vpack.c.bf16 %v504_v48, %v500_v46  ;;  %v509_v52 = vld [vmem:[%s1408_s5 + $0xc8] sm:$0xff]  ;;  %v511_v54 = vld [vmem:[%s1408_s5 + $0xd8] sm:$0xff]  ;;  %v630_v55 = vpack.c.bf16 %v506_v50, %v502_v49  ;;  %v508_v58 = vld [vmem:[%s1408_s5 + $0xc0] sm:$0xff] }
  0x6b   : > { %718 = vmatpush1.bf16.msra.mxu0 %v624_v38  ;;  %v513_v53 = vld [vmem:[%s1408_s5 + $0xe8] sm:$0xff]  ;;  %v515_v57 = vld [vmem:[%s1408_s5 + $0xf8] sm:$0xff]  ;;  %v512_v59 = vld [vmem:[%s1408_s5 + $0xe0] sm:$0xff] }
  0x6c   : > { %800 = vmatpush1.bf16.msra.mxu1 %v626_v42  ;;  %719 = vmatprep.subr.bf16.mxu0 %v629_v43  ;;  %v633_v56 = vpack.c.bf16 %v513_v53, %v509_v52  ;;  %v635_v60 = vpack.c.bf16 %v515_v57, %v511_v54  ;;  %v510_v61 = vld [vmem:[%s1408_s5 + $0xd0] sm:$0xff]  ;;  %v517_v63 = vld [vmem:[%s1408_s5 + $0x108] sm:$0xff]  ;;  %v519_v1 = vld [vmem:[%s1408_s5 + $0x118] sm:$0xff]  ;;  %v632_v3 = vpack.c.bf16 %v512_v59, %v508_v58 }
  0x6d   : > { %801 = vmatprep.subr.bf16.mxu1 %v631_v47  ;;  %v514_v62 = vld [vmem:[%s1408_s5 + $0xf0] sm:$0xff]  ;;  %v521_v0 = vld [vmem:[%s1408_s5 + $0x128] sm:$0xff]  ;;  %v523_v2 = vld [vmem:[%s1408_s5 + $0x138] sm:$0xff] }
  0x6e   : > { %v634_v4 = vpack.c.bf16 %v514_v62, %v510_v61  ;;  %v637_v5 = vpack.c.bf16 %v521_v0, %v517_v63  ;;  %v516_v6 = vld [vmem:[%s1408_s5 + $0x100] sm:$0xff]  ;;  %v518_v8 = vld [vmem:[%s1408_s5 + $0x110] sm:$0xff]  ;;  %v639_v11 = vpack.c.bf16 %v523_v2, %v519_v1  ;;  %v525_v15 = vld [vmem:[%s1408_s5 + $0x148] sm:$0xff] }
  0x6f   : > { %720 = vmatpush1.bf16.msra.mxu0 %v628_v51  ;;  %v520_v7 = vld [vmem:[%s1408_s5 + $0x120] sm:$0xff]  ;;  %v522_v14 = vld [vmem:[%s1408_s5 + $0x130] sm:$0xff]  ;;  %v529_v16 = vld [vmem:[%s1408_s5 + $0x168] sm:$0xff] }
  0x70   : > { %802 = vmatpush1.bf16.msra.mxu1 %v630_v55  ;;  %721 = vmatprep.subr.bf16.mxu0 %v633_v56  ;;  %v527_v17 = vld [vmem:[%s1408_s5 + $0x158] sm:$0xff]  ;;  %v636_v19 = vpack.c.bf16 %v520_v7, %v516_v6  ;;  %v638_v20 = vpack.c.bf16 %v522_v14, %v518_v8  ;;  %v641_v21 = vpack.c.bf16 %v529_v16, %v525_v15  ;;  %v524_v22 = vld [vmem:[%s1408_s5 + $0x140] sm:$0xff]  ;;  %v526_v24 = vld [vmem:[%s1408_s5 + $0x150] sm:$0xff] }
  0x71   : > { %803 = vmatprep.subr.bf16.mxu1 %v635_v60  ;;  %v531_v18 = vld [vmem:[%s1408_s5 + $0x178] sm:$0xff]  ;;  %v528_v23 = vld [vmem:[%s1408_s5 + $0x160] sm:$0xff]  ;;  %v530_v26 = vld [vmem:[%s1408_s5 + $0x170] sm:$0xff] }
  0x72   : > { %v643_v25 = vpack.c.bf16 %v531_v18, %v527_v17  ;;  %v533_v27 = vld [vmem:[%s1408_s5 + $0x188] sm:$0xff]  ;;  %v535_v29 = vld [vmem:[%s1408_s5 + $0x198] sm:$0xff]  ;;  %v640_v31 = vpack.c.bf16 %v528_v23, %v524_v22  ;;  %v642_v32 = vpack.c.bf16 %v530_v26, %v526_v24  ;;  %v532_v34 = vld [vmem:[%s1408_s5 + $0x180] sm:$0xff] }
  0x73   : > { %722 = vmatpush1.bf16.msra.mxu0 %v632_v3  ;;  %v537_v28 = vld [vmem:[%s1408_s5 + $0x1a8] sm:$0xff]  ;;  %v539_v30 = vld [vmem:[%s1408_s5 + $0x1b8] sm:$0xff]  ;;  %v536_v35 = vld [vmem:[%s1408_s5 + $0x1a0] sm:$0xff] }
  0x74   : > { %804 = vmatpush1.bf16.msra.mxu1 %v634_v4  ;;  %723 = vmatprep.subr.bf16.mxu0 %v637_v5  ;;  %v645_v33 = vpack.c.bf16 %v537_v28, %v533_v27  ;;  %v534_v36 = vld [vmem:[%s1408_s5 + $0x190] sm:$0xff]  ;;  %v647_v37 = vpack.c.bf16 %v539_v30, %v535_v29  ;;  %v541_v39 = vld [vmem:[%s1408_s5 + $0x1c8] sm:$0xff]  ;;  %v543_v41 = vld [vmem:[%s1408_s5 + $0x1d8] sm:$0xff]  ;;  %v644_v43 = vpack.c.bf16 %v536_v35, %v532_v34 }
  0x75   : > { %805 = vmatprep.subr.bf16.mxu1 %v639_v11  ;;  %v538_v38 = vld [vmem:[%s1408_s5 + $0x1b0] sm:$0xff]  ;;  %v545_v40 = vld [vmem:[%s1408_s5 + $0x1e8] sm:$0xff]  ;;  %v547_v42 = vld [vmem:[%s1408_s5 + $0x1f8] sm:$0xff] }
  0x76   : > { %v646_v44 = vpack.c.bf16 %v538_v38, %v534_v36  ;;  %v649_v45 = vpack.c.bf16 %v545_v40, %v541_v39  ;;  %v540_v46 = vld [vmem:[%s1408_s5 + $0x1c0] sm:$0xff]  ;;  %v542_v48 = vld [vmem:[%s1408_s5 + $0x1d0] sm:$0xff]  ;;  %v651_v49 = vpack.c.bf16 %v547_v42, %v543_v41  ;;  %v549_v51 = vld [vmem:[%s1408_s5 + $0x208] sm:$0xff] }
  0x77   : > { %724 = vmatpush1.bf16.msra.mxu0 %v636_v19  ;;  %v544_v47 = vld [vmem:[%s1408_s5 + $0x1e0] sm:$0xff]  ;;  %v546_v50 = vld [vmem:[%s1408_s5 + $0x1f0] sm:$0xff]  ;;  %v553_v52 = vld [vmem:[%s1408_s5 + $0x228] sm:$0xff] }
  0x78   : > { %806 = vmatpush1.bf16.msra.mxu1 %v638_v20  ;;  %725 = vmatprep.subr.bf16.mxu0 %v641_v21  ;;  %v551_v53 = vld [vmem:[%s1408_s5 + $0x218] sm:$0xff]  ;;  %v648_v55 = vpack.c.bf16 %v544_v47, %v540_v46  ;;  %v650_v56 = vpack.c.bf16 %v546_v50, %v542_v48  ;;  %v653_v57 = vpack.c.bf16 %v553_v52, %v549_v51  ;;  %v548_v58 = vld [vmem:[%s1408_s5 + $0x200] sm:$0xff]  ;;  %v550_v60 = vld [vmem:[%s1408_s5 + $0x210] sm:$0xff] }
  0x79   : > { %807 = vmatprep.subr.bf16.mxu1 %v643_v25  ;;  %v555_v54 = vld [vmem:[%s1408_s5 + $0x238] sm:$0xff]  ;;  %v552_v59 = vld [vmem:[%s1408_s5 + $0x220] sm:$0xff]  ;;  %v554_v62 = vld [vmem:[%s1408_s5 + $0x230] sm:$0xff] }
  0x7a   : > { %v655_v61 = vpack.c.bf16 %v555_v54, %v551_v53  ;;  %v557_v63 = vld [vmem:[%s1408_s5 + $0x248] sm:$0xff]  ;;  %v559_v1 = vld [vmem:[%s1408_s5 + $0x258] sm:$0xff]  ;;  %v652_v3 = vpack.c.bf16 %v552_v59, %v548_v58  ;;  %v654_v4 = vpack.c.bf16 %v554_v62, %v550_v60  ;;  %v556_v6 = vld [vmem:[%s1408_s5 + $0x240] sm:$0xff] }
  0x7b   : > { %726 = vmatpush1.bf16.msra.mxu0 %v640_v31  ;;  %v561_v0 = vld [vmem:[%s1408_s5 + $0x268] sm:$0xff]  ;;  %v563_v2 = vld [vmem:[%s1408_s5 + $0x278] sm:$0xff]  ;;  %v560_v7 = vld [vmem:[%s1408_s5 + $0x260] sm:$0xff] }
  0x7c   : > { %808 = vmatpush1.bf16.msra.mxu1 %v642_v32  ;;  %727 = vmatprep.subr.bf16.mxu0 %v645_v33  ;;  %v657_v5 = vpack.c.bf16 %v561_v0, %v557_v63  ;;  %v558_v8 = vld [vmem:[%s1408_s5 + $0x250] sm:$0xff]  ;;  %v659_v11 = vpack.c.bf16 %v563_v2, %v559_v1  ;;  %v565_v15 = vld [vmem:[%s1408_s5 + $0x288] sm:$0xff]  ;;  %v567_v17 = vld [vmem:[%s1408_s5 + $0x298] sm:$0xff]  ;;  %v656_v19 = vpack.c.bf16 %v560_v7, %v556_v6 }
  0x7d   : > { %809 = vmatprep.subr.bf16.mxu1 %v647_v37  ;;  %v562_v14 = vld [vmem:[%s1408_s5 + $0x270] sm:$0xff]  ;;  %v569_v16 = vld [vmem:[%s1408_s5 + $0x2a8] sm:$0xff]  ;;  %v571_v18 = vld [vmem:[%s1408_s5 + $0x2b8] sm:$0xff] }
  0x7e   : > { %v658_v20 = vpack.c.bf16 %v562_v14, %v558_v8  ;;  %v661_v21 = vpack.c.bf16 %v569_v16, %v565_v15  ;;  %v564_v22 = vld [vmem:[%s1408_s5 + $0x280] sm:$0xff]  ;;  %v566_v24 = vld [vmem:[%s1408_s5 + $0x290] sm:$0xff]  ;;  %v663_v25 = vpack.c.bf16 %v571_v18, %v567_v17  ;;  %v573_v27 = vld [vmem:[%s1408_s5 + $0x2c8] sm:$0xff] }
  0x7f   : > { %728 = vmatpush1.bf16.msra.mxu0 %v644_v43  ;;  %v568_v23 = vld [vmem:[%s1408_s5 + $0x2a0] sm:$0xff]  ;;  %v570_v26 = vld [vmem:[%s1408_s5 + $0x2b0] sm:$0xff]  ;;  %v577_v28 = vld [vmem:[%s1408_s5 + $0x2e8] sm:$0xff] }
  0x80   : > { %810 = vmatpush1.bf16.msra.mxu1 %v646_v44  ;;  %729 = vmatprep.subr.bf16.mxu0 %v649_v45  ;;  %v575_v29 = vld [vmem:[%s1408_s5 + $0x2d8] sm:$0xff]  ;;  %v660_v31 = vpack.c.bf16 %v568_v23, %v564_v22  ;;  %v662_v32 = vpack.c.bf16 %v570_v26, %v566_v24  ;;  %v665_v33 = vpack.c.bf16 %v577_v28, %v573_v27  ;;  %v572_v34 = vld [vmem:[%s1408_s5 + $0x2c0] sm:$0xff]  ;;  %v574_v36 = vld [vmem:[%s1408_s5 + $0x2d0] sm:$0xff] }
  0x81   : > { %811 = vmatprep.subr.bf16.mxu1 %v651_v49  ;;  %v579_v30 = vld [vmem:[%s1408_s5 + $0x2f8] sm:$0xff]  ;;  %v576_v35 = vld [vmem:[%s1408_s5 + $0x2e0] sm:$0xff]  ;;  %v578_v38 = vld [vmem:[%s1408_s5 + $0x2f0] sm:$0xff] }
  0x82   : > { %v667_v37 = vpack.c.bf16 %v579_v30, %v575_v29  ;;  %v581_v39 = vld [vmem:[%s1408_s5 + $0x308] sm:$0xff]  ;;  %v583_v41 = vld [vmem:[%s1408_s5 + $0x318] sm:$0xff]  ;;  %v664_v43 = vpack.c.bf16 %v576_v35, %v572_v34  ;;  %v666_v44 = vpack.c.bf16 %v578_v38, %v574_v36  ;;  %v580_v46 = vld [vmem:[%s1408_s5 + $0x300] sm:$0xff] }
  0x83   : > { %730 = vmatpush1.bf16.msra.mxu0 %v648_v55  ;;  %v585_v40 = vld [vmem:[%s1408_s5 + $0x328] sm:$0xff]  ;;  %v587_v42 = vld [vmem:[%s1408_s5 + $0x338] sm:$0xff]  ;;  %v584_v47 = vld [vmem:[%s1408_s5 + $0x320] sm:$0xff] }
  0x84   : > { %812 = vmatpush1.bf16.msra.mxu1 %v650_v56  ;;  %731 = vmatprep.subr.bf16.mxu0 %v653_v57  ;;  %v669_v45 = vpack.c.bf16 %v585_v40, %v581_v39  ;;  %v582_v48 = vld [vmem:[%s1408_s5 + $0x310] sm:$0xff]  ;;  %v671_v49 = vpack.c.bf16 %v587_v42, %v583_v41  ;;  %v589_v51 = vld [vmem:[%s1408_s5 + $0x348] sm:$0xff]  ;;  %v591_v53 = vld [vmem:[%s1408_s5 + $0x358] sm:$0xff]  ;;  %v668_v55 = vpack.c.bf16 %v584_v47, %v580_v46  ;;  %v476_v46 = vsub.s32 2, %v1401_v12 }
  0x85   : > { %813 = vmatprep.subr.bf16.mxu1 %v655_v61  ;;  %v586_v50 = vld [vmem:[%s1408_s5 + $0x330] sm:$0xff]  ;;  %v593_v52 = vld [vmem:[%s1408_s5 + $0x368] sm:$0xff]  ;;  %v595_v54 = vld [vmem:[%s1408_s5 + $0x378] sm:$0xff] }
  0x86   : > { %v670_v56 = vpack.c.bf16 %v586_v50, %v582_v48  ;;  %v673_v57 = vpack.c.bf16 %v593_v52, %v589_v51  ;;  %v588_v58 = vld [vmem:[%s1408_s5 + $0x340] sm:$0xff]  ;;  %v590_v60 = vld [vmem:[%s1408_s5 + $0x350] sm:$0xff]  ;;  %v675_v61 = vpack.c.bf16 %v595_v54, %v591_v53  ;;  %v597_v63 = vld [vmem:[%s1408_s5 + $0x388] sm:$0xff]  ;;  %v477_v47 = vrot.slane %v1406_v13, %v476_v46 }
  0x87   : > { %732 = vmatpush1.bf16.msra.mxu0 %v652_v3  ;;  %v592_v59 = vld [vmem:[%s1408_s5 + $0x360] sm:$0xff]  ;;  %v594_v62 = vld [vmem:[%s1408_s5 + $0x370] sm:$0xff]  ;;  %v601_v0 = vld [vmem:[%s1408_s5 + $0x3a8] sm:$0xff] }
  0x88   : > { %814 = vmatpush1.bf16.msra.mxu1 %v654_v4  ;;  %733 = vmatprep.subr.bf16.mxu0 %v657_v5  ;;  %v599_v1 = vld [vmem:[%s1408_s5 + $0x398] sm:$0xff]  ;;  %v672_v3 = vpack.c.bf16 %v592_v59, %v588_v58  ;;  %v674_v4 = vpack.c.bf16 %v594_v62, %v590_v60  ;;  %v677_v5 = vpack.c.bf16 %v601_v0, %v597_v63  ;;  %v596_v6 = vld [vmem:[%s1408_s5 + $0x380] sm:$0xff]  ;;  %v598_v8 = vld [vmem:[%s1408_s5 + $0x390] sm:$0xff] }
  0x89   : > { %815 = vmatprep.subr.bf16.mxu1 %v659_v11  ;;  %v603_v2 = vld [vmem:[%s1408_s5 + $0x3b8] sm:$0xff]  ;;  %v600_v7 = vld [vmem:[%s1408_s5 + $0x3a0] sm:$0xff]  ;;  %v602_v14 = vld [vmem:[%s1408_s5 + $0x3b0] sm:$0xff]  ;;  %v483_v48 = vpack.c.bf16 %v477_v47, %v477_v47 }
  0x8a   : > { %v679_v11 = vpack.c.bf16 %v603_v2, %v599_v1  ;;  %v605_v15 = vld [vmem:[%s1408_s5 + $0x3c8] sm:$0xff]  ;;  %v607_v17 = vld [vmem:[%s1408_s5 + $0x3d8] sm:$0xff]  ;;  %v608_v22 = vld [vmem:[%s1408_s5 + $0x3e0] sm:$0xff]  ;;  %v678_v24 = vpack.c.bf16 %v602_v14, %v598_v8 }
  0x8b   : > { %734 = vmatpush1.bf16.msra.mxu0 %v656_v19  ;;  %v609_v16 = vld [vmem:[%s1408_s5 + $0x3e8] sm:$0xff]  ;;  %v611_v18 = vld [vmem:[%s1408_s5 + $0x3f8] sm:$0xff]  ;;  %v468_v19 = vsub.s32 0, %v1401_v12  ;;  %v606_v23 = vld [vmem:[%s1408_s5 + $0x3d0] sm:$0xff] }
  0x8c   : > { %816 = vmatpush1.bf16.msra.mxu1 %v658_v20  ;;  %735 = vmatprep.subr.bf16.mxu0 %v661_v21  ;;  %v676_v20 = vpack.c.bf16 %v600_v7, %v596_v6  ;;  %v604_v21 = vld [vmem:[%s1408_s5 + $0x3c0] sm:$0xff]  ;;  %v610_v26 = vld [vmem:[%s1408_s5 + $0x3f0] sm:$0xff]  ;;  %v613_v27 = vld [vmem:[%s1408_s5 + $0x408] sm:$0xff]  ;;  %v683_v29 = vpack.c.bf16 %v611_v18, %v607_v17 }
  0x8d   : > { %817 = vmatprep.subr.bf16.mxu1 %v663_v25  ;;  %v681_v25 = vpack.c.bf16 %v609_v16, %v605_v15  ;;  %v617_v28 = vld [vmem:[%s1408_s5 + $0x428] sm:$0x3f]  ;;  %v615_v30 = vld [vmem:[%s1408_s5 + $0x418] sm:$0xff]  ;;  %v614_v35 = vld [vmem:[%s1408_s5 + $0x410] sm:$0xff]  ;;  %v682_v38 = vpack.c.bf16 %v610_v26, %v606_v23 }
  0x8e   : > { %v619_v34 = vld [vmem:[%s1408_s5 + $0x438] sm:$0x3f]  ;;  %v618_v36 = vld [vmem:[%s1408_s5 + $0x430] sm:$0x3f]  ;;  %v685_v39 = vpack.c.bf16 %v617_v28, %v613_v27 }
  0x8f   : > { %736 = vmatpush1.bf16.msra.mxu0 %v660_v31  ;;  %v612_v31 = vld [vmem:[%s1408_s5 + $0x400] sm:$0xff]  ;;  %v687_v41 = vpack.c.bf16 %v619_v34, %v615_v30  ;;  %v686_v42 = vpack.c.bf16 %v618_v36, %v614_v35 }
  0x90   : > { %818 = vmatpush1.bf16.msra.mxu1 %v662_v32  ;;  %737 = vmatprep.subr.bf16.mxu0 %v665_v33  ;;  %v616_v32 = vld [vmem:[%s1408_s5 + $0x420] sm:$0x3f]  ;;  %v469_v33 = vrot.slane %v1406_v13, %v468_v19 }
  0x91   : > { %819 = vmatprep.subr.bf16.mxu1 %v667_v37  ;;  %v680_v37 = vpack.c.bf16 %v608_v22, %v604_v21  ;;  %v684_v40 = vpack.c.bf16 %v616_v32, %v612_v31 }
  0x93   : > { %738 = vmatpush1.bf16.msra.mxu0 %v664_v43  ;;  %v481_v43 = vpack.c.bf16 %v469_v33, %v469_v33 }
  0x94   : > { %820 = vmatpush1.bf16.msra.mxu1 %v666_v44  ;;  %739 = vmatprep.subr.bf16.mxu0 %v669_v45  ;;  %v704_v44 = vsel %vm702_vm0, %v684_v40, 0  ;;  %v710_v45 = vsel %vm702_vm0, %v686_v42, 0 }
  0x95   : > { %821 = vmatprep.subr.bf16.mxu1 %v671_v49 }
  0x97   : > { %740 = vmatpush1.bf16.msra.mxu0 %v668_v55 }
  0x98   : > { %822 = vmatpush1.bf16.msra.mxu1 %v670_v56  ;;  %741 = vmatprep.subr.bf16.mxu0 %v673_v57 }
  0x99   : > { %823 = vmatprep.subr.bf16.mxu1 %v675_v61  ;;  %v1062_v61 = vmov 1966171168  }
  0x9a   : > { %v890_v62 = vunpack.c.l.s4 %v1062_v61 }
  0x9b   : > { %742 = vmatpush1.bf16.msra.mxu0 %v672_v3 }
  0x9c   : > { %824 = vmatpush1.bf16.msra.mxu1 %v674_v4  ;;  %743 = vmatprep.subr.bf16.mxu0 %v677_v5  ;;  %v891_v63 = vunpack.c.0.s8 %v890_v62 }
  0x9d   : > { %825 = vmatprep.subr.bf16.mxu1 %v679_v11 }
  0x9e   : > { %v894_v2 = vsub.s32 %v891_v63, %v1401_v12 }
  0x9f   : > { %744 = vmatpush1.bf16.msra.mxu0 %v676_v20 }
  0xa0   : > { %826 = vmatpush1.bf16.msra.mxu1 %v678_v24  ;;  %745 = vmatprep.subr.bf16.mxu0 %v681_v25 }
  0xa1   : > { %827 = vmatprep.subr.bf16.mxu1 %v683_v29 }
  0xa3   : > { %746 = vmatpush1.bf16.msra.mxu0 %v680_v37 }
  0xa4   : > { %828 = vmatpush1.bf16.msra.mxu1 %v682_v38  ;;  %981 = vmatprep.subr.msk.bf16.mxu0 %vm702_vm0, %v685_v39 }
  0xa5   : > { %983 = vmatprep.subr.msk.bf16.mxu1 %vm702_vm0, %v687_v41 }
  0xa6   : > { %748 = vmatmul.mubr.bf16.vlgmr.msra.gmra.mrb[0].mxu0 %v481_v43 }
  0xa7   : > { %830 = vmatmul.mubr.bf16.vlgmr.msra.gmra.mrb[0].mxu1 %v481_v43  ;;  %757 = vmatpush1.bf16.msra.mxu0 %v704_v44 }
  0xa8   : > { %839 = vmatpush1.bf16.msra.mxu1 %v710_v45  ;;  %788 = vmatprep.mubr.bf16.mxu0 %v1061_v10 }
  0xa9   : > { %870 = vmatprep.mubr.bf16.mxu1 %v1061_v10 }
  0xb2   : > { %982 = vmatmul.mubr.msk.bf16.vlgmr.msra.gmra.mrb[0].mxu0 %vm698_vm1, %v483_v48 }
  0xb3   : > { %984 = vmatmul.mubr.msk.bf16.vlgmr.msra.gmra.mrb[0].mxu1 %vm698_vm1, %v483_v48 }
  0xde   : > { %v692_v49 = vpop.permute.xlu0 %691 }
  0xdf   : > { %v697_v50 = vrot.slane %v692_v49, %v468_v19 }
 0x185   : > { %v790_v51 = vpop.f32.mrb[0].mxu0 }
 0x186   : > { %v988_v52 = vadd.f32 %v790_v51, %v697_v50  ;;  %v872_v53 = vpop.f32.mrb[0].mxu1  ;;  %v792_v54 = vpop.f32.mrb[1].mxu0 }
 0x187   : > { %v990_v55 = vadd.f32 %v872_v53, %v697_v50  ;;  %v989_v56 = vadd.f32 %v792_v54, %v697_v50  ;;  %v874_v57 = vpop.f32.mrb[1].mxu1  ;;  %v794_v58 = vpop.f32.mrb[2].mxu0 }
 0x188   : > { %1029 = vtanh.f32 %v988_v52  ;;  %v991_v59 = vadd.f32 %v874_v57, %v697_v50  ;;  %v876_v10 = vpop.f32.mrb[2].mxu1  ;;  %v795_v60 = vpop.f32.mrb[3].mxu0 }
 0x189   : > { %1031 = vtanh.f32 %v990_v55  ;;  %v877_v13 = vpop.f32.mrb[3].mxu1 }
 0x18a   : > { %1033 = vtanh.f32 %v989_v56 }
 0x18b   : > { %1035 = vtanh.f32 %v991_v59 }
 0x192   : > { %v1030_v0 = vpop.eup %1029 }
 0x193   : > { %v1032_v1 = vpop.eup %1031 }
 0x194   : > { %v1034_v3 = vpop.eup %1033 }
 0x195   : > { %v1036_v4 = vpop.eup %1035  ;;  %v887_v5 = vcombine.low %v1030_v0, %v1034_v3 }
 0x196   : > { %v888_v6 = vcombine.low %v1032_v1, %v1036_v4 }
 0x197   : > { %v895_v7 = vrot.slane %v887_v5, %v894_v2 }
 0x198   : > { %v902_v8 = vrot.slane %v888_v6, %v894_v2 }
 0x19a   : > { %v903_v11 = vcombine.low %v895_v7, %v902_v8 }
 0x19c   : > { %v910_v14 = vrot.slane %v903_v11, %v894_v2 }
 0x19e   : > { %916 = vst.msk [vmem:[%s461_s9] sm:$0xf] %vm914_vm2, %v910_v14 }
 0x19f PF: > { %p12_p9 = scmp.ge.s32.totalorder %s1103_s17, 6   ;;  %s1575_s14 = smov %s1055_s15 }
 0x1a0   : > { %s1576_s15 = smov %s1112_s20  ;;  %s1577_s16 = smov %s1103_s17 }
 0x1a1   :  { %14 = sbr.rel (!%p12_p9) target bundleno = 5 (0x5), region = 90 }

</bundles_post_ra>
